<compile_context>
chip_gen: v6e
topology: v6e:2x2x1
jax: 0.10.0
libtpu: 0.0.40
codegen_flags: <defaults>
</compile_context>

<pallas_src>
import functools
import math

import jax
import jax.numpy as jnp
from jax.experimental import pallas as pl
from jax.experimental.pallas import tpu as pltpu  # noqa: F401  (kept per convention)

# ----------------------------------------------------------------------------
# Small synthetic config consistent with SentenceTransformer.forward:
#   input_ids       : [B, P, 1, S]   (B users, P posts/user, seq len S)
#   attention_masks : [B, P, 1, S]
# ----------------------------------------------------------------------------
B = 2      # users (outer python loop in the torch forward)
P = 4      # posts per user (transformer batch inside each loop iteration)
S = 16     # max_seq_len
H = 32     # transformer hidden size
NH = 4     # attention heads of the synthetic encoder
HD = H // NH
FF = 64    # FFN intermediate size
V = 100    # vocab size
L = 3      # num_labels


# --------------------------- in-kernel helpers -------------------------------
def _layernorm(x, g, b, eps=1e-12):
    mu = jnp.mean(x, axis=-1, keepdims=True)
    var = jnp.mean(jnp.square(x - mu), axis=-1, keepdims=True)
    return (x - mu) * jax.lax.rsqrt(var + eps) * g + b


def _gelu(x):
    c = math.sqrt(2.0 / math.pi)
    return 0.5 * x * (1.0 + jnp.tanh(c * (x + 0.044715 * x * x * x)))


# ------------------------------ fused kernel ----------------------------------
# Embedding LayerNorm + 1-layer multi-head self-attention + FFN + masked mean
# pooling (mean_pooling) + post-level Attention module + classification head,
# all in one kernel body; pooled post encodings stay on-chip.
def fused_forward_kernel(
        x_ref, mask_ref,
        ln0g_ref, ln0b_ref,
        wqkv_ref, bqkv_ref,
        wo_ref, bo_ref, ln1g_ref, ln1b_ref,
        w1_ref, b1_ref, w2_ref, b2_ref,
        ln2g_ref, ln2b_ref,
        pw_ref, pb_ref,
        hw1_ref, hb1_ref, hw2_ref, hb2_ref,
        pred_ref, attn_ref, attw_ref,
        *, num_heads, n_users, n_posts, seq_len):
    h = x_ref.shape[-1]
    n = n_users * n_posts
    s = seq_len
    hd = h // num_heads

    x = x_ref[...]                                   # [N*S, H]  (one flat view)
    mask = mask_ref[...]                             # [N, S]

    # ---- embedding LayerNorm ----
    x = _layernorm(x, ln0g_ref[...], ln0b_ref[...])

    # ---- fused Q/K/V projection: one [N*S, H] x [H, 3H] matmul ----
    qkv = (jnp.dot(x, wqkv_ref[...], preferred_element_type=jnp.float32)
           + bqkv_ref[...])                          # [N*S, 3H]
    qkv = qkv.reshape(n, s, 3 * h)

    # Fold heads into the batch axis (leading-axis concats only):
    # batch index = head * N + sequence.
    def heads(base):
        return jnp.concatenate(
            [qkv[:, :, base + i * hd: base + (i + 1) * hd]
             for i in range(num_heads)], axis=0)     # [NH*N, S, HD]

    qb, kb, vb = heads(0), heads(h), heads(2 * h)

    # additive mask replicated per head
    neg = ((1.0 - mask) * (-1e9))[:, None, :]                      # [N, 1, S]
    negb = jnp.concatenate([neg] * num_heads, axis=0)              # [NH*N, 1, S]

    # ---- batched multi-head attention (one contraction per stage) ----
    scale = 1.0 / math.sqrt(hd)
    sc = jnp.einsum('bqd,bkd->bqk', qb, kb,
                    preferred_element_type=jnp.float32) * scale + negb
    sc = sc - jnp.max(sc, axis=-1, keepdims=True)
    e = jnp.exp(sc)
    p = e * pl.reciprocal(jnp.sum(e, axis=-1, keepdims=True), approx=True)
    attn_ref[...] = p                                              # single store

    ctx = jnp.einsum('bqk,bkd->bqd', p, vb,
                     preferred_element_type=jnp.float32)           # [NH*N, S, HD]
    ctx = jnp.concatenate([ctx[i * n:(i + 1) * n] for i in range(num_heads)],
                          axis=-1)                                 # [N, S, H]
    ctx = ctx.reshape(n * s, h)
    attn_out = (jnp.dot(ctx, wo_ref[...], preferred_element_type=jnp.float32)
                + bo_ref[...])
    x = _layernorm(x + attn_out, ln1g_ref[...], ln1b_ref[...])

    # ---- feed forward ----
    hid = _gelu(jnp.dot(x, w1_ref[...], preferred_element_type=jnp.float32)
                + b1_ref[...])
    ffn = (jnp.dot(hid, w2_ref[...], preferred_element_type=jnp.float32)
           + b2_ref[...])
    x = _layernorm(x + ffn, ln2g_ref[...], ln2b_ref[...])

    # ---- masked mean pooling (SentenceTransformer.mean_pooling) ----
    x3 = x.reshape(n, s, h)
    msum = jnp.sum(x3 * mask[:, :, None], axis=1)                    # [N, H]
    denom = jnp.maximum(jnp.sum(mask, axis=1, keepdims=True), 1e-9)  # clamp(min=1e-9)
    pooled = msum * pl.reciprocal(denom, approx=True)                # [N, H]

    # ---- post-level Attention + classifier (previously a 2nd pallas_call) ----
    enc = pooled.reshape(n_users, n_posts, h)                        # [B, P, H]
    vals = jnp.sum(enc * pw_ref[...][None, :, :], axis=-1) + pb_ref[...]  # [B, P]
    vals = vals - jnp.max(vals, axis=-1, keepdims=True)
    e2 = jnp.exp(vals)
    w = e2 * pl.reciprocal(jnp.sum(e2, axis=-1, keepdims=True), approx=True)
    attw_ref[...] = w                                                # [B, P]
    agg = jnp.sum(enc * w[:, :, None], axis=1)                       # [B, H]
    # dropout: identity at inference
    h1 = jnp.tanh(jnp.dot(agg, hw1_ref[...],
                          preferred_element_type=jnp.float32) + hb1_ref[...])
    pred_ref[...] = (jnp.dot(h1, hw2_ref[...],
                             preferred_element_type=jnp.float32) + hb2_ref[...])


# ------------------------------ pallas_call glue ------------------------------
def _full_spec(shape):
    nd = len(shape)
    return pl.BlockSpec(shape, lambda i, _n=nd: (0,) * _n)


def run_fused(x_flat, mask, prm, b_users, p_posts):
    n = b_users * p_posts
    inputs = (x_flat, mask,
              prm['ln0g'], prm['ln0b'],
              prm['wqkv'], prm['bqkv'],
              prm['wo'], prm['bo'], prm['ln1g'], prm['ln1b'],
              prm['w1'], prm['b1'], prm['w2'], prm['b2'],
              prm['ln2g'], prm['ln2b'],
              prm['pw'], prm['pb'],
              prm['hw1'], prm['hb1'], prm['hw2'], prm['hb2'])
    out_shape = (
        jax.ShapeDtypeStruct((b_users, L), jnp.float32),        # predict
        jax.ShapeDtypeStruct((NH * n, S, S), jnp.float32),      # attention probs
        jax.ShapeDtypeStruct((b_users, p_posts), jnp.float32),  # post weights
    )
    cost = pl.CostEstimate(flops=2_400_000, transcendentals=20_000,
                           bytes_accessed=100_000)
    fn = pl.pallas_call(
        functools.partial(fused_forward_kernel, num_heads=NH,
                          n_users=b_users, n_posts=p_posts, seq_len=S),
        grid=(1,),
        in_specs=[_full_spec(a.shape) for a in inputs],
        out_specs=tuple(_full_spec(o.shape) for o in out_shape),
        out_shape=out_shape,
        cost_estimate=cost,
    )
    return fn(*inputs)


# ------------------------------ parameters ------------------------------------
def init_params(key):
    ks = jax.random.split(key, 10)

    def w(k, shape, scale=0.02):
        return (scale * jax.random.normal(k, shape)).astype(jnp.float32)

    ones = lambda shp: jnp.ones(shp, jnp.float32)
    zeros = lambda shp: jnp.zeros(shp, jnp.float32)
    return dict(
        tok_emb=w(ks[0], (V, H)), pos_emb=w(ks[1], (S, H)),
        ln0g=ones((1, H)), ln0b=zeros((1, H)),
        # fused Q/K/V projection, columns ordered [Wq | Wk | Wv]
        wqkv=w(ks[2], (H, 3 * H)), bqkv=zeros((1, 3 * H)),
        wo=w(ks[3], (H, H)), bo=zeros((1, H)),
        ln1g=ones((1, H)), ln1b=zeros((1, H)),
        w1=w(ks[4], (H, FF)), b1=zeros((1, FF)),
        w2=w(ks[5], (FF, H)), b2=zeros((1, H)),
        ln2g=ones((1, H)), ln2b=zeros((1, H)),
        # Attention(hidden_dim=H): Linear(H, 1)
        pw=w(ks[6], (1, H)), pb=zeros((1, 1)),
        # self.linear: Linear(H, H) + Tanh + Linear(H, num_labels)
        hw1=w(ks[7], (H, H)), hb1=zeros((1, H)),
        hw2=w(ks[8], (H, L)), hb2=zeros((1, L)),
    )


# ------------------------------ forward ---------------------------------------
def sentence_transformer_forward(prm, input_ids, attention_masks):
    b, p, _, s = input_ids.shape
    # The torch loop runs the transformer per user on [P, S] batches; since the
    # encoder treats batch rows independently, batching all B*P sequences into a
    # single fused kernel call is semantically identical.
    ids = input_ids.reshape(b * p, s)
    mask = attention_masks.reshape(b * p, s).astype(jnp.float32)
    # embedding lookup + learned positions (gather stays in XLA)
    x = (prm['tok_emb'][ids] + prm['pos_emb'][None, :s, :]).astype(jnp.float32)
    x_flat = x.reshape(b * p * s, H)

    predict, attn_probs, post_w = run_fused(x_flat, mask, prm, b, p)

    # [NH*N, S, S] (head-major batch) -> (B, P, NH, S, S): tiny wrapper-side relayout
    post_attentions = (jnp.transpose(attn_probs.reshape(NH, b, p, s, s),
                                     (1, 2, 0, 3, 4)),)             # per-layer tuple
    attn = post_w[:, None, :]                                       # [B, 1, P]
    return predict, (post_attentions, attn)


# ------------------------------ main -------------------------------------------
if __name__ == "__main__":
    key = jax.random.PRNGKey(0)
    kp, kid, klen = jax.random.split(key, 3)
    prm = init_params(kp)

    input_ids = jax.random.randint(kid, (B, P, 1, S), 0, V, dtype=jnp.int32)
    lengths = jax.random.randint(klen, (B, P, 1, 1), S // 2, S + 1)
    attention_masks = (jnp.arange(S)[None, None, None, :] < lengths).astype(jnp.int32)

    predict, (post_attn, attn_w) = sentence_transformer_forward(
        prm, input_ids, attention_masks)
    jax.block_until_ready((predict, post_attn, attn_w))

    assert predict.shape == (B, L)
    assert attn_w.shape == (B, 1, P)
    assert post_attn[0].shape == (B, P, NH, S, S)
    print("KERNEL_OK")
</pallas_src>

<mosaic_0001>
module attributes {stable_mosaic.version = 11 : i64} {
  func.func @fused_forward_kernel(%arg0: i32, %arg1: memref<128x32xf32, #tpu.memory_space<vmem>>, %arg2: memref<8x16xf32, #tpu.memory_space<vmem>>, %arg3: memref<1x32xf32, #tpu.memory_space<vmem>>, %arg4: memref<1x32xf32, #tpu.memory_space<vmem>>, %arg5: memref<32x96xf32, #tpu.memory_space<vmem>>, %arg6: memref<1x96xf32, #tpu.memory_space<vmem>>, %arg7: memref<32x32xf32, #tpu.memory_space<vmem>>, %arg8: memref<1x32xf32, #tpu.memory_space<vmem>>, %arg9: memref<1x32xf32, #tpu.memory_space<vmem>>, %arg10: memref<1x32xf32, #tpu.memory_space<vmem>>, %arg11: memref<32x64xf32, #tpu.memory_space<vmem>>, %arg12: memref<1x64xf32, #tpu.memory_space<vmem>>, %arg13: memref<64x32xf32, #tpu.memory_space<vmem>>, %arg14: memref<1x32xf32, #tpu.memory_space<vmem>>, %arg15: memref<1x32xf32, #tpu.memory_space<vmem>>, %arg16: memref<1x32xf32, #tpu.memory_space<vmem>>, %arg17: memref<1x32xf32, #tpu.memory_space<vmem>>, %arg18: memref<1x1xf32, #tpu.memory_space<vmem>>, %arg19: memref<32x32xf32, #tpu.memory_space<vmem>>, %arg20: memref<1x32xf32, #tpu.memory_space<vmem>>, %arg21: memref<32x3xf32, #tpu.memory_space<vmem>>, %arg22: memref<1x3xf32, #tpu.memory_space<vmem>>, %arg23: memref<2x3xf32, #tpu.memory_space<vmem>>, %arg24: memref<32x16x16xf32, #tpu.memory_space<vmem>>, %arg25: memref<2x4xf32, #tpu.memory_space<vmem>>) attributes {dimension_semantics = [#tpu.dimension_semantics<arbitrary>], iteration_bounds = array<i64: 1>, scalar_prefetch = 0 : i64, scratch_operands = 0 : i64, tpu.core_type = #tpu.core_type<tc>, window_params = [{pipeline_mode = #tpu.pipeline_mode<synchronous>, transform_indices = @transform_0, window_bounds = array<i64: 128, 32>}, {pipeline_mode = #tpu.pipeline_mode<synchronous>, transform_indices = @transform_1, window_bounds = array<i64: 8, 16>}, {pipeline_mode = #tpu.pipeline_mode<synchronous>, transform_indices = @transform_2, window_bounds = array<i64: 1, 32>}, {pipeline_mode = #tpu.pipeline_mode<synchronous>, transform_indices = @transform_3, window_bounds = array<i64: 1, 32>}, {pipeline_mode = #tpu.pipeline_mode<synchronous>, transform_indices = @transform_4, window_bounds = array<i64: 32, 96>}, {pipeline_mode = #tpu.pipeline_mode<synchronous>, transform_indices = @transform_5, window_bounds = array<i64: 1, 96>}, {pipeline_mode = #tpu.pipeline_mode<synchronous>, transform_indices = @transform_6, window_bounds = array<i64: 32, 32>}, {pipeline_mode = #tpu.pipeline_mode<synchronous>, transform_indices = @transform_7, window_bounds = array<i64: 1, 32>}, {pipeline_mode = #tpu.pipeline_mode<synchronous>, transform_indices = @transform_8, window_bounds = array<i64: 1, 32>}, {pipeline_mode = #tpu.pipeline_mode<synchronous>, transform_indices = @transform_9, window_bounds = array<i64: 1, 32>}, {pipeline_mode = #tpu.pipeline_mode<synchronous>, transform_indices = @transform_10, window_bounds = array<i64: 32, 64>}, {pipeline_mode = #tpu.pipeline_mode<synchronous>, transform_indices = @transform_11, window_bounds = array<i64: 1, 64>}, {pipeline_mode = #tpu.pipeline_mode<synchronous>, transform_indices = @transform_12, window_bounds = array<i64: 64, 32>}, {pipeline_mode = #tpu.pipeline_mode<synchronous>, transform_indices = @transform_13, window_bounds = array<i64: 1, 32>}, {pipeline_mode = #tpu.pipeline_mode<synchronous>, transform_indices = @transform_14, window_bounds = array<i64: 1, 32>}, {pipeline_mode = #tpu.pipeline_mode<synchronous>, transform_indices = @transform_15, window_bounds = array<i64: 1, 32>}, {pipeline_mode = #tpu.pipeline_mode<synchronous>, transform_indices = @transform_16, window_bounds = array<i64: 1, 32>}, {pipeline_mode = #tpu.pipeline_mode<synchronous>, transform_indices = @transform_17, window_bounds = array<i64: 1, 1>}, {pipeline_mode = #tpu.pipeline_mode<synchronous>, transform_indices = @transform_18, window_bounds = array<i64: 32, 32>}, {pipeline_mode = #tpu.pipeline_mode<synchronous>, transform_indices = @transform_19, window_bounds = array<i64: 1, 32>}, {pipeline_mode = #tpu.pipeline_mode<synchronous>, transform_indices = @transform_20, window_bounds = array<i64: 32, 3>}, {pipeline_mode = #tpu.pipeline_mode<synchronous>, transform_indices = @transform_21, window_bounds = array<i64: 1, 3>}, {pipeline_mode = #tpu.pipeline_mode<synchronous>, transform_indices = @transform_22, window_bounds = array<i64: 2, 3>}, {pipeline_mode = #tpu.pipeline_mode<synchronous>, transform_indices = @transform_23, window_bounds = array<i64: 32, 16, 16>}, {pipeline_mode = #tpu.pipeline_mode<synchronous>, transform_indices = @transform_24, window_bounds = array<i64: 2, 4>}]} {
    %c0 = arith.constant 0 : index
    %c0_0 = arith.constant 0 : index
    %0 = vector.load %arg1[%c0, %c0_0] : memref<128x32xf32, #tpu.memory_space<vmem>>, vector<128x32xf32>
    %c0_1 = arith.constant 0 : index
    %c0_2 = arith.constant 0 : index
    %1 = vector.load %arg2[%c0_1, %c0_2] : memref<8x16xf32, #tpu.memory_space<vmem>>, vector<8x16xf32>
    %c0_3 = arith.constant 0 : index
    %c0_4 = arith.constant 0 : index
    %2 = vector.load %arg3[%c0_3, %c0_4] : memref<1x32xf32, #tpu.memory_space<vmem>>, vector<1x32xf32>
    %c0_5 = arith.constant 0 : index
    %c0_6 = arith.constant 0 : index
    %3 = vector.load %arg4[%c0_5, %c0_6] : memref<1x32xf32, #tpu.memory_space<vmem>>, vector<1x32xf32>
    %cst = arith.constant dense<0.000000e+00> : vector<128xf32>
    %4 = vector.multi_reduction <add>, %0, %cst [1] : vector<128x32xf32> to vector<128xf32>
    %5 = vector.shape_cast %4 : vector<128xf32> to vector<128x1xf32>
    %cst_7 = arith.constant 3.200000e+01 : f32
    %6 = vector.broadcast %cst_7 : f32 to vector<128x1xf32>
    %7 = arith.divf %5, %6 : vector<128x1xf32>
    %8 = vector.broadcast %7 : vector<128x1xf32> to vector<128x32xf32>
    %9 = arith.subf %0, %8 : vector<128x32xf32>
    %10 = arith.mulf %9, %9 : vector<128x32xf32>
    %cst_8 = arith.constant dense<0.000000e+00> : vector<128xf32>
    %11 = vector.multi_reduction <add>, %10, %cst_8 [1] : vector<128x32xf32> to vector<128xf32>
    %12 = vector.shape_cast %11 : vector<128xf32> to vector<128x1xf32>
    %cst_9 = arith.constant 3.200000e+01 : f32
    %13 = vector.broadcast %cst_9 : f32 to vector<128x1xf32>
    %14 = arith.divf %12, %13 : vector<128x1xf32>
    %15 = vector.broadcast %7 : vector<128x1xf32> to vector<128x32xf32>
    %16 = arith.subf %0, %15 : vector<128x32xf32>
    %cst_10 = arith.constant 9.99999996E-13 : f32
    %17 = vector.broadcast %cst_10 : f32 to vector<128x1xf32>
    %18 = arith.addf %14, %17 : vector<128x1xf32>
    %19 = math.rsqrt %18 : vector<128x1xf32>
    %20 = vector.broadcast %19 : vector<128x1xf32> to vector<128x32xf32>
    %21 = arith.mulf %16, %20 : vector<128x32xf32>
    %22 = vector.broadcast %2 : vector<1x32xf32> to vector<128x32xf32>
    %23 = arith.mulf %21, %22 : vector<128x32xf32>
    %24 = vector.broadcast %3 : vector<1x32xf32> to vector<128x32xf32>
    %25 = arith.addf %23, %24 : vector<128x32xf32>
    %c0_11 = arith.constant 0 : index
    %c0_12 = arith.constant 0 : index
    %26 = vector.load %arg5[%c0_11, %c0_12] : memref<32x96xf32, #tpu.memory_space<vmem>>, vector<32x96xf32>
    %cst_13 = arith.constant dense<0.000000e+00> : vector<128x96xf32>
    %27 = tpu.matmul %25, %26, %cst_13 {dimension_numbers = #tpu.dot_dimension_numbers<[1], [0], [0], [1], [0, 0, 1, 1], [], []>} : vector<128x32xf32>, vector<32x96xf32>, vector<128x96xf32> -> vector<128x96xf32>
    %c0_14 = arith.constant 0 : index
    %c0_15 = arith.constant 0 : index
    %28 = vector.load %arg6[%c0_14, %c0_15] : memref<1x96xf32, #tpu.memory_space<vmem>>, vector<1x96xf32>
    %29 = vector.broadcast %28 : vector<1x96xf32> to vector<128x96xf32>
    %30 = arith.addf %27, %29 : vector<128x96xf32>
    %31 = vector.shape_cast %30 : vector<128x96xf32> to vector<8x16x96xf32>
    %32 = vector.extract_strided_slice %31 {offsets = [0, 0, 0], sizes = [8, 16, 8], strides = [1, 1, 1]} : vector<8x16x96xf32> to vector<8x16x8xf32>
    %33 = vector.extract_strided_slice %31 {offsets = [0, 0, 8], sizes = [8, 16, 8], strides = [1, 1, 1]} : vector<8x16x96xf32> to vector<8x16x8xf32>
    %34 = vector.extract_strided_slice %31 {offsets = [0, 0, 16], sizes = [8, 16, 8], strides = [1, 1, 1]} : vector<8x16x96xf32> to vector<8x16x8xf32>
    %35 = vector.extract_strided_slice %31 {offsets = [0, 0, 24], sizes = [8, 16, 8], strides = [1, 1, 1]} : vector<8x16x96xf32> to vector<8x16x8xf32>
    %36 = tpu.concatenate %32, %33, %34, %35 in 0 : vector<8x16x8xf32>, vector<8x16x8xf32>, vector<8x16x8xf32>, vector<8x16x8xf32> -> vector<32x16x8xf32>
    %37 = vector.extract_strided_slice %31 {offsets = [0, 0, 32], sizes = [8, 16, 8], strides = [1, 1, 1]} : vector<8x16x96xf32> to vector<8x16x8xf32>
    %38 = vector.extract_strided_slice %31 {offsets = [0, 0, 40], sizes = [8, 16, 8], strides = [1, 1, 1]} : vector<8x16x96xf32> to vector<8x16x8xf32>
    %39 = vector.extract_strided_slice %31 {offsets = [0, 0, 48], sizes = [8, 16, 8], strides = [1, 1, 1]} : vector<8x16x96xf32> to vector<8x16x8xf32>
    %40 = vector.extract_strided_slice %31 {offsets = [0, 0, 56], sizes = [8, 16, 8], strides = [1, 1, 1]} : vector<8x16x96xf32> to vector<8x16x8xf32>
    %41 = tpu.concatenate %37, %38, %39, %40 in 0 : vector<8x16x8xf32>, vector<8x16x8xf32>, vector<8x16x8xf32>, vector<8x16x8xf32> -> vector<32x16x8xf32>
    %42 = vector.extract_strided_slice %31 {offsets = [0, 0, 64], sizes = [8, 16, 8], strides = [1, 1, 1]} : vector<8x16x96xf32> to vector<8x16x8xf32>
    %43 = vector.extract_strided_slice %31 {offsets = [0, 0, 72], sizes = [8, 16, 8], strides = [1, 1, 1]} : vector<8x16x96xf32> to vector<8x16x8xf32>
    %44 = vector.extract_strided_slice %31 {offsets = [0, 0, 80], sizes = [8, 16, 8], strides = [1, 1, 1]} : vector<8x16x96xf32> to vector<8x16x8xf32>
    %45 = vector.extract_strided_slice %31 {offsets = [0, 0, 88], sizes = [8, 16, 8], strides = [1, 1, 1]} : vector<8x16x96xf32> to vector<8x16x8xf32>
    %46 = tpu.concatenate %42, %43, %44, %45 in 0 : vector<8x16x8xf32>, vector<8x16x8xf32>, vector<8x16x8xf32>, vector<8x16x8xf32> -> vector<32x16x8xf32>
    %cst_16 = arith.constant 1.000000e+00 : f32
    %47 = vector.broadcast %cst_16 : f32 to vector<8x16xf32>
    %48 = arith.subf %47, %1 : vector<8x16xf32>
    %cst_17 = arith.constant -1.000000e+09 : f32
    %49 = vector.broadcast %cst_17 : f32 to vector<8x16xf32>
    %50 = arith.mulf %48, %49 : vector<8x16xf32>
    %51 = vector.shape_cast %50 : vector<8x16xf32> to vector<8x1x16xf32>
    %52 = tpu.concatenate %51, %51, %51, %51 in 0 : vector<8x1x16xf32>, vector<8x1x16xf32>, vector<8x1x16xf32>, vector<8x1x16xf32> -> vector<32x1x16xf32>
    "tpu.trace_start"() <{level = 10 : i32, message = "bqd,bkd->bqk"}> : () -> ()
    %cst_18 = arith.constant dense<0.000000e+00> : vector<32x16x16xf32>
    %53 = tpu.matmul %36, %41, %cst_18 {dimension_numbers = #tpu.dot_dimension_numbers<[2], [2], [1], [1], [0, 0, 0, 1, 1, 1], [0], [0]>} : vector<32x16x8xf32>, vector<32x16x8xf32>, vector<32x16x16xf32> -> vector<32x16x16xf32>
    "tpu.trace_stop"() : () -> ()
    %cst_19 = arith.constant 0.353553385 : f32
    %54 = vector.broadcast %cst_19 : f32 to vector<32x16x16xf32>
    %55 = arith.mulf %53, %54 : vector<32x16x16xf32>
    %56 = vector.broadcast %52 : vector<32x1x16xf32> to vector<32x16x16xf32>
    %57 = arith.addf %55, %56 : vector<32x16x16xf32>
    %cst_20 = arith.constant dense<0xFF800000> : vector<32x16xf32>
    %58 = vector.multi_reduction <maximumf>, %57, %cst_20 [2] : vector<32x16x16xf32> to vector<32x16xf32>
    %59 = vector.shape_cast %58 : vector<32x16xf32> to vector<32x16x1xf32>
    %60 = vector.broadcast %59 : vector<32x16x1xf32> to vector<32x16x16xf32>
    %61 = arith.subf %57, %60 : vector<32x16x16xf32>
    %62 = math.exp %61 : vector<32x16x16xf32>
    %cst_21 = arith.constant dense<0.000000e+00> : vector<32x16xf32>
    %63 = vector.multi_reduction <add>, %62, %cst_21 [2] : vector<32x16x16xf32> to vector<32x16xf32>
    %64 = vector.shape_cast %63 : vector<32x16xf32> to vector<32x16x1xf32>
    %65 = tpu.reciprocal %64 {approx = true} : vector<32x16x1xf32> -> vector<32x16x1xf32>
    %66 = vector.broadcast %65 : vector<32x16x1xf32> to vector<32x16x16xf32>
    %67 = arith.mulf %62, %66 : vector<32x16x16xf32>
    %c0_22 = arith.constant 0 : index
    %c0_23 = arith.constant 0 : index
    %c0_24 = arith.constant 0 : index
    %68 = vector.load %arg24[%c0_22, %c0_23, %c0_24] : memref<32x16x16xf32, #tpu.memory_space<vmem>>, vector<32x16x16xf32>
    tpu.vector_store %arg24[%c0_22, %c0_23, %c0_24], %67 {strides = array<i32>} : memref<32x16x16xf32, #tpu.memory_space<vmem>>, vector<32x16x16xf32>,
    "tpu.trace_start"() <{level = 10 : i32, message = "bqk,bkd->bqd"}> : () -> ()
    %cst_25 = arith.constant dense<0.000000e+00> : vector<32x16x8xf32>
    %69 = tpu.matmul %67, %46, %cst_25 {dimension_numbers = #tpu.dot_dimension_numbers<[2], [1], [1], [2], [0, 0, 0, 1, 1, 2], [0], [0]>} : vector<32x16x16xf32>, vector<32x16x8xf32>, vector<32x16x8xf32> -> vector<32x16x8xf32>
    "tpu.trace_stop"() : () -> ()
    %70 = vector.extract_strided_slice %69 {offsets = [0, 0, 0], sizes = [8, 16, 8], strides = [1, 1, 1]} : vector<32x16x8xf32> to vector<8x16x8xf32>
    %71 = vector.extract_strided_slice %69 {offsets = [8, 0, 0], sizes = [8, 16, 8], strides = [1, 1, 1]} : vector<32x16x8xf32> to vector<8x16x8xf32>
    %72 = vector.extract_strided_slice %69 {offsets = [16, 0, 0], sizes = [8, 16, 8], strides = [1, 1, 1]} : vector<32x16x8xf32> to vector<8x16x8xf32>
    %73 = vector.extract_strided_slice %69 {offsets = [24, 0, 0], sizes = [8, 16, 8], strides = [1, 1, 1]} : vector<32x16x8xf32> to vector<8x16x8xf32>
    %74 = tpu.concatenate %70, %71, %72, %73 in 2 : vector<8x16x8xf32>, vector<8x16x8xf32>, vector<8x16x8xf32>, vector<8x16x8xf32> -> vector<8x16x32xf32>
    %75 = vector.shape_cast %74 : vector<8x16x32xf32> to vector<128x32xf32>
    %c0_26 = arith.constant 0 : index
    %c0_27 = arith.constant 0 : index
    %76 = vector.load %arg7[%c0_26, %c0_27] : memref<32x32xf32, #tpu.memory_space<vmem>>, vector<32x32xf32>
    %cst_28 = arith.constant dense<0.000000e+00> : vector<128x32xf32>
    %77 = tpu.matmul %75, %76, %cst_28 {dimension_numbers = #tpu.dot_dimension_numbers<[1], [0], [0], [1], [0, 0, 1, 1], [], []>} : vector<128x32xf32>, vector<32x32xf32>, vector<128x32xf32> -> vector<128x32xf32>
    %c0_29 = arith.constant 0 : index
    %c0_30 = arith.constant 0 : index
    %78 = vector.load %arg8[%c0_29, %c0_30] : memref<1x32xf32, #tpu.memory_space<vmem>>, vector<1x32xf32>
    %79 = vector.broadcast %78 : vector<1x32xf32> to vector<128x32xf32>
    %80 = arith.addf %77, %79 : vector<128x32xf32>
    %81 = arith.addf %25, %80 : vector<128x32xf32>
    %c0_31 = arith.constant 0 : index
    %c0_32 = arith.constant 0 : index
    %82 = vector.load %arg9[%c0_31, %c0_32] : memref<1x32xf32, #tpu.memory_space<vmem>>, vector<1x32xf32>
    %c0_33 = arith.constant 0 : index
    %c0_34 = arith.constant 0 : index
    %83 = vector.load %arg10[%c0_33, %c0_34] : memref<1x32xf32, #tpu.memory_space<vmem>>, vector<1x32xf32>
    %cst_35 = arith.constant dense<0.000000e+00> : vector<128xf32>
    %84 = vector.multi_reduction <add>, %81, %cst_35 [1] : vector<128x32xf32> to vector<128xf32>
    %85 = vector.shape_cast %84 : vector<128xf32> to vector<128x1xf32>
    %cst_36 = arith.constant 3.200000e+01 : f32
    %86 = vector.broadcast %cst_36 : f32 to vector<128x1xf32>
    %87 = arith.divf %85, %86 : vector<128x1xf32>
    %88 = vector.broadcast %87 : vector<128x1xf32> to vector<128x32xf32>
    %89 = arith.subf %81, %88 : vector<128x32xf32>
    %90 = arith.mulf %89, %89 : vector<128x32xf32>
    %cst_37 = arith.constant dense<0.000000e+00> : vector<128xf32>
    %91 = vector.multi_reduction <add>, %90, %cst_37 [1] : vector<128x32xf32> to vector<128xf32>
    %92 = vector.shape_cast %91 : vector<128xf32> to vector<128x1xf32>
    %cst_38 = arith.constant 3.200000e+01 : f32
    %93 = vector.broadcast %cst_38 : f32 to vector<128x1xf32>
    %94 = arith.divf %92, %93 : vector<128x1xf32>
    %95 = vector.broadcast %87 : vector<128x1xf32> to vector<128x32xf32>
    %96 = arith.subf %81, %95 : vector<128x32xf32>
    %cst_39 = arith.constant 9.99999996E-13 : f32
    %97 = vector.broadcast %cst_39 : f32 to vector<128x1xf32>
    %98 = arith.addf %94, %97 : vector<128x1xf32>
    %99 = math.rsqrt %98 : vector<128x1xf32>
    %100 = vector.broadcast %99 : vector<128x1xf32> to vector<128x32xf32>
    %101 = arith.mulf %96, %100 : vector<128x32xf32>
    %102 = vector.broadcast %82 : vector<1x32xf32> to vector<128x32xf32>
    %103 = arith.mulf %101, %102 : vector<128x32xf32>
    %104 = vector.broadcast %83 : vector<1x32xf32> to vector<128x32xf32>
    %105 = arith.addf %103, %104 : vector<128x32xf32>
    %c0_40 = arith.constant 0 : index
    %c0_41 = arith.constant 0 : index
    %106 = vector.load %arg11[%c0_40, %c0_41] : memref<32x64xf32, #tpu.memory_space<vmem>>, vector<32x64xf32>
    %cst_42 = arith.constant dense<0.000000e+00> : vector<128x64xf32>
    %107 = tpu.matmul %105, %106, %cst_42 {dimension_numbers = #tpu.dot_dimension_numbers<[1], [0], [0], [1], [0, 0, 1, 1], [], []>} : vector<128x32xf32>, vector<32x64xf32>, vector<128x64xf32> -> vector<128x64xf32>
    %c0_43 = arith.constant 0 : index
    %c0_44 = arith.constant 0 : index
    %108 = vector.load %arg12[%c0_43, %c0_44] : memref<1x64xf32, #tpu.memory_space<vmem>>, vector<1x64xf32>
    %109 = vector.broadcast %108 : vector<1x64xf32> to vector<128x64xf32>
    %110 = arith.addf %107, %109 : vector<128x64xf32>
    %cst_45 = arith.constant 5.000000e-01 : f32
    %111 = vector.broadcast %cst_45 : f32 to vector<128x64xf32>
    %112 = arith.mulf %111, %110 : vector<128x64xf32>
    %cst_46 = arith.constant 4.471500e-02 : f32
    %113 = vector.broadcast %cst_46 : f32 to vector<128x64xf32>
    %114 = arith.mulf %113, %110 : vector<128x64xf32>
    %115 = arith.mulf %114, %110 : vector<128x64xf32>
    %116 = arith.mulf %115, %110 : vector<128x64xf32>
    %117 = arith.addf %110, %116 : vector<128x64xf32>
    %cst_47 = arith.constant 0.797884583 : f32
    %118 = vector.broadcast %cst_47 : f32 to vector<128x64xf32>
    %119 = arith.mulf %118, %117 : vector<128x64xf32>
    %120 = math.tanh %119 : vector<128x64xf32>
    %cst_48 = arith.constant 1.000000e+00 : f32
    %121 = vector.broadcast %cst_48 : f32 to vector<128x64xf32>
    %122 = arith.addf %121, %120 : vector<128x64xf32>
    %123 = arith.mulf %112, %122 : vector<128x64xf32>
    %c0_49 = arith.constant 0 : index
    %c0_50 = arith.constant 0 : index
    %124 = vector.load %arg13[%c0_49, %c0_50] : memref<64x32xf32, #tpu.memory_space<vmem>>, vector<64x32xf32>
    %cst_51 = arith.constant dense<0.000000e+00> : vector<128x32xf32>
    %125 = tpu.matmul %123, %124, %cst_51 {dimension_numbers = #tpu.dot_dimension_numbers<[1], [0], [0], [1], [0, 0, 1, 1], [], []>} : vector<128x64xf32>, vector<64x32xf32>, vector<128x32xf32> -> vector<128x32xf32>
    %c0_52 = arith.constant 0 : index
    %c0_53 = arith.constant 0 : index
    %126 = vector.load %arg14[%c0_52, %c0_53] : memref<1x32xf32, #tpu.memory_space<vmem>>, vector<1x32xf32>
    %127 = vector.broadcast %126 : vector<1x32xf32> to vector<128x32xf32>
    %128 = arith.addf %125, %127 : vector<128x32xf32>
    %129 = arith.addf %105, %128 : vector<128x32xf32>
    %c0_54 = arith.constant 0 : index
    %c0_55 = arith.constant 0 : index
    %130 = vector.load %arg15[%c0_54, %c0_55] : memref<1x32xf32, #tpu.memory_space<vmem>>, vector<1x32xf32>
    %c0_56 = arith.constant 0 : index
    %c0_57 = arith.constant 0 : index
    %131 = vector.load %arg16[%c0_56, %c0_57] : memref<1x32xf32, #tpu.memory_space<vmem>>, vector<1x32xf32>
    %cst_58 = arith.constant dense<0.000000e+00> : vector<128xf32>
    %132 = vector.multi_reduction <add>, %129, %cst_58 [1] : vector<128x32xf32> to vector<128xf32>
    %133 = vector.shape_cast %132 : vector<128xf32> to vector<128x1xf32>
    %cst_59 = arith.constant 3.200000e+01 : f32
    %134 = vector.broadcast %cst_59 : f32 to vector<128x1xf32>
    %135 = arith.divf %133, %134 : vector<128x1xf32>
    %136 = vector.broadcast %135 : vector<128x1xf32> to vector<128x32xf32>
    %137 = arith.subf %129, %136 : vector<128x32xf32>
    %138 = arith.mulf %137, %137 : vector<128x32xf32>
    %cst_60 = arith.constant dense<0.000000e+00> : vector<128xf32>
    %139 = vector.multi_reduction <add>, %138, %cst_60 [1] : vector<128x32xf32> to vector<128xf32>
    %140 = vector.shape_cast %139 : vector<128xf32> to vector<128x1xf32>
    %cst_61 = arith.constant 3.200000e+01 : f32
    %141 = vector.broadcast %cst_61 : f32 to vector<128x1xf32>
    %142 = arith.divf %140, %141 : vector<128x1xf32>
    %143 = vector.broadcast %135 : vector<128x1xf32> to vector<128x32xf32>
    %144 = arith.subf %129, %143 : vector<128x32xf32>
    %cst_62 = arith.constant 9.99999996E-13 : f32
    %145 = vector.broadcast %cst_62 : f32 to vector<128x1xf32>
    %146 = arith.addf %142, %145 : vector<128x1xf32>
    %147 = math.rsqrt %146 : vector<128x1xf32>
    %148 = vector.broadcast %147 : vector<128x1xf32> to vector<128x32xf32>
    %149 = arith.mulf %144, %148 : vector<128x32xf32>
    %150 = vector.broadcast %130 : vector<1x32xf32> to vector<128x32xf32>
    %151 = arith.mulf %149, %150 : vector<128x32xf32>
    %152 = vector.broadcast %131 : vector<1x32xf32> to vector<128x32xf32>
    %153 = arith.addf %151, %152 : vector<128x32xf32>
    %154 = vector.shape_cast %153 : vector<128x32xf32> to vector<8x16x32xf32>
    %155 = vector.shape_cast %1 : vector<8x16xf32> to vector<8x16x1xf32>
    %156 = vector.broadcast %155 : vector<8x16x1xf32> to vector<8x16x32xf32>
    %157 = arith.mulf %154, %156 : vector<8x16x32xf32>
    %cst_63 = arith.constant dense<0.000000e+00> : vector<8x32xf32>
    %158 = vector.multi_reduction <add>, %157, %cst_63 [1] : vector<8x16x32xf32> to vector<8x32xf32>
    %cst_64 = arith.constant dense<0.000000e+00> : vector<8xf32>
    %159 = vector.multi_reduction <add>, %1, %cst_64 [1] : vector<8x16xf32> to vector<8xf32>
    %160 = vector.shape_cast %159 : vector<8xf32> to vector<8x1xf32>
    %cst_65 = arith.constant 9.99999971E-10 : f32
    %161 = vector.broadcast %cst_65 : f32 to vector<8x1xf32>
    %162 = arith.maximumf %160, %161 : vector<8x1xf32>
    %163 = tpu.reciprocal %162 {approx = true} : vector<8x1xf32> -> vector<8x1xf32>
    %164 = vector.broadcast %163 : vector<8x1xf32> to vector<8x32xf32>
    %165 = arith.mulf %158, %164 : vector<8x32xf32>
    %166 = vector.shape_cast %165 : vector<8x32xf32> to vector<2x4x32xf32>
    %c0_66 = arith.constant 0 : index
    %c0_67 = arith.constant 0 : index
    %167 = vector.load %arg17[%c0_66, %c0_67] : memref<1x32xf32, #tpu.memory_space<vmem>>, vector<1x32xf32>
    %168 = vector.shape_cast %167 : vector<1x32xf32> to vector<1x1x32xf32>
    %169 = vector.broadcast %168 : vector<1x1x32xf32> to vector<2x4x32xf32>
    %170 = arith.mulf %166, %169 : vector<2x4x32xf32>
    %cst_68 = arith.constant dense<0.000000e+00> : vector<2x4xf32>
    %171 = vector.multi_reduction <add>, %170, %cst_68 [2] : vector<2x4x32xf32> to vector<2x4xf32>
    %c0_69 = arith.constant 0 : index
    %c0_70 = arith.constant 0 : index
    %172 = vector.load %arg18[%c0_69, %c0_70] : memref<1x1xf32, #tpu.memory_space<vmem>>, vector<1x1xf32>
    %173 = vector.broadcast %172 : vector<1x1xf32> to vector<2x4xf32>
    %174 = arith.addf %171, %173 : vector<2x4xf32>
    %cst_71 = arith.constant dense<0xFF800000> : vector<2xf32>
    %175 = vector.multi_reduction <maximumf>, %174, %cst_71 [1] : vector<2x4xf32> to vector<2xf32>
    %176 = vector.shape_cast %175 : vector<2xf32> to vector<2x1xf32>
    %177 = vector.broadcast %176 : vector<2x1xf32> to vector<2x4xf32>
    %178 = arith.subf %174, %177 : vector<2x4xf32>
    %179 = math.exp %178 : vector<2x4xf32>
    %cst_72 = arith.constant dense<0.000000e+00> : vector<2xf32>
    %180 = vector.multi_reduction <add>, %179, %cst_72 [1] : vector<2x4xf32> to vector<2xf32>
    %181 = vector.shape_cast %180 : vector<2xf32> to vector<2x1xf32>
    %182 = tpu.reciprocal %181 {approx = true} : vector<2x1xf32> -> vector<2x1xf32>
    %183 = vector.broadcast %182 : vector<2x1xf32> to vector<2x4xf32>
    %184 = arith.mulf %179, %183 : vector<2x4xf32>
    %c0_73 = arith.constant 0 : index
    %c0_74 = arith.constant 0 : index
    %185 = vector.load %arg25[%c0_73, %c0_74] : memref<2x4xf32, #tpu.memory_space<vmem>>, vector<2x4xf32>
    tpu.vector_store %arg25[%c0_73, %c0_74], %184 {strides = array<i32>} : memref<2x4xf32, #tpu.memory_space<vmem>>, vector<2x4xf32>,
    %186 = vector.shape_cast %184 : vector<2x4xf32> to vector<2x4x1xf32>
    %187 = vector.broadcast %186 : vector<2x4x1xf32> to vector<2x4x32xf32>
    %188 = arith.mulf %166, %187 : vector<2x4x32xf32>
    %cst_75 = arith.constant dense<0.000000e+00> : vector<2x32xf32>
    %189 = vector.multi_reduction <add>, %188, %cst_75 [1] : vector<2x4x32xf32> to vector<2x32xf32>
    %c0_76 = arith.constant 0 : index
    %c0_77 = arith.constant 0 : index
    %190 = vector.load %arg19[%c0_76, %c0_77] : memref<32x32xf32, #tpu.memory_space<vmem>>, vector<32x32xf32>
    %cst_78 = arith.constant dense<0.000000e+00> : vector<2x32xf32>
    %191 = tpu.matmul %189, %190, %cst_78 {dimension_numbers = #tpu.dot_dimension_numbers<[1], [0], [0], [1], [0, 0, 1, 1], [], []>} : vector<2x32xf32>, vector<32x32xf32>, vector<2x32xf32> -> vector<2x32xf32>
    %c0_79 = arith.constant 0 : index
    %c0_80 = arith.constant 0 : index
    %192 = vector.load %arg20[%c0_79, %c0_80] : memref<1x32xf32, #tpu.memory_space<vmem>>, vector<1x32xf32>
    %193 = vector.broadcast %192 : vector<1x32xf32> to vector<2x32xf32>
    %194 = arith.addf %191, %193 : vector<2x32xf32>
    %195 = math.tanh %194 : vector<2x32xf32>
    %c0_81 = arith.constant 0 : index
    %c0_82 = arith.constant 0 : index
    %196 = vector.load %arg21[%c0_81, %c0_82] : memref<32x3xf32, #tpu.memory_space<vmem>>, vector<32x3xf32>
    %cst_83 = arith.constant dense<0.000000e+00> : vector<2x3xf32>
    %197 = tpu.matmul %195, %196, %cst_83 {dimension_numbers = #tpu.dot_dimension_numbers<[1], [0], [0], [1], [0, 0, 1, 1], [], []>} : vector<2x32xf32>, vector<32x3xf32>, vector<2x3xf32> -> vector<2x3xf32>
    %c0_84 = arith.constant 0 : index
    %c0_85 = arith.constant 0 : index
    %198 = vector.load %arg22[%c0_84, %c0_85] : memref<1x3xf32, #tpu.memory_space<vmem>>, vector<1x3xf32>
    %199 = vector.broadcast %198 : vector<1x3xf32> to vector<2x3xf32>
    %200 = arith.addf %197, %199 : vector<2x3xf32>
    %c0_86 = arith.constant 0 : index
    %c0_87 = arith.constant 0 : index
    %201 = vector.load %arg23[%c0_86, %c0_87] : memref<2x3xf32, #tpu.memory_space<vmem>>, vector<2x3xf32>
    tpu.vector_store %arg23[%c0_86, %c0_87], %200 {strides = array<i32>} : memref<2x3xf32, #tpu.memory_space<vmem>>, vector<2x3xf32>,
    return
  }
  func.func @transform_0(%arg0: i32) -> (i32, i32) {
    %c0_i32 = arith.constant 0 : i32
    %c0_i32_0 = arith.constant 0 : i32
    %c0_i32_1 = arith.constant 0 : i32
    return %c0_i32, %c0_i32_0 : i32, i32
  }
  func.func @transform_1(%arg0: i32) -> (i32, i32) {
    %c0_i32 = arith.constant 0 : i32
    %c0_i32_0 = arith.constant 0 : i32
    %c0_i32_1 = arith.constant 0 : i32
    return %c0_i32, %c0_i32_0 : i32, i32
  }
  func.func @transform_2(%arg0: i32) -> (i32, i32) {
    %c0_i32 = arith.constant 0 : i32
    %c0_i32_0 = arith.constant 0 : i32
    %c0_i32_1 = arith.constant 0 : i32
    return %c0_i32, %c0_i32_0 : i32, i32
  }
  func.func @transform_3(%arg0: i32) -> (i32, i32) {
    %c0_i32 = arith.constant 0 : i32
    %c0_i32_0 = arith.constant 0 : i32
    %c0_i32_1 = arith.constant 0 : i32
    return %c0_i32, %c0_i32_0 : i32, i32
  }
  func.func @transform_4(%arg0: i32) -> (i32, i32) {
    %c0_i32 = arith.constant 0 : i32
    %c0_i32_0 = arith.constant 0 : i32
    %c0_i32_1 = arith.constant 0 : i32
    return %c0_i32, %c0_i32_0 : i32, i32
  }
  func.func @transform_5(%arg0: i32) -> (i32, i32) {
    %c0_i32 = arith.constant 0 : i32
    %c0_i32_0 = arith.constant 0 : i32
    %c0_i32_1 = arith.constant 0 : i32
    return %c0_i32, %c0_i32_0 : i32, i32
  }
  func.func @transform_6(%arg0: i32) -> (i32, i32) {
    %c0_i32 = arith.constant 0 : i32
    %c0_i32_0 = arith.constant 0 : i32
    %c0_i32_1 = arith.constant 0 : i32
    return %c0_i32, %c0_i32_0 : i32, i32
  }
  func.func @transform_7(%arg0: i32) -> (i32, i32) {
    %c0_i32 = arith.constant 0 : i32
    %c0_i32_0 = arith.constant 0 : i32
    %c0_i32_1 = arith.constant 0 : i32
    return %c0_i32, %c0_i32_0 : i32, i32
  }
  func.func @transform_8(%arg0: i32) -> (i32, i32) {
    %c0_i32 = arith.constant 0 : i32
    %c0_i32_0 = arith.constant 0 : i32
    %c0_i32_1 = arith.constant 0 : i32
    return %c0_i32, %c0_i32_0 : i32, i32
  }
  func.func @transform_9(%arg0: i32) -> (i32, i32) {
    %c0_i32 = arith.constant 0 : i32
    %c0_i32_0 = arith.constant 0 : i32
    %c0_i32_1 = arith.constant 0 : i32
    return %c0_i32, %c0_i32_0 : i32, i32
  }
  func.func @transform_10(%arg0: i32) -> (i32, i32) {
    %c0_i32 = arith.constant 0 : i32
    %c0_i32_0 = arith.constant 0 : i32
    %c0_i32_1 = arith.constant 0 : i32
    return %c0_i32, %c0_i32_0 : i32, i32
  }
  func.func @transform_11(%arg0: i32) -> (i32, i32) {
    %c0_i32 = arith.constant 0 : i32
    %c0_i32_0 = arith.constant 0 : i32
    %c0_i32_1 = arith.constant 0 : i32
    return %c0_i32, %c0_i32_0 : i32, i32
  }
  func.func @transform_12(%arg0: i32) -> (i32, i32) {
    %c0_i32 = arith.constant 0 : i32
    %c0_i32_0 = arith.constant 0 : i32
    %c0_i32_1 = arith.constant 0 : i32
    return %c0_i32, %c0_i32_0 : i32, i32
  }
  func.func @transform_13(%arg0: i32) -> (i32, i32) {
    %c0_i32 = arith.constant 0 : i32
    %c0_i32_0 = arith.constant 0 : i32
    %c0_i32_1 = arith.constant 0 : i32
    return %c0_i32, %c0_i32_0 : i32, i32
  }
  func.func @transform_14(%arg0: i32) -> (i32, i32) {
    %c0_i32 = arith.constant 0 : i32
    %c0_i32_0 = arith.constant 0 : i32
    %c0_i32_1 = arith.constant 0 : i32
    return %c0_i32, %c0_i32_0 : i32, i32
  }
  func.func @transform_15(%arg0: i32) -> (i32, i32) {
    %c0_i32 = arith.constant 0 : i32
    %c0_i32_0 = arith.constant 0 : i32
    %c0_i32_1 = arith.constant 0 : i32
    return %c0_i32, %c0_i32_0 : i32, i32
  }
  func.func @transform_16(%arg0: i32) -> (i32, i32) {
    %c0_i32 = arith.constant 0 : i32
    %c0_i32_0 = arith.constant 0 : i32
    %c0_i32_1 = arith.constant 0 : i32
    return %c0_i32, %c0_i32_0 : i32, i32
  }
  func.func @transform_17(%arg0: i32) -> (i32, i32) {
    %c0_i32 = arith.constant 0 : i32
    %c0_i32_0 = arith.constant 0 : i32
    %c0_i32_1 = arith.constant 0 : i32
    return %c0_i32, %c0_i32_0 : i32, i32
  }
  func.func @transform_18(%arg0: i32) -> (i32, i32) {
    %c0_i32 = arith.constant 0 : i32
    %c0_i32_0 = arith.constant 0 : i32
    %c0_i32_1 = arith.constant 0 : i32
    return %c0_i32, %c0_i32_0 : i32, i32
  }
  func.func @transform_19(%arg0: i32) -> (i32, i32) {
    %c0_i32 = arith.constant 0 : i32
    %c0_i32_0 = arith.constant 0 : i32
    %c0_i32_1 = arith.constant 0 : i32
    return %c0_i32, %c0_i32_0 : i32, i32
  }
  func.func @transform_20(%arg0: i32) -> (i32, i32) {
    %c0_i32 = arith.constant 0 : i32
    %c0_i32_0 = arith.constant 0 : i32
    %c0_i32_1 = arith.constant 0 : i32
    return %c0_i32, %c0_i32_0 : i32, i32
  }
  func.func @transform_21(%arg0: i32) -> (i32, i32) {
    %c0_i32 = arith.constant 0 : i32
    %c0_i32_0 = arith.constant 0 : i32
    %c0_i32_1 = arith.constant 0 : i32
    return %c0_i32, %c0_i32_0 : i32, i32
  }
  func.func @transform_22(%arg0: i32) -> (i32, i32) {
    %c0_i32 = arith.constant 0 : i32
    %c0_i32_0 = arith.constant 0 : i32
    %c0_i32_1 = arith.constant 0 : i32
    return %c0_i32, %c0_i32_0 : i32, i32
  }
  func.func @transform_23(%arg0: i32) -> (i32, i32, i32) {
    %c0_i32 = arith.constant 0 : i32
    %c0_i32_0 = arith.constant 0 : i32
    %c0_i32_1 = arith.constant 0 : i32
    %c0_i32_2 = arith.constant 0 : i32
    return %c0_i32, %c0_i32_0, %c0_i32_1 : i32, i32, i32
  }
  func.func @transform_24(%arg0: i32) -> (i32, i32) {
    %c0_i32 = arith.constant 0 : i32
    %c0_i32_0 = arith.constant 0 : i32
    %c0_i32_1 = arith.constant 0 : i32
    return %c0_i32, %c0_i32_0 : i32, i32
  }
}

</mosaic_0001>

<bundles_post_ra>
// kernel: tpu_custom_call.1
= control target key start
LH: loop header
LB: loop body
LE: loop exit
PB: predicated region body
PF: predicated region fallthrough
CT: control target
= control target key end

     0   :  { %s14963_s0 = inlined_call_operand.vmem [shape: f32[128,32], index: 0, kind: input, shape index: {}]   ;;  %s14964_s1 = inlined_call_operand.vmem [shape: f32[8,16], index: 1, kind: input, shape index: {}]   ;;  %s14965_s2 = inlined_call_operand.vmem [shape: f32[1,32], index: 2, kind: input, shape index: {}]   ;;  %s14966_s3 = inlined_call_operand.vmem [shape: f32[1,32], index: 3, kind: input, shape index: {}]   ;;  %s14967_s4 = inlined_call_operand.vmem [shape: f32[32,96], index: 4, kind: input, shape index: {}]   ;;  %s14968_s5 = inlined_call_operand.vmem [shape: f32[1,96], index: 5, kind: input, shape index: {}]   ;;  %s14969_s6 = inlined_call_operand.vmem [shape: f32[32,32], index: 6, kind: input, shape index: {}]   ;;  %s14970_s7 = inlined_call_operand.vmem [shape: f32[1,32], index: 7, kind: input, shape index: {}]   ;;  %s14971_s8 = inlined_call_operand.vmem [shape: f32[1,32], index: 8, kind: input, shape index: {}]   ;;  %s14972_s9 = inlined_call_operand.vmem [shape: f32[1,32], index: 9, kind: input, shape index: {}]   ;;  %s14973_s10 = inlined_call_operand.vmem [shape: f32[32,64], index: 10, kind: input, shape index: {}]   ;;  %s14974_s11 = inlined_call_operand.vmem [shape: f32[1,64], index: 11, kind: input, shape index: {}]   ;;  %s14975_s12 = inlined_call_operand.vmem [shape: f32[64,32], index: 12, kind: input, shape index: {}]   ;;  %s14976_s13 = inlined_call_operand.vmem [shape: f32[1,32], index: 13, kind: input, shape index: {}]   ;;  %s14977_s14 = inlined_call_operand.vmem [shape: f32[1,32], index: 14, kind: input, shape index: {}]   ;;  %s14978_s15 = inlined_call_operand.vmem [shape: f32[1,32], index: 15, kind: input, shape index: {}]   ;;  %s14979_s16 = inlined_call_operand.vmem [shape: f32[1,32], index: 16, kind: input, shape index: {}]   ;;  %s14980_s17 = inlined_call_operand.<no memory space> [shape: f32[1,1], index: 17, kind: input, shape index: {}]   ;;  %s14981_s18 = inlined_call_operand.vmem [shape: f32[32,32], index: 18, kind: input, shape index: {}]   ;;  %s14982_s19 = inlined_call_operand.vmem [shape: f32[1,32], index: 19, kind: input, shape index: {}]   ;;  %s14983_s20 = inlined_call_operand.vmem [shape: f32[32,3], index: 20, kind: input, shape index: {}]   ;;  %s14984_s21 = inlined_call_operand.vmem [shape: f32[1,3], index: 21, kind: input, shape index: {}]   ;;  %s14985_s22 = inlined_call_operand.hbm [shape: f32[2,3], index: 22, kind: output, shape index: {0}]   ;;  %s14986_s23 = inlined_call_operand.vmem [shape: f32[32,16,16], index: 23, kind: output, shape index: {1}]   ;;  %s14987_s24 = inlined_call_operand.hbm [shape: f32[2,4], index: 24, kind: output, shape index: {2}]  }
   0x1   :  { %15119 = sst [smem:[#allocation102_spill]] %s14963_s0  ;;  %v30_v0 = vstv %s14980_s17 }
   0x2   :  { %15120 = sst [smem:[#allocation103_spill]] %s14964_s1  ;;  %31 = vst [vmem:[#allocation2] sm:$0x1] %v30_v0 }
   0x3   :  { %15121 = sst [smem:[#allocation104_spill]] %s14965_s2 }
   0x4   :  { %15122 = sst [smem:[#allocation105_spill]] %s14966_s3 }
   0x5   :  { %15123 = sst [smem:[#allocation106_spill]] %s14967_s4 }
   0x6   :  { %15124 = sst [smem:[#allocation107_spill]] %s14968_s5 }
   0x7   :  { %15125 = sst [smem:[#allocation108_spill]] %s14969_s6 }
   0x8   :  { %15126 = sst [smem:[#allocation109_spill]] %s14970_s7 }
   0x9   :  { %15127 = sst [smem:[#allocation110_spill]] %s14971_s8 }
   0xa   :  { %32 = vsyncpa [#allocation4], 0  ;;  %s15128_s6 = sld [smem:[#allocation102_spill]]  ;;  %vm97_vm0 = vcmask 261120  }
  0x10   :  { %v78_v1 = vld [vmem:[%s15128_s6] sm:$0xff]  ;;  %v80_v2 = vld [vmem:[%s15128_s6 + $0x10] sm:$0xff]  ;;  %v79_v3 = vld [vmem:[%s15128_s6 + $0x8] sm:$0xff] }
  0x11   :  { %v98_v4 = vsel %vm97_vm0, %v78_v1, 0.0  ;;  %v104_v5 = vsel %vm97_vm0, %v80_v2, 0.0  ;;  %v81_v6 = vld [vmem:[%s15128_s6 + $0x18] sm:$0xff]  ;;  %v101_v7 = vsel %vm97_vm0, %v79_v3, 0.0  ;;  %v82_v9 = vld [vmem:[%s15128_s6 + $0x20] sm:$0xff]  ;;  %v83_v10 = vld [vmem:[%s15128_s6 + $0x28] sm:$0xff] }
  0x12   :  { %99 = vadd.xlane.f32.xlu0 %v98_v4  ;;  %105 = vadd.xlane.f32.xlu1 %v104_v5  ;;  %v107_v8 = vsel %vm97_vm0, %v81_v6, 0.0 }
  0x13   :  { %33 = vsyncpa [#allocation6], 0  ;;  %v110_v11 = vsel %vm97_vm0, %v82_v9, 0.0  ;;  %v113_v12 = vsel %vm97_vm0, %v83_v10, 0.0  ;;  %v11244_v13 = vld [vmem:[%s15128_s6 + $0x30] sm:$0xff]  ;;  %v11249_v14 = vld [vmem:[%s15128_s6 + $0x38] sm:$0xff] }
  0x14   :  { %v116_v15 = vsel %vm97_vm0, %v11244_v13, 0.0  ;;  %v119_v16 = vsel %vm97_vm0, %v11249_v14, 0.0  ;;  %v11258_v17 = vld [vmem:[%s15128_s6 + $0x40] sm:$0xff]  ;;  %v11263_v18 = vld [vmem:[%s15128_s6 + $0x48] sm:$0xff]  ;;  %v11272_v21 = vld [vmem:[%s15128_s6 + $0x50] sm:$0xff]  ;;  %s15129_s29 = sld [smem:[#allocation106_spill]] }
  0x15   :  { %v122_v19 = vsel %vm97_vm0, %v11258_v17, 0.0  ;;  %v125_v20 = vsel %vm97_vm0, %v11263_v18, 0.0  ;;  %v11277_v22 = vld [vmem:[%s15128_s6 + $0x58] sm:$0xff]  ;;  %v128_v23 = vsel %vm97_vm0, %v11272_v21, 0.0  ;;  %v11286_v25 = vld [vmem:[%s15128_s6 + $0x60] sm:$0xff]  ;;  %v11291_v26 = vld [vmem:[%s15128_s6 + $0x68] sm:$0xff] }
  0x16   :  { %102 = vadd.xlane.f32.xlu0 %v101_v7  ;;  %108 = vadd.xlane.f32.xlu1 %v107_v8  ;;  %v131_v24 = vsel %vm97_vm0, %v11277_v22, 0.0  ;;  %v134_v27 = vsel %vm97_vm0, %v11286_v25, 0.0  ;;  %v137_v28 = vsel %vm97_vm0, %v11291_v26, 0.0  ;;  %v11300_v29 = vld [vmem:[%s15128_s6 + $0x70] sm:$0xff]  ;;  %v11305_v30 = vld [vmem:[%s15128_s6 + $0x78] sm:$0xff]  ;;  %s15130_s1 = sld [smem:[#allocation104_spill]] }
  0x17   :  { %v140_v31 = vsel %vm97_vm0, %v11300_v29, 0.0  ;;  %v143_v32 = vsel %vm97_vm0, %v11305_v30, 0.0  ;;  %s15131_s27 = sld [smem:[#allocation105_spill]]  ;;  %vm723_vm1 = vcmask 64512   ;;  %s11076_s0 = smov 120   ;;  %vm3672_vm2 = vcmask 130048  }
  0x18   :  { %s15148_s2 = sld [smem:[#allocation107_spill]]  ;;  %s11077_s7 = smov 64   ;;  %vm7449_vm3 = vcmask 195584   ;;  %vm8303_vm4 = vcmask 523264   ;;  %vm8996_vm5 = vcmask 1041409   ;;  %vm8999_vm6 = vcmask 1042434  }
  0x19   :  { %s11078_s17 = smov 112   ;;  %s11079_s30 = smov 104   ;;  %vm9002_vm7 = vcmask 1043459   ;;  %vm9012_vm8 = vcmask 257024   ;;  %vm9045_vm9 = vcmask 25600   ;;  %vm11086_vm10 = vmmov 0  }
  0x1a   :  { %111 = vadd.xlane.f32.xlu0 %v110_v11  ;;  %114 = vadd.xlane.f32.xlu1 %v113_v12  ;;  %s15184_s8 = sld [smem:[#allocation103_spill]] }
  0x1b   :  { %s15349_s5 = sld [smem:[#allocation108_spill]] }
  0x1c   :  { %s15367_s6 = sld [smem:[#allocation110_spill]] }
  0x1e   :  { %117 = vadd.xlane.f32.xlu0 %v116_v15  ;;  %120 = vadd.xlane.f32.xlu1 %v119_v16 }
  0x22   :  { %123 = vadd.xlane.f32.xlu0 %v122_v19  ;;  %126 = vadd.xlane.f32.xlu1 %v125_v20 }
  0x26   :  { %129 = vadd.xlane.f32.xlu0 %v128_v23  ;;  %132 = vadd.xlane.f32.xlu1 %v131_v24 }
  0x2a   :  { %135 = vadd.xlane.f32.xlu0 %v134_v27  ;;  %138 = vadd.xlane.f32.xlu1 %v137_v28 }
  0x2e   :  { %141 = vadd.xlane.f32.xlu0 %v140_v31  ;;  %144 = vadd.xlane.f32.xlu1 %v143_v32 }
  0x9b   :  { %v100_v33 = vpop.xlane.xlu0 %99  ;;  %v106_v34 = vpop.xlane.xlu1 %105 }
  0x9c   :  { %v147_v35 = vmul.f32 0.03125, %v100_v33  ;;  %v149_v36 = vmul.f32 0.03125, %v106_v34 }
  0x9e   :  { %v11311_v37 = vsub.f32 %v78_v1, %v147_v35  ;;  %v11313_v38 = vsub.f32 %v80_v2, %v149_v36 }
  0x9f   :  { %v103_v39 = vpop.xlane.xlu0 %102  ;;  %v109_v40 = vpop.xlane.xlu1 %108 }
  0xa0   :  { %v148_v41 = vmul.f32 0.03125, %v103_v39  ;;  %v150_v42 = vmul.f32 0.03125, %v109_v40  ;;  %v179_v43 = vmul.f32 %v11311_v37, %v11311_v37  ;;  %v181_v44 = vmul.f32 %v11313_v38, %v11313_v38 }
  0xa2   :  { %v11319_v45 = vsub.f32 %v79_v3, %v148_v41  ;;  %v11321_v46 = vsub.f32 %v81_v6, %v150_v42  ;;  %v195_v47 = vsel %vm97_vm0, %v179_v43, 0.0  ;;  %v201_v50 = vsel %vm97_vm0, %v181_v44, 0.0 }
  0xa3   :  { %196 = vadd.xlane.f32.xlu0 %v195_v47  ;;  %v112_v48 = vpop.xlane.xlu0 %111  ;;  %v115_v49 = vpop.xlane.xlu1 %114 }
  0xa4   :  { %v151_v51 = vmul.f32 0.03125, %v112_v48  ;;  %v152_v52 = vmul.f32 0.03125, %v115_v49  ;;  %v180_v53 = vmul.f32 %v11319_v45, %v11319_v45  ;;  %v182_v54 = vmul.f32 %v11321_v46, %v11321_v46 }
  0xa6   :  { %v11329_v55 = vsub.f32 %v82_v9, %v151_v51  ;;  %v11331_v56 = vsub.f32 %v83_v10, %v152_v52  ;;  %v198_v57 = vsel %vm97_vm0, %v180_v53, 0.0  ;;  %v204_v60 = vsel %vm97_vm0, %v182_v54, 0.0  ;;  %v353_v54 = vld [vmem:[%s15129_s29 + $0x10] sm:$0xff] }
  0xa7   :  { %202 = vadd.xlane.f32.xlu0 %v201_v50  ;;  %199 = vadd.xlane.f32.xlu1 %v198_v57  ;;  %v118_v58 = vpop.xlane.xlu0 %117  ;;  %v121_v59 = vpop.xlane.xlu1 %120  ;;  %v352_v57 = vld [vmem:[%s15129_s29 + $0x8] sm:$0xff] }
  0xa8   :  { %v153_v61 = vmul.f32 0.03125, %v118_v58  ;;  %v154_v62 = vmul.f32 0.03125, %v121_v59  ;;  %v183_v63 = vmul.f32 %v11329_v55, %v11329_v55  ;;  %v184_v0 = vmul.f32 %v11331_v56, %v11331_v56  ;;  %v351_v58 = vld [vmem:[%s15129_s29] sm:$0xff] }
  0xaa   :  { %v11340_v1 = vsub.f32 %v11244_v13, %v153_v61  ;;  %v11343_v2 = vsub.f32 %v11249_v14, %v154_v62  ;;  %v207_v3 = vsel %vm97_vm0, %v183_v63, 0.0  ;;  %v210_v6 = vsel %vm97_vm0, %v184_v0, 0.0 }
  0xab   :  { %205 = vadd.xlane.f32.xlu1 %v204_v60  ;;  %208 = vadd.xlane.f32.xlu0 %v207_v3  ;;  %v124_v4 = vpop.xlane.xlu0 %123  ;;  %v127_v5 = vpop.xlane.xlu1 %126 }
  0xac   :  { %v155_v7 = vmul.f32 0.03125, %v124_v4  ;;  %v156_v8 = vmul.f32 0.03125, %v127_v5  ;;  %v185_v9 = vmul.f32 %v11340_v1, %v11340_v1  ;;  %v186_v10 = vmul.f32 %v11343_v2, %v11343_v2 }
  0xae   :  { %v11352_v11 = vsub.f32 %v11258_v17, %v155_v7  ;;  %v11355_v12 = vsub.f32 %v11263_v18, %v156_v8  ;;  %v213_v13 = vsel %vm97_vm0, %v185_v9, 0.0  ;;  %v216_v16 = vsel %vm97_vm0, %v186_v10, 0.0 }
  0xaf   :  { %211 = vadd.xlane.f32.xlu1 %v210_v6  ;;  %214 = vadd.xlane.f32.xlu0 %v213_v13  ;;  %v130_v14 = vpop.xlane.xlu0 %129  ;;  %v133_v15 = vpop.xlane.xlu1 %132 }
  0xb0   :  { %v157_v19 = vmul.f32 0.03125, %v130_v14  ;;  %v158_v20 = vmul.f32 0.03125, %v133_v15  ;;  %v187_v23 = vmul.f32 %v11352_v11, %v11352_v11  ;;  %v188_v17 = vmul.f32 %v11355_v12, %v11355_v12 }
  0xb2   :  { %v11364_v24 = vsub.f32 %v11272_v21, %v157_v19  ;;  %v11367_v18 = vsub.f32 %v11277_v22, %v158_v20  ;;  %v219_v27 = vsel %vm97_vm0, %v187_v23, 0.0  ;;  %v222_v32 = vsel %vm97_vm0, %v188_v17, 0.0 }
  0xb3   :  { %217 = vadd.xlane.f32.xlu1 %v216_v16  ;;  %220 = vadd.xlane.f32.xlu0 %v219_v27  ;;  %v136_v28 = vpop.xlane.xlu0 %135  ;;  %v139_v31 = vpop.xlane.xlu1 %138 }
  0xb4   :  { %v159_v33 = vmul.f32 0.03125, %v136_v28  ;;  %v160_v34 = vmul.f32 0.03125, %v139_v31  ;;  %v189_v35 = vmul.f32 %v11364_v24, %v11364_v24  ;;  %v190_v21 = vmul.f32 %v11367_v18, %v11367_v18 }
  0xb6   :  { %v11376_v36 = vsub.f32 %v11286_v25, %v159_v33  ;;  %v11379_v22 = vsub.f32 %v11291_v26, %v160_v34  ;;  %v225_v39 = vsel %vm97_vm0, %v189_v35, 0.0  ;;  %v228_v42 = vsel %vm97_vm0, %v190_v21, 0.0  ;;  %v11416_v33 = vld [vmem:[%s15130_s1] ss:$0 sm:$0xff] }
  0xb7   :  { %223 = vadd.xlane.f32.xlu1 %v222_v32  ;;  %226 = vadd.xlane.f32.xlu0 %v225_v39  ;;  %v142_v40 = vpop.xlane.xlu0 %141  ;;  %v145_v41 = vpop.xlane.xlu1 %144 }
  0xb8   :  { %v161_v43 = vmul.f32 0.03125, %v142_v40  ;;  %v162_v44 = vmul.f32 0.03125, %v145_v41  ;;  %v191_v47 = vmul.f32 %v11376_v36, %v11376_v36  ;;  %v192_v25 = vmul.f32 %v11379_v22, %v11379_v22  ;;  %v11422_v41 = vld [vmem:[%s15131_s27] ss:$0 sm:$0xff] }
  0xba   :  { %v11388_v48 = vsub.f32 %v11300_v29, %v161_v43  ;;  %v11391_v26 = vsub.f32 %v11305_v30, %v162_v44  ;;  %v231_v49 = vsel %vm97_vm0, %v191_v47, 0.0  ;;  %v234_v50 = vsel %vm97_vm0, %v192_v25, 0.0  ;;  %v354_v30 = vld [vmem:[%s15129_s29 + $0x18] sm:$0xff]  ;;  %s11075_s29 = smov 96  }
  0xbb   :  { %229 = vadd.xlane.f32.xlu1 %v228_v42  ;;  %232 = vadd.xlane.f32.xlu0 %v231_v49 }
  0xbc   :  { %v193_v51 = vmul.f32 %v11388_v48, %v11388_v48  ;;  %v194_v52 = vmul.f32 %v11391_v26, %v11391_v26  ;;  %10006 = vmatprep.subr.mxu0 %v354_v30  ;;  %10612 = vmatprep.subr.mxu1 %v354_v30 }
  0xbd   :  { %10007 = vmatpush3.msra.mxu0 %v354_v30  ;;  %10616 = vmatpush3.msra.mxu1 %v354_v30 }
  0xbe   :  { %v237_v53 = vsel %vm97_vm0, %v193_v51, 0.0  ;;  %v240_v29 = vsel %vm97_vm0, %v194_v52, 0.0  ;;  %10008 = vmatprep.subr.mxu0 %v353_v54  ;;  %10613 = vmatprep.subr.mxu1 %v353_v54 }
  0xbf   :  { %235 = vadd.xlane.f32.xlu1 %v234_v50  ;;  %238 = vadd.xlane.f32.xlu0 %v237_v53 }
  0xc0   :  { %10009 = vmatpush3.msra.mxu0 %v353_v54  ;;  %10617 = vmatpush3.msra.mxu1 %v353_v54 }
  0xc1   :  { %10010 = vmatprep.subr.mxu0 %v352_v57  ;;  %10614 = vmatprep.subr.mxu1 %v352_v57 }
  0xc2   :  { %10011 = vmatpush3.msra.mxu0 %v352_v57  ;;  %10618 = vmatpush3.msra.mxu1 %v352_v57 }
  0xc3   :  { %241 = vadd.xlane.f32.xlu1 %v240_v29  ;;  %10012 = vmatprep.subr.mxu0 %v351_v58 }
  0xc4   :  { %10013 = vmatpush3.msra.mxu0 %v351_v58  ;;  %10615 = vmatprep.subr.mxu1 %v351_v58 }
  0xc5   :  { %10619 = vmatpush3.msra.mxu1 %v351_v58 }
 0x12c   :  { %v197_v59 = vpop.xlane.xlu0 %196 }
 0x12d   :  { %v243_v60 = vmul.f32 0.03125, %v197_v59 }
 0x12f   :  { %v259_v61 = vadd.f32 1e-12, %v243_v60 }
 0x130   :  { %v200_v62 = vpop.xlane.xlu1 %199  ;;  %v203_v63 = vpop.xlane.xlu0 %202 }
 0x131   :  { %10636 = vrsqrt.f32 %v259_v61  ;;  %v244_v0 = vmul.f32 0.03125, %v200_v62  ;;  %v245_v3 = vmul.f32 0.03125, %v203_v63 }
 0x133   :  { %v260_v4 = vadd.f32 1e-12, %v244_v0  ;;  %v261_v5 = vadd.f32 1e-12, %v245_v3 }
 0x134   :  { %v206_v6 = vpop.xlane.xlu1 %205  ;;  %v209_v7 = vpop.xlane.xlu0 %208 }
 0x135   :  { %10638 = vrsqrt.f32 %v260_v4  ;;  %v246_v8 = vmul.f32 0.03125, %v206_v6  ;;  %v247_v9 = vmul.f32 0.03125, %v209_v7 }
 0x136   :  { %10640 = vrsqrt.f32 %v261_v5 }
 0x137   :  { %v262_v10 = vadd.f32 1e-12, %v246_v8  ;;  %v263_v13 = vadd.f32 1e-12, %v247_v9 }
 0x138   :  { %v212_v14 = vpop.xlane.xlu1 %211  ;;  %v215_v15 = vpop.xlane.xlu0 %214 }
 0x139   :  { %10642 = vrsqrt.f32 %v262_v10  ;;  %v248_v16 = vmul.f32 0.03125, %v212_v14  ;;  %v249_v19 = vmul.f32 0.03125, %v215_v15 }
 0x13a   :  { %10644 = vrsqrt.f32 %v263_v13 }
 0x13b   :  { %v264_v20 = vadd.f32 1e-12, %v248_v16  ;;  %v265_v23 = vadd.f32 1e-12, %v249_v19 }
 0x13c   :  { %v218_v17 = vpop.xlane.xlu1 %217  ;;  %v221_v27 = vpop.xlane.xlu0 %220 }
 0x13d   :  { %10646 = vrsqrt.f32 %v264_v20  ;;  %v250_v28 = vmul.f32 0.03125, %v218_v17  ;;  %v251_v31 = vmul.f32 0.03125, %v221_v27 }
 0x13e   :  { %v10637_v32 = vpop.eup %10636  ;;  %10648 = vrsqrt.f32 %v265_v23 }
 0x13f   :  { %v266_v34 = vadd.f32 1e-12, %v250_v28  ;;  %v267_v35 = vadd.f32 1e-12, %v251_v31  ;;  %v291_v21 = vmul.f32 %v10637_v32, %v11311_v37 }
 0x140   :  { %v224_v39 = vpop.xlane.xlu1 %223  ;;  %v227_v40 = vpop.xlane.xlu0 %226 }
 0x141   :  { %10650 = vrsqrt.f32 %v266_v34  ;;  %v252_v42 = vmul.f32 0.03125, %v224_v39  ;;  %v253_v43 = vmul.f32 0.03125, %v227_v40  ;;  %v313_v44 = vmul.f32 %v11416_v33, %v291_v21 }
 0x142   :  { %v10639_v47 = vpop.eup %10638  ;;  %10652 = vrsqrt.f32 %v267_v35 }
 0x143   :  { %v10641_v25 = vpop.eup %10640  ;;  %v268_v49 = vadd.f32 1e-12, %v252_v42  ;;  %v269_v50 = vadd.f32 1e-12, %v253_v43  ;;  %v11426_v51 = vadd.f32 %v11422_v41, %v313_v44  ;;  %v292_v37 = vmul.f32 %v10639_v47, %v11319_v45 }
 0x144   :  { %v230_v52 = vpop.xlane.xlu1 %229  ;;  %v233_v53 = vpop.xlane.xlu0 %232  ;;  %v293_v29 = vmul.f32 %v10641_v25, %v11313_v38 }
 0x145   :  { %15132 = vst [vmem:[#allocation9_spill] sm:$0xff] %v11426_v51  ;;  %10654 = vrsqrt.f32 %v268_v49  ;;  %v254_v30 = vmul.f32 0.03125, %v230_v52  ;;  %v255_v54 = vmul.f32 0.03125, %v233_v53  ;;  %10014 = vmatprep.mubr.msk.f32.mxu0 %vm97_vm0, %v11426_v51  ;;  %v314_v57 = vmul.f32 %v11416_v33, %v292_v37 }
 0x146   :  { %v10643_v58 = vpop.eup %10642  ;;  %10656 = vrsqrt.f32 %v269_v50  ;;  %v315_v59 = vmul.f32 %v11416_v33, %v293_v29 }
 0x147   :  { %v10645_v60 = vpop.eup %10644  ;;  %v270_v61 = vadd.f32 1e-12, %v254_v30  ;;  %v271_v62 = vadd.f32 1e-12, %v255_v54  ;;  %v11435_v45 = vadd.f32 %v11422_v41, %v314_v57  ;;  %v294_v38 = vmul.f32 %v10643_v58, %v11321_v46 }
 0x148   :  { %v236_v63 = vpop.xlane.xlu1 %235  ;;  %v239_v0 = vpop.xlane.xlu0 %238  ;;  %v11439_v3 = vadd.f32 %v11422_v41, %v315_v59  ;;  %v295_v4 = vmul.f32 %v10645_v60, %v11329_v55 }
 0x149   :  { %15133 = vst [vmem:[#allocation10_spill] sm:$0xff] %v11435_v45  ;;  %10658 = vrsqrt.f32 %v270_v61  ;;  %v256_v5 = vmul.f32 0.03125, %v236_v63  ;;  %v257_v6 = vmul.f32 0.03125, %v239_v0  ;;  %10015 = vmatmul.mubr.msk.f32.vlgmr.msra.gmra.mxu0 %vm97_vm0, %v11435_v45  ;;  %v316_v7 = vmul.f32 %v11416_v33, %v294_v38 }
 0x14a   :  { %15134 = vst [vmem:[#allocation11_spill] sm:$0xff] %v11439_v3  ;;  %v10647_v8 = vpop.eup %10646  ;;  %10660 = vrsqrt.f32 %v271_v62  ;;  %10017 = vmatprep.mubr.msk.f32.mxu0 %vm97_vm0, %v11439_v3  ;;  %v317_v46 = vmul.f32 %v11416_v33, %v295_v4 }
 0x14b   :  { %v10649_v9 = vpop.eup %10648  ;;  %v272_v10 = vadd.f32 1e-12, %v256_v5  ;;  %v273_v13 = vadd.f32 1e-12, %v257_v6  ;;  %v11449_v55 = vadd.f32 %v11422_v41, %v316_v7  ;;  %v296_v14 = vmul.f32 %v10647_v8, %v11331_v56 }
 0x14c   :  { %v242_v15 = vpop.xlane.xlu1 %241  ;;  %v11453_v16 = vadd.f32 %v11422_v41, %v317_v46  ;;  %v297_v19 = vmul.f32 %v10649_v9, %v11340_v1 }
 0x14d   :  { %15135 = vst [vmem:[#allocation12_spill] sm:$0xff] %v11449_v55  ;;  %10662 = vrsqrt.f32 %v272_v10  ;;  %v258_v20 = vmul.f32 0.03125, %v242_v15  ;;  %10018 = vmatmul.mubr.msk.f32.gmra.mxu0 %vm97_vm0, %v11449_v55  ;;  %v318_v23 = vmul.f32 %v11416_v33, %v296_v14 }
 0x14e   :  { %15136 = vst [vmem:[#allocation13_spill] sm:$0xff] %v11453_v16  ;;  %v10651_v17 = vpop.eup %10650  ;;  %10664 = vrsqrt.f32 %v273_v13  ;;  %10020 = vmatprep.mubr.msk.f32.mxu0 %vm97_vm0, %v11453_v16  ;;  %v319_v56 = vmul.f32 %v11416_v33, %v297_v19 }
 0x14f   :  { %v10653_v27 = vpop.eup %10652  ;;  %v274_v28 = vadd.f32 1e-12, %v258_v20  ;;  %v11463_v31 = vadd.f32 %v11422_v41, %v318_v23  ;;  %v298_v1 = vmul.f32 %v10651_v17, %v11343_v2 }
 0x150   :  { %v11467_v32 = vadd.f32 %v11422_v41, %v319_v56  ;;  %v299_v34 = vmul.f32 %v10653_v27, %v11352_v11 }
 0x151   :  { %15137 = vst [vmem:[#allocation14_spill] sm:$0xff] %v11463_v31  ;;  %10666 = vrsqrt.f32 %v274_v28  ;;  %10021 = vmatmul.mubr.msk.f32.gmra.mxu0 %vm97_vm0, %v11463_v31  ;;  %v320_v35 = vmul.f32 %v11416_v33, %v298_v1 }
 0x152   :  { %15138 = vst [vmem:[#allocation15_spill] sm:$0xff] %v11467_v32  ;;  %v10655_v21 = vpop.eup %10654  ;;  %10023 = vmatprep.mubr.msk.f32.mxu0 %vm97_vm0, %v11467_v32  ;;  %v321_v39 = vmul.f32 %v11416_v33, %v299_v34 }
 0x153   :  { %v10657_v40 = vpop.eup %10656  ;;  %v11477_v2 = vadd.f32 %v11422_v41, %v320_v35  ;;  %v300_v42 = vmul.f32 %v10655_v21, %v11355_v12 }
 0x154   :  { %v11481_v11 = vadd.f32 %v11422_v41, %v321_v39  ;;  %v301_v43 = vmul.f32 %v10657_v40, %v11364_v24 }
 0x155   :  { %15139 = vst [vmem:[#allocation16_spill] sm:$0xff] %v11477_v2  ;;  %10024 = vmatmul.mubr.msk.f32.gmra.mxu0 %vm97_vm0, %v11477_v2  ;;  %v322_v44 = vmul.f32 %v11416_v33, %v300_v42 }
 0x156   :  { %15140 = vst [vmem:[#allocation17_spill] sm:$0xff] %v11481_v11  ;;  %v10659_v47 = vpop.eup %10658  ;;  %10026 = vmatprep.mubr.msk.f32.mxu0 %vm97_vm0, %v11481_v11  ;;  %v323_v25 = vmul.f32 %v11416_v33, %v301_v43 }
 0x157   :  { %v10661_v49 = vpop.eup %10660  ;;  %v11491_v50 = vadd.f32 %v11422_v41, %v322_v44  ;;  %v302_v12 = vmul.f32 %v10659_v47, %v11367_v18 }
 0x158   :  { %v11495_v37 = vadd.f32 %v11422_v41, %v323_v25  ;;  %v303_v24 = vmul.f32 %v10661_v49, %v11376_v36 }
 0x159   :  { %15141 = vst [vmem:[#allocation18_spill] sm:$0xff] %v11491_v50  ;;  %10027 = vmatmul.mubr.msk.f32.gmra.mxu0 %vm97_vm0, %v11491_v50  ;;  %v324_v52 = vmul.f32 %v11416_v33, %v302_v12 }
 0x15a   :  { %15142 = vst [vmem:[#allocation19_spill] sm:$0xff] %v11495_v37  ;;  %v10663_v53 = vpop.eup %10662  ;;  %10029 = vmatprep.mubr.msk.f32.mxu0 %vm97_vm0, %v11495_v37  ;;  %v325_v29 = vmul.f32 %v11416_v33, %v303_v24 }
 0x15b   :  { %v10665_v30 = vpop.eup %10664  ;;  %v11505_v54 = vadd.f32 %v11422_v41, %v324_v52  ;;  %v304_v18 = vmul.f32 %v10663_v53, %v11379_v22 }
 0x15c   :  { %v11509_v57 = vadd.f32 %v11422_v41, %v325_v29  ;;  %v305_v36 = vmul.f32 %v10665_v30, %v11388_v48 }
 0x15d   :  { %15143 = vst [vmem:[#allocation20_spill] sm:$0xff] %v11505_v54  ;;  %10030 = vmatmul.mubr.msk.f32.gmra.mxu0 %vm97_vm0, %v11505_v54  ;;  %v326_v58 = vmul.f32 %v11416_v33, %v304_v18 }
 0x15e   :  { %15144 = vst [vmem:[#allocation21_spill] sm:$0xff] %v11509_v57  ;;  %v10667_v59 = vpop.eup %10666  ;;  %10032 = vmatprep.mubr.msk.f32.mxu1 %vm97_vm0, %v11509_v57  ;;  %v327_v60 = vmul.f32 %v11416_v33, %v305_v36 }
 0x15f   :  { %v11519_v61 = vadd.f32 %v11422_v41, %v326_v58  ;;  %v306_v22 = vmul.f32 %v10667_v59, %v11391_v26  ;;  %v11538_v26 = vld [vmem:[%s15148_s2] ss:$0 sm:$0xff] }
 0x160   :  { %v11523_v62 = vadd.f32 %v11422_v41, %v327_v60 }
 0x161   :  { %15145 = vst [vmem:[#allocation22_spill] sm:$0xff] %v11519_v61  ;;  %10033 = vmatmul.mubr.msk.f32.vlgmr.msra.gmra.mxu1 %vm97_vm0, %v11519_v61  ;;  %v328_v48 = vmul.f32 %v11416_v33, %v306_v22 }
 0x162   :  { %15146 = vst [vmem:[#allocation23_spill] sm:$0xff] %v11523_v62  ;;  %10035 = vmatprep.mubr.msk.f32.mxu1 %vm97_vm0, %v11523_v62 }
 0x163   :  { %v11531_v38 = vadd.f32 %v11422_v41, %v328_v48 }
 0x165   :  { %15147 = vst [vmem:[#allocation24_spill] sm:$0xff] %v11531_v38  ;;  %10036 = vmatmul.mubr.msk.f32.gmra.mxu1 %vm97_vm0, %v11531_v38 }
 0x209   :  { %v10016_v63 = vpop.f32.mrf.mxu0 }
 0x20a   :  { %v11541_v0 = vadd.f32 %v10016_v63, %v11538_v26 }
 0x20b   :  { %v476_v4 = vpop.f32.mrf.mxu0 }
 0x20c   :  { %v477_v33 = vadd.f32 %v11538_v26, %v476_v4  ;;  %721 = vrot.lane.b32.xlu1 %v11541_v0, %s11075_s29  ;;  %573 = vrot.lane.b32.xlu0 %v11541_v0, %s11076_s0 }
 0x20d   :  { %v10019_v41 = vpop.f32.mrf.mxu0 }
 0x20e   :  { %10042 = vmatprep.mubr.msk.f32.mxu1 %vm723_vm1, %v477_v33  ;;  %v11601_v35 = vadd.f32 %v10019_v41, %v11538_v26 }
 0x20f   :  { %v486_v5 = vpop.f32.mrf.mxu0 }
 0x210   :  { %4443 = vrot.lane.b32.xlu0 %v11541_v0, %s11077_s7  ;;  %v487_v21 = vadd.f32 %v11538_v26, %v486_v5 }
 0x211   :  { %v10022_v6 = vpop.f32.mrf.mxu0 }
 0x212   :  { %v11552_v7 = vadd.f32 %v10022_v6, %v11538_v26 }
 0x213   :  { %v496_v8 = vpop.f32.mrf.mxu0 }
 0x214   :  { %v11555_v46 = vadd.f32 %v11538_v26, %v496_v8  ;;  %719 = vrot.lane.b32.xlu0 %v477_v33, %s11075_s29 }
 0x215   :  { %v10025_v9 = vpop.f32.mrf.mxu0 }
 0x216   :  { %v11559_v10 = vadd.f32 %v10025_v9, %v11538_v26 }
 0x217   :  { %v506_v13 = vpop.f32.mrf.mxu0 }
 0x218   :  { %v11562_v14 = vadd.f32 %v11538_v26, %v506_v13 }
 0x219   :  { %v10028_v15 = vpop.f32.mrf.mxu0 }
 0x21a   :  { %v11565_v19 = vadd.f32 %v10028_v15, %v11538_v26 }
 0x21b   :  { %v516_v20 = vpop.f32.mrf.mxu0 }
 0x21c   :  { %v11568_v23 = vadd.f32 %v11538_v26, %v516_v20 }
 0x21d   :  { %v10031_v25 = vpop.f32.mrf.mxu0 }
 0x21e   :  { %10070 = vmatprep.mubr.msk.f32.mxu0 %vm723_vm1, %v11568_v23  ;;  %v11699_v49 = vadd.f32 %v10031_v25, %v11538_v26 }
 0x21f   :  { %v526_v12 = vpop.f32.mrf.mxu0 }
 0x220   :  { %v11712_v52 = vadd.f32 %v11538_v26, %v526_v12 }
 0x221   :  { %v10034_v17 = vpop.f32.mrf.mxu1 }
 0x222   :  { %v11573_v56 = vadd.f32 %v10034_v17, %v11538_v26 }
 0x223   :  { %v536_v27 = vpop.f32.mrf.mxu1 }
 0x224   :  { %v11576_v28 = vadd.f32 %v11538_v26, %v536_v27  ;;  %597 = vrot.lane.b32.xlu1 %v11573_v56, %s11076_s0 }
 0x225   :  { %v10037_v1 = vpop.f32.mrf.mxu1 }
 0x226   :  { %1242 = vrot.lane.b32.xlu0 %v11576_v28, %s11075_s29  ;;  %v11594_v34 = vadd.f32 %v10037_v1, %v11538_v26 }
 0x227   :  { %v546_v39 = vpop.f32.mrf.mxu1 }
 0x228   :  { %605 = vrot.lane.b32.xlu1 %v11541_v0, %s11078_s17  ;;  %v11615_v40 = vadd.f32 %v11538_v26, %v546_v39 }
 0x22a   :  { %627 = vrot.lane.b32.xlu0 %v11576_v28, %s11078_s17 }
 0x22c   :  { %1244 = vrot.lane.b32.xlu1 %v11573_v56, %s11075_s29 }
 0x22e   :  { %635 = vrot.lane.b32.xlu0 %v477_v33, %s11079_s30 }
 0x230   :  { %629 = vrot.lane.b32.xlu1 %v11573_v56, %s11078_s17 }
 0x232   :  { %659 = vrot.lane.b32.xlu0 %v11576_v28, %s11079_s30 }
 0x234   :  { %637 = vrot.lane.b32.xlu1 %v11541_v0, %s11079_s30 }
 0x236   :  { %601 = vrot.lane.b32.xlu0 %v11594_v34, %s11076_s0 }
 0x238   :  { %661 = vrot.lane.b32.xlu1 %v11573_v56, %s11079_s30 }
 0x23a   :  { %609 = vrot.lane.b32.xlu0 %v11601_v35, %s11078_s17 }
 0x23c   :  { %571 = vrot.lane.b32.xlu1 %v477_v33, %s11076_s0 }
 0x23e   :  { %4530 = vrot.lane.b32.xlu0 %v11601_v35, %s11077_s7 }
 0x240   :  { %595 = vrot.lane.b32.xlu1 %v11576_v28, %s11076_s0 }
 0x242   :  { %807 = vrot.lane.b32.xlu0 %v487_v21, %s11075_s29 }
 0x244   :  { %603 = vrot.lane.b32.xlu1 %v477_v33, %s11078_s17 }
 0x246   :  { %599 = vrot.lane.b32.xlu0 %v11615_v40, %s11076_s0 }
 0x248   :  { %4441 = vrot.lane.b32.xlu1 %v477_v33, %s11077_s7 }
 0x24a   :  { %607 = vrot.lane.b32.xlu0 %v487_v21, %s11078_s17 }
 0x24c   :  { %577 = vrot.lane.b32.xlu1 %v11601_v35, %s11076_s0 }
 0x24e   :  { %1329 = vrot.lane.b32.xlu0 %v11615_v40, %s11075_s29 }
 0x250   :  { %809 = vrot.lane.b32.xlu1 %v11601_v35, %s11075_s29 }
 0x252   :  { %631 = vrot.lane.b32.xlu0 %v11615_v40, %s11078_s17 }
 0x254   :  { %1331 = vrot.lane.b32.xlu1 %v11594_v34, %s11075_s29 }
 0x256   :  { %639 = vrot.lane.b32.xlu0 %v487_v21, %s11079_s30 }
 0x258   :  { %633 = vrot.lane.b32.xlu1 %v11594_v34, %s11078_s17 }
 0x25a   :  { %663 = vrot.lane.b32.xlu0 %v11615_v40, %s11079_s30 }
 0x25c   :  { %641 = vrot.lane.b32.xlu1 %v11601_v35, %s11079_s30 }
 0x25e   :  { %581 = vrot.lane.b32.xlu0 %v11552_v7, %s11076_s0 }
 0x260   :  { %665 = vrot.lane.b32.xlu1 %v11594_v34, %s11079_s30 }
 0x262   :  { %894 = vrot.lane.b32.xlu0 %v11555_v46, %s11075_s29 }
 0x264   :  { %575 = vrot.lane.b32.xlu1 %v487_v21, %s11076_s0 }
 0x266   :  { %611 = vrot.lane.b32.xlu0 %v11555_v46, %s11078_s17 }
 0x268   :  { %4528 = vrot.lane.b32.xlu1 %v487_v21, %s11077_s7 }
 0x26a   :  { %643 = vrot.lane.b32.xlu0 %v11555_v46, %s11079_s30 }
 0x26c   :  { %896 = vrot.lane.b32.xlu1 %v11552_v7, %s11075_s29 }
 0x26e   :  { %585 = vrot.lane.b32.xlu0 %v11559_v10, %s11076_s0 }
 0x270   :  { %613 = vrot.lane.b32.xlu1 %v11552_v7, %s11078_s17 }
 0x272   :  { %4704 = vrot.lane.b32.xlu0 %v11559_v10, %s11077_s7 }
 0x274   :  { %645 = vrot.lane.b32.xlu1 %v11552_v7, %s11079_s30 }
 0x276   :  { %583 = vrot.lane.b32.xlu0 %v11562_v14, %s11076_s0 }
 0x278   :  { %4617 = vrot.lane.b32.xlu1 %v11552_v7, %s11077_s7 }
 0x27a   :  { %981 = vrot.lane.b32.xlu0 %v11562_v14, %s11075_s29 }
 0x27c   :  { %579 = vrot.lane.b32.xlu1 %v11555_v46, %s11076_s0 }
 0x27e   :  { %v722_v42 = vpop.permute.xlu1 %721  ;;  %615 = vrot.lane.b32.xlu0 %v11562_v14, %s11078_s17  ;;  %v11671_v43 = vpop.permute.xlu0 %573 }
 0x27f   :  { %10038 = vmatprep.subr.msk.mxu1 %vm723_vm1, %v722_v42 }
 0x280   :  { %10039 = vmatpush3.xpose.msk.msra.mxu1 %vm723_vm1, %v722_v42  ;;  %4615 = vrot.lane.b32.xlu1 %v11555_v46, %s11077_s7 }
 0x282   :  { %647 = vrot.lane.b32.xlu0 %v11562_v14, %s11079_s30  ;;  %v11679_v44 = vpop.permute.xlu0 %4443 }
 0x283   :  { %15149 = vst [vmem:[#allocation25_spill] sm:$0xff] %v11679_v44 }
 0x284   :  { %983 = vrot.lane.b32.xlu1 %v11559_v10, %s11075_s29 }
 0x286   :  { %1068 = vrot.lane.b32.xlu0 %v11568_v23, %s11075_s29  ;;  %v720_v47 = vpop.permute.xlu0 %719 }
 0x287   :  { %10040 = vmatprep.subr.msk.mxu1 %vm723_vm1, %v720_v47 }
 0x288   :  { %617 = vrot.lane.b32.xlu1 %v11559_v10, %s11078_s17  ;;  %10041 = vmatpush3.xpose.msk.msra.mxu1 %vm723_vm1, %v720_v47 }
 0x28a   :  { %619 = vrot.lane.b32.xlu0 %v11568_v23, %s11078_s17 }
 0x28b   :  { %10043 = vmatmul.mubr.msk.f32.vlgmr.msra.gmra.mxu1 %vm723_vm1, %v11541_v0 }
 0x28c   :  { %649 = vrot.lane.b32.xlu1 %v11559_v10, %s11079_s30  ;;  %10049 = vmatprep.mubr.msk.f32.mxu1 %vm723_vm1, %v487_v21 }
 0x28e   :  { %651 = vrot.lane.b32.xlu0 %v11568_v23, %s11079_s30 }
 0x290   :  { %4702 = vrot.lane.b32.xlu1 %v11562_v14, %s11077_s7 }
 0x292   :  { %593 = vrot.lane.b32.xlu0 %v11699_v49, %s11076_s0 }
 0x294   :  { %589 = vrot.lane.b32.xlu1 %v11565_v19, %s11076_s0 }
 0x296   :  { %v11707_v24 = vpop.permute.xlu1 %597  ;;  %4878 = vrot.lane.b32.xlu0 %v11699_v49, %s11077_s7 }
 0x298   :  { %1070 = vrot.lane.b32.xlu1 %v11565_v19, %s11075_s29  ;;  %v11716_v53 = vpop.permute.xlu0 %1242 }
 0x29a   :  { %v11718_v29 = vpop.permute.xlu1 %605  ;;  %591 = vrot.lane.b32.xlu0 %v11712_v52, %s11076_s0 }
 0x29c   :  { %621 = vrot.lane.b32.xlu1 %v11565_v19, %s11078_s17  ;;  %v11724_v30 = vpop.permute.xlu0 %627 }
 0x29e   :  { %v11726_v18 = vpop.permute.xlu1 %1244  ;;  %1155 = vrot.lane.b32.xlu0 %v11712_v52, %s11075_s29 }
 0x2a0   :  { %653 = vrot.lane.b32.xlu1 %v11565_v19, %s11079_s30  ;;  %v11732_v36 = vpop.permute.xlu0 %635 }
 0x2a1   :  { %15150 = vst [vmem:[#allocation26_spill] sm:$0xff] %v11732_v36 }
 0x2a2   :  { %v11734_v58 = vpop.permute.xlu1 %629  ;;  %623 = vrot.lane.b32.xlu0 %v11712_v52, %s11078_s17 }
 0x2a4   :  { %4791 = vrot.lane.b32.xlu1 %v11565_v19, %s11077_s7  ;;  %v11740_v59 = vpop.permute.xlu0 %659 }
 0x2a5   :  { %15151 = vst [vmem:[#allocation27_spill] sm:$0xff] %v11740_v59 }
 0x2a6   :  { %v11742_v60 = vpop.permute.xlu1 %637  ;;  %655 = vrot.lane.b32.xlu0 %v11712_v52, %s11079_s30 }
 0x2a7   :  { %15152 = vst [vmem:[#allocation28_spill] sm:$0xff] %v11742_v60 }
 0x2a8   :  { %587 = vrot.lane.b32.xlu1 %v11568_v23, %s11076_s0  ;;  %v11748_v22 = vpop.permute.xlu0 %601  ;;  %s11083_s0 = smov 24  }
 0x2aa   :  { %v11750_v48 = vpop.permute.xlu1 %661  ;;  %2636 = vrot.lane.b32.xlu0 %v11734_v58, %s11075_s29 }
 0x2ab   :  { %15153 = vst [vmem:[#allocation29_spill] sm:$0xff] %v11750_v48 }
 0x2ac   :  { %4789 = vrot.lane.b32.xlu1 %v11568_v23, %s11077_s7  ;;  %v11756_v26 = vpop.permute.xlu0 %609 }
 0x2ae   :  { %v11758_v63 = vpop.permute.xlu1 %571  ;;  %2810 = vrot.lane.b32.xlu0 %v11742_v60, %s11075_s29 }
 0x2b0   :  { %1157 = vrot.lane.b32.xlu1 %v11699_v49, %s11075_s29  ;;  %v11764_v0 = vpop.permute.xlu0 %4530 }
 0x2b1   :  { %15154 = vst [vmem:[#allocation30_spill] sm:$0xff] %v11764_v0 }
 0x2b2   :  { %v11766_v4 = vpop.permute.xlu1 %595  ;;  %3332 = vrot.lane.b32.xlu0 %v11750_v48, %s11075_s29 }
 0x2b4   :  { %625 = vrot.lane.b32.xlu1 %v11699_v49, %s11078_s17  ;;  %v808_v33 = vpop.permute.xlu0 %807 }
 0x2b6   :  { %v11772_v41 = vpop.permute.xlu1 %603  ;;  %1416 = vrot.lane.b32.xlu0 %v11758_v63, %s11075_s29 }
 0x2b8   :  { %657 = vrot.lane.b32.xlu1 %v11699_v49, %s11079_s30  ;;  %v11778_v5 = vpop.permute.xlu0 %599  ;;  %s15350_s30 = sld [smem:[#allocation109_spill]] }
 0x2ba   :  { %v11780_v6 = vpop.permute.xlu1 %4441  ;;  %1938 = vrot.lane.b32.xlu0 %v11766_v4, %s11075_s29 }
 0x2bb   :  { %15155 = vst [vmem:[#allocation31_spill] sm:$0xff] %v11780_v6 }
 0x2bc   :  { %1418 = vrot.lane.b32.xlu1 %v11671_v43, %s11075_s29  ;;  %v11786_v8 = vpop.permute.xlu0 %607 }
 0x2be   :  { %v11788_v9 = vpop.permute.xlu1 %577  ;;  %2112 = vrot.lane.b32.xlu0 %v11772_v41, %s11075_s29 }
 0x2c0   :  { %1940 = vrot.lane.b32.xlu1 %v11707_v24, %s11075_s29  ;;  %v11794_v13 = vpop.permute.xlu0 %1329 }
 0x2c2   :  { %v810_v15 = vpop.permute.xlu1 %809 }
 0x2c3   :  { %10045 = vmatprep.subr.msk.mxu1 %vm723_vm1, %v810_v15 }
 0x2c4   :  { %2114 = vrot.lane.b32.xlu1 %v11718_v29, %s11075_s29  ;;  %10046 = vmatpush3.xpose.msk.msra.mxu1 %vm723_vm1, %v810_v15  ;;  %v11800_v20 = vpop.permute.xlu0 %631 }
 0x2c5   :  { %15156 = vst [vmem:[#allocation32_spill] sm:$0xff] %v11800_v20  ;;  %10047 = vmatprep.subr.msk.mxu1 %vm723_vm1, %v808_v33 }
 0x2c6   :  { %v11803_v23 = vpop.permute.xlu1 %1331 }
 0x2c8   :  { %2634 = vrot.lane.b32.xlu1 %v11724_v30, %s11075_s29  ;;  %10048 = vmatpush3.xpose.msk.msra.mxu1 %vm723_vm1, %v808_v33  ;;  %v11808_v17 = vpop.permute.xlu0 %639 }
 0x2c9   :  { %15157 = vst [vmem:[#allocation33_spill] sm:$0xff] %v11808_v17 }
 0x2ca   :  { %v11810_v27 = vpop.permute.xlu1 %633 }
 0x2cb   :  { %15158 = vst [vmem:[#allocation34_spill] sm:$0xff] %v11810_v27  ;;  %2723 = vrot.lane.b32.xlu0 %v11810_v27, %s11075_s29  ;;  %10050 = vmatmul.mubr.msk.f32.vlgmr.msra.gmra.mxu1 %vm723_vm1, %v11601_v35 }
 0x2cc   :  { %2808 = vrot.lane.b32.xlu1 %v11732_v36, %s11075_s29  ;;  %10056 = vmatprep.mubr.msk.f32.mxu1 %vm723_vm1, %v11555_v46  ;;  %v11820_v1 = vpop.permute.xlu0 %663 }
 0x2cd   :  { %15159 = vst [vmem:[#allocation35_spill] sm:$0xff] %v11820_v1 }
 0x2ce   :  { %v11822_v21 = vpop.permute.xlu1 %641 }
 0x2cf   :  { %15160 = vst [vmem:[#allocation36_spill] sm:$0xff] %v11822_v21  ;;  %2897 = vrot.lane.b32.xlu0 %v11822_v21, %s11075_s29 }
 0x2d0   :  { %3330 = vrot.lane.b32.xlu1 %v11740_v59, %s11075_s29  ;;  %v11828_v39 = vpop.permute.xlu0 %581 }
 0x2d2   :  { %v11830_v42 = vpop.permute.xlu1 %665 }
 0x2d3   :  { %15161 = vst [vmem:[#allocation37_spill] sm:$0xff] %v11830_v42  ;;  %3419 = vrot.lane.b32.xlu0 %v11830_v42, %s11075_s29 }
 0x2d4   :  { %1505 = vrot.lane.b32.xlu1 %v11788_v9, %s11075_s29  ;;  %v895_v46 = vpop.permute.xlu0 %894 }
 0x2d6   :  { %v11836_v35 = vpop.permute.xlu1 %575 }
 0x2d7   :  { %1503 = vrot.lane.b32.xlu0 %v11836_v35, %s11075_s29 }
 0x2d8   :  { %2027 = vrot.lane.b32.xlu1 %v11748_v22, %s11075_s29  ;;  %v11842_v47 = vpop.permute.xlu0 %611 }
 0x2da   :  { %v11844_v25 = vpop.permute.xlu1 %4528 }
 0x2db   :  { %15162 = vst [vmem:[#allocation38_spill] sm:$0xff] %v11844_v25  ;;  %2025 = vrot.lane.b32.xlu0 %v11778_v5, %s11075_s29 }
 0x2dc   :  { %2201 = vrot.lane.b32.xlu1 %v11756_v26, %s11075_s29  ;;  %v11850_v12 = vpop.permute.xlu0 %643 }
 0x2dd   :  { %15163 = vst [vmem:[#allocation39_spill] sm:$0xff] %v11850_v12 }
 0x2de   :  { %v897_v33 = vpop.permute.xlu1 %896 }
 0x2df   :  { %10052 = vmatprep.subr.msk.mxu1 %vm723_vm1, %v897_v33 }
 0x2e0   :  { %10053 = vmatpush3.xpose.msk.msra.mxu1 %vm723_vm1, %v897_v33  ;;  %2199 = vrot.lane.b32.xlu1 %v11786_v8, %s11075_s29  ;;  %v11856_v15 = vpop.permute.xlu0 %585 }
 0x2e1   :  { %10054 = vmatprep.subr.msk.mxu1 %vm723_vm1, %v895_v46 }
 0x2e2   :  { %v11859_v62 = vpop.permute.xlu1 %613 }
 0x2e3   :  { %2288 = vrot.lane.b32.xlu0 %v11859_v62, %s11075_s29 }
 0x2e4   :  { %2721 = vrot.lane.b32.xlu1 %v11800_v20, %s11075_s29  ;;  %10055 = vmatpush3.xpose.msk.msra.mxu1 %vm723_vm1, %v895_v46  ;;  %v11866_v38 = vpop.permute.xlu0 %4704 }
 0x2e5   :  { %15164 = vst [vmem:[#allocation40_spill] sm:$0xff] %v11866_v38 }
 0x2e6   :  { %v11868_v33 = vpop.permute.xlu1 %645 }
 0x2e7   :  { %15165 = vst [vmem:[#allocation41_spill] sm:$0xff] %v11868_v33  ;;  %2984 = vrot.lane.b32.xlu0 %v11868_v33, %s11075_s29  ;;  %10057 = vmatmul.mubr.msk.f32.vlgmr.msra.gmra.mxu1 %vm723_vm1, %v11552_v7 }
 0x2e8   :  { %2895 = vrot.lane.b32.xlu1 %v11808_v17, %s11075_s29  ;;  %10063 = vmatprep.mubr.msk.f32.mxu1 %vm723_vm1, %v11562_v14  ;;  %v11878_v57 = vpop.permute.xlu0 %583 }
 0x2ea   :  { %v11880_v61 = vpop.permute.xlu1 %4617 }
 0x2eb   :  { %15166 = vst [vmem:[#allocation42_spill] sm:$0xff] %v11880_v61  ;;  %v15037_v61 = vlaneseq }
 0x2ec   :  { %3417 = vrot.lane.b32.xlu1 %v11820_v1, %s11075_s29  ;;  %v982_v46 = vpop.permute.xlu0 %981 }
 0x2ee   :  { %v11884_v37 = vpop.permute.xlu1 %579 }
 0x2ef   :  { %1590 = vrot.lane.b32.xlu0 %v11884_v37, %s11075_s29 }
 0x2f0   :  { %1592 = vrot.lane.b32.xlu1 %v11828_v39, %s11075_s29  ;;  %v11890_v7 = vpop.permute.xlu0 %615 }
 0x2f2   :  { %v11892_v54 = vpop.permute.xlu1 %4615 }
 0x2f3   :  { %15167 = vst [vmem:[#allocation43_spill] sm:$0xff] %v11892_v54 }
 0x2f4   :  { %2286 = vrot.lane.b32.xlu1 %v11842_v47, %s11075_s29  ;;  %v11896_v14 = vpop.permute.xlu0 %647 }
 0x2f5   :  { %15168 = vst [vmem:[#allocation44_spill] sm:$0xff] %v11896_v14 }
 0x2f6   :  { %v984_v11 = vpop.permute.xlu1 %983 }
 0x2f7   :  { %10059 = vmatprep.subr.msk.mxu1 %vm723_vm1, %v984_v11 }
 0x2f8   :  { %10060 = vmatpush3.xpose.msk.msra.mxu1 %vm723_vm1, %v984_v11  ;;  %2982 = vrot.lane.b32.xlu1 %v11850_v12, %s11075_s29  ;;  %v1069_v50 = vpop.permute.xlu0 %1068 }
 0x2f9   :  { %10061 = vmatprep.subr.msk.mxu1 %vm723_vm1, %v982_v46 }
 0x2fa   :  { %v11903_v32 = vpop.permute.xlu1 %617 }
 0x2fb   :  { %2375 = vrot.lane.b32.xlu0 %v11903_v32, %s11075_s29 }
 0x2fc   :  { %1679 = vrot.lane.b32.xlu1 %v11856_v15, %s11075_s29  ;;  %10062 = vmatpush3.xpose.msk.msra.mxu1 %vm723_vm1, %v982_v46  ;;  %v11910_v2 = vpop.permute.xlu0 %619 }
 0x2fe   :  { %v11912_v16 = vpop.permute.xlu1 %649 }
 0x2ff   :  { %15169 = vst [vmem:[#allocation45_spill] sm:$0xff] %v11912_v16  ;;  %3071 = vrot.lane.b32.xlu0 %v11912_v16, %s11075_s29  ;;  %10064 = vmatmul.mubr.msk.f32.vlgmr.msra.gmra.mxu1 %vm723_vm1, %v11559_v10  ;;  %v94_v16 = vld [vmem:[%s15184_s8] sm:$0xff] }
 0x300   :  { %10077 = vmatprep.mubr.msk.f32.mxu1 %vm723_vm1, %v11712_v52  ;;  %2373 = vrot.lane.b32.xlu1 %v11890_v7, %s11075_s29  ;;  %v11922_v11 = vpop.permute.xlu0 %651  ;;  %v667_v48 = vsub.f32 1.0, %v94_v16 }
 0x301   :  { %15170 = vst [vmem:[#allocation46_spill] sm:$0xff] %v11922_v11 }
 0x302   :  { %v11924_v31 = vpop.permute.xlu1 %4702  ;;  %v12153_v21 = vmul.f32 -1e+09, %v667_v48 }
 0x303   :  { %15171 = vst [vmem:[#allocation47_spill] sm:$0xff] %v11924_v31  ;;  %1677 = vrot.lane.b32.xlu0 %v11878_v57, %s11075_s29 }
 0x304   :  { %3069 = vrot.lane.b32.xlu1 %v11896_v14, %s11075_s29  ;;  %v11930_v46 = vpop.permute.xlu0 %593  ;;  %v12144_v14 = vshrl.u32 %v15037_v61, 7 }
 0x306   :  { %v11932_v3 = vpop.permute.xlu1 %589  ;;  %15185 = vst [vmem:[#allocation60_spill] sm:$0xff] %v12144_v14  ;;  %v12177_v59 = vsub.s32 0, %v12144_v14 }
 0x308   :  { %1766 = vrot.lane.b32.xlu1 %v11932_v3, %s11075_s29  ;;  %v11936_v10 = vpop.permute.xlu0 %4878  ;;  %15187 = vst [vmem:[#allocation62_spill] sm:$0xff] %v12177_v59 }
 0x309   :  { %15172 = vst [vmem:[#allocation48_spill] sm:$0xff] %v11936_v10 }
 0x30a   :  { %v1071_v55 = vpop.permute.xlu1 %1070 }
 0x30b   :  { %10066 = vmatprep.subr.msk.mxu0 %vm723_vm1, %v1071_v55 }
 0x30c   :  { %10067 = vmatpush3.xpose.msk.msra.mxu0 %vm723_vm1, %v1071_v55  ;;  %2460 = vrot.lane.b32.xlu1 %v11910_v2, %s11075_s29  ;;  %v11942_v51 = vpop.permute.xlu0 %591 }
 0x30d   :  { %10068 = vmatprep.subr.msk.mxu0 %vm723_vm1, %v1069_v50 }
 0x30e   :  { %v11945_v45 = vpop.permute.xlu1 %621 }
 0x30f   :  { %2462 = vrot.lane.b32.xlu0 %v11945_v45, %s11075_s29 }
 0x310   :  { %10069 = vmatpush3.xpose.msk.msra.mxu0 %vm723_vm1, %v1069_v50  ;;  %3156 = vrot.lane.b32.xlu1 %v11922_v11, %s11075_s29  ;;  %v1156_v10 = vpop.permute.xlu0 %1155 }
 0x311   :  { %10080 = vmatprep.subr.msk.mxu0 %vm723_vm1, %v11726_v18 }
 0x312   :  { %v11954_v55 = vpop.permute.xlu1 %653 }
 0x313   :  { %15173 = vst [vmem:[#allocation49_spill] sm:$0xff] %v11954_v55  ;;  %3158 = vrot.lane.b32.xlu0 %v11954_v55, %s11075_s29  ;;  %10071 = vmatmul.mubr.msk.f32.vlgmr.msra.gmra.mxu0 %vm723_vm1, %v11565_v19 }
 0x314   :  { %10081 = vmatpush3.xpose.msk.msra.mxu0 %vm723_vm1, %v11726_v18  ;;  %10084 = vmatprep.mubr.msk.f32.mxu0 %vm723_vm1, %v11576_v28  ;;  %v11964_v50 = vpop.permute.xlu0 %623 }
 0x315   :  { %1853 = vrot.lane.b32.xlu1 %v11930_v46, %s11075_s29  ;;  %10082 = vmatprep.subr.msk.mxu0 %vm723_vm1, %v11716_v53 }
 0x316   :  { %v11970_v31 = vpop.permute.xlu1 %4791 }
 0x317   :  { %15174 = vst [vmem:[#allocation50_spill] sm:$0xff] %v11970_v31 }
 0x318   :  { %10083 = vmatpush3.xpose.msk.msra.mxu0 %vm723_vm1, %v11716_v53  ;;  %v11974_v19 = vpop.permute.xlu0 %655 }
 0x319   :  { %15175 = vst [vmem:[#allocation51_spill] sm:$0xff] %v11974_v19  ;;  %4965 = vrot.lane.b32.xlu1 %v11573_v56, %s11077_s7 }
 0x31a   :  { %v11978_v18 = vpop.permute.xlu1 %587 }
 0x31b   :  { %1764 = vrot.lane.b32.xlu0 %v11978_v18, %s11075_s29  ;;  %10085 = vmatmul.mubr.msk.f32.vlgmr.msra.gmra.mxu0 %vm723_vm1, %v11573_v56 }
 0x31c   :  { %10098 = vmatprep.mubr.msk.f32.mxu0 %vm723_vm1, %v11758_v63  ;;  %v11986_v31 = vpop.permute.xlu0 %2636 }
 0x31d   :  { %4876 = vrot.lane.b32.xlu1 %v11712_v52, %s11077_s7 }
 0x31e   :  { %v11990_v53 = vpop.permute.xlu1 %4789 }
 0x31f   :  { %15176 = vst [vmem:[#allocation52_spill] sm:$0xff] %v11990_v53  ;;  %5052 = vrot.lane.b32.xlu0 %v11594_v34, %s11077_s7 }
 0x320   :  { %v11996_v54 = vpop.permute.xlu0 %2810 }
 0x321   :  { %4963 = vrot.lane.b32.xlu1 %v11576_v28, %s11077_s7 }
 0x322   :  { %v1158_v38 = vpop.permute.xlu1 %1157 }
 0x323   :  { %5226 = vrot.lane.b32.xlu0 %v11788_v9, %s11077_s7  ;;  %10073 = vmatprep.subr.msk.mxu1 %vm723_vm1, %v1158_v38 }
 0x324   :  { %10074 = vmatpush3.xpose.msk.msra.mxu1 %vm723_vm1, %v1158_v38  ;;  %v12007_v52 = vpop.permute.xlu0 %3332 }
 0x325   :  { %5139 = vrot.lane.b32.xlu1 %v11671_v43, %s11077_s7  ;;  %10075 = vmatprep.subr.msk.mxu1 %vm723_vm1, %v1156_v10  ;;  %15177 = vst [vmem:[#allocation53_spill] sm:$0xff] %v12007_v52 }
 0x326   :  { %v12005_v56 = vpop.permute.xlu1 %625 }
 0x327   :  { %2549 = vrot.lane.b32.xlu0 %v12005_v56, %s11075_s29 }
 0x328   :  { %10076 = vmatpush3.xpose.msk.msra.mxu1 %vm723_vm1, %v1156_v10  ;;  %v1417_v28 = vpop.permute.xlu0 %1416 }
 0x329   :  { %5050 = vrot.lane.b32.xlu1 %v11615_v40, %s11077_s7  ;;  %10087 = vmatprep.subr.msk.mxu1 %vm723_vm1, %v11803_v23 }
 0x32a   :  { %v12016_v38 = vpop.permute.xlu1 %657 }
 0x32b   :  { %15178 = vst [vmem:[#allocation54_spill] sm:$0xff] %v12016_v38  ;;  %3245 = vrot.lane.b32.xlu0 %v12016_v38, %s11075_s29  ;;  %10078 = vmatmul.mubr.msk.f32.vlgmr.msra.gmra.mxu1 %vm723_vm1, %v11699_v49  ;;  %v11080_v38 = vmov 1966171168  }
 0x32c   :  { %10088 = vmatpush3.xpose.msk.msra.mxu1 %vm723_vm1, %v11803_v23  ;;  %10091 = vmatprep.mubr.msk.f32.mxu1 %vm723_vm1, %v11615_v40  ;;  %v12041_v49 = vpop.permute.xlu0 %1938 }
 0x32d   :  { %5137 = vrot.lane.b32.xlu1 %v11758_v63, %s11077_s7  ;;  %10089 = vmatprep.subr.msk.mxu1 %vm723_vm1, %v11794_v13 }
 0x32e   :  { %v1419_v10 = vpop.permute.xlu1 %1418 }
 0x32f   :  { %10094 = vmatprep.subr.msk.mxu0 %vm723_vm1, %v1419_v10  ;;  %1851 = vrot.lane.b32.xlu0 %v11942_v51, %s11075_s29 }
 0x330   :  { %10095 = vmatpush3.xpose.msk.msra.mxu0 %vm723_vm1, %v1419_v10  ;;  %10090 = vmatpush3.xpose.msk.msra.mxu1 %vm723_vm1, %v11794_v13 }
 0x331   :  { %5313 = vrot.lane.b32.xlu1 %v11828_v39, %s11077_s7  ;;  %10096 = vmatprep.subr.msk.mxu0 %vm723_vm1, %v1417_v28 }
 0x332   :  { %v12039_v40 = vpop.permute.xlu1 %1940 }
 0x333   :  { %5400 = vrot.lane.b32.xlu0 %v11856_v15, %s11077_s7  ;;  %10092 = vmatmul.mubr.msk.f32.vlgmr.msra.gmra.mxu1 %vm723_vm1, %v11594_v34  ;;  %v12060_v34 = vpop.permute.xlu0 %2112 }
 0x334   :  { %10097 = vmatpush3.xpose.msk.msra.mxu0 %vm723_vm1, %v1417_v28  ;;  %10105 = vmatprep.mubr.msk.f32.mxu1 %vm723_vm1, %v11836_v35 }
 0x335   :  { %5224 = vrot.lane.b32.xlu1 %v11836_v35, %s11077_s7 }
 0x336   :  { %v12052_v63 = vpop.permute.xlu1 %2114 }
 0x337   :  { %5574 = vrot.lane.b32.xlu0 %v11930_v46, %s11077_s7  ;;  %10099 = vmatmul.mubr.msk.f32.vlgmr.msra.gmra.mxu0 %vm723_vm1, %v11671_v43 }
 0x338   :  { %10112 = vmatprep.mubr.msk.f32.mxu0 %vm723_vm1, %v11884_v37 }
 0x339   :  { %2547 = vrot.lane.b32.xlu1 %v11964_v50, %s11075_s29 }
 0x33a   :  { %v12064_v13 = vpop.permute.xlu1 %2634 }
 0x33b   :  { %5748 = vrot.lane.b32.xlu0 %v11748_v22, %s11077_s7 }
 0x33d   :  { %5311 = vrot.lane.b32.xlu1 %v11884_v37, %s11077_s7  ;;  %v12070_v23 = vpop.permute.xlu0 %2723 }
 0x33e   :  { %v12072_v35 = vpop.permute.xlu1 %2808 }
 0x33f   :  { %5746 = vrot.lane.b32.xlu0 %v11778_v5, %s11077_s7 }
 0x341   :  { %5487 = vrot.lane.b32.xlu1 %v11932_v3, %s11077_s7  ;;  %v12078_v43 = vpop.permute.xlu0 %2897 }
 0x342   :  { %15179 = vst [vmem:[#allocation55_spill] sm:$0xff] %v12078_v43  ;;  %v12080_v28 = vpop.permute.xlu1 %3330 }
 0x343   :  { %15180 = vst [vmem:[#allocation56_spill] sm:$0xff] %v12080_v28  ;;  %5922 = vrot.lane.b32.xlu0 %v11756_v26, %s11077_s7 }
 0x345   :  { %5398 = vrot.lane.b32.xlu1 %v11878_v57, %s11077_s7  ;;  %v12086_v37 = vpop.permute.xlu0 %3419 }
 0x346   :  { %15181 = vst [vmem:[#allocation57_spill] sm:$0xff] %v12086_v37  ;;  %v1506_v10 = vpop.permute.xlu1 %1505  ;;  %v672_v37 = vunpack.c.l.s4 %v11080_v38 }
 0x347   :  { %5920 = vrot.lane.b32.xlu0 %v11786_v8, %s11077_s7  ;;  %10101 = vmatprep.subr.msk.mxu1 %vm723_vm1, %v1506_v10 }
 0x348   :  { %10102 = vmatpush3.xpose.msk.msra.mxu1 %vm723_vm1, %v1506_v10  ;;  %v673_v44 = vunpack.c.0.s8 %v672_v37 }
 0x349   :  { %5485 = vrot.lane.b32.xlu1 %v11978_v18, %s11077_s7  ;;  %v1504_v53 = vpop.permute.xlu0 %1503 }
 0x34a   :  { %v12094_v25 = vpop.permute.xlu1 %2027  ;;  %10103 = vmatprep.subr.msk.mxu1 %vm723_vm1, %v1504_v53  ;;  %v12156_v16 = vsub.s32 %v673_v44, %v12144_v14 }
 0x34b   :  { %6096 = vrot.lane.b32.xlu0 %v11903_v32, %s11077_s7  ;;  %v10044_v37 = vpop.f32.mrf.mxu1 }
 0x34c   :  { %10104 = vmatpush3.xpose.msk.msra.mxu1 %vm723_vm1, %v1504_v53  ;;  %15186 = vst [vmem:[#allocation61_spill] sm:$0xff] %v12156_v16 }
 0x34d   :  { %5661 = vrot.lane.b32.xlu1 %v11707_v24, %s11077_s7  ;;  %v12118_v53 = vpop.permute.xlu0 %2025  ;;  %v798_v48 = vpop.f32.mrf.mxu1 }
 0x34e   :  { %v12102_v42 = vpop.permute.xlu1 %2201 }
 0x34f   :  { %6094 = vrot.lane.b32.xlu0 %v11890_v7, %s11077_s7  ;;  %10106 = vmatmul.mubr.msk.f32.vlgmr.msra.gmra.mxu1 %vm723_vm1, %v11788_v9 }
 0x350   :  { %10119 = vmatprep.mubr.msk.f32.mxu1 %vm723_vm1, %v11878_v57 }
 0x351   :  { %5659 = vrot.lane.b32.xlu1 %v11766_v4, %s11077_s7 }
 0x352   :  { %v12112_v10 = vpop.permute.xlu1 %2199 }
 0x353   :  { %6270 = vrot.lane.b32.xlu0 %v12005_v56, %s11077_s7 }
 0x355   :  { %5835 = vrot.lane.b32.xlu1 %v11718_v29, %s11077_s7  ;;  %v12126_v57 = vpop.permute.xlu0 %2288 }
 0x356   :  { %v12120_v0 = vpop.permute.xlu1 %2721 }
 0x357   :  { %5572 = vrot.lane.b32.xlu0 %v11942_v51, %s11077_s7 }
 0x359   :  { %3243 = vrot.lane.b32.xlu1 %v11974_v19, %s11075_s29  ;;  %v12139_v19 = vpop.permute.xlu0 %2984 }
 0x35a   :  { %v12128_v9 = vpop.permute.xlu1 %2895 }
 0x35b   :  { %15182 = vst [vmem:[#allocation58_spill] sm:$0xff] %v12128_v9  ;;  %6268 = vrot.lane.b32.xlu0 %v11964_v50, %s11077_s7 }
 0x35d   :  { %5833 = vrot.lane.b32.xlu1 %v11772_v41, %s11077_s7 }
 0x35e   :  { %v12134_v1 = vpop.permute.xlu1 %3417 }
 0x35f   :  { %15183 = vst [vmem:[#allocation59_spill] sm:$0xff] %v12134_v1 }
 0x361   :  { %6009 = vrot.lane.b32.xlu1 %v11859_v62, %s11077_s7  ;;  %v1591_v1 = vpop.permute.xlu0 %1590 }
 0x362   :  { %v1593_v6 = vpop.permute.xlu1 %1592 }
 0x363   :  { %10108 = vmatprep.subr.msk.mxu0 %vm723_vm1, %v1593_v6 }
 0x364   :  { %10109 = vmatpush3.xpose.msk.msra.mxu0 %vm723_vm1, %v1593_v6  ;;  %v677_v6 = vrot.slane %v12153_v21, %v12156_v16 }
 0x365   :  { %6007 = vrot.lane.b32.xlu1 %v11842_v47, %s11077_s7  ;;  %10110 = vmatprep.subr.msk.mxu0 %vm723_vm1, %v1591_v1 }
 0x366   :  { %v12151_v38 = vpop.permute.xlu1 %2286  ;;  %v12174_v28 = vrot.slane %v677_v6, %v12156_v16 }
 0x368   :  { %10111 = vmatpush3.xpose.msk.msra.mxu0 %vm723_vm1, %v1591_v1  ;;  %v12189_v52 = vrot.slane %v12174_v28, %v12177_v59 }
 0x369   :  { %6183 = vrot.lane.b32.xlu1 %v11945_v45, %s11077_s7 }
 0x36a   :  { %v12161_v61 = vpop.permute.xlu1 %2982 }
 0x36b   :  { %10113 = vmatmul.mubr.msk.f32.vlgmr.msra.gmra.mxu0 %vm723_vm1, %v11828_v39  ;;  %v3504_v39 = vmul.f32 0.35355338, %v798_v48 }
 0x36c   :  { %10126 = vmatprep.mubr.msk.f32.mxu0 %vm723_vm1, %v11978_v18 }
 0x36d   :  { %6181 = vrot.lane.b32.xlu1 %v11910_v2, %s11077_s7  ;;  %v12171_v44 = vpop.permute.xlu0 %2375  ;;  %v12192_v9 = vadd.f32 %v12189_v52, %v3504_v39 }
 0x36e   :  { %v1680_v1 = vpop.permute.xlu1 %1679 }
 0x36f   :  { %10115 = vmatprep.subr.msk.mxu1 %vm723_vm1, %v1680_v1  ;;  %15189 = vst [vmem:[#allocation64_spill] sm:$0xff] %v12192_v9  ;;  %v3673_v48 = vsel %vm3672_vm2, %v12192_v9, -inf }
 0x370   :  { %10116 = vmatpush3.xpose.msk.msra.mxu1 %vm723_vm1, %v1680_v1 }
 0x371   :  { %6357 = vrot.lane.b32.xlu1 %v11734_v58, %s11077_s7  ;;  %v12183_v18 = vpop.permute.xlu0 %3071 }
 0x372   :  { %15188 = vst [vmem:[#allocation63_spill] sm:$0xff] %v12183_v18  ;;  %v12185_v55 = vpop.permute.xlu1 %2373 }
 0x375   :  { %6355 = vrot.lane.b32.xlu1 %v11724_v30, %s11077_s7  ;;  %v1678_v14 = vpop.permute.xlu0 %1677 }
 0x376   :  { %v12196_v1 = vpop.permute.xlu1 %3069  ;;  %10117 = vmatprep.subr.msk.mxu1 %vm723_vm1, %v1678_v14 }
 0x377   :  { %15190 = vst [vmem:[#allocation65_spill] sm:$0xff] %v12196_v1  ;;  %10118 = vmatpush3.xpose.msk.msra.mxu1 %vm723_vm1, %v1678_v14  ;;  %v685_v14 = vcombine.high %v677_v6, %v677_v6 }
 0x379   :  { %v12215_v9 = vrot.slane %v685_v14, %v12156_v16 }
 0x37a   :  { %v1767_v18 = vpop.permute.xlu1 %1766  ;;  %3674 = vmax.xlane.f32.xlu0 %v3673_v48  ;;  %10120 = vmatmul.mubr.msk.f32.vlgmr.msra.gmra.mxu1 %vm723_vm1, %v11856_v15 }
 0x37b   :  { %10122 = vmatprep.subr.msk.mxu0 %vm723_vm1, %v1767_v18  ;;  %10133 = vmatprep.mubr.msk.f32.mxu1 %vm723_vm1, %v11942_v51  ;;  %v12223_v51 = vrot.slane %v12215_v9, %v12177_v59 }
 0x37c   :  { %10123 = vmatpush3.xpose.msk.msra.mxu0 %vm723_vm1, %v1767_v18 }
 0x37e   :  { %v12208_v39 = vpop.permute.xlu1 %2460 }
 0x381   :  { %v12212_v17 = vpop.permute.xlu0 %2462 }
 0x382   :  { %v12210_v1 = vpop.permute.xlu1 %3156 }
 0x383   :  { %15191 = vst [vmem:[#allocation66_spill] sm:$0xff] %v12210_v1 }
 0x385   :  { %v12218_v15 = vpop.permute.xlu0 %3158 }
 0x387   :  { %v1854_v48 = vpop.permute.xlu1 %1853 }
 0x388   :  { %10129 = vmatprep.subr.msk.mxu1 %vm723_vm1, %v1854_v48 }
 0x389   :  { %10130 = vmatpush3.xpose.msk.msra.mxu1 %vm723_vm1, %v1854_v48  ;;  %v3505_v48 = vmul.f32 0.35355338, %v10044_v37 }
 0x38b   :  { %v12225_v18 = vpop.permute.xlu1 %4965  ;;  %v10051_v27 = vpop.f32.mrf.mxu1 }
 0x38c   :  { %15192 = vst [vmem:[#allocation67_spill] sm:$0xff] %v12225_v18  ;;  %v3507_v6 = vmul.f32 0.35355338, %v10051_v27 }
 0x38d   :  { %v885_v1 = vpop.f32.mrf.mxu1  ;;  %v1765_v43 = vpop.permute.xlu0 %1764 }
 0x38e   :  { %v12228_v14 = vadd.f32 %v12223_v51, %v3507_v6  ;;  %v3506_v11 = vmul.f32 0.35355338, %v885_v1  ;;  %10124 = vmatprep.subr.msk.mxu0 %vm723_vm1, %v1765_v43 }
 0x38f   :  { %v12231_v33 = vpop.permute.xlu1 %4876  ;;  %10125 = vmatpush3.xpose.msk.msra.mxu0 %vm723_vm1, %v1765_v43 }
 0x390   :  { %15193 = vst [vmem:[#allocation68_spill] sm:$0xff] %v12231_v33  ;;  %v12235_v16 = vadd.f32 %v12223_v51, %v3506_v11  ;;  %10136 = vmatprep.subr.msk.mxu0 %vm723_vm1, %v12039_v40  ;;  %v3682_v27 = vsel %vm3672_vm2, %v12228_v14, -inf  ;;  %v12252_v11 = vadd.f32 %v12189_v52, %v3505_v48 }
 0x391   :  { %3683 = vmax.xlane.f32.xlu0 %v3682_v27  ;;  %v12241_v6 = vpop.permute.xlu0 %5052 }
 0x392   :  { %15194 = vst [vmem:[#allocation69_spill] sm:$0xff] %v12241_v6  ;;  %10127 = vmatmul.mubr.msk.f32.vlgmr.msra.gmra.mxu0 %vm723_vm1, %v11932_v3  ;;  %v3679_v43 = vsel %vm3672_vm2, %v12235_v16, -inf }
 0x393   :  { %v12245_v1 = vpop.permute.xlu1 %4963  ;;  %10137 = vmatpush3.xpose.msk.msra.mxu0 %vm723_vm1, %v12039_v40  ;;  %10140 = vmatprep.mubr.msk.f32.mxu0 %vm723_vm1, %v11766_v4  ;;  %v3676_v4 = vsel %vm3672_vm2, %v12252_v11, -inf }
 0x394   :  { %15195 = vst [vmem:[#allocation70_spill] sm:$0xff] %v12245_v1  ;;  %10138 = vmatprep.subr.msk.mxu0 %vm723_vm1, %v12041_v49 }
 0x395   :  { %3680 = vmax.xlane.f32.xlu0 %v3679_v43  ;;  %v12258_v37 = vpop.permute.xlu0 %5226 }
 0x396   :  { %15196 = vst [vmem:[#allocation71_spill] sm:$0xff] %v12258_v37 }
 0x397   :  { %v12260_v3 = vpop.permute.xlu1 %5139  ;;  %10139 = vmatpush3.xpose.msk.msra.mxu0 %vm723_vm1, %v12041_v49 }
 0x398   :  { %15197 = vst [vmem:[#allocation72_spill] sm:$0xff] %v12260_v3  ;;  %10150 = vmatprep.subr.msk.mxu0 %vm723_vm1, %v12052_v63 }
 0x399   :  { %3677 = vmax.xlane.f32.xlu1 %v3676_v4  ;;  %v12268_v40 = vpop.permute.xlu0 %2549  ;;  %v15217_v4 = vld [vmem:[#allocation49_spill] sm:$0xff] }
 0x39a   :  { %10141 = vmatmul.mubr.msk.f32.vlgmr.msra.gmra.mxu0 %vm723_vm1, %v11707_v24 }
 0x39b   :  { %v12272_v48 = vpop.permute.xlu1 %5050  ;;  %10151 = vmatpush3.xpose.msk.msra.mxu0 %vm723_vm1, %v12052_v63  ;;  %10154 = vmatprep.mubr.msk.f32.mxu0 %vm723_vm1, %v11772_v41  ;;  %v715_v41 = vcombine.high %v12174_v28, %v12174_v28 }
 0x39c   :  { %15198 = vst [vmem:[#allocation73_spill] sm:$0xff] %v12272_v48  ;;  %10152 = vmatprep.subr.msk.mxu0 %vm723_vm1, %v12060_v34 }
 0x39d   :  { %v12280_v49 = vpop.permute.xlu0 %3245 }
 0x39f   :  { %v12282_v27 = vpop.permute.xlu1 %5137  ;;  %10153 = vmatpush3.xpose.msk.msra.mxu0 %vm723_vm1, %v12060_v34 }
 0x3a0   :  { %15199 = vst [vmem:[#allocation74_spill] sm:$0xff] %v12282_v27  ;;  %10164 = vmatprep.subr.msk.mxu0 %vm723_vm1, %v12126_v57 }
 0x3a1   :  { %v1852_v24 = vpop.permute.xlu0 %1851 }
 0x3a2   :  { %10131 = vmatprep.subr.msk.mxu1 %vm723_vm1, %v1852_v24  ;;  %10155 = vmatmul.mubr.msk.f32.vlgmr.msra.gmra.mxu0 %vm723_vm1, %v11718_v29  ;;  %v12307_v29 = vrot.slane %v715_v41, %v12177_v59  ;;  %v15218_v41 = vld [vmem:[#allocation27_spill] sm:$0xff] }
 0x3a3   :  { %v12293_v63 = vpop.permute.xlu1 %5313  ;;  %10132 = vmatpush3.xpose.msk.msra.mxu1 %vm723_vm1, %v1852_v24  ;;  %10165 = vmatpush3.xpose.msk.msra.mxu0 %vm723_vm1, %v12126_v57 }
 0x3a4   :  { %15200 = vst [vmem:[#allocation75_spill] sm:$0xff] %v12293_v63  ;;  %10168 = vmatprep.mubr.msk.f32.mxu0 %vm723_vm1, %v11842_v47  ;;  %10143 = vmatprep.subr.msk.mxu1 %vm723_vm1, %v12094_v25 }
 0x3a5   :  { %10166 = vmatprep.subr.msk.mxu0 %vm723_vm1, %v12151_v38 }
 0x3a6   :  { %10134 = vmatmul.mubr.msk.f32.vlgmr.msra.gmra.mxu1 %vm723_vm1, %v11930_v46 }
 0x3a7   :  { %v10058_v34 = vpop.f32.mrf.mxu1  ;;  %10144 = vmatpush3.xpose.msk.msra.mxu1 %vm723_vm1, %v12094_v25  ;;  %10147 = vmatprep.mubr.msk.f32.mxu1 %vm723_vm1, %v11778_v5  ;;  %v12317_v28 = vpop.permute.xlu1 %5224 }
 0x3a8   :  { %v3509_v47 = vmul.f32 0.35355338, %v10058_v34  ;;  %10167 = vmatpush3.xpose.msk.msra.mxu0 %vm723_vm1, %v12151_v38  ;;  %10145 = vmatprep.subr.msk.mxu1 %vm723_vm1, %v12118_v53  ;;  %15201 = vst [vmem:[#allocation76_spill] sm:$0xff] %v12317_v28  ;;  %v15219_v34 = vld [vmem:[#allocation63_spill] sm:$0xff] }
 0x3a9   :  { %10178 = vmatprep.subr.msk.mxu0 %vm723_vm1, %v12212_v17  ;;  %v972_v46 = vpop.f32.mrf.mxu1 }
 0x3aa   :  { %v12322_v57 = vadd.f32 %v12307_v29, %v3509_v47  ;;  %v3508_v25 = vmul.f32 0.35355338, %v972_v46  ;;  %v15220_v47 = vld [vmem:[#allocation56_spill] sm:$0xff] }
 0x3ab   :  { %10169 = vmatmul.mubr.msk.f32.vlgmr.msra.gmra.mxu0 %vm723_vm1, %v11859_v62  ;;  %10146 = vmatpush3.xpose.msk.msra.mxu1 %vm723_vm1, %v12118_v53  ;;  %v15212_v53 = vld [vmem:[#allocation34_spill] sm:$0xff] }
 0x3ac   :  { %v12329_v5 = vadd.f32 %v12307_v29, %v3508_v25  ;;  %10179 = vmatpush3.xpose.msk.msra.mxu0 %vm723_vm1, %v12212_v17  ;;  %10182 = vmatprep.mubr.msk.f32.mxu0 %vm723_vm1, %v11910_v2  ;;  %v3688_v38 = vsel %vm3672_vm2, %v12322_v57, -inf  ;;  %v2548_v17 = vpop.permute.xlu1 %2547 }
 0x3ad   :  { %10157 = vmatprep.subr.msk.mxu1 %vm723_vm1, %v12102_v42  ;;  %10180 = vmatprep.subr.msk.mxu0 %vm723_vm1, %v12208_v39 }
 0x3ae   :  { %3689 = vmax.xlane.f32.xlu1 %v3688_v38  ;;  %10148 = vmatmul.mubr.msk.f32.vlgmr.msra.gmra.mxu1 %vm723_vm1, %v11748_v22  ;;  %v3685_v62 = vsel %vm3672_vm2, %v12329_v5, -inf }
 0x3af   :  { %3686 = vmax.xlane.f32.xlu0 %v3685_v62  ;;  %10158 = vmatpush3.xpose.msk.msra.mxu1 %vm723_vm1, %v12102_v42  ;;  %v15221_v62 = vld [vmem:[#allocation36_spill] sm:$0xff] }
 0x3b0   :  { %10161 = vmatprep.mubr.msk.f32.mxu1 %vm723_vm1, %v11786_v8  ;;  %10181 = vmatpush3.xpose.msk.msra.mxu0 %vm723_vm1, %v12208_v39  ;;  %v12363_v2 = vpop.permute.xlu1 %5311  ;;  %v15215_v39 = vld [vmem:[#allocation53_spill] sm:$0xff] }
 0x3b1   :  { %10159 = vmatprep.subr.msk.mxu1 %vm723_vm1, %v12112_v10  ;;  %10192 = vmatprep.subr.msk.mxu0 %vm723_vm1, %v11986_v31  ;;  %15202 = vst [vmem:[#allocation77_spill] sm:$0xff] %v12363_v2 }
 0x3b3   :  { %10183 = vmatmul.mubr.msk.f32.vlgmr.msra.gmra.mxu0 %vm723_vm1, %v11945_v45  ;;  %10160 = vmatpush3.xpose.msk.msra.mxu1 %vm723_vm1, %v12112_v10  ;;  %v717_v45 = vcombine.high %v12215_v9, %v12215_v9  ;;  %v15211_v10 = vld [vmem:[#allocation66_spill] sm:$0xff]  ;;  %v15213_v9 = vld [vmem:[#allocation33_spill] sm:$0xff] }
 0x3b4   :  { %10193 = vmatpush3.xpose.msk.msra.mxu0 %vm723_vm1, %v11986_v31  ;;  %10196 = vmatprep.mubr.msk.f32.mxu0 %vm723_vm1, %v11724_v30  ;;  %v12383_v31 = vpop.permute.xlu1 %5487 }
 0x3b5   :  { %10171 = vmatprep.subr.msk.mxu1 %vm723_vm1, %v12171_v44  ;;  %10194 = vmatprep.subr.msk.mxu0 %vm723_vm1, %v12064_v13  ;;  %15203 = vst [vmem:[#allocation78_spill] sm:$0xff] %v12383_v31  ;;  %v12400_v30 = vrot.slane %v717_v45, %v12177_v59  ;;  %v15222_v45 = vld [vmem:[#allocation44_spill] sm:$0xff] }
 0x3b6   :  { %10162 = vmatmul.mubr.msk.f32.vlgmr.msra.gmra.mxu1 %vm723_vm1, %v11756_v26  ;;  %v15257_v31 = vld [vmem:[#allocation64_spill] sm:$0xff] }
 0x3b7   :  { %10172 = vmatpush3.xpose.msk.msra.mxu1 %vm723_vm1, %v12171_v44  ;;  %10175 = vmatprep.mubr.msk.f32.mxu1 %vm723_vm1, %v11890_v7  ;;  %v15214_v44 = vld [vmem:[#allocation58_spill] sm:$0xff] }
 0x3b8   :  { %10195 = vmatpush3.xpose.msk.msra.mxu0 %vm723_vm1, %v12064_v13  ;;  %10173 = vmatprep.subr.msk.mxu1 %vm723_vm1, %v12185_v55  ;;  %v12409_v22 = vpop.permute.xlu1 %5398  ;;  %v15207_v13 = vld [vmem:[#allocation41_spill] sm:$0xff] }
 0x3b9   :  { %10206 = vmatprep.subr.msk.mxu0 %vm723_vm1, %v11996_v54  ;;  %15204 = vst [vmem:[#allocation79_spill] sm:$0xff] %v12409_v22 }
 0x3bb   :  { %10197 = vmatmul.mubr.msk.f32.vlgmr.msra.gmra.mxu0 %vm723_vm1, %v11734_v58  ;;  %10174 = vmatpush3.xpose.msk.msra.mxu1 %vm723_vm1, %v12185_v55  ;;  %v670_v55 = vcombine.high %v12153_v21, %v12153_v21 }
 0x3bc   :  { %10207 = vmatpush3.xpose.msk.msra.mxu0 %vm723_vm1, %v11996_v54  ;;  %10210 = vmatprep.mubr.msk.f32.mxu0 %vm723_vm1, %v11732_v36 }
 0x3bd   :  { %10185 = vmatprep.subr.msk.mxu1 %vm723_vm1, %v12268_v40  ;;  %10208 = vmatprep.subr.msk.mxu0 %vm723_vm1, %v12072_v35 }
 0x3be   :  { %10176 = vmatmul.mubr.msk.f32.vlgmr.msra.gmra.mxu1 %vm723_vm1, %v11903_v32 }
 0x3bf   :  { %v10065_v58 = vpop.f32.mrf.mxu1  ;;  %10186 = vmatpush3.xpose.msk.msra.mxu1 %vm723_vm1, %v12268_v40  ;;  %10189 = vmatprep.mubr.msk.f32.mxu1 %vm723_vm1, %v11964_v50  ;;  %v12436_v50 = vpop.permute.xlu1 %5485 }
 0x3c0   :  { %v3511_v54 = vmul.f32 0.35355338, %v10065_v58  ;;  %10209 = vmatpush3.xpose.msk.msra.mxu0 %vm723_vm1, %v12072_v35  ;;  %10187 = vmatprep.subr.msk.mxu1 %vm723_vm1, %v2548_v17  ;;  %15205 = vst [vmem:[#allocation80_spill] sm:$0xff] %v12436_v50  ;;  %v15210_v35 = vld [vmem:[#allocation55_spill] sm:$0xff] }
 0x3c1   :  { %10220 = vmatprep.subr.msk.mxu0 %vm723_vm1, %v12139_v19  ;;  %v1059_v32 = vpop.f32.mrf.mxu1 }
 0x3c2   :  { %v12414_v26 = vadd.f32 %v12400_v30, %v3511_v54  ;;  %v3510_v8 = vmul.f32 0.35355338, %v1059_v32  ;;  %v15223_v54 = vld [vmem:[#allocation65_spill] sm:$0xff] }
 0x3c3   :  { %10211 = vmatmul.mubr.msk.f32.vlgmr.msra.gmra.mxu0 %vm723_vm1, %v11742_v60  ;;  %10188 = vmatpush3.xpose.msk.msra.mxu1 %vm723_vm1, %v2548_v17 }
 0x3c4   :  { %10221 = vmatpush3.xpose.msk.msra.mxu0 %vm723_vm1, %v12139_v19  ;;  %10224 = vmatprep.mubr.msk.f32.mxu0 %vm723_vm1, %v11850_v12  ;;  %v3694_v42 = vsel %vm3672_vm2, %v12414_v26, -inf  ;;  %v12426_v7 = vadd.f32 %v12400_v30, %v3510_v8  ;;  %v15206_v19 = vld [vmem:[#allocation61_spill] sm:$0xff] }
 0x3c5   :  { %10199 = vmatprep.subr.msk.mxu1 %vm723_vm1, %v12070_v23  ;;  %10222 = vmatprep.subr.msk.mxu0 %vm723_vm1, %v12161_v61 }
 0x3c6   :  { %3695 = vmax.xlane.f32.xlu0 %v3694_v42  ;;  %10190 = vmatmul.mubr.msk.f32.vlgmr.msra.gmra.mxu1 %vm723_vm1, %v12005_v56  ;;  %v3691_v21 = vsel %vm3672_vm2, %v12426_v7, -inf  ;;  %v12451_v56 = vrot.slane %v670_v55, %v15206_v19  ;;  %v15225_v42 = vld [vmem:[#allocation25_spill] sm:$0xff] }
 0x3c7   :  { %10200 = vmatpush3.xpose.msk.msra.mxu1 %vm723_vm1, %v12070_v23  ;;  %10203 = vmatprep.mubr.msk.f32.mxu1 %vm723_vm1, %v11800_v20  ;;  %v12461_v23 = vpop.permute.xlu1 %5661 }
 0x3c8   :  { %10223 = vmatpush3.xpose.msk.msra.mxu0 %vm723_vm1, %v12161_v61  ;;  %10201 = vmatprep.subr.msk.mxu1 %vm723_vm1, %v12120_v0  ;;  %v15208_v61 = vld [vmem:[#allocation46_spill] sm:$0xff]  ;;  %15209 = vst [vmem:[#allocation61_spill] sm:$0xff] %v12461_v23 }
 0x3c9   :  { %10234 = vmatprep.subr.msk.mxu0 %vm723_vm1, %v12218_v15 }
 0x3ca   :  { %3692 = vmax.xlane.f32.xlu0 %v3691_v21  ;;  %v15226_v21 = vld [vmem:[#allocation29_spill] sm:$0xff] }
 0x3cb   :  { %10225 = vmatmul.mubr.msk.f32.vlgmr.msra.gmra.mxu0 %vm723_vm1, %v15207_v13  ;;  %10202 = vmatpush3.xpose.msk.msra.mxu1 %vm723_vm1, %v12120_v0  ;;  %v700_v0 = vrot.slane %v12451_v56, %v15206_v19  ;;  %v12484_v43 = vpop.permute.xlu1 %5659 }
 0x3cc   :  { %10235 = vmatpush3.xpose.msk.msra.mxu0 %vm723_vm1, %v12218_v15  ;;  %10238 = vmatprep.mubr.msk.f32.mxu0 %vm723_vm1, %v15208_v61  ;;  %15216 = vst [vmem:[#allocation55_spill] sm:$0xff] %v12484_v43 }
 0x3cd   :  { %10213 = vmatprep.subr.msk.mxu1 %vm723_vm1, %v15210_v35  ;;  %10236 = vmatprep.subr.msk.mxu0 %vm723_vm1, %v15211_v10  ;;  %v12482_v15 = vrot.slane %v700_v0, %v12177_v59  ;;  %v716_v17 = vcombine.high %v700_v0, %v700_v0 }
 0x3ce   :  { %10204 = vmatmul.mubr.msk.f32.vlgmr.msra.gmra.mxu1 %vm723_vm1, %v15212_v53 }
 0x3cf   :  { %10214 = vmatpush3.xpose.msk.msra.mxu1 %vm723_vm1, %v15210_v35  ;;  %10217 = vmatprep.mubr.msk.f32.mxu1 %vm723_vm1, %v15213_v9  ;;  %v12516_v8 = vpop.permute.xlu1 %5835  ;;  %v12520_v55 = vrot.slane %v716_v17, %v12177_v59  ;;  %v15230_v17 = vld [vmem:[#allocation51_spill] sm:$0xff] }
 0x3d0   :  { %10237 = vmatpush3.xpose.msk.msra.mxu0 %vm723_vm1, %v15211_v10  ;;  %10215 = vmatprep.subr.msk.mxu1 %vm723_vm1, %v15214_v44  ;;  %15224 = vst [vmem:[#allocation66_spill] sm:$0xff] %v12516_v8 }
 0x3d1   :  { %10248 = vmatprep.subr.msk.mxu0 %vm723_vm1, %v15215_v39 }
 0x3d3   :  { %10239 = vmatmul.mubr.msk.f32.vlgmr.msra.gmra.mxu0 %vm723_vm1, %v15217_v4  ;;  %v10072_v40 = vpop.f32.mrf.mxu0  ;;  %10216 = vmatpush3.xpose.msk.msra.mxu1 %vm723_vm1, %v15214_v44  ;;  %v15227_v44 = vld [vmem:[#allocation31_spill] sm:$0xff] }
 0x3d4   :  { %v3513_v24 = vmul.f32 0.35355338, %v10072_v40  ;;  %10249 = vmatpush3.xpose.msk.msra.mxu0 %vm723_vm1, %v15215_v39  ;;  %10252 = vmatprep.mubr.msk.f32.mxu0 %vm723_vm1, %v15218_v41 }
 0x3d5   :  { %10227 = vmatprep.subr.msk.mxu1 %vm723_vm1, %v15219_v34  ;;  %10250 = vmatprep.subr.msk.mxu0 %vm723_vm1, %v15220_v47  ;;  %v1146_v46 = vpop.f32.mrf.mxu0 }
 0x3d6   :  { %v12499_v25 = vadd.f32 %v12482_v15, %v3513_v24  ;;  %v3512_v38 = vmul.f32 0.35355338, %v1146_v46  ;;  %10218 = vmatmul.mubr.msk.f32.vlgmr.msra.gmra.mxu1 %vm723_vm1, %v15221_v62  ;;  %v15229_v46 = vld [vmem:[#allocation42_spill] sm:$0xff] }
 0x3d7   :  { %10228 = vmatpush3.xpose.msk.msra.mxu1 %vm723_vm1, %v15219_v34  ;;  %10231 = vmatprep.mubr.msk.f32.mxu1 %vm723_vm1, %v15222_v45  ;;  %v15228_v34 = vld [vmem:[#allocation45_spill] sm:$0xff] }
 0x3d8   :  { %v12508_v58 = vadd.f32 %v12482_v15, %v3512_v38  ;;  %10251 = vmatpush3.xpose.msk.msra.mxu0 %vm723_vm1, %v15220_v47  ;;  %10229 = vmatprep.subr.msk.mxu1 %vm723_vm1, %v15223_v54  ;;  %v3700_v32 = vsel %vm3672_vm2, %v12499_v25, -inf  ;;  %v3244_v47 = vpop.permute.xlu1 %3243 }
 0x3d9   :  { %10262 = vmatprep.subr.mxu0 %v15225_v42  ;;  %3701 = vmax.xlane.f32.xlu1 %v3700_v32  ;;  %v686_v32 = vcombine.high %v12451_v56, %v12451_v56  ;;  %v15234_v56 = vld [vmem:[#allocation59_spill] sm:$0xff] }
 0x3da   :  { %v3697_v0 = vsel %vm3672_vm2, %v12508_v58, -inf }
 0x3db   :  { %10253 = vmatmul.mubr.msk.f32.vlgmr.msra.gmra.mxu0 %vm723_vm1, %v15226_v21  ;;  %v10086_v35 = vpop.f32.mrf.mxu0  ;;  %10230 = vmatpush3.xpose.msk.msra.mxu1 %vm723_vm1, %v15223_v54 }
 0x3dc   :  { %v3517_v10 = vmul.f32 0.35355338, %v10086_v35  ;;  %10263 = vmatpush3.msra.mxu0 %v15225_v42  ;;  %10241 = vmatprep.subr.msk.mxu1 %vm723_vm1, %v12280_v49  ;;  %v15231_v42 = vld [vmem:[#allocation57_spill] sm:$0xff]  ;;  %v15232_v35 = vld [vmem:[#allocation54_spill] sm:$0xff]  ;;  %v12634_v61 = vpop.permute.xlu1 %5833 }
 0x3dd   :  { %10264 = vmatprep.subr.mxu0 %v15227_v44  ;;  %v1320_v39 = vpop.f32.mrf.mxu0  ;;  %3698 = vmax.xlane.f32.xlu1 %v3697_v0  ;;  %v15233_v0 = vld [vmem:[#allocation35_spill] sm:$0xff]  ;;  %15241 = vst [vmem:[#allocation63_spill] sm:$0xff] %v12634_v61 }
 0x3de   :  { %v12533_v40 = vadd.f32 %v12520_v55, %v3517_v10  ;;  %v3516_v24 = vmul.f32 0.35355338, %v1320_v39  ;;  %10265 = vmatpush3.msra.mxu0 %v15227_v44  ;;  %10232 = vmatmul.mubr.msk.f32.vlgmr.msra.gmra.mxu1 %vm723_vm1, %v15228_v34  ;;  %v714_v10 = vrot.slane %v686_v32, %v15206_v19 }
 0x3df   :  { %10276 = vmatprep.subr.mxu0 %v15229_v46  ;;  %10242 = vmatpush3.xpose.msk.msra.mxu1 %vm723_vm1, %v12280_v49 }
 0x3e0   :  { %v12542_v38 = vadd.f32 %v12520_v55, %v3516_v24  ;;  %10245 = vmatprep.mubr.msk.f32.mxu1 %vm723_vm1, %v15230_v17  ;;  %10243 = vmatprep.subr.msk.mxu1 %vm723_vm1, %v3244_v47  ;;  %v3712_v54 = vsel %vm3672_vm2, %v12533_v40, -inf  ;;  %v12566_v44 = vrot.slane %v714_v10, %v12177_v59  ;;  %v12638_v45 = vpop.permute.xlu1 %6009 }
 0x3e1   :  { %3713 = vmax.xlane.f32.xlu1 %v3712_v54  ;;  %15243 = vst [vmem:[#allocation65_spill] sm:$0xff] %v12638_v45 }
 0x3e2   :  { %v3709_v49 = vsel %vm3672_vm2, %v12542_v38, -inf }
 0x3e3   :  { %10244 = vmatpush3.xpose.msk.msra.mxu1 %vm723_vm1, %v3244_v47  ;;  %v15235_v47 = vld [vmem:[#allocation30_spill] sm:$0xff] }
 0x3e4   :  { %10255 = vmatprep.subr.msk.mxu1 %vm723_vm1, %v15231_v42 }
 0x3e5   :  { %3710 = vmax.xlane.f32.xlu1 %v3709_v49  ;;  %v718_v49 = vcombine.high %v714_v10, %v714_v10 }
 0x3e6   :  { %10246 = vmatmul.mubr.msk.f32.vlgmr.msra.gmra.mxu1 %vm723_vm1, %v15232_v35  ;;  %v15237_v35 = vld [vmem:[#allocation38_spill] sm:$0xff] }
 0x3e7   :  { %10256 = vmatpush3.xpose.msk.msra.mxu1 %vm723_vm1, %v15231_v42  ;;  %10259 = vmatprep.mubr.msk.f32.mxu1 %vm723_vm1, %v15233_v0  ;;  %v15236_v42 = vld [vmem:[#allocation37_spill] sm:$0xff] }
 0x3e8   :  { %10257 = vmatprep.subr.msk.mxu1 %vm723_vm1, %v15234_v56 }
 0x3eb   :  { %v10079_v39 = vpop.f32.mrf.mxu1  ;;  %10258 = vmatpush3.xpose.msk.msra.mxu1 %vm723_vm1, %v15234_v56 }
 0x3ec   :  { %v3515_v24 = vmul.f32 0.35355338, %v10079_v39  ;;  %10269 = vmatprep.subr.mxu1 %v15235_v47  ;;  %v15238_v39 = vld [vmem:[#allocation40_spill] sm:$0xff] }
 0x3ed   :  { %v1233_v19 = vpop.f32.mrf.mxu1 }
 0x3ee   :  { %v12572_v54 = vadd.f32 %v12566_v44, %v3515_v24  ;;  %v3514_v32 = vmul.f32 0.35355338, %v1233_v19  ;;  %10260 = vmatmul.mubr.msk.f32.vlgmr.msra.gmra.mxu1 %vm723_vm1, %v15236_v42  ;;  %v12586_v24 = vrot.slane %v718_v49, %v12177_v59 }
 0x3ef   :  { %10270 = vmatpush3.msra.mxu1 %v15235_v47 }
 0x3f0   :  { %v12578_v21 = vadd.f32 %v12566_v44, %v3514_v32  ;;  %10271 = vmatprep.subr.mxu1 %v15237_v35  ;;  %v3706_v56 = vsel %vm3672_vm2, %v12572_v54, -inf }
 0x3f1   :  { %3707 = vmax.xlane.f32.xlu0 %v3706_v56  ;;  %10272 = vmatpush3.msra.mxu1 %v15237_v35 }
 0x3f2   :  { %10283 = vmatprep.subr.mxu1 %v15238_v39  ;;  %v3703_v47 = vsel %vm3672_vm2, %v12578_v21, -inf }
 0x3f3   :  { %v10093_v19 = vpop.f32.mrf.mxu1 }
 0x3f4   :  { %v3519_v10 = vmul.f32 0.35355338, %v10093_v19 }
 0x3f5   :  { %v1407_v32 = vpop.f32.mrf.mxu1  ;;  %3704 = vmax.xlane.f32.xlu0 %v3703_v47 }
 0x3f6   :  { %v12591_v42 = vadd.f32 %v12586_v24, %v3519_v10  ;;  %v3518_v4 = vmul.f32 0.35355338, %v1407_v32 }
 0x3f7   :  { %v10100_v34 = vpop.f32.mrf.mxu0 }
 0x3f8   :  { %v12594_v56 = vadd.f32 %v12586_v24, %v3518_v4  ;;  %v3521_v35 = vmul.f32 0.35355338, %v10100_v34  ;;  %v3718_v49 = vsel %vm3672_vm2, %v12591_v42, -inf }
 0x3f9   :  { %3719 = vmax.xlane.f32.xlu0 %v3718_v49  ;;  %v1494_v59 = vpop.f32.mrf.mxu0 }
 0x3fa   :  { %v12599_v19 = vadd.f32 %v12189_v52, %v3521_v35  ;;  %v3520_v13 = vmul.f32 0.35355338, %v1494_v59  ;;  %v3715_v10 = vsel %vm3672_vm2, %v12594_v56, -inf }
 0x3fc   :  { %v12602_v47 = vadd.f32 %v12189_v52, %v3520_v13  ;;  %v3724_v4 = vsel %vm3672_vm2, %v12599_v19, -inf }
 0x3fd   :  { %3716 = vmax.xlane.f32.xlu0 %v3715_v10  ;;  %3725 = vmax.xlane.f32.xlu1 %v3724_v4  ;;  %v12620_v4 = vpop.permute.xlu0 %5400 }
 0x3fe   :  { %v3721_v34 = vsel %vm3672_vm2, %v12602_v47, -inf  ;;  %15239 = vst [vmem:[#allocation58_spill] sm:$0xff] %v12620_v4 }
 0x401   :  { %3722 = vmax.xlane.f32.xlu1 %v3721_v34  ;;  %v12625_v17 = vpop.permute.xlu0 %5574 }
 0x402   :  { %15240 = vst [vmem:[#allocation53_spill] sm:$0xff] %v12625_v17 }
 0x40f   :  { %v10107_v32 = vpop.f32.mrf.mxu1 }
 0x410   :  { %v3523_v49 = vmul.f32 0.35355338, %v10107_v32 }
 0x411   :  { %v1581_v35 = vpop.f32.mrf.mxu1 }
 0x412   :  { %v12611_v59 = vadd.f32 %v12223_v51, %v3523_v49  ;;  %v3522_v13 = vmul.f32 0.35355338, %v1581_v35 }
 0x414   :  { %v12614_v62 = vadd.f32 %v12223_v51, %v3522_v13  ;;  %v3730_v0 = vsel %vm3672_vm2, %v12611_v59, -inf }
 0x415   :  { %3731 = vmax.xlane.f32.xlu0 %v3730_v0 }
 0x416   :  { %v3727_v10 = vsel %vm3672_vm2, %v12614_v62, -inf }
 0x419   :  { %3728 = vmax.xlane.f32.xlu0 %v3727_v10 }
 0x42b   :  { %v10114_v34 = vpop.f32.mrf.mxu0 }
 0x42c   :  { %v3525_v32 = vmul.f32 0.35355338, %v10114_v34  ;;  %v12636_v34 = vpop.permute.xlu0 %5748 }
 0x42d   :  { %v1668_v41 = vpop.f32.mrf.mxu0  ;;  %15242 = vst [vmem:[#allocation56_spill] sm:$0xff] %v12636_v34 }
 0x42e   :  { %v12623_v49 = vadd.f32 %v12307_v29, %v3525_v32  ;;  %v3524_v35 = vmul.f32 0.35355338, %v1668_v41 }
 0x430   :  { %v12628_v13 = vadd.f32 %v12307_v29, %v3524_v35  ;;  %v3736_v0 = vsel %vm3672_vm2, %v12623_v49, -inf  ;;  %v12640_v12 = vpop.permute.xlu0 %5746 }
 0x431   :  { %3737 = vmax.xlane.f32.xlu1 %v3736_v0  ;;  %15244 = vst [vmem:[#allocation25_spill] sm:$0xff] %v12640_v12 }
 0x432   :  { %v3733_v10 = vsel %vm3672_vm2, %v12628_v13, -inf }
 0x434   :  { %v12652_v43 = vpop.permute.xlu0 %5922 }
 0x435   :  { %3734 = vmax.xlane.f32.xlu1 %v3733_v10  ;;  %v12650_v10 = vpop.permute.xlu1 %6007  ;;  %15246 = vst [vmem:[#allocation42_spill] sm:$0xff] %v12652_v43 }
 0x436   :  { %15245 = vst [vmem:[#allocation31_spill] sm:$0xff] %v12650_v10 }
 0x439   :  { %v12656_v45 = vpop.permute.xlu1 %6183 }
 0x43a   :  { %v10121_v32 = vpop.f32.mrf.mxu1  ;;  %15247 = vst [vmem:[#allocation57_spill] sm:$0xff] %v12656_v45 }
 0x43b   :  { %v3527_v41 = vmul.f32 0.35355338, %v10121_v32 }
 0x43c   :  { %v1755_v35 = vpop.f32.mrf.mxu1 }
 0x43d   :  { %v12643_v9 = vadd.f32 %v12400_v30, %v3527_v41  ;;  %v3526_v8 = vmul.f32 0.35355338, %v1755_v35  ;;  %v12658_v41 = vpop.permute.xlu0 %5920  ;;  %v12660_v35 = vpop.permute.xlu1 %6181 }
 0x43e   :  { %15248 = vst [vmem:[#allocation59_spill] sm:$0xff] %v12658_v41  ;;  %15249 = vst [vmem:[#allocation30_spill] sm:$0xff] %v12660_v35 }
 0x43f   :  { %v12646_v0 = vadd.f32 %v12400_v30, %v3526_v8  ;;  %v3742_v61 = vsel %vm3672_vm2, %v12643_v9, -inf }
 0x440   :  { %3743 = vmax.xlane.f32.xlu0 %v3742_v61 }
 0x441   :  { %v3739_v32 = vsel %vm3672_vm2, %v12646_v0, -inf  ;;  %v12662_v8 = vpop.permute.xlu0 %6096  ;;  %v12664_v20 = vpop.permute.xlu1 %6357 }
 0x442   :  { %15250 = vst [vmem:[#allocation38_spill] sm:$0xff] %v12662_v8  ;;  %15251 = vst [vmem:[#allocation81_spill] sm:$0xff] %v12664_v20 }
 0x444   :  { %3740 = vmax.xlane.f32.xlu0 %v3739_v32 }
 0x445   :  { %v12666_v53 = vpop.permute.xlu0 %6094  ;;  %v12676_v35 = vpop.permute.xlu1 %6355 }
 0x446   :  { %15252 = vst [vmem:[#allocation82_spill] sm:$0xff] %v12666_v53  ;;  %15253 = vst [vmem:[#allocation83_spill] sm:$0xff] %v12676_v35 }
 0x449   :  { %v12678_v8 = vpop.permute.xlu0 %6270  ;;  %v3678_v41 = vpop.xlane.xlu1 %3677 }
 0x44a   :  { %15254 = vst [vmem:[#allocation84_spill] sm:$0xff] %v12678_v8 }
 0x44d   :  { %v12690_v35 = vpop.permute.xlu0 %5572  ;;  %v3690_v28 = vpop.xlane.xlu1 %3689 }
 0x44e   :  { %15255 = vst [vmem:[#allocation85_spill] sm:$0xff] %v12690_v35  ;;  %v3870_v48 = vsub.f32 %v12322_v57, %v3690_v28 }
 0x450   :  { %v3939_v57 = vmul.f32 1.442695, %v3870_v48 }
 0x451   :  { %v12698_v36 = vpop.permute.xlu0 %6268 }
 0x452   :  { %v10128_v12 = vpop.f32.mrf.mxu0  ;;  %15256 = vst [vmem:[#allocation86_spill] sm:$0xff] %v12698_v36 }
 0x453   :  { %v3529_v61 = vmul.f32 0.35355338, %v10128_v12 }
 0x454   :  { %v1842_v10 = vpop.f32.mrf.mxu0 }
 0x455   :  { %v12669_v43 = vadd.f32 %v12482_v15, %v3529_v61  ;;  %v3528_v34 = vmul.f32 0.35355338, %v1842_v10 }
 0x457   :  { %v12672_v32 = vadd.f32 %v12482_v15, %v3528_v34  ;;  %v3748_v45 = vsel %vm3672_vm2, %v12669_v43, -inf }
 0x458   :  { %3749 = vmax.xlane.f32.xlu1 %v3748_v45 }
 0x459   :  { %v3745_v53 = vsel %vm3672_vm2, %v12672_v32, -inf }
 0x45a   :  { %v10142_v20 = vpop.f32.mrf.mxu0 }
 0x45b   :  { %v3533_v12 = vmul.f32 0.35355338, %v10142_v20  ;;  %v3866_v20 = vsub.f32 %v12252_v11, %v3678_v41 }
 0x45c   :  { %3746 = vmax.xlane.f32.xlu1 %v3745_v53  ;;  %v2016_v61 = vpop.f32.mrf.mxu0 }
 0x45d   :  { %v12683_v10 = vadd.f32 %v12520_v55, %v3533_v12  ;;  %v3532_v34 = vmul.f32 0.35355338, %v2016_v61  ;;  %v3931_v23 = vmul.f32 1.442695, %v3866_v20 }
 0x45f   :  { %v12686_v17 = vadd.f32 %v12520_v55, %v3532_v34  ;;  %v3760_v45 = vsel %vm3672_vm2, %v12683_v10, -inf  ;;  %10668 = vpow2.f32 %v3931_v23 }
 0x460   :  { %3761 = vmax.xlane.f32.xlu1 %v3760_v45 }
 0x461   :  { %v3757_v53 = vsel %vm3672_vm2, %v12686_v17, -inf }
 0x462   :  { %v10156_v8 = vpop.f32.mrf.mxu0  ;;  %v3702_v63 = vpop.xlane.xlu1 %3701 }
 0x463   :  { %v3537_v22 = vmul.f32 0.35355338, %v10156_v8 }
 0x464   :  { %3758 = vmax.xlane.f32.xlu1 %v3757_v53  ;;  %v2190_v12 = vpop.f32.mrf.mxu0 }
 0x465   :  { %v12696_v61 = vadd.f32 %v12189_v52, %v3537_v22  ;;  %v3536_v34 = vmul.f32 0.35355338, %v2190_v12  ;;  %v3675_v22 = vpop.xlane.xlu0 %3674 }
 0x466   :  { %v10135_v50 = vpop.f32.mrf.mxu1 }
 0x467   :  { %v3531_v60 = vmul.f32 0.35355338, %v10135_v50  ;;  %v12701_v11 = vadd.f32 %v12189_v52, %v3536_v34  ;;  %v3772_v41 = vsel %vm3672_vm2, %v12696_v61, -inf }
 0x468   :  { %v1929_v8 = vpop.f32.mrf.mxu1  ;;  %3773 = vmax.xlane.f32.xlu1 %v3772_v41 }
 0x469   :  { %v12706_v45 = vadd.f32 %v12566_v44, %v3531_v60  ;;  %v3530_v20 = vmul.f32 0.35355338, %v1929_v8  ;;  %v3769_v34 = vsel %vm3672_vm2, %v12701_v11, -inf  ;;  %v3684_v35 = vpop.xlane.xlu0 %3683 }
 0x46b   :  { %v12709_v53 = vadd.f32 %v12566_v44, %v3530_v20  ;;  %v10170_v12 = vpop.f32.mrf.mxu0  ;;  %v3754_v50 = vsel %vm3672_vm2, %v12706_v45, -inf  ;;  %v3865_v20 = vsub.f32 %v15257_v31, %v3675_v22 }
 0x46c   :  { %v3541_v23 = vmul.f32 0.35355338, %v10170_v12  ;;  %3755 = vmax.xlane.f32.xlu0 %v3754_v50  ;;  %3770 = vmax.xlane.f32.xlu1 %v3769_v34 }
 0x46d   :  { %v2364_v36 = vpop.f32.mrf.mxu0  ;;  %v3751_v2 = vsel %vm3672_vm2, %v12709_v53, -inf  ;;  %v3929_v37 = vmul.f32 1.442695, %v3865_v20 }
 0x46e   :  { %v12716_v60 = vadd.f32 %v12307_v29, %v3541_v23  ;;  %v3540_v41 = vmul.f32 0.35355338, %v2364_v36  ;;  %v10149_v8 = vpop.f32.mrf.mxu1 }
 0x46f   :  { %v3535_v4 = vmul.f32 0.35355338, %v10149_v8  ;;  %10670 = vpow2.f32 %v3929_v37 }
 0x470   :  { %v12722_v12 = vadd.f32 %v12307_v29, %v3540_v41  ;;  %v3784_v50 = vsel %vm3672_vm2, %v12716_v60, -inf  ;;  %3752 = vmax.xlane.f32.xlu0 %v3751_v2  ;;  %v2103_v34 = vpop.f32.mrf.mxu1  ;;  %v3681_v41 = vpop.xlane.xlu0 %3680  ;;  %10672 = vpow2.f32 %v3939_v57 }
 0x471   :  { %v12727_v23 = vadd.f32 %v12586_v24, %v3535_v4  ;;  %3785 = vmax.xlane.f32.xlu1 %v3784_v50  ;;  %v3534_v36 = vmul.f32 0.35355338, %v2103_v34  ;;  %v12737_v4 = vpop.eup %10668  ;;  %v3868_v50 = vsub.f32 %v12228_v14, %v3684_v35 }
 0x472   :  { %v3781_v2 = vsel %vm3672_vm2, %v12722_v12, -inf }
 0x473   :  { %v12730_v31 = vadd.f32 %v12586_v24, %v3534_v36  ;;  %v10184_v22 = vpop.f32.mrf.mxu0  ;;  %v3766_v8 = vsel %vm3672_vm2, %v12727_v23, -inf  ;;  %v3874_v36 = vsub.f32 %v12499_v25, %v3702_v63  ;;  %v3935_v63 = vmul.f32 1.442695, %v3868_v50 }
 0x474   :  { %v3545_v6 = vmul.f32 0.35355338, %v10184_v22  ;;  %3767 = vmax.xlane.f32.xlu0 %v3766_v8  ;;  %v3687_v22 = vpop.xlane.xlu0 %3686  ;;  %v3867_v50 = vsub.f32 %v12235_v16, %v3681_v41 }
 0x475   :  { %3782 = vmax.xlane.f32.xlu1 %v3781_v2  ;;  %v2538_v20 = vpop.f32.mrf.mxu0  ;;  %v3763_v28 = vsel %vm3672_vm2, %v12730_v31, -inf  ;;  %v4060_v2 = vsel %vm3672_vm2, %v12737_v4, 0.0  ;;  %v3869_v25 = vsub.f32 %v12329_v5, %v3687_v22  ;;  %v3947_v35 = vmul.f32 1.442695, %v3874_v36 }
 0x476   :  { %v10163_v34 = vpop.f32.mrf.mxu1  ;;  %v12744_v33 = vadd.f32 %v12482_v15, %v3545_v6  ;;  %v3544_v8 = vmul.f32 0.35355338, %v2538_v20  ;;  %10674 = vpow2.f32 %v3935_v63  ;;  %v3933_v41 = vmul.f32 1.442695, %v3867_v50 }
 0x477   :  { %v3539_v27 = vmul.f32 0.35355338, %v10163_v34  ;;  %v3937_v22 = vmul.f32 1.442695, %v3869_v25  ;;  %10676 = vpow2.f32 %v3947_v35 }
 0x478   :  { %3764 = vmax.xlane.f32.xlu0 %v3763_v28  ;;  %v2277_v3 = vpop.f32.mrf.mxu1  ;;  %v12758_v34 = vadd.f32 %v12482_v15, %v3544_v8 }
 0x479   :  { %v12749_v14 = vadd.f32 %v12223_v51, %v3539_v27  ;;  %4061 = vadd.xlane.f32.xlu1 %v4060_v2  ;;  %v3538_v37 = vmul.f32 0.35355338, %v2277_v3  ;;  %v3796_v27 = vsel %vm3672_vm2, %v12744_v33, -inf  ;;  %v3699_v3 = vpop.xlane.xlu1 %3698  ;;  %10678 = vpow2.f32 %v3937_v22 }
 0x47a   :  { %v3873_v8 = vsub.f32 %v12508_v58, %v3699_v3  ;;  %10680 = vpow2.f32 %v3933_v41 }
 0x47b   :  { %v12753_v48 = vadd.f32 %v12223_v51, %v3538_v37  ;;  %v10198_v6 = vpop.f32.mrf.mxu0  ;;  %v3778_v20 = vsel %vm3672_vm2, %v12749_v14, -inf }
 0x47c   :  { %v3549_v28 = vmul.f32 0.35355338, %v10198_v6  ;;  %3779 = vmax.xlane.f32.xlu0 %v3778_v20  ;;  %v3793_v20 = vsel %vm3672_vm2, %v12758_v34, -inf  ;;  %v3945_v58 = vmul.f32 1.442695, %v3873_v8  ;;  %v3696_v8 = vpop.xlane.xlu0 %3695 }
 0x47d   :  { %3797 = vmax.xlane.f32.xlu1 %v3796_v27  ;;  %v2712_v5 = vpop.f32.mrf.mxu0  ;;  %v3775_v57 = vsel %vm3672_vm2, %v12753_v48, -inf  ;;  %v12776_v27 = vpop.eup %10670 }
 0x47e   :  { %v10177_v36 = vpop.f32.mrf.mxu1  ;;  %v12767_v37 = vadd.f32 %v12520_v55, %v3549_v28  ;;  %v3548_v6 = vmul.f32 0.35355338, %v2712_v5  ;;  %v4057_v50 = vsel %vm3672_vm2, %v12776_v27, 0.0  ;;  %10682 = vpow2.f32 %v3945_v58 }
 0x47f   :  { %v3543_v2 = vmul.f32 0.35355338, %v10177_v36  ;;  %v3872_v58 = vsub.f32 %v12414_v26, %v3696_v8 }
 0x480   :  { %3776 = vmax.xlane.f32.xlu0 %v3775_v57  ;;  %v2451_v63 = vpop.f32.mrf.mxu1  ;;  %v12779_v28 = vadd.f32 %v12520_v55, %v3548_v6  ;;  %v3808_v3 = vsel %vm3672_vm2, %v12767_v37, -inf  ;;  %v3714_v57 = vpop.xlane.xlu1 %3713 }
 0x481   :  { %v12772_v16 = vadd.f32 %v12400_v30, %v3543_v2  ;;  %3794 = vmax.xlane.f32.xlu1 %v3793_v20  ;;  %v3542_v25 = vmul.f32 0.35355338, %v2451_v63  ;;  %v12790_v2 = vpop.eup %10672  ;;  %v3943_v26 = vmul.f32 1.442695, %v3872_v58 }
 0x482   :  { %v3805_v22 = vsel %vm3672_vm2, %v12779_v28, -inf  ;;  %15258 = vst [vmem:[#allocation64_spill] sm:$0xff] %v12790_v2 }
 0x483   :  { %v3790_v35 = vsel %vm3672_vm2, %v12772_v16, -inf  ;;  %v12784_v5 = vadd.f32 %v12400_v30, %v3542_v25  ;;  %v12792_v6 = vpop.eup %10674  ;;  %v3878_v25 = vsub.f32 %v12533_v40, %v3714_v57 }
 0x484   :  { %3791 = vmax.xlane.f32.xlu0 %v3790_v35  ;;  %15259 = vst [vmem:[#allocation87_spill] sm:$0xff] %v12792_v6  ;;  %v12796_v41 = vpop.eup %10676  ;;  %v4072_v35 = vsel %vm3672_vm2, %v12790_v2, 0.0  ;;  %v3711_v57 = vpop.xlane.xlu1 %3710 }
 0x485   :  { %3809 = vmax.xlane.f32.xlu1 %v3808_v3  ;;  %v3787_v63 = vsel %vm3672_vm2, %v12784_v5, -inf  ;;  %15260 = vst [vmem:[#allocation88_spill] sm:$0xff] %v12796_v41  ;;  %v4084_v39 = vsel %vm3672_vm2, %v12796_v41, 0.0 }
 0x486   :  { %v10191_v36 = vpop.f32.mrf.mxu1  ;;  %v12809_v40 = vpop.eup %10678 }
 0x487   :  { %v3547_v20 = vmul.f32 0.35355338, %v10191_v36  ;;  %v3693_v36 = vpop.xlane.xlu0 %3692 }
 0x488   :  { %4058 = vadd.xlane.f32.xlu0 %v4057_v50  ;;  %v4066_v50 = vsel %vm3672_vm2, %v12792_v6, 0.0  ;;  %v2625_v1 = vpop.f32.mrf.mxu1  ;;  %v3871_v8 = vsub.f32 %v12426_v7, %v3693_v36 }
 0x489   :  { %3806 = vmax.xlane.f32.xlu1 %v3805_v22  ;;  %v12803_v3 = vadd.f32 %v12566_v44, %v3547_v20  ;;  %v3955_v22 = vmul.f32 1.442695, %v3878_v25  ;;  %v3546_v20 = vmul.f32 0.35355338, %v2625_v1  ;;  %v3877_v25 = vsub.f32 %v12542_v38, %v3711_v57 }
 0x48a   :  { %v3941_v1 = vmul.f32 1.442695, %v3871_v8 }
 0x48b   :  { %v3802_v18 = vsel %vm3672_vm2, %v12803_v3, -inf  ;;  %10684 = vpow2.f32 %v3955_v22  ;;  %v12824_v58 = vadd.f32 %v12566_v44, %v3546_v20  ;;  %v3953_v38 = vmul.f32 1.442695, %v3877_v25 }
 0x48c   :  { %3788 = vmax.xlane.f32.xlu0 %v3787_v63  ;;  %v10212_v63 = vpop.f32.mrf.mxu0  ;;  %10686 = vpow2.f32 %v3943_v26 }
 0x48d   :  { %4073 = vadd.xlane.f32.xlu1 %v4072_v35  ;;  %v12811_v35 = vpop.eup %10680  ;;  %v3553_v6 = vmul.f32 0.35355338, %v10212_v63  ;;  %10688 = vpow2.f32 %v3941_v1 }
 0x48e   :  { %15261 = vst [vmem:[#allocation89_spill] sm:$0xff] %v12811_v35  ;;  %v10205_v41 = vpop.f32.mrf.mxu1  ;;  %v12819_v2 = vpop.eup %10682  ;;  %v4063_v7 = vsel %vm3672_vm2, %v12811_v35, 0.0  ;;  %10690 = vpow2.f32 %v3953_v38 }
 0x48f   :  { %15262 = vst [vmem:[#allocation90_spill] sm:$0xff] %v12819_v2  ;;  %v3551_v36 = vmul.f32 0.35355338, %v10205_v41  ;;  %v12827_v22 = vadd.f32 %v12189_v52, %v3553_v6  ;;  %v4081_v63 = vsel %vm3672_vm2, %v12819_v2, 0.0  ;;  %v3799_v41 = vsel %vm3672_vm2, %v12824_v58, -inf }
 0x490   :  { %4067 = vadd.xlane.f32.xlu0 %v4066_v50  ;;  %v4069_v50 = vsel %vm3672_vm2, %v12809_v40, 0.0  ;;  %v2799_v57 = vpop.f32.mrf.mxu1 }
 0x491   :  { %4085 = vadd.xlane.f32.xlu1 %v4084_v39  ;;  %v2886_v39 = vpop.f32.mrf.mxu0  ;;  %15263 = vst [vmem:[#allocation91_spill] sm:$0xff] %v12827_v22  ;;  %v12832_v26 = vadd.f32 %v12586_v24, %v3551_v36  ;;  %v3550_v8 = vmul.f32 0.35355338, %v2799_v57  ;;  %v3820_v20 = vsel %vm3672_vm2, %v12827_v22, -inf }
 0x493   :  { %v3814_v1 = vsel %vm3672_vm2, %v12832_v26, -inf }
 0x494   :  { %3803 = vmax.xlane.f32.xlu0 %v3802_v18  ;;  %v3552_v18 = vmul.f32 0.35355338, %v2886_v39 }
 0x495   :  { %4070 = vadd.xlane.f32.xlu1 %v4069_v50  ;;  %v3708_v50 = vpop.xlane.xlu0 %3707 }
 0x496   :  { %v12837_v6 = vadd.f32 %v12189_v52, %v3552_v18  ;;  %v10219_v25 = vpop.f32.mrf.mxu1  ;;  %v3876_v39 = vsub.f32 %v12572_v54, %v3708_v50 }
 0x497   :  { %v3555_v57 = vmul.f32 0.35355338, %v10219_v25 }
 0x498   :  { %4064 = vadd.xlane.f32.xlu0 %v4063_v7  ;;  %v12843_v7 = vadd.f32 %v12586_v24, %v3550_v8  ;;  %v3817_v52 = vsel %vm3672_vm2, %v12837_v6, -inf  ;;  %v12849_v38 = vpop.eup %10684  ;;  %v3951_v18 = vmul.f32 1.442695, %v3876_v39  ;;  %v10226_v8 = vpop.f32.mrf.mxu0 }
 0x499   :  { %4082 = vadd.xlane.f32.xlu1 %v4081_v63  ;;  %v3705_v36 = vpop.xlane.xlu0 %3704  ;;  %15264 = vst [vmem:[#allocation92_spill] sm:$0xff] %v12849_v38  ;;  %v12854_v50 = vpop.eup %10686  ;;  %v4096_v25 = vsel %vm3672_vm2, %v12849_v38, 0.0 }
 0x49a   :  { %v3875_v63 = vsub.f32 %v12578_v21, %v3705_v36  ;;  %v3811_v54 = vsel %vm3672_vm2, %v12843_v7, -inf  ;;  %15265 = vst [vmem:[#allocation93_spill] sm:$0xff] %v12854_v50  ;;  %10692 = vpow2.f32 %v3951_v18  ;;  %v4078_v21 = vsel %vm3672_vm2, %v12854_v50, 0.0  ;;  %v12863_v36 = vpop.eup %10688  ;;  %v3060_v22 = vpop.f32.mrf.mxu0 }
 0x49b   :  { %15266 = vst [vmem:[#allocation94_spill] sm:$0xff] %v12863_v36  ;;  %v12867_v35 = vpop.eup %10690  ;;  %v3726_v18 = vpop.xlane.xlu1 %3725 }
 0x49c   :  { %3800 = vmax.xlane.f32.xlu0 %v3799_v41  ;;  %v12857_v41 = vadd.f32 %v12223_v51, %v3555_v57  ;;  %15267 = vst [vmem:[#allocation95_spill] sm:$0xff] %v12867_v35  ;;  %v10240_v38 = vpop.f32.mrf.mxu0 }
 0x49d   :  { %3821 = vmax.xlane.f32.xlu1 %v3820_v20  ;;  %v2973_v20 = vpop.f32.mrf.mxu1 }
 0x49e   :  { %v3554_v39 = vmul.f32 0.35355338, %v2973_v20  ;;  %v3826_v57 = vsel %vm3672_vm2, %v12857_v41, -inf }
 0x49f   :  { %v10233_v2 = vpop.f32.mrf.mxu1 }
 0x4a0   :  { %3815 = vmax.xlane.f32.xlu0 %v3814_v1  ;;  %v3949_v1 = vmul.f32 1.442695, %v3875_v63  ;;  %v3556_v63 = vmul.f32 0.35355338, %v3060_v22  ;;  %v12870_v20 = vadd.f32 %v12223_v51, %v3554_v39  ;;  %v3559_v50 = vmul.f32 0.35355338, %v10233_v2 }
 0x4a1   :  { %3818 = vmax.xlane.f32.xlu1 %v3817_v52  ;;  %v3557_v52 = vmul.f32 0.35355338, %v10226_v8  ;;  %v3882_v22 = vsub.f32 %v12599_v19, %v3726_v18  ;;  %v3147_v39 = vpop.f32.mrf.mxu1  ;;  %v3234_v18 = vpop.f32.mrf.mxu0 }
 0x4a2   :  { %10694 = vpow2.f32 %v3949_v1  ;;  %v12882_v51 = vadd.f32 %v12307_v29, %v3556_v63  ;;  %v12887_v2 = vadd.f32 %v12400_v30, %v3559_v50 }
 0x4a3   :  { %v12875_v8 = vadd.f32 %v12307_v29, %v3557_v52  ;;  %v3823_v52 = vsel %vm3672_vm2, %v12870_v20, -inf  ;;  %v3963_v29 = vmul.f32 1.442695, %v3882_v22  ;;  %v3558_v22 = vmul.f32 0.35355338, %v3147_v39 }
 0x4a4   :  { %3812 = vmax.xlane.f32.xlu0 %v3811_v54  ;;  %v3720_v54 = vpop.xlane.xlu0 %3719  ;;  %15269 = vst [vmem:[#allocation97_spill] sm:$0xff] %v12882_v51  ;;  %v3829_v63 = vsel %vm3672_vm2, %v12882_v51, -inf  ;;  %v3560_v39 = vmul.f32 0.35355338, %v3234_v18 }
 0x4a5   :  { %4097 = vadd.xlane.f32.xlu1 %v4096_v25  ;;  %v4075_v25 = vsel %vm3672_vm2, %v12863_v36, 0.0  ;;  %15268 = vst [vmem:[#allocation96_spill] sm:$0xff] %v12875_v8  ;;  %v3880_v1 = vsub.f32 %v12591_v42, %v3720_v54  ;;  %v3561_v36 = vmul.f32 0.35355338, %v10240_v38 }
 0x4a6   :  { %v10247_v42 = vpop.f32.mrf.mxu1 }
 0x4a7   :  { %v3959_v19 = vmul.f32 1.442695, %v3880_v1  ;;  %v12898_v50 = vadd.f32 %v12482_v15, %v3561_v36  ;;  %v10254_v1 = vpop.f32.mrf.mxu0 }
 0x4a8   :  { %4079 = vadd.xlane.f32.xlu0 %v4078_v21  ;;  %v4093_v21 = vsel %vm3672_vm2, %v12867_v35, 0.0  ;;  %v12894_v35 = vpop.eup %10692  ;;  %v3565_v36 = vmul.f32 0.35355338, %v10254_v1 }
 0x4a9   :  { %3827 = vmax.xlane.f32.xlu1 %v3826_v57  ;;  %v3717_v57 = vpop.xlane.xlu0 %3716  ;;  %10696 = vpow2.f32 %v3959_v19 }
 0x4aa   :  { %v3879_v54 = vsub.f32 %v12594_v56, %v3717_v57  ;;  %10698 = vpow2.f32 %v3963_v29  ;;  %v3321_v57 = vpop.f32.mrf.mxu1 }
 0x4ac   :  { %4076 = vadd.xlane.f32.xlu0 %v4075_v25  ;;  %v3832_v25 = vsel %vm3672_vm2, %v12875_v8, -inf  ;;  %v3563_v8 = vmul.f32 0.35355338, %v10247_v42  ;;  %v3957_v56 = vmul.f32 1.442695, %v3879_v54  ;;  %v3844_v42 = vsel %vm3672_vm2, %v12898_v50, -inf }
 0x4ad   :  { %4094 = vadd.xlane.f32.xlu1 %v4093_v21  ;;  %v3723_v21 = vpop.xlane.xlu1 %3722  ;;  %v12912_v54 = vadd.f32 %v12400_v30, %v3558_v22  ;;  %v12923_v30 = vadd.f32 %v12482_v15, %v3560_v39 }
 0x4ae   :  { %v3881_v38 = vsub.f32 %v12602_v47, %v3723_v21  ;;  %v12907_v21 = vadd.f32 %v12566_v44, %v3563_v8  ;;  %10700 = vpow2.f32 %v3957_v56  ;;  %v12918_v8 = vadd.f32 %v12520_v55, %v3565_v36  ;;  %v3732_v56 = vpop.xlane.xlu0 %3731 }
 0x4af   :  { %v12904_v51 = vpop.eup %10694  ;;  %v3835_v22 = vsel %vm3672_vm2, %v12912_v54, -inf  ;;  %v3884_v15 = vsub.f32 %v12611_v59, %v3732_v56 }
 0x4b0   :  { %3824 = vmax.xlane.f32.xlu0 %v3823_v52  ;;  %v3838_v52 = vsel %vm3672_vm2, %v12887_v2, -inf  ;;  %v3961_v47 = vmul.f32 1.442695, %v3881_v38  ;;  %v4087_v38 = vsel %vm3672_vm2, %v12904_v51, 0.0  ;;  %v3850_v1 = vsel %vm3672_vm2, %v12907_v21, -inf }
 0x4b1   :  { %3833 = vmax.xlane.f32.xlu1 %v3832_v25  ;;  %v4090_v25 = vsel %vm3672_vm2, %v12894_v35, 0.0  ;;  %v3856_v36 = vsel %vm3672_vm2, %v12918_v8, -inf }
 0x4b2   :  { %10702 = vpow2.f32 %v3961_v47 }
 0x4b4   :  { %3830 = vmax.xlane.f32.xlu0 %v3829_v63  ;;  %v10261_v63 = vpop.f32.mrf.mxu1 }
 0x4b5   :  { %3839 = vmax.xlane.f32.xlu1 %v3838_v52  ;;  %v3567_v52 = vmul.f32 0.35355338, %v10261_v63 }
 0x4b6   :  { %v12933_v63 = vpop.eup %10696 }
 0x4b7   :  { %v12929_v47 = vadd.f32 %v12586_v24, %v3567_v52  ;;  %v12938_v39 = vpop.eup %10698  ;;  %v4102_v59 = vsel %vm3672_vm2, %v12933_v63, 0.0 }
 0x4b8   :  { %4091 = vadd.xlane.f32.xlu0 %v4090_v25  ;;  %v4108_v56 = vsel %vm3672_vm2, %v12938_v39, 0.0 }
 0x4b9   :  { %3845 = vmax.xlane.f32.xlu1 %v3844_v42  ;;  %15270 = vst [vmem:[#allocation98_spill] sm:$0xff] %v12929_v47 }
 0x4ba   :  { %v3738_v19 = vpop.xlane.xlu1 %3737 }
 0x4bb   :  { %v3886_v29 = vsub.f32 %v12623_v49, %v3738_v19  ;;  %v3729_v19 = vpop.xlane.xlu0 %3728  ;;  %v12943_v52 = vpop.eup %10700 }
 0x4bc   :  { %4088 = vadd.xlane.f32.xlu0 %v4087_v38  ;;  %v3883_v38 = vsub.f32 %v12614_v62, %v3729_v19  ;;  %v3495_v19 = vpop.f32.mrf.mxu1 }
 0x4bd   :  { %v3971_v25 = vmul.f32 1.442695, %v3886_v29  ;;  %3851 = vmax.xlane.f32.xlu1 %v3850_v1  ;;  %v3862_v29 = vsel %vm3672_vm2, %v12929_v47, -inf  ;;  %v3408_v1 = vpop.f32.mrf.mxu0 }
 0x4be   :  { %v3735_v18 = vpop.xlane.xlu1 %3734 }
 0x4bf   :  { %v3885_v49 = vsub.f32 %v12628_v13, %v3735_v18  ;;  %10704 = vpow2.f32 %v3971_v25  ;;  %v3841_v13 = vsel %vm3672_vm2, %v12923_v30, -inf  ;;  %v3967_v25 = vmul.f32 1.442695, %v3884_v15 }
 0x4c0   :  { %3836 = vmax.xlane.f32.xlu0 %v3835_v22  ;;  %v3562_v18 = vmul.f32 0.35355338, %v3321_v57  ;;  %v4099_v57 = vsel %vm3672_vm2, %v12943_v52, 0.0 }
 0x4c1   :  { %v3969_v42 = vmul.f32 1.442695, %v3885_v49  ;;  %3857 = vmax.xlane.f32.xlu1 %v3856_v36  ;;  %v12949_v49 = vpop.eup %10702  ;;  %v3564_v36 = vmul.f32 0.35355338, %v3408_v1 }
 0x4c2   :  { %v12952_v62 = vadd.f32 %v12566_v44, %v3562_v18  ;;  %v3566_v44 = vmul.f32 0.35355338, %v3495_v19 }
 0x4c3   :  { %10706 = vpow2.f32 %v3969_v42  ;;  %v3965_v42 = vmul.f32 1.442695, %v3883_v38  ;;  %v12962_v38 = vadd.f32 %v12520_v55, %v3564_v36 }
 0x4c4   :  { %3842 = vmax.xlane.f32.xlu0 %v3841_v13  ;;  %10708 = vpow2.f32 %v3967_v25  ;;  %v4105_v13 = vsel %vm3672_vm2, %v12949_v49, 0.0  ;;  %v3847_v25 = vsel %vm3672_vm2, %v12952_v62, -inf }
 0x4c5   :  { %3863 = vmax.xlane.f32.xlu1 %v3862_v29  ;;  %10710 = vpow2.f32 %v3965_v42  ;;  %v3853_v36 = vsel %vm3672_vm2, %v12962_v38, -inf }
 0x4c8   :  { %4103 = vadd.xlane.f32.xlu0 %v4102_v59 }
 0x4c9   :  { %4109 = vadd.xlane.f32.xlu1 %v4108_v56  ;;  %v3744_v22 = vpop.xlane.xlu0 %3743 }
 0x4ca   :  { %v3888_v15 = vsub.f32 %v12643_v9, %v3744_v22  ;;  %v12972_v22 = vadd.f32 %v12586_v24, %v3566_v44 }
 0x4cc   :  { %4100 = vadd.xlane.f32.xlu0 %v4099_v57  ;;  %v12959_v29 = vpop.eup %10704  ;;  %v3975_v1 = vmul.f32 1.442695, %v3888_v15  ;;  %15271 = vst [vmem:[#allocation99_spill] sm:$0xff] %v12972_v22  ;;  %v3859_v42 = vsel %vm3672_vm2, %v12972_v22, -inf }
 0x4cd   :  { %4106 = vadd.xlane.f32.xlu1 %v4105_v13  ;;  %v3741_v59 = vpop.xlane.xlu0 %3740  ;;  %v4120_v18 = vsel %vm3672_vm2, %v12959_v29, 0.0 }
 0x4ce   :  { %v3887_v9 = vsub.f32 %v12646_v0, %v3741_v59  ;;  %10712 = vpow2.f32 %v3975_v1 }
 0x4d0   :  { %3848 = vmax.xlane.f32.xlu0 %v3847_v25  ;;  %v12969_v56 = vpop.eup %10706  ;;  %v3973_v55 = vmul.f32 1.442695, %v3887_v9 }
 0x4d1   :  { %4121 = vadd.xlane.f32.xlu1 %v4120_v18  ;;  %v4117_v0 = vsel %vm3672_vm2, %v12969_v56, 0.0  ;;  %v12980_v15 = vpop.eup %10708 }
 0x4d2   :  { %10714 = vpow2.f32 %v3973_v55  ;;  %v12982_v57 = vpop.eup %10710  ;;  %v4114_v24 = vsel %vm3672_vm2, %v12980_v15, 0.0 }
 0x4d3   :  { %v4111_v19 = vsel %vm3672_vm2, %v12982_v57, 0.0 }
 0x4d4   :  { %3854 = vmax.xlane.f32.xlu0 %v3853_v36 }
 0x4d5   :  { %4118 = vadd.xlane.f32.xlu1 %v4117_v0 }
 0x4d8   :  { %3860 = vmax.xlane.f32.xlu0 %v3859_v42 }
 0x4db   :  { %v12988_v13 = vpop.eup %10712 }
 0x4dc   :  { %4115 = vadd.xlane.f32.xlu0 %v4114_v24  ;;  %v4126_v1 = vsel %vm3672_vm2, %v12988_v13, 0.0 }
 0x4df   :  { %v12993_v9 = vpop.eup %10714 }
 0x4e0   :  { %4112 = vadd.xlane.f32.xlu0 %v4111_v19  ;;  %15272 = vst [vmem:[#allocation100_spill] sm:$0xff] %v12993_v9  ;;  %v4123_v36 = vsel %vm3672_vm2, %v12993_v9, 0.0 }
 0x4e1   :  { %v3750_v59 = vpop.xlane.xlu1 %3749 }
 0x4e2   :  { %v3890_v44 = vsub.f32 %v12669_v43, %v3750_v59 }
 0x4e4   :  { %v3979_v25 = vmul.f32 1.442695, %v3890_v44  ;;  %4127 = vadd.xlane.f32.xlu0 %v4126_v1 }
 0x4e5   :  { %v3747_v18 = vpop.xlane.xlu1 %3746 }
 0x4e6   :  { %10716 = vpow2.f32 %v3979_v25  ;;  %v3889_v55 = vsub.f32 %v12672_v32, %v3747_v18 }
 0x4e8   :  { %v3977_v0 = vmul.f32 1.442695, %v3889_v55  ;;  %4124 = vadd.xlane.f32.xlu0 %v4123_v36 }
 0x4e9   :  { %v3762_v42 = vpop.xlane.xlu1 %3761 }
 0x4ea   :  { %10718 = vpow2.f32 %v3977_v0  ;;  %v3894_v55 = vsub.f32 %v12683_v10, %v3762_v42 }
 0x4ed   :  { %v3759_v24 = vpop.xlane.xlu1 %3758 }
 0x4ee   :  { %v3893_v59 = vsub.f32 %v12686_v17, %v3759_v24 }
 0x4f0   :  { %v3985_v36 = vmul.f32 1.442695, %v3893_v59 }
 0x4f1   :  { %v3774_v43 = vpop.xlane.xlu1 %3773 }
 0x4f2   :  { %v3898_v42 = vsub.f32 %v12696_v61, %v3774_v43 }
 0x4f3   :  { %v12998_v19 = vpop.eup %10716 }
 0x4f4   :  { %15273 = vst [vmem:[#allocation101_spill] sm:$0xff] %v12998_v19  ;;  %v4132_v44 = vsel %vm3672_vm2, %v12998_v19, 0.0  ;;  %v3987_v19 = vmul.f32 1.442695, %v3894_v55 }
 0x4f5   :  { %4133 = vadd.xlane.f32.xlu1 %v4132_v44  ;;  %v3756_v1 = vpop.xlane.xlu0 %3755  ;;  %v3771_v25 = vpop.xlane.xlu1 %3770 }
 0x4f6   :  { %v3892_v32 = vsub.f32 %v12706_v45, %v3756_v1  ;;  %v3897_v44 = vsub.f32 %v12701_v11, %v3771_v25 }
 0x4f7   :  { %v13004_v18 = vpop.eup %10718 }
 0x4f8   :  { %v3983_v0 = vmul.f32 1.442695, %v3892_v32  ;;  %v4129_v22 = vsel %vm3672_vm2, %v13004_v18, 0.0  ;;  %v3993_v59 = vmul.f32 1.442695, %v3897_v44 }
 0x4f9   :  { %4130 = vadd.xlane.f32.xlu1 %v4129_v22  ;;  %v3753_v9 = vpop.xlane.xlu0 %3752 }
 0x4fa   :  { %10720 = vpow2.f32 %v3983_v0  ;;  %v3786_v17 = vpop.xlane.xlu1 %3785  ;;  %v3891_v24 = vsub.f32 %v12709_v53, %v3753_v9  ;;  %v3995_v9 = vmul.f32 1.442695, %v3898_v42 }
 0x4fb   :  { %10722 = vpow2.f32 %v3985_v36 }
 0x4fc   :  { %v3981_v45 = vmul.f32 1.442695, %v3891_v24 }
 0x4fd   :  { %v3768_v1 = vpop.xlane.xlu0 %3767 }
 0x4fe   :  { %10724 = vpow2.f32 %v3981_v45  ;;  %v3783_v47 = vpop.xlane.xlu1 %3782  ;;  %v3896_v10 = vsub.f32 %v12727_v23, %v3768_v1  ;;  %v3902_v1 = vsub.f32 %v12716_v60, %v3786_v17 }
 0x4ff   :  { %10726 = vpow2.f32 %v3987_v19  ;;  %v3901_v22 = vsub.f32 %v12722_v12, %v3783_v47 }
 0x500   :  { %v3991_v32 = vmul.f32 1.442695, %v3896_v10 }
 0x501   :  { %v3765_v0 = vpop.xlane.xlu0 %3764  ;;  %v4001_v25 = vmul.f32 1.442695, %v3901_v22 }
 0x502   :  { %10728 = vpow2.f32 %v3991_v32  ;;  %v4062_v53 = vpop.xlane.xlu1 %4061  ;;  %v3895_v11 = vsub.f32 %v12730_v31, %v3765_v0 }
 0x503   :  { %10730 = vpow2.f32 %v3993_v59 }
 0x504   :  { %10732 = vrcp.f32 %v4062_v53  ;;  %v3989_v55 = vmul.f32 1.442695, %v3895_v11 }
 0x505   :  { %v3780_v36 = vpop.xlane.xlu0 %3779 }
 0x506   :  { %10734 = vpow2.f32 %v3989_v55  ;;  %v13015_v23 = vpop.xlane.xlu1 %3797  ;;  %v3900_v61 = vsub.f32 %v12749_v14, %v3780_v36 }
 0x507   :  { %v13018_v43 = vpop.eup %10720  ;;  %10736 = vpow2.f32 %v3995_v9 }
 0x508   :  { %10738 = vpow2.f32 %v4001_v25  ;;  %v3999_v12 = vmul.f32 1.442695, %v3900_v61  ;;  %v4138_v47 = vsel %vm3672_vm2, %v13018_v43, 0.0  ;;  %v13022_v31 = vpop.eup %10722 }
 0x509   :  { %4139 = vadd.xlane.f32.xlu0 %v4138_v47  ;;  %v3777_v19 = vpop.xlane.xlu0 %3776  ;;  %v4141_v42 = vsel %vm3672_vm2, %v13022_v31, 0.0 }
 0x50a   :  { %v3795_v24 = vpop.xlane.xlu1 %3794  ;;  %v3899_v44 = vsub.f32 %v12753_v48, %v3777_v19  ;;  %10740 = vpow2.f32 %v3999_v12 }
 0x50b   :  { %v13025_v45 = vpop.eup %10724  ;;  %v3905_v14 = vsub.f32 %v12758_v34, %v3795_v24  ;;  %v4003_v34 = vmul.f32 1.442695, %v3902_v1 }
 0x50c   :  { %v3997_v10 = vmul.f32 1.442695, %v3899_v44  ;;  %v4135_v59 = vsel %vm3672_vm2, %v13025_v45, 0.0  ;;  %v13033_v22 = vpop.eup %10726 }
 0x50d   :  { %v4009_v32 = vmul.f32 1.442695, %v3905_v14  ;;  %4142 = vadd.xlane.f32.xlu0 %v4141_v42  ;;  %4136 = vadd.xlane.f32.xlu1 %v4135_v59  ;;  %v3792_v48 = vpop.xlane.xlu0 %3791  ;;  %v4144_v11 = vsel %vm3672_vm2, %v13033_v22, 0.0  ;;  %v3906_v59 = vsub.f32 %v12744_v33, %v13015_v23 }
 0x50e   :  { %v13035_v0 = vpop.xlane.xlu1 %3809  ;;  %v3904_v60 = vsub.f32 %v12772_v16, %v3792_v48 }
 0x50f   :  { %v13038_v17 = vpop.eup %10728  ;;  %10742 = vpow2.f32 %v4009_v32 }
 0x510   :  { %v13040_v53 = vpop.eup %10730  ;;  %10744 = vpow2.f32 %v3997_v10  ;;  %v4150_v9 = vsel %vm3672_vm2, %v13038_v17, 0.0  ;;  %v4007_v36 = vmul.f32 1.442695, %v3904_v60 }
 0x511   :  { %v10733_v25 = vpop.eup %10732  ;;  %4145 = vadd.xlane.f32.xlu1 %v4144_v11  ;;  %4151 = vadd.xlane.f32.xlu0 %v4150_v9  ;;  %v4059_v55 = vpop.xlane.xlu0 %4058  ;;  %10746 = vpow2.f32 %v4003_v34  ;;  %v4153_v24 = vsel %vm3672_vm2, %v13040_v53, 0.0  ;;  %v4011_v9 = vmul.f32 1.442695, %v3906_v59 }
 0x512   :  { %v3807_v61 = vpop.xlane.xlu1 %3806  ;;  %v4314_v16 = vmul.f32 %v10733_v25, %v12737_v4  ;;  %10748 = vrcp.f32 %v4059_v55 }
 0x513   :  { %v13047_v12 = vpop.eup %10734  ;;  %v3909_v47 = vsub.f32 %v12779_v28, %v3807_v61  ;;  %10750 = vpow2.f32 %v4007_v36 }
 0x514   :  { %v13050_v19 = vpop.eup %10736  ;;  %v4147_v44 = vsel %vm3672_vm2, %v13047_v12, 0.0  ;;  %4378 = vst.msk [vmem:[%s14986_s23 + $0x8] sm:$0xff] %vm3672_vm2, %v4314_v16 }
 0x515   :  { %v13060_v4 = vpop.eup %10738  ;;  %v4017_v1 = vmul.f32 1.442695, %v3909_v47  ;;  %4154 = vadd.xlane.f32.xlu1 %v4153_v24  ;;  %4148 = vadd.xlane.f32.xlu0 %v4147_v44  ;;  %v3789_v28 = vpop.xlane.xlu0 %3788  ;;  %v4156_v42 = vsel %vm3672_vm2, %v13050_v19, 0.0 }
 0x516   :  { %v4074_v14 = vpop.xlane.xlu1 %4073  ;;  %v3903_v10 = vsub.f32 %v12784_v5, %v3789_v28  ;;  %v4165_v48 = vsel %vm3672_vm2, %v13060_v4, 0.0 }
 0x517   :  { %10752 = vpow2.f32 %v4017_v1  ;;  %v13069_v60 = vpop.eup %10740 }
 0x518   :  { %10754 = vrcp.f32 %v4074_v14  ;;  %v4005_v32 = vmul.f32 1.442695, %v3903_v10  ;;  %v4162_v33 = vsel %vm3672_vm2, %v13069_v60, 0.0 }
 0x519   :  { %4166 = vadd.xlane.f32.xlu1 %v4165_v48  ;;  %4157 = vadd.xlane.f32.xlu0 %v4156_v42  ;;  %v4068_v34 = vpop.xlane.xlu0 %4067 }
 0x51a   :  { %10756 = vpow2.f32 %v4005_v32  ;;  %v4086_v11 = vpop.xlane.xlu1 %4085 }
 0x51b   :  { %10758 = vrcp.f32 %v4086_v11 }
 0x51c   :  { %v13071_v5 = vpop.eup %10742  ;;  %10760 = vrcp.f32 %v4068_v34  ;;  %v3910_v34 = vsub.f32 %v12767_v37, %v13035_v0 }
 0x51d   :  { %v13075_v23 = vpop.eup %10744  ;;  %v4177_v25 = vsel %vm3672_vm2, %v13071_v5, 0.0  ;;  %4163 = vadd.xlane.f32.xlu0 %v4162_v33  ;;  %v3804_v55 = vpop.xlane.xlu0 %3803  ;;  %v15274_v33 = vld [vmem:[#allocation64_spill] sm:$0xff] }
 0x51e   :  { %v4071_v36 = vpop.xlane.xlu1 %4070  ;;  %4178 = vadd.xlane.f32.xlu1 %v4177_v25  ;;  %v3908_v61 = vsub.f32 %v12803_v3, %v3804_v55  ;;  %v13080_v47 = vpop.eup %10746  ;;  %v4159_v24 = vsel %vm3672_vm2, %v13075_v23, 0.0 }
 0x51f   :  { %10762 = vrcp.f32 %v4071_v36  ;;  %v10749_v44 = vpop.eup %10748  ;;  %v4168_v3 = vsel %vm3672_vm2, %v13080_v47, 0.0 }
 0x520   :  { %10764 = vpow2.f32 %v4011_v9  ;;  %v4313_v14 = vmul.f32 %v10749_v44, %v12776_v27  ;;  %v13085_v10 = vpop.eup %10750  ;;  %v4015_v42 = vmul.f32 1.442695, %v3908_v61 }
 0x521   :  { %4160 = vadd.xlane.f32.xlu0 %v4159_v24  ;;  %v4065_v1 = vpop.xlane.xlu0 %4064  ;;  %v4174_v37 = vsel %vm3672_vm2, %v13085_v10, 0.0  ;;  %v15277_v24 = vld [vmem:[#allocation88_spill] sm:$0xff] }
 0x522   :  { %v4083_v28 = vpop.xlane.xlu1 %4082  ;;  %4377 = vst.msk [vmem:[%s14986_s23] sm:$0xff] %vm3672_vm2, %v4313_v14  ;;  %10266 = vmatprep.mubr.msk.f32.mxu0 %vm3672_vm2, %v4313_v14 }
 0x523   :  { %10766 = vrcp.f32 %v4083_v28  ;;  %10267 = vmatmul.mubr.msk.f32.vlgmr.msra.gmra.mxu0 %vm3672_vm2, %v4314_v16  ;;  %v15275_v16 = vld [vmem:[#allocation43_spill] sm:$0xff] }
 0x524   :  { %v13087_v59 = vpop.eup %10752  ;;  %10768 = vrcp.f32 %v4065_v1  ;;  %10277 = vmatpush3.msra.mxu0 %v15229_v46  ;;  %v4019_v1 = vmul.f32 1.442695, %v3910_v34 }
 0x525   :  { %v10755_v32 = vpop.eup %10754  ;;  %v4189_v27 = vsel %vm3672_vm2, %v13087_v59, 0.0  ;;  %4169 = vadd.xlane.f32.xlu0 %v4168_v3  ;;  %v3801_v48 = vpop.xlane.xlu0 %3800  ;;  %10770 = vpow2.f32 %v4015_v42  ;;  %10278 = vmatprep.subr.mxu0 %v15275_v16  ;;  %v15278_v42 = vld [vmem:[#allocation87_spill] sm:$0xff] }
 0x526   :  { %v13102_v11 = vpop.xlane.xlu1 %3821  ;;  %4190 = vadd.xlane.f32.xlu1 %v4189_v27  ;;  %v3907_v9 = vsub.f32 %v12824_v58, %v3801_v48  ;;  %v4318_v25 = vmul.f32 %v10755_v32, %v15274_v33  ;;  %10279 = vmatpush3.msra.mxu0 %v15275_v16  ;;  %v15276_v58 = vld [vmem:[#allocation50_spill] sm:$0xff] }
 0x527   :  { %v13106_v55 = vpop.eup %10756  ;;  %10290 = vmatprep.subr.mxu0 %v15276_v58 }
 0x528   :  { %v10759_v36 = vpop.eup %10758  ;;  %v4013_v61 = vmul.f32 1.442695, %v3907_v9  ;;  %4382 = vst.msk [vmem:[%s14986_s23 + $0x28] sm:$0xff] %vm3672_vm2, %v4318_v25  ;;  %v4171_v48 = vsel %vm3672_vm2, %v13106_v55, 0.0 }
 0x529   :  { %v10761_v46 = vpop.eup %10760  ;;  %4175 = vadd.xlane.f32.xlu0 %v4174_v37  ;;  %v3816_v0 = vpop.xlane.xlu0 %3815  ;;  %v4322_v44 = vmul.f32 %v10759_v36, %v15277_v24 }
 0x52a   :  { %10772 = vpow2.f32 %v4013_v61  ;;  %v3819_v28 = vpop.xlane.xlu1 %3818  ;;  %v3912_v14 = vsub.f32 %v12832_v26, %v3816_v0  ;;  %v4316_v3 = vmul.f32 %v10761_v46, %v15278_v42  ;;  %v15279_v0 = vld [vmem:[#allocation90_spill] sm:$0xff] }
 0x52b   :  { %v3913_v32 = vsub.f32 %v12837_v6, %v3819_v28  ;;  %4386 = vst.msk [vmem:[%s14986_s23 + $0x48] sm:$0xff] %vm3672_vm2, %v4322_v44  ;;  %10774 = vpow2.f32 %v4019_v1  ;;  %v15280_v1 = vld [vmem:[#allocation52_spill] sm:$0xff] }
 0x52c   :  { %v10763_v27 = vpop.eup %10762  ;;  %4380 = vst.msk [vmem:[%s14986_s23 + $0x18] sm:$0xff] %vm3672_vm2, %v4316_v3  ;;  %v4023_v33 = vmul.f32 1.442695, %v3912_v14  ;;  %v15281_v14 = vld [vmem:[#allocation89_spill] sm:$0xff] }
 0x52d   :  { %v13131_v34 = vpop.eup %10764  ;;  %v4025_v26 = vmul.f32 1.442695, %v3913_v32  ;;  %4172 = vadd.xlane.f32.xlu0 %v4171_v48  ;;  %v3813_v9 = vpop.xlane.xlu0 %3812  ;;  %v4317_v6 = vmul.f32 %v10763_v27, %v12809_v40  ;;  %v15282_v32 = vld [vmem:[#allocation91_spill] sm:$0xff] }
 0x52e   :  { %v4098_v16 = vpop.xlane.xlu1 %4097  ;;  %v3911_v36 = vsub.f32 %v12843_v7, %v3813_v9  ;;  %v4180_v40 = vsel %vm3672_vm2, %v13131_v34, 0.0 }
 0x52f   :  { %10776 = vpow2.f32 %v4025_v26  ;;  %4381 = vst.msk [vmem:[%s14986_s23 + $0x20] sm:$0xff] %vm3672_vm2, %v4317_v6  ;;  %10280 = vmatprep.mubr.msk.f32.mxu0 %vm3672_vm2, %v4317_v6  ;;  %v15284_v26 = vld [vmem:[#allocation40_spill] sm:$0xff] }
 0x530   :  { %v10767_v61 = vpop.eup %10766  ;;  %10778 = vrcp.f32 %v4098_v16  ;;  %10281 = vmatmul.mubr.msk.f32.vlgmr.msra.gmra.mxu0 %vm3672_vm2, %v4318_v25  ;;  %v4021_v46 = vmul.f32 1.442695, %v3911_v36  ;;  %v3914_v25 = vsub.f32 %v15282_v32, %v13102_v11  ;;  %v15285_v16 = vld [vmem:[#allocation47_spill] sm:$0xff]  ;;  %v15286_v36 = vld [vmem:[#allocation70_spill] sm:$0xff] }
 0x531   :  { %v10769_v37 = vpop.eup %10768  ;;  %10291 = vmatpush3.msra.mxu0 %v15276_v58  ;;  %4181 = vadd.xlane.f32.xlu0 %v4180_v40  ;;  %v4080_v7 = vpop.xlane.xlu0 %4079  ;;  %v4321_v24 = vmul.f32 %v10767_v61, %v15279_v0  ;;  %10780 = vpow2.f32 %v4023_v33 }
 0x532   :  { %10292 = vmatprep.subr.mxu0 %v15280_v1  ;;  %v3828_v28 = vpop.xlane.xlu1 %3827  ;;  %v4315_v42 = vmul.f32 %v10769_v37, %v15281_v14  ;;  %10782 = vrcp.f32 %v4080_v7  ;;  %v13156_v58 = vpop.eup %10770  ;;  %v4027_v33 = vmul.f32 1.442695, %v3914_v25  ;;  %v15288_v37 = vld [vmem:[#allocation48_spill] sm:$0xff] }
 0x533   :  { %v3916_v27 = vsub.f32 %v12857_v41, %v3828_v28  ;;  %10293 = vmatpush3.msra.mxu0 %v15280_v1  ;;  %4385 = vst.msk [vmem:[%s14986_s23 + $0x40] sm:$0xff] %vm3672_vm2, %v4321_v24  ;;  %10294 = vmatprep.mubr.msk.f32.mxu0 %vm3672_vm2, %v4321_v24  ;;  %v15283_v41 = vld [vmem:[#allocation67_spill] sm:$0xff]  ;;  %10784 = vpow2.f32 %v4021_v46  ;;  %v15289_v24 = vld [vmem:[#allocation96_spill] sm:$0xff] }
 0x534   :  { %4379 = vst.msk [vmem:[%s14986_s23 + $0x10] sm:$0xff] %vm3672_vm2, %v4315_v42  ;;  %10273 = vmatprep.mubr.msk.f32.mxu1 %vm3672_vm2, %v4315_v42  ;;  %10304 = vmatprep.subr.mxu0 %v15283_v41 }
 0x535   :  { %v4031_v11 = vmul.f32 1.442695, %v3916_v27  ;;  %10274 = vmatmul.mubr.msk.f32.vlgmr.msra.gmra.mxu1 %vm3672_vm2, %v4316_v3  ;;  %10295 = vmatmul.mubr.msk.f32.vlgmr.msra.gmra.mxu0 %vm3672_vm2, %v4322_v44  ;;  %v4077_v48 = vpop.xlane.xlu0 %4076  ;;  %v4186_v3 = vsel %vm3672_vm2, %v13156_v58, 0.0  ;;  %v15287_v44 = vld [vmem:[#allocation72_spill] sm:$0xff] }
 0x536   :  { %10284 = vmatpush3.msra.mxu1 %v15284_v26  ;;  %10305 = vmatpush3.msra.mxu0 %v15283_v41  ;;  %v4095_v9 = vpop.xlane.xlu1 %4094  ;;  %10786 = vrcp.f32 %v4077_v48  ;;  %v15291_v48 = vld [vmem:[#allocation92_spill] sm:$0xff] }
 0x537   :  { %v13168_v6 = vpop.eup %10772  ;;  %10788 = vpow2.f32 %v4031_v11  ;;  %10285 = vmatprep.subr.mxu1 %v15285_v16  ;;  %10306 = vmatprep.subr.mxu0 %v15286_v36  ;;  %v15290_v11 = vld [vmem:[#allocation97_spill] sm:$0xff] }
 0x538   :  { %10790 = vrcp.f32 %v4095_v9  ;;  %10307 = vmatpush3.msra.mxu0 %v15286_v36  ;;  %4187 = vadd.xlane.f32.xlu0 %v4186_v3  ;;  %v4183_v61 = vsel %vm3672_vm2, %v13168_v6, 0.0  ;;  %v13181_v0 = vpop.eup %10774 }
 0x539   :  { %10286 = vmatpush3.msra.mxu1 %v15285_v16  ;;  %10318 = vmatprep.subr.mxu0 %v15287_v44  ;;  %v3825_v40 = vpop.xlane.xlu0 %3824  ;;  %10792 = vpow2.f32 %v4027_v33  ;;  %v4192_v16 = vsel %vm3672_vm2, %v13181_v0, 0.0 }
 0x53a   :  { %10297 = vmatprep.subr.mxu1 %v15288_v37  ;;  %v3834_v46 = vpop.xlane.xlu1 %3833  ;;  %v3915_v7 = vsub.f32 %v12870_v20, %v3825_v40 }
 0x53b   :  { %v3918_v1 = vsub.f32 %v15289_v24, %v3834_v46  ;;  %v15292_v46 = vld [vmem:[#allocation93_spill] sm:$0xff] }
 0x53c   :  { %v13184_v28 = vpop.eup %10776  ;;  %4184 = vadd.xlane.f32.xlu0 %v4183_v61  ;;  %v4029_v14 = vmul.f32 1.442695, %v3915_v7 }
 0x53d   :  { %v10779_v42 = vpop.eup %10778  ;;  %v4035_v32 = vmul.f32 1.442695, %v3918_v1  ;;  %v4201_v25 = vsel %vm3672_vm2, %v13184_v28, 0.0  ;;  %v3831_v27 = vpop.xlane.xlu0 %3830 }
 0x53e   :  { %10794 = vpow2.f32 %v4029_v14  ;;  %v3840_v41 = vpop.xlane.xlu1 %3839  ;;  %4202 = vadd.xlane.f32.xlu1 %v4201_v25  ;;  %v3917_v20 = vsub.f32 %v15290_v11, %v3831_v27  ;;  %v4326_v26 = vmul.f32 %v10779_v42, %v15291_v48  ;;  %v13190_v9 = vpop.eup %10780  ;;  %v15293_v25 = vld [vmem:[#allocation94_spill] sm:$0xff] }
 0x53f   :  { %10796 = vpow2.f32 %v4035_v32  ;;  %v3920_v33 = vsub.f32 %v12887_v2, %v3840_v41  ;;  %v10783_v36 = vpop.eup %10782  ;;  %v4198_v42 = vsel %vm3672_vm2, %v13190_v9, 0.0 }
 0x540   :  { %4193 = vadd.xlane.f32.xlu0 %v4192_v16  ;;  %v4033_v3 = vmul.f32 1.442695, %v3917_v20  ;;  %4390 = vst.msk [vmem:[%s14986_s23 + $0x68] sm:$0xff] %vm3672_vm2, %v4326_v26  ;;  %v4320_v7 = vmul.f32 %v10783_v36, %v15292_v46  ;;  %v13200_v24 = vpop.eup %10784  ;;  %v15295_v46 = vld [vmem:[#allocation68_spill] sm:$0xff] }
 0x541   :  { %v4039_v61 = vmul.f32 1.442695, %v3920_v33  ;;  %v4092_v40 = vpop.xlane.xlu0 %4091  ;;  %v15294_v33 = vld [vmem:[#allocation95_spill] sm:$0xff] }
 0x542   :  { %10798 = vpow2.f32 %v4033_v3  ;;  %v3846_v1 = vpop.xlane.xlu1 %3845  ;;  %4384 = vst.msk [vmem:[%s14986_s23 + $0x38] sm:$0xff] %vm3672_vm2, %v4320_v7  ;;  %v4195_v3 = vsel %vm3672_vm2, %v13200_v24, 0.0 }
 0x543   :  { %v10787_v2 = vpop.eup %10786  ;;  %10800 = vpow2.f32 %v4039_v61  ;;  %v3922_v14 = vsub.f32 %v12898_v50, %v3846_v1 }
 0x544   :  { %v13209_v32 = vpop.eup %10788  ;;  %4199 = vadd.xlane.f32.xlu0 %v4198_v42  ;;  %10802 = vrcp.f32 %v4092_v40  ;;  %v4319_v27 = vmul.f32 %v10787_v2, %v15293_v25 }
 0x545   :  { %v10791_v41 = vpop.eup %10790  ;;  %v4043_v11 = vmul.f32 1.442695, %v3922_v14  ;;  %v4210_v20 = vsel %vm3672_vm2, %v13209_v32, 0.0  ;;  %v4089_v50 = vpop.xlane.xlu0 %4088  ;;  %v15296_v14 = vld [vmem:[#allocation74_spill] sm:$0xff] }
 0x546   :  { %v3852_v48 = vpop.xlane.xlu1 %3851  ;;  %4211 = vadd.xlane.f32.xlu1 %v4210_v20  ;;  %10804 = vrcp.f32 %v4089_v50  ;;  %4383 = vst.msk [vmem:[%s14986_s23 + $0x30] sm:$0xff] %vm3672_vm2, %v4319_v27  ;;  %10287 = vmatprep.mubr.msk.f32.mxu1 %vm3672_vm2, %v4319_v27  ;;  %v4325_v16 = vmul.f32 %v10791_v41, %v15294_v33  ;;  %v13224_v61 = vpop.eup %10792  ;;  %v15298_v27 = vld [vmem:[#allocation75_spill] sm:$0xff] }
 0x547   :  { %10806 = vpow2.f32 %v4043_v11  ;;  %v3924_v36 = vsub.f32 %v12907_v21, %v3852_v48  ;;  %10288 = vmatmul.mubr.msk.f32.vlgmr.msra.gmra.mxu1 %vm3672_vm2, %v4320_v7 }
 0x548   :  { %4196 = vadd.xlane.f32.xlu0 %v4195_v3  ;;  %4389 = vst.msk [vmem:[%s14986_s23 + $0x60] sm:$0xff] %vm3672_vm2, %v4325_v16  ;;  %10308 = vmatprep.mubr.msk.f32.mxu0 %vm3672_vm2, %v4325_v16 }
 0x549   :  { %v4047_v40 = vmul.f32 1.442695, %v3924_v36  ;;  %10298 = vmatpush3.msra.mxu1 %v15288_v37  ;;  %10309 = vmatmul.mubr.msk.f32.vlgmr.msra.gmra.mxu0 %vm3672_vm2, %v4326_v26  ;;  %v3837_v21 = vpop.xlane.xlu0 %3836  ;;  %v4204_v37 = vsel %vm3672_vm2, %v13224_v61, 0.0 }
 0x54a   :  { %10319 = vmatpush3.msra.mxu0 %v15287_v44  ;;  %10299 = vmatprep.subr.mxu1 %v15295_v46  ;;  %v3858_v7 = vpop.xlane.xlu1 %3857  ;;  %v3919_v1 = vsub.f32 %v12912_v54, %v3837_v21  ;;  %v15297_v54 = vld [vmem:[#allocation69_spill] sm:$0xff] }
 0x54b   :  { %v13236_v2 = vpop.eup %10794  ;;  %10808 = vpow2.f32 %v4047_v40  ;;  %10320 = vmatprep.subr.mxu0 %v15296_v14  ;;  %v3926_v42 = vsub.f32 %v12918_v8, %v3858_v7  ;;  %10300 = vmatpush3.msra.mxu1 %v15295_v46 }
 0x54c   :  { %v13243_v26 = vpop.eup %10796  ;;  %10321 = vmatpush3.msra.mxu0 %v15296_v14  ;;  %4205 = vadd.xlane.f32.xlu0 %v4204_v37  ;;  %v4037_v44 = vmul.f32 1.442695, %v3919_v1  ;;  %v4207_v8 = vsel %vm3672_vm2, %v13236_v2, 0.0 }
 0x54d   :  { %v4051_v25 = vmul.f32 1.442695, %v3926_v42  ;;  %10311 = vmatprep.subr.mxu1 %v15297_v54  ;;  %10332 = vmatprep.subr.mxu0 %v15298_v27  ;;  %v4216_v41 = vsel %vm3672_vm2, %v13243_v26, 0.0  ;;  %v3843_v11 = vpop.xlane.xlu0 %3842 }
 0x54e   :  { %10810 = vpow2.f32 %v4037_v44  ;;  %v13252_v20 = vpop.xlane.xlu1 %3863  ;;  %4217 = vadd.xlane.f32.xlu1 %v4216_v41  ;;  %v3921_v50 = vsub.f32 %v12923_v30, %v3843_v11 }
 0x54f   :  { %v13255_v48 = vpop.eup %10798  ;;  %10812 = vpow2.f32 %v4051_v25 }
 0x550   :  { %v13257_v33 = vpop.eup %10800  ;;  %4208 = vadd.xlane.f32.xlu0 %v4207_v8  ;;  %v4041_v16 = vmul.f32 1.442695, %v3921_v50  ;;  %v4213_v40 = vsel %vm3672_vm2, %v13255_v48, 0.0 }
 0x551   :  { %v10803_v36 = vpop.eup %10802  ;;  %v4222_v3 = vsel %vm3672_vm2, %v13257_v33, 0.0  ;;  %v4104_v21 = vpop.xlane.xlu0 %4103 }
 0x552   :  { %10814 = vpow2.f32 %v4041_v16  ;;  %v4110_v46 = vpop.xlane.xlu1 %4109  ;;  %4223 = vadd.xlane.f32.xlu1 %v4222_v3  ;;  %v4324_v30 = vmul.f32 %v10803_v36, %v12894_v35  ;;  %v15300_v16 = vld [vmem:[#allocation71_spill] sm:$0xff] }
 0x553   :  { %v10805_v7 = vpop.eup %10804  ;;  %10816 = vrcp.f32 %v4110_v46 }
 0x554   :  { %v13264_v1 = vpop.eup %10806  ;;  %4214 = vadd.xlane.f32.xlu0 %v4213_v40  ;;  %v4323_v14 = vmul.f32 %v10805_v7, %v12904_v51  ;;  %4388 = vst.msk [vmem:[%s14986_s23 + $0x58] sm:$0xff] %vm3672_vm2, %v4324_v30  ;;  %10818 = vrcp.f32 %v4104_v21  ;;  %v15299_v51 = vld [vmem:[#allocation73_spill] sm:$0xff] }
 0x555   :  { %v4228_v42 = vsel %vm3672_vm2, %v13264_v1, 0.0  ;;  %v4101_v37 = vpop.xlane.xlu0 %4100 }
 0x556   :  { %v4107_v44 = vpop.xlane.xlu1 %4106  ;;  %4229 = vadd.xlane.f32.xlu1 %v4228_v42  ;;  %10820 = vrcp.f32 %v4101_v37  ;;  %4387 = vst.msk [vmem:[%s14986_s23 + $0x50] sm:$0xff] %vm3672_vm2, %v4323_v14  ;;  %10301 = vmatprep.mubr.msk.f32.mxu1 %vm3672_vm2, %v4323_v14 }
 0x557   :  { %10822 = vrcp.f32 %v4107_v44  ;;  %10302 = vmatmul.mubr.msk.f32.vlgmr.msra.gmra.mxu1 %vm3672_vm2, %v4324_v30 }
 0x558   :  { %v13279_v35 = vpop.eup %10808  ;;  %10312 = vmatpush3.msra.mxu1 %v15297_v54 }
 0x559   :  { %10313 = vmatprep.subr.mxu1 %v15299_v51  ;;  %v4234_v25 = vsel %vm3672_vm2, %v13279_v35, 0.0  ;;  %v3849_v41 = vpop.xlane.xlu0 %3848 }
 0x55a   :  { %v4122_v8 = vpop.xlane.xlu1 %4121  ;;  %4235 = vadd.xlane.f32.xlu1 %v4234_v25  ;;  %10314 = vmatpush3.msra.mxu1 %v15299_v51  ;;  %v3923_v11 = vsub.f32 %v12952_v62, %v3849_v41 }
 0x55b   :  { %v13287_v50 = vpop.eup %10810  ;;  %10824 = vrcp.f32 %v4122_v8  ;;  %10325 = vmatprep.subr.mxu1 %v15300_v16 }
 0x55c   :  { %v13290_v36 = vpop.eup %10812  ;;  %v4045_v54 = vmul.f32 1.442695, %v3923_v11  ;;  %v4219_v3 = vsel %vm3672_vm2, %v13287_v50, 0.0 }
 0x55d   :  { %v4240_v40 = vsel %vm3672_vm2, %v13290_v36, 0.0  ;;  %4220 = vadd.xlane.f32.xlu0 %v4219_v3  ;;  %v3855_v21 = vpop.xlane.xlu0 %3854  ;;  %v15302_v3 = vld [vmem:[#allocation77_spill] sm:$0xff] }
 0x55e   :  { %10826 = vpow2.f32 %v4045_v54  ;;  %v4119_v46 = vpop.xlane.xlu1 %4118  ;;  %4241 = vadd.xlane.f32.xlu1 %v4240_v40  ;;  %v3925_v62 = vsub.f32 %v12962_v38, %v3855_v21  ;;  %v15303_v21 = vld [vmem:[#allocation58_spill] sm:$0xff] }
 0x55f   :  { %v13297_v30 = vpop.eup %10814  ;;  %10828 = vrcp.f32 %v4119_v46 }
 0x560   :  { %v4049_v7 = vmul.f32 1.442695, %v3925_v62  ;;  %v4225_v14 = vsel %vm3672_vm2, %v13297_v30, 0.0  ;;  %v10817_v42 = vpop.eup %10816 }
 0x561   :  { %4226 = vadd.xlane.f32.xlu0 %v4225_v14  ;;  %v13301_v37 = vpop.xlane.xlu0 %3860  ;;  %v10819_v44 = vpop.eup %10818  ;;  %v4330_v51 = vmul.f32 %v10817_v42, %v12938_v39  ;;  %v15301_v39 = vld [vmem:[#allocation76_spill] sm:$0xff] }
 0x562   :  { %10830 = vpow2.f32 %v4049_v7  ;;  %v4328_v41 = vmul.f32 %v10819_v44, %v12933_v63  ;;  %v15305_v14 = vld [vmem:[#allocation28_spill] sm:$0xff] }
 0x563   :  { %v10821_v25 = vpop.eup %10820  ;;  %4394 = vst.msk [vmem:[%s14986_s23 + $0x88] sm:$0xff] %vm3672_vm2, %v4330_v51  ;;  %v15306_v44 = vld [vmem:[#allocation80_spill] sm:$0xff] }
 0x564   :  { %v10823_v8 = vpop.eup %10822  ;;  %v4327_v38 = vmul.f32 %v10821_v25, %v12943_v52  ;;  %4392 = vst.msk [vmem:[%s14986_s23 + $0x78] sm:$0xff] %vm3672_vm2, %v4328_v41 }
 0x565   :  { %v4116_v11 = vpop.xlane.xlu0 %4115  ;;  %v4329_v54 = vmul.f32 %v10823_v8, %v12949_v49 }
 0x566   :  { %4391 = vst.msk [vmem:[%s14986_s23 + $0x70] sm:$0xff] %vm3672_vm2, %v4327_v38  ;;  %10315 = vmatprep.mubr.msk.f32.mxu1 %vm3672_vm2, %v4327_v38  ;;  %10832 = vrcp.f32 %v4116_v11 }
 0x567   :  { %4393 = vst.msk [vmem:[%s14986_s23 + $0x80] sm:$0xff] %vm3672_vm2, %v4329_v54  ;;  %10322 = vmatprep.mubr.msk.f32.mxu0 %vm3672_vm2, %v4329_v54  ;;  %10316 = vmatmul.mubr.msk.f32.vlgmr.msra.gmra.mxu1 %vm3672_vm2, %v4328_v41  ;;  %v15308_v41 = vld [vmem:[#allocation61_spill] sm:$0xff] }
 0x568   :  { %v10825_v63 = vpop.eup %10824  ;;  %10323 = vmatmul.mubr.msk.f32.vlgmr.msra.gmra.mxu0 %vm3672_vm2, %v4330_v51  ;;  %10326 = vmatpush3.msra.mxu1 %v15300_v16  ;;  %v15304_v16 = vld [vmem:[#allocation78_spill] sm:$0xff] }
 0x569   :  { %10333 = vmatpush3.msra.mxu0 %v15298_v27  ;;  %10327 = vmatprep.subr.mxu1 %v15301_v39  ;;  %v4113_v52 = vpop.xlane.xlu0 %4112  ;;  %v4334_v49 = vmul.f32 %v10825_v63, %v12959_v29  ;;  %v15307_v51 = vld [vmem:[#allocation26_spill] sm:$0xff]  ;;  %v15309_v63 = vld [vmem:[#allocation79_spill] sm:$0xff] }
 0x56a   :  { %10334 = vmatprep.subr.mxu0 %v15302_v3  ;;  %10328 = vmatpush3.msra.mxu1 %v15301_v39  ;;  %10834 = vrcp.f32 %v4113_v52  ;;  %v15310_v39 = vld [vmem:[#allocation98_spill] sm:$0xff] }
 0x56b   :  { %v13333_v40 = vpop.eup %10826  ;;  %10335 = vmatpush3.msra.mxu0 %v15302_v3  ;;  %10339 = vmatprep.subr.mxu1 %v15303_v21  ;;  %4398 = vst.msk [vmem:[%s14986_s23 + $0xa8] sm:$0xff] %vm3672_vm2, %v4334_v49  ;;  %v3928_v52 = vsub.f32 %v15310_v39, %v13252_v20  ;;  %v15311_v3 = vld [vmem:[#allocation53_spill] sm:$0xff]  ;;  %v15320_v39 = vld [vmem:[#allocation66_spill] sm:$0xff] }
 0x56c   :  { %v10829_v27 = vpop.eup %10828  ;;  %10346 = vmatprep.subr.mxu0 %v15304_v16  ;;  %v4231_v29 = vsel %vm3672_vm2, %v13333_v40, 0.0  ;;  %v15313_v20 = vld [vmem:[#allocation85_spill] sm:$0xff] }
 0x56d   :  { %4232 = vadd.xlane.f32.xlu0 %v4231_v29  ;;  %v4128_v46 = vpop.xlane.xlu0 %4127  ;;  %v4333_v62 = vmul.f32 %v10829_v27, %v12969_v56  ;;  %v15314_v29 = vld [vmem:[#allocation56_spill] sm:$0xff] }
 0x56e   :  { %10836 = vrcp.f32 %v4128_v46  ;;  %v15315_v46 = vld [vmem:[#allocation34_spill] sm:$0xff] }
 0x56f   :  { %v13345_v7 = vpop.eup %10830  ;;  %6531 = vrot.lane.b32.xlu1 %v15305_v14, %s11077_s7  ;;  %4397 = vst.msk [vmem:[%s14986_s23 + $0xa0] sm:$0xff] %vm3672_vm2, %v4333_v62  ;;  %10336 = vmatprep.mubr.msk.f32.mxu0 %vm3672_vm2, %v4333_v62  ;;  %v15316_v62 = vld [vmem:[#allocation32_spill] sm:$0xff] }
 0x570   :  { %10337 = vmatmul.mubr.msk.f32.vlgmr.msra.gmra.mxu0 %vm3672_vm2, %v4334_v49  ;;  %v4237_v42 = vsel %vm3672_vm2, %v13345_v7, 0.0 }
 0x571   :  { %10347 = vmatpush3.msra.mxu0 %v15304_v16  ;;  %4238 = vadd.xlane.f32.xlu0 %v4237_v42  ;;  %v4125_v56 = vpop.xlane.xlu0 %4124  ;;  %v15317_v42 = vld [vmem:[#allocation101_spill] sm:$0xff] }
 0x572   :  { %10348 = vmatprep.subr.mxu0 %v15306_v44  ;;  %10838 = vrcp.f32 %v4125_v56 }
 0x573   :  { %10349 = vmatpush3.msra.mxu0 %v15306_v44  ;;  %6529 = vrot.lane.b32.xlu1 %v15307_v51, %s11077_s7  ;;  %v10833_v25 = vpop.eup %10832  ;;  %v15318_v51 = vld [vmem:[#allocation99_spill] sm:$0xff] }
 0x574   :  { %10360 = vmatprep.subr.mxu0 %v15308_v41  ;;  %v4332_v8 = vmul.f32 %v10833_v25, %v12980_v15  ;;  %v3927_v25 = vsub.f32 %v15318_v51, %v13301_v37 }
 0x576   :  { %4396 = vst.msk [vmem:[%s14986_s23 + $0x98] sm:$0xff] %vm3672_vm2, %v4332_v8 }
 0x577   :  { %v10835_v38 = vpop.eup %10834 }
 0x578   :  { %v4331_v11 = vmul.f32 %v10835_v38, %v12982_v57 }
 0x57a   :  { %4395 = vst.msk [vmem:[%s14986_s23 + $0x90] sm:$0xff] %vm3672_vm2, %v4331_v11  ;;  %10329 = vmatprep.mubr.msk.f32.mxu1 %vm3672_vm2, %v4331_v11 }
 0x57b   :  { %v10837_v54 = vpop.eup %10836  ;;  %10330 = vmatmul.mubr.msk.f32.vlgmr.msra.gmra.mxu1 %vm3672_vm2, %v4332_v8 }
 0x57c   :  { %10340 = vmatpush3.msra.mxu1 %v15303_v21  ;;  %v4336_v15 = vmul.f32 %v10837_v54, %v12988_v13  ;;  %v15312_v21 = vld [vmem:[#allocation100_spill] sm:$0xff]  ;;  %v4055_v13 = vmul.f32 1.442695, %v3928_v52  ;;  %v4053_v54 = vmul.f32 1.442695, %v3927_v25 }
 0x57d   :  { %10341 = vmatprep.subr.mxu1 %v15309_v63 }
 0x57e   :  { %10342 = vmatpush3.msra.mxu1 %v15309_v63  ;;  %v4134_v57 = vpop.xlane.xlu1 %4133  ;;  %4400 = vst.msk [vmem:[%s14986_s23 + $0xb8] sm:$0xff] %vm3672_vm2, %v4336_v15 }
 0x57f   :  { %v10839_v49 = vpop.eup %10838  ;;  %10840 = vrcp.f32 %v4134_v57  ;;  %10353 = vmatprep.subr.mxu1 %v15311_v3 }
 0x580   :  { %v4335_v27 = vmul.f32 %v10839_v49, %v15312_v21 }
 0x582   :  { %v4131_v16 = vpop.xlane.xlu1 %4130  ;;  %4399 = vst.msk [vmem:[%s14986_s23 + $0xb0] sm:$0xff] %vm3672_vm2, %v4335_v27  ;;  %10343 = vmatprep.mubr.msk.f32.mxu1 %vm3672_vm2, %v4335_v27 }
 0x583   :  { %10842 = vrcp.f32 %v4131_v16  ;;  %10344 = vmatmul.mubr.msk.f32.vlgmr.msra.gmra.mxu1 %vm3672_vm2, %v4336_v15  ;;  %v15319_v15 = vld [vmem:[#allocation55_spill] sm:$0xff] }
 0x584   :  { %10354 = vmatpush3.msra.mxu1 %v15311_v3  ;;  %10844 = vpow2.f32 %v4055_v13 }
 0x585   :  { %10355 = vmatprep.subr.mxu1 %v15313_v20 }
 0x586   :  { %10356 = vmatpush3.msra.mxu1 %v15313_v20 }
 0x587   :  { %10367 = vmatprep.subr.mxu1 %v15314_v29  ;;  %6444 = vrot.lane.b32.xlu0 %v15315_v46, %s11077_s7 }
 0x58b   :  { %6442 = vrot.lane.b32.xlu0 %v15316_v62, %s11077_s7 }
 0x58c   :  { %v10841_v14 = vpop.eup %10840 }
 0x58d   :  { %v4338_v56 = vmul.f32 %v10841_v14, %v15317_v42 }
 0x58f   :  { %4402 = vst.msk [vmem:[%s14986_s23 + $0xc8] sm:$0xff] %vm3672_vm2, %v4338_v56 }
 0x590   :  { %v10843_v44 = vpop.eup %10842 }
 0x591   :  { %v4337_v8 = vmul.f32 %v10843_v44, %v13004_v18  ;;  %v13409_v11 = vpop.eup %10844  ;;  %v15321_v44 = vld [vmem:[#allocation33_spill] sm:$0xff] }
 0x592   :  { %v4140_v38 = vpop.xlane.xlu0 %4139  ;;  %v4246_v18 = vsel %vm3672_vm2, %v13409_v11, 0.0 }
 0x593   :  { %10846 = vrcp.f32 %v4140_v38  ;;  %4401 = vst.msk [vmem:[%s14986_s23 + $0xc0] sm:$0xff] %vm3672_vm2, %v4337_v8  ;;  %10350 = vmatprep.mubr.msk.f32.mxu0 %vm3672_vm2, %v4337_v8  ;;  %v15322_v38 = vld [vmem:[#allocation25_spill] sm:$0xff] }
 0x594   :  { %10351 = vmatmul.mubr.msk.f32.vlgmr.msra.gmra.mxu0 %vm3672_vm2, %v4338_v56 }
 0x595   :  { %10361 = vmatpush3.msra.mxu0 %v15308_v41 }
 0x596   :  { %10362 = vmatprep.subr.mxu0 %v15319_v15  ;;  %v4137_v37 = vpop.xlane.xlu1 %4136  ;;  %v4143_v63 = vpop.xlane.xlu0 %4142 }
 0x597   :  { %4247 = vadd.xlane.f32.xlu1 %v4246_v18  ;;  %10848 = vrcp.f32 %v4137_v37  ;;  %10363 = vmatpush3.msra.mxu0 %v15319_v15  ;;  %v15325_v18 = vld [vmem:[#allocation63_spill] sm:$0xff] }
 0x598   :  { %10850 = vrcp.f32 %v4143_v63  ;;  %10374 = vmatprep.subr.mxu0 %v15320_v39 }
 0x599   :  { %10852 = vpow2.f32 %v4053_v54 }
 0x59a   :  { %v4146_v52 = vpop.xlane.xlu1 %4145  ;;  %v4152_v57 = vpop.xlane.xlu0 %4151 }
 0x59b   :  { %10854 = vrcp.f32 %v4146_v52 }
 0x59c   :  { %10856 = vrcp.f32 %v4152_v57  ;;  %v15326_v57 = vld [vmem:[#allocation65_spill] sm:$0xff] }
 0x59e   :  { %v4155_v41 = vpop.xlane.xlu1 %4154  ;;  %v4149_v49 = vpop.xlane.xlu0 %4148 }
 0x59f   :  { %10858 = vrcp.f32 %v4155_v41 }
 0x5a0   :  { %v10847_v3 = vpop.eup %10846  ;;  %10860 = vrcp.f32 %v4149_v49 }
 0x5a1   :  { %v4340_v21 = vmul.f32 %v10847_v3, %v13018_v43 }
 0x5a2   :  { %v4167_v27 = vpop.xlane.xlu1 %4166  ;;  %v4158_v13 = vpop.xlane.xlu0 %4157 }
 0x5a3   :  { %10862 = vrcp.f32 %v4167_v27  ;;  %4404 = vst.msk [vmem:[%s14986_s23 + $0xd8] sm:$0xff] %vm3672_vm2, %v4340_v21  ;;  %v15328_v27 = vld [vmem:[#allocation59_spill] sm:$0xff] }
 0x5a4   :  { %v10849_v16 = vpop.eup %10848  ;;  %10864 = vrcp.f32 %v4158_v13  ;;  %v15329_v13 = vld [vmem:[#allocation46_spill] sm:$0xff] }
 0x5a5   :  { %v10851_v20 = vpop.eup %10850  ;;  %v4339_v46 = vmul.f32 %v10849_v16, %v13025_v45  ;;  %v15330_v16 = vld [vmem:[#allocation38_spill] sm:$0xff] }
 0x5a6   :  { %v13429_v62 = vpop.eup %10852  ;;  %v4164_v14 = vpop.xlane.xlu0 %4163  ;;  %v4341_v42 = vmul.f32 %v10851_v20, %v13022_v31 }
 0x5a7   :  { %v4179_v56 = vpop.xlane.xlu1 %4178  ;;  %10866 = vrcp.f32 %v4164_v14  ;;  %4403 = vst.msk [vmem:[%s14986_s23 + $0xd0] sm:$0xff] %vm3672_vm2, %v4339_v46  ;;  %10357 = vmatprep.mubr.msk.f32.mxu1 %vm3672_vm2, %v4339_v46  ;;  %v4243_v45 = vsel %vm3672_vm2, %v13429_v62, 0.0  ;;  %v15331_v14 = vld [vmem:[#allocation31_spill] sm:$0xff] }
 0x5a8   :  { %v10855_v43 = vpop.eup %10854  ;;  %10868 = vrcp.f32 %v4179_v56  ;;  %6616 = vrot.lane.b32.xlu1 %v15321_v44, %s11077_s7  ;;  %4405 = vst.msk [vmem:[%s14986_s23 + $0xe0] sm:$0xff] %vm3672_vm2, %v4341_v42  ;;  %10364 = vmatprep.mubr.msk.f32.mxu0 %vm3672_vm2, %v4341_v42 }
 0x5a9   :  { %v10857_v31 = vpop.eup %10856  ;;  %10358 = vmatmul.mubr.msk.f32.vlgmr.msra.gmra.mxu1 %vm3672_vm2, %v4340_v21  ;;  %v4342_v51 = vmul.f32 %v10855_v43, %v13033_v22  ;;  %v15323_v22 = vld [vmem:[#allocation39_spill] sm:$0xff] }
 0x5aa   :  { %10368 = vmatpush3.msra.mxu1 %v15314_v29  ;;  %4244 = vadd.xlane.f32.xlu0 %v4243_v45  ;;  %v4161_v25 = vpop.xlane.xlu0 %4160  ;;  %v4344_v8 = vmul.f32 %v10857_v31, %v13038_v17  ;;  %v15324_v29 = vld [vmem:[#allocation42_spill] sm:$0xff]  ;;  %v15334_v31 = vld [vmem:[#allocation27_spill] sm:$0xff] }
 0x5ab   :  { %10369 = vmatprep.subr.mxu1 %v15322_v38  ;;  %10870 = vrcp.f32 %v4161_v25  ;;  %4406 = vst.msk [vmem:[%s14986_s23 + $0xe8] sm:$0xff] %vm3672_vm2, %v4342_v51  ;;  %10365 = vmatmul.mubr.msk.f32.vlgmr.msra.gmra.mxu0 %vm3672_vm2, %v4342_v51  ;;  %v15335_v51 = vld [vmem:[#allocation82_spill] sm:$0xff] }
 0x5ac   :  { %v10859_v54 = vpop.eup %10858  ;;  %10370 = vmatpush3.msra.mxu1 %v15322_v38  ;;  %6703 = vrot.lane.b32.xlu1 %v15323_v22, %s11077_s7  ;;  %4408 = vst.msk [vmem:[%s14986_s23 + $0xf8] sm:$0xff] %vm3672_vm2, %v4344_v8  ;;  %v15336_v38 = vld [vmem:[#allocation35_spill] sm:$0xff] }
 0x5ad   :  { %v10861_v17 = vpop.eup %10860  ;;  %10375 = vmatpush3.msra.mxu0 %v15320_v39  ;;  %10381 = vmatprep.subr.mxu1 %v15324_v29  ;;  %v4345_v15 = vmul.f32 %v10859_v54, %v13040_v53  ;;  %v15327_v53 = vld [vmem:[#allocation44_spill] sm:$0xff] }
 0x5ae   :  { %10376 = vmatprep.subr.mxu0 %v15325_v18  ;;  %v4170_v37 = vpop.xlane.xlu0 %4169  ;;  %v4343_v63 = vmul.f32 %v10861_v17, %v13047_v12  ;;  %v15338_v54 = vld [vmem:[#allocation36_spill] sm:$0xff]  ;;  %v15339_v17 = vld [vmem:[#allocation30_spill] sm:$0xff] }
 0x5af   :  { %10377 = vmatpush3.msra.mxu0 %v15325_v18  ;;  %v4191_v52 = vpop.xlane.xlu1 %4190  ;;  %10872 = vrcp.f32 %v4170_v37  ;;  %4409 = vst.msk [vmem:[%s14986_s23 + $0x100] sm:$0xff] %vm3672_vm2, %v4345_v15  ;;  %10378 = vmatprep.mubr.msk.f32.mxu0 %vm3672_vm2, %v4345_v15  ;;  %v15340_v15 = vld [vmem:[#allocation81_spill] sm:$0xff] }
 0x5b0   :  { %v10863_v39 = vpop.eup %10862  ;;  %10874 = vrcp.f32 %v4191_v52  ;;  %10388 = vmatprep.subr.mxu0 %v15326_v57  ;;  %6790 = vrot.lane.b32.xlu1 %v15327_v53, %s11077_s7  ;;  %4407 = vst.msk [vmem:[%s14986_s23 + $0xf0] sm:$0xff] %vm3672_vm2, %v4343_v63  ;;  %v15341_v37 = vld [vmem:[#allocation41_spill] sm:$0xff]  ;;  %v15343_v53 = vld [vmem:[#allocation86_spill] sm:$0xff] }
 0x5b1   :  { %v10865_v12 = vpop.eup %10864  ;;  %10371 = vmatprep.mubr.msk.f32.mxu1 %vm3672_vm2, %v4343_v63  ;;  %v4349_v41 = vmul.f32 %v10863_v39, %v13060_v4 }
 0x5b2   :  { %10372 = vmatmul.mubr.msk.f32.vlgmr.msra.gmra.mxu1 %vm3672_vm2, %v4344_v8  ;;  %v4176_v49 = vpop.xlane.xlu0 %4175  ;;  %v4346_v3 = vmul.f32 %v10865_v12, %v13050_v19 }
 0x5b3   :  { %10382 = vmatpush3.msra.mxu1 %v15324_v29  ;;  %10876 = vrcp.f32 %v4176_v49  ;;  %4413 = vst.msk [vmem:[%s14986_s23 + $0x120] sm:$0xff] %vm3672_vm2, %v4349_v41 }
 0x5b4   :  { %v10867_v21 = vpop.eup %10866  ;;  %10383 = vmatprep.subr.mxu1 %v15328_v27  ;;  %6877 = vrot.lane.b32.xlu1 %v15329_v13, %s11077_s7  ;;  %4410 = vst.msk [vmem:[%s14986_s23 + $0x108] sm:$0xff] %vm3672_vm2, %v4346_v3  ;;  %v15346_v13 = vld [vmem:[#allocation54_spill] sm:$0xff] }
 0x5b5   :  { %v10869_v19 = vpop.eup %10868  ;;  %10384 = vmatpush3.msra.mxu1 %v15328_v27  ;;  %10379 = vmatmul.mubr.msk.f32.vlgmr.msra.gmra.mxu0 %vm3672_vm2, %v4346_v3  ;;  %v4348_v4 = vmul.f32 %v10867_v21, %v13069_v60  ;;  %v15332_v60 = vld [vmem:[#allocation51_spill] sm:$0xff] }
 0x5b6   :  { %10389 = vmatpush3.msra.mxu0 %v15326_v57  ;;  %10395 = vmatprep.subr.mxu1 %v15330_v16  ;;  %v4173_v20 = vpop.xlane.xlu0 %4172  ;;  %v4353_v46 = vmul.f32 %v10869_v19, %v13071_v5  ;;  %v15333_v5 = vld [vmem:[#allocation57_spill] sm:$0xff] }
 0x5b7   :  { %10390 = vmatprep.subr.mxu0 %v15331_v14  ;;  %10392 = vmatprep.mubr.msk.f32.mxu0 %vm3672_vm2, %v4349_v41  ;;  %10878 = vrcp.f32 %v4173_v20  ;;  %4412 = vst.msk [vmem:[%s14986_s23 + $0x118] sm:$0xff] %vm3672_vm2, %v4348_v4  ;;  %v15342_v57 = vld [vmem:[#allocation45_spill] sm:$0xff] }
 0x5b8   :  { %v10871_v42 = vpop.eup %10870  ;;  %10391 = vmatpush3.msra.mxu0 %v15331_v14  ;;  %6964 = vrot.lane.b32.xlu1 %v15332_v60, %s11077_s7  ;;  %4417 = vst.msk [vmem:[%s14986_s23 + $0x140] sm:$0xff] %vm3672_vm2, %v4353_v46  ;;  %v15344_v41 = vld [vmem:[#allocation49_spill] sm:$0xff] }
 0x5b9   :  { %10402 = vmatprep.subr.mxu0 %v15333_v5  ;;  %v4347_v56 = vmul.f32 %v10871_v42, %v13075_v23 }
 0x5ba   :  { %v4182_v43 = vpop.xlane.xlu0 %4181 }
 0x5bb   :  { %10880 = vrcp.f32 %v4182_v43  ;;  %4411 = vst.msk [vmem:[%s14986_s23 + $0x110] sm:$0xff] %vm3672_vm2, %v4347_v56  ;;  %10385 = vmatprep.mubr.msk.f32.mxu1 %vm3672_vm2, %v4347_v56 }
 0x5bc   :  { %v10873_v44 = vpop.eup %10872  ;;  %7051 = vrot.lane.b32.xlu1 %v15334_v31, %s11077_s7  ;;  %10386 = vmatmul.mubr.msk.f32.vlgmr.msra.gmra.mxu1 %vm3672_vm2, %v4348_v4 }
 0x5bd   :  { %v10875_v45 = vpop.eup %10874  ;;  %10396 = vmatpush3.msra.mxu1 %v15330_v16  ;;  %v4350_v23 = vmul.f32 %v10873_v44, %v13080_v47 }
 0x5be   :  { %10397 = vmatprep.subr.mxu1 %v15335_v51  ;;  %v4357_v25 = vmul.f32 %v10875_v45, %v13087_v59  ;;  %v15337_v59 = vld [vmem:[#allocation84_spill] sm:$0xff] }
 0x5bf   :  { %10398 = vmatpush3.msra.mxu1 %v15335_v51  ;;  %4414 = vst.msk [vmem:[%s14986_s23 + $0x128] sm:$0xff] %vm3672_vm2, %v4350_v23  ;;  %10393 = vmatmul.mubr.msk.f32.vlgmr.msra.gmra.mxu0 %vm3672_vm2, %v4350_v23 }
 0x5c0   :  { %v10877_v8 = vpop.eup %10876  ;;  %7138 = vrot.lane.b32.xlu1 %v15336_v38, %s11077_s7  ;;  %10403 = vmatpush3.msra.mxu0 %v15333_v5  ;;  %4421 = vst.msk [vmem:[%s14986_s23 + $0x160] sm:$0xff] %vm3672_vm2, %v4357_v25  ;;  %v15348_v5 = vld [vmem:[#allocation37_spill] sm:$0xff] }
 0x5c1   :  { %v4188_v47 = vpop.xlane.xlu0 %4187  ;;  %10409 = vmatprep.subr.mxu1 %v15337_v59  ;;  %6618 = vrot.lane.b32.xlu0 %v15338_v54, %s11077_s7  ;;  %v4352_v22 = vmul.f32 %v10877_v8, %v13085_v10 }
 0x5c2   :  { %10882 = vrcp.f32 %v4188_v47  ;;  %10404 = vmatprep.subr.mxu0 %v15339_v17  ;;  %10406 = vmatprep.mubr.msk.f32.mxu0 %vm3672_vm2, %v4353_v46  ;;  %v15347_v46 = vld [vmem:[#allocation29_spill] sm:$0xff] }
 0x5c3   :  { %10405 = vmatpush3.msra.mxu0 %v15339_v17  ;;  %4416 = vst.msk [vmem:[%s14986_s23 + $0x138] sm:$0xff] %vm3672_vm2, %v4352_v22 }
 0x5c4   :  { %v10879_v29 = vpop.eup %10878  ;;  %10416 = vmatprep.subr.mxu0 %v15340_v15 }
 0x5c5   :  { %v4185_v18 = vpop.xlane.xlu0 %4184  ;;  %6705 = vrot.lane.b32.xlu0 %v15341_v37, %s11077_s7  ;;  %v4351_v10 = vmul.f32 %v10879_v29, %v13106_v55 }
 0x5c6   :  { %10884 = vrcp.f32 %v4185_v18 }
 0x5c7   :  { %v4203_v63 = vpop.xlane.xlu1 %4202  ;;  %4415 = vst.msk [vmem:[%s14986_s23 + $0x130] sm:$0xff] %vm3672_vm2, %v4351_v10  ;;  %10399 = vmatprep.mubr.msk.f32.mxu1 %vm3672_vm2, %v4351_v10 }
 0x5c8   :  { %v10881_v52 = vpop.eup %10880  ;;  %10886 = vrcp.f32 %v4203_v63  ;;  %10400 = vmatmul.mubr.msk.f32.vlgmr.msra.gmra.mxu1 %vm3672_vm2, %v4352_v22 }
 0x5c9   :  { %v4194_v39 = vpop.xlane.xlu0 %4193  ;;  %6792 = vrot.lane.b32.xlu0 %v15342_v57, %s11077_s7  ;;  %10410 = vmatpush3.msra.mxu1 %v15337_v59  ;;  %v4354_v55 = vmul.f32 %v10881_v52, %v13131_v34  ;;  %v15345_v34 = vld [vmem:[#allocation83_spill] sm:$0xff] }
 0x5ca   :  { %10888 = vrcp.f32 %v4194_v39  ;;  %10411 = vmatprep.subr.mxu1 %v15343_v53 }
 0x5cb   :  { %10412 = vmatpush3.msra.mxu1 %v15343_v53  ;;  %4418 = vst.msk [vmem:[%s14986_s23 + $0x148] sm:$0xff] %vm3672_vm2, %v4354_v55  ;;  %10407 = vmatmul.mubr.msk.f32.vlgmr.msra.gmra.mxu0 %vm3672_vm2, %v4354_v55 }
 0x5cc   :  { %10417 = vmatpush3.msra.mxu0 %v15340_v15  ;;  %10420 = vmatprep.mubr.msk.f32.mxu0 %vm3672_vm2, %v4357_v25 }
 0x5cd   :  { %v4200_v12 = vpop.xlane.xlu0 %4199  ;;  %6879 = vrot.lane.b32.xlu0 %v15344_v41, %s11077_s7  ;;  %10418 = vmatprep.subr.mxu0 %v15345_v34 }
 0x5ce   :  { %10890 = vrcp.f32 %v4200_v12  ;;  %10419 = vmatpush3.msra.mxu0 %v15345_v34 }
 0x5cf   :  { %v10883_v49 = vpop.eup %10882  ;;  %v4212_v3 = vpop.xlane.xlu1 %4211 }
 0x5d0   :  { %10892 = vrcp.f32 %v4212_v3  ;;  %v4356_v21 = vmul.f32 %v10883_v49, %v13156_v58 }
 0x5d1   :  { %v4197_v27 = vpop.xlane.xlu0 %4196  ;;  %6966 = vrot.lane.b32.xlu0 %v15346_v13, %s11077_s7 }
 0x5d2   :  { %10894 = vrcp.f32 %v4197_v27  ;;  %4420 = vst.msk [vmem:[%s14986_s23 + $0x158] sm:$0xff] %vm3672_vm2, %v4356_v21 }
 0x5d3   :  { %v10885_v19 = vpop.eup %10884 }
 0x5d4   :  { %v4355_v4 = vmul.f32 %v10885_v19, %v13168_v6 }
 0x5d5   :  { %v10887_v16 = vpop.eup %10886  ;;  %v4206_v20 = vpop.xlane.xlu0 %4205  ;;  %7053 = vrot.lane.b32.xlu0 %v15347_v46, %s11077_s7 }
 0x5d6   :  { %10896 = vrcp.f32 %v4206_v20  ;;  %4419 = vst.msk [vmem:[%s14986_s23 + $0x150] sm:$0xff] %vm3672_vm2, %v4355_v4  ;;  %10413 = vmatprep.mubr.msk.f32.mxu1 %vm3672_vm2, %v4355_v4  ;;  %v4361_v58 = vmul.f32 %v10887_v16, %v13184_v28 }
 0x5d7   :  { %v10889_v14 = vpop.eup %10888  ;;  %10414 = vmatmul.mubr.msk.f32.vlgmr.msra.gmra.mxu1 %vm3672_vm2, %v4356_v21  ;;  %v4218_v42 = vpop.xlane.xlu1 %4217 }
 0x5d8   :  { %10898 = vrcp.f32 %v4218_v42  ;;  %v4358_v6 = vmul.f32 %v10889_v14, %v13181_v0  ;;  %4425 = vst.msk [vmem:[%s14986_s23 + $0x180] sm:$0xff] %vm3672_vm2, %v4361_v58 }
 0x5d9   :  { %v4209_v60 = vpop.xlane.xlu0 %4208  ;;  %7140 = vrot.lane.b32.xlu0 %v15348_v5, %s11077_s7  ;;  %s11081_s7 = smov 8  }
 0x5da   :  { %10900 = vrcp.f32 %v4209_v60  ;;  %4422 = vst.msk [vmem:[%s14986_s23 + $0x168] sm:$0xff] %vm3672_vm2, %v4358_v6  ;;  %10421 = vmatmul.mubr.msk.f32.vlgmr.msra.gmra.mxu0 %vm3672_vm2, %v4358_v6 }
 0x5db   :  { %v10891_v28 = vpop.eup %10890  ;;  %10434 = vmatprep.mubr.msk.f32.mxu0 %vm3672_vm2, %v4361_v58  ;;  %v4224_v0 = vpop.xlane.xlu1 %4223 }
 0x5dc   :  { %10902 = vrcp.f32 %v4224_v0  ;;  %v13612_v56 = vmul.f32 %v10891_v28, %v13190_v9 }
 0x5dd   :  { %v10893_v43 = vpop.eup %10892  ;;  %v4215_v44 = vpop.xlane.xlu0 %4214 }
 0x5de   :  { %10904 = vrcp.f32 %v4215_v44  ;;  %4424 = vst.msk [vmem:[%s14986_s23 + $0x178] sm:$0xff] %vm3672_vm2, %v13612_v56  ;;  %v13620_v31 = vmul.f32 %v10893_v43, %v13209_v32 }
 0x5df   :  { %v10895_v45 = vpop.eup %10894  ;;  %v4230_v23 = vpop.xlane.xlu1 %4229 }
 0x5e0   :  { %10906 = vrcp.f32 %v4230_v23  ;;  %v4359_v51 = vmul.f32 %v10895_v45, %v13200_v24  ;;  %4428 = vst.msk [vmem:[%s14986_s23 + $0x198] sm:$0xff] %vm3672_vm2, %v13620_v31 }
 0x5e2   :  { %4423 = vst.msk [vmem:[%s14986_s23 + $0x170] sm:$0xff] %vm3672_vm2, %v4359_v51  ;;  %10427 = vmatprep.mubr.msk.f32.mxu1 %vm3672_vm2, %v4359_v51 }
 0x5e3   :  { %v10897_v9 = vpop.eup %10896  ;;  %v4236_v32 = vpop.xlane.xlu1 %4235 }
 0x5e4   :  { %10908 = vrcp.f32 %v4236_v32  ;;  %v4362_v25 = vmul.f32 %v10897_v9, %v13224_v61 }
 0x5e5   :  { %v10899_v8 = vpop.eup %10898 }
 0x5e6   :  { %v4221_v24 = vpop.xlane.xlu0 %4220  ;;  %4426 = vst.msk [vmem:[%s14986_s23 + $0x188] sm:$0xff] %vm3672_vm2, %v4362_v25  ;;  %v13639_v38 = vmul.f32 %v10899_v8, %v13243_v26 }
 0x5e7   :  { %v10901_v47 = vpop.eup %10900  ;;  %v4242_v59 = vpop.xlane.xlu1 %4241  ;;  %10910 = vrcp.f32 %v4221_v24 }
 0x5e8   :  { %10912 = vrcp.f32 %v4242_v59  ;;  %v4363_v54 = vmul.f32 %v10901_v47, %v13236_v2  ;;  %4430 = vst.msk [vmem:[%s14986_s23 + $0x1a8] sm:$0xff] %vm3672_vm2, %v13639_v38 }
 0x5e9   :  { %v10903_v61 = vpop.eup %10902 }
 0x5ea   :  { %v4227_v22 = vpop.xlane.xlu0 %4226  ;;  %4427 = vst.msk [vmem:[%s14986_s23 + $0x190] sm:$0xff] %vm3672_vm2, %v4363_v54  ;;  %v13652_v26 = vmul.f32 %v10903_v61, %v13257_v33 }
 0x5eb   :  { %v10905_v17 = vpop.eup %10904  ;;  %v6532_v29 = vpop.permute.xlu1 %6531  ;;  %10914 = vrcp.f32 %v4227_v22 }
 0x5ec   :  { %10430 = vmatprep.subr.mxu0 %v6532_v29  ;;  %v4365_v2 = vmul.f32 %v10905_v17, %v13255_v48  ;;  %4432 = vst.msk [vmem:[%s14986_s23 + $0x1b8] sm:$0xff] %vm3672_vm2, %v13652_v26 }
 0x5ed   :  { %v10907_v15 = vpop.eup %10906  ;;  %10431 = vmatpush3.msra.mxu0 %v6532_v29 }
 0x5ee   :  { %4429 = vst.msk [vmem:[%s14986_s23 + $0x1a0] sm:$0xff] %vm3672_vm2, %v4365_v2  ;;  %v13665_v33 = vmul.f32 %v10907_v15, %v13264_v1 }
 0x5ef   :  { %v6530_v18 = vpop.permute.xlu1 %6529 }
 0x5f0   :  { %10432 = vmatprep.subr.mxu0 %v6530_v18  ;;  %4434 = vst.msk [vmem:[%s14986_s23 + $0x1c8] sm:$0xff] %vm3672_vm2, %v13665_v33 }
 0x5f1   :  { %v10909_v48 = vpop.eup %10908  ;;  %10433 = vmatpush3.msra.mxu0 %v6530_v18 }
 0x5f2   :  { %10435 = vmatmul.mubr.msk.f32.vlgmr.msra.gmra.mxu0 %vm3672_vm2, %v4362_v25  ;;  %v13674_v37 = vmul.f32 %v10909_v48, %v13279_v35 }
 0x5f3   :  { %10448 = vmatprep.mubr.msk.f32.mxu0 %vm3672_vm2, %v4365_v2 }
 0x5f4   :  { %v10911_v10 = vpop.eup %10910  ;;  %4436 = vst.msk [vmem:[%s14986_s23 + $0x1d8] sm:$0xff] %vm3672_vm2, %v13674_v37 }
 0x5f5   :  { %v10913_v1 = vpop.eup %10912  ;;  %v13683_v63 = vmul.f32 %v10911_v10, %v13287_v50  ;;  %v13737_v13 = vpop.f32.mrf.mxu1 }
 0x5f6   :  { %v4233_v52 = vpop.xlane.xlu0 %4232  ;;  %v13686_v39 = vmul.f32 %v10913_v1, %v13290_v36 }
 0x5f7   :  { %10916 = vrcp.f32 %v4233_v52  ;;  %4431 = vst.msk [vmem:[%s14986_s23 + $0x1b0] sm:$0xff] %vm3672_vm2, %v13683_v63  ;;  %v13741_v4 = vpop.f32.mrf.mxu1 }
 0x5f8   :  { %v10915_v35 = vpop.eup %10914  ;;  %4438 = vst.msk [vmem:[%s14986_s23 + $0x1e8] sm:$0xff] %vm3672_vm2, %v13686_v39 }
 0x5f9   :  { %v13699_v50 = vmul.f32 %v10915_v35, %v13297_v30 }
 0x5fa   :  { %v4239_v57 = vpop.xlane.xlu0 %4238 }
 0x5fb   :  { %10918 = vrcp.f32 %v4239_v57  ;;  %4433 = vst.msk [vmem:[%s14986_s23 + $0x1c0] sm:$0xff] %vm3672_vm2, %v13699_v50 }
 0x5fe   :  { %v6445_v36 = vpop.permute.xlu0 %6444 }
 0x5ff   :  { %10423 = vmatprep.subr.mxu1 %v6445_v36 }
 0x600   :  { %10424 = vmatpush3.msra.mxu1 %v6445_v36 }
 0x602   :  { %v6443_v55 = vpop.permute.xlu0 %6442 }
 0x603   :  { %10425 = vmatprep.subr.mxu1 %v6443_v55 }
 0x604   :  { %v10917_v53 = vpop.eup %10916  ;;  %10426 = vmatpush3.msra.mxu1 %v6443_v55 }
 0x605   :  { %10428 = vmatmul.mubr.msk.f32.vlgmr.msra.gmra.mxu1 %vm3672_vm2, %v13612_v56  ;;  %v13709_v30 = vmul.f32 %v10917_v53, %v13333_v40  ;;  %v13725_v40 = vpop.f32.mrf.mxu0 }
 0x606   :  { %10441 = vmatprep.mubr.msk.f32.mxu1 %vm3672_vm2, %v4363_v54 }
 0x607   :  { %4435 = vst.msk [vmem:[%s14986_s23 + $0x1d0] sm:$0xff] %vm3672_vm2, %v13709_v30  ;;  %v13727_v34 = vpop.f32.mrf.mxu0  ;;  %v13745_v20 = vpop.f32.mrf.mxu1 }
 0x608   :  { %v10919_v12 = vpop.eup %10918 }
 0x609   :  { %v13718_v41 = vmul.f32 %v10919_v12, %v13345_v7  ;;  %v13729_v49 = vpop.f32.mrf.mxu0  ;;  %v13749_v14 = vpop.f32.mrf.mxu1 }
 0x60b   :  { %4437 = vst.msk [vmem:[%s14986_s23 + $0x1e0] sm:$0xff] %vm3672_vm2, %v13718_v41  ;;  %v13731_v3 = vpop.f32.mrf.mxu0 }
 0x60d   :  { %v13733_v21 = vpop.f32.mrf.mxu0 }
 0x60f   :  { %v13735_v27 = vpop.f32.mrf.mxu0 }
 0x611   :  { %v13739_v19 = vpop.f32.mrf.mxu0 }
 0x613   :  { %v13743_v16 = vpop.f32.mrf.mxu0 }
 0x617   :  { %v13751_v60 = vpop.f32.mrf.mxu1 }
 0x619   :  { %v13761_v28 = vpop.f32.mrf.mxu1 }
 0x620   :  { %v4248_v7 = vpop.xlane.xlu1 %4247 }
 0x621   :  { %10920 = vrcp.f32 %v4248_v7 }
 0x624   :  { %v6617_v42 = vpop.permute.xlu1 %6616 }
 0x627   :  { %v13763_v43 = vpop.f32.mrf.mxu1 }
 0x628   :  { %v10324_v46 = vpop.f32.mrf.mxu0  ;;  %v6704_v0 = vpop.permute.xlu1 %6703 }
 0x629   :  { %7243 = vrot.lane.b32.xlu1 %v10324_v46, %s11081_s7  ;;  %v13765_v45 = vpop.f32.mrf.mxu1 }
 0x62a   :  { %v5215_v58 = vpop.f32.mrf.mxu0 }
 0x62b   :  { %7241 = vrot.lane.b32.xlu0 %v5215_v58, %s11081_s7  ;;  %v7469_v58 = vld [vmem:[%s15349_s5 + $0x18] sm:$0xff] }
 0x62c   :  { %v6791_v23 = vpop.permute.xlu1 %6790 }
 0x62e   :  { %v10921_v6 = vpop.eup %10920 }
 0x62f   :  { %v13754_v5 = vmul.f32 %v10921_v6, %v13409_v11  ;;  %v7467_v6 = vld [vmem:[%s15349_s5 + $0x8] sm:$0xff] }
 0x630   :  { %v10338_v32 = vpop.f32.mrf.mxu0  ;;  %v6878_v25 = vpop.permute.xlu1 %6877 }
 0x631   :  { %4440 = vst.msk [vmem:[%s14986_s23 + $0x1f8] sm:$0xff] %vm3672_vm2, %v13754_v5 }
 0x633   :  { %v4245_v56 = vpop.xlane.xlu0 %4244 }
 0x634   :  { %10922 = vrcp.f32 %v4245_v56 }
 0x637   :  { %v6619_v44 = vpop.permute.xlu0 %6618 }
 0x638   :  { %10437 = vmatprep.subr.mxu1 %v6619_v44 }
 0x639   :  { %10438 = vmatpush3.msra.mxu1 %v6619_v44 }
 0x63a   :  { %10439 = vmatprep.subr.mxu1 %v6617_v42 }
 0x63b   :  { %v10331_v11 = vpop.f32.mrf.mxu1  ;;  %10440 = vmatpush3.msra.mxu1 %v6617_v42  ;;  %v6706_v51 = vpop.permute.xlu0 %6705  ;;  %v7468_v42 = vld [vmem:[%s15349_s5 + $0x10] sm:$0xff] }
 0x63c   :  { %7247 = vrot.lane.b32.xlu1 %v10331_v11, %s11081_s7  ;;  %10442 = vmatmul.mubr.msk.f32.vlgmr.msra.gmra.mxu1 %vm3672_vm2, %v13620_v31  ;;  %v5389_v31 = vpop.f32.mrf.mxu0 }
 0x63d   :  { %10444 = vmatprep.subr.mxu0 %v6706_v51  ;;  %v5302_v9 = vpop.f32.mrf.mxu1  ;;  %10455 = vmatprep.mubr.msk.f32.mxu1 %vm3672_vm2, %v13683_v63 }
 0x63e   :  { %10445 = vmatpush3.msra.mxu0 %v6706_v51  ;;  %7245 = vrot.lane.b32.xlu0 %v5302_v9, %s11081_s7 }
 0x63f   :  { %10446 = vmatprep.subr.mxu0 %v6704_v0  ;;  %v6793_v8 = vpop.permute.xlu0 %6792 }
 0x640   :  { %10447 = vmatpush3.msra.mxu0 %v6704_v0  ;;  %7251 = vrot.lane.b32.xlu1 %v10338_v32, %s11081_s7 }
 0x641   :  { %v10923_v24 = vpop.eup %10922  ;;  %10449 = vmatmul.mubr.msk.f32.vlgmr.msra.gmra.mxu0 %vm3672_vm2, %v13639_v38  ;;  %10451 = vmatprep.subr.mxu1 %v6793_v8  ;;  %v6965_v38 = vpop.permute.xlu1 %6964 }
 0x642   :  { %10452 = vmatpush3.msra.mxu1 %v6793_v8  ;;  %10462 = vmatprep.mubr.msk.f32.mxu0 %vm3672_vm2, %v13699_v50  ;;  %v4375_v47 = vmul.f32 %v10923_v24, %v13429_v62 }
 0x643   :  { %7249 = vrot.lane.b32.xlu0 %v5389_v31, %s11081_s7  ;;  %10453 = vmatprep.subr.mxu1 %v6791_v23  ;;  %v10345_v59 = vpop.f32.mrf.mxu1  ;;  %v6880_v54 = vpop.permute.xlu0 %6879 }
 0x644   :  { %10454 = vmatpush3.msra.mxu1 %v6791_v23  ;;  %7255 = vrot.lane.b32.xlu1 %v10345_v59, %s11081_s7  ;;  %4439 = vst.msk [vmem:[%s14986_s23 + $0x1f0] sm:$0xff] %vm3672_vm2, %v4375_v47  ;;  %s11082_s23 = smov 16  }
 0x645   :  { %10456 = vmatmul.mubr.msk.f32.vlgmr.msra.gmra.mxu1 %vm3672_vm2, %v13652_v26  ;;  %10458 = vmatprep.subr.mxu0 %v6880_v54  ;;  %v5476_v61 = vpop.f32.mrf.mxu1  ;;  %v7052_v22 = vpop.permute.xlu1 %7051 }
 0x646   :  { %10459 = vmatpush3.msra.mxu0 %v6880_v54  ;;  %10469 = vmatprep.mubr.msk.f32.mxu1 %vm3672_vm2, %v13709_v30 }
 0x647   :  { %7253 = vrot.lane.b32.xlu0 %v5476_v61, %s11081_s7  ;;  %10460 = vmatprep.subr.mxu0 %v6878_v25  ;;  %v6967_v62 = vpop.permute.xlu0 %6966 }
 0x648   :  { %10461 = vmatpush3.msra.mxu0 %v6878_v25  ;;  %10465 = vmatprep.subr.mxu1 %v6967_v62 }
 0x649   :  { %10463 = vmatmul.mubr.msk.f32.vlgmr.msra.gmra.mxu0 %vm3672_vm2, %v13665_v33  ;;  %10466 = vmatpush3.msra.mxu1 %v6967_v62  ;;  %v7139_v29 = vpop.permute.xlu1 %7138 }
 0x64a   :  { %10476 = vmatprep.mubr.msk.f32.mxu0 %vm3672_vm2, %v13718_v41  ;;  %10467 = vmatprep.subr.mxu1 %v6965_v38 }
 0x64b   :  { %10468 = vmatpush3.msra.mxu1 %v6965_v38  ;;  %v7054_v26 = vpop.permute.xlu0 %7053 }
 0x64c   :  { %10470 = vmatmul.mubr.msk.f32.vlgmr.msra.gmra.mxu1 %vm3672_vm2, %v13674_v37  ;;  %10472 = vmatprep.subr.mxu0 %v7054_v26 }
 0x64d   :  { %10473 = vmatpush3.msra.mxu0 %v7054_v26  ;;  %10483 = vmatprep.mubr.msk.f32.mxu1 %vm3672_vm2, %v4375_v47 }
 0x64e   :  { %10474 = vmatprep.subr.mxu0 %v7052_v22 }
 0x64f   :  { %10475 = vmatpush3.msra.mxu0 %v7052_v22  ;;  %v7141_v17 = vpop.permute.xlu0 %7140 }
 0x650   :  { %10477 = vmatmul.mubr.msk.f32.vlgmr.msra.gmra.mxu0 %vm3672_vm2, %v13686_v39  ;;  %10479 = vmatprep.subr.mxu1 %v7141_v17 }
 0x651   :  { %10480 = vmatpush3.msra.mxu1 %v7141_v17  ;;  %10486 = vmatprep.subr.mxu0 %v7469_v58 }
 0x652   :  { %10481 = vmatprep.subr.mxu1 %v7139_v29  ;;  %10487 = vmatpush3.msra.mxu0 %v7469_v58 }
 0x653   :  { %10482 = vmatpush3.msra.mxu1 %v7139_v29  ;;  %10488 = vmatprep.subr.mxu0 %v7468_v42 }
 0x654   :  { %v10352_v2 = vpop.f32.mrf.mxu0  ;;  %10484 = vmatmul.mubr.msk.f32.vlgmr.msra.gmra.mxu1 %vm3672_vm2, %v13754_v5  ;;  %10489 = vmatpush3.msra.mxu0 %v7468_v42  ;;  %v7466_v5 = vld [vmem:[%s15349_s5] sm:$0xff] }
 0x655   :  { %7259 = vrot.lane.b32.xlu1 %v10352_v2, %s11081_s7  ;;  %10490 = vmatprep.subr.mxu0 %v7467_v6 }
 0x656   :  { %v5563_v15 = vpop.f32.mrf.mxu0  ;;  %10491 = vmatpush3.msra.mxu0 %v7467_v6 }
 0x657   :  { %7257 = vrot.lane.b32.xlu0 %v5563_v15, %s11081_s7  ;;  %10492 = vmatprep.subr.mxu0 %v7466_v5 }
 0x658   :  { %10493 = vmatpush3.msra.mxu0 %v7466_v5 }
 0x669   :  { %v10359_v33 = vpop.f32.mrf.mxu1 }
 0x66a   :  { %7263 = vrot.lane.b32.xlu1 %v10359_v33, %s11081_s7 }
 0x66b   :  { %v5650_v18 = vpop.f32.mrf.mxu1  ;;  %v10366_v48 = vpop.f32.mrf.mxu0 }
 0x66c   :  { %7261 = vrot.lane.b32.xlu0 %v5650_v18, %s11081_s7 }
 0x66d   :  { %v5737_v37 = vpop.f32.mrf.mxu0 }
 0x66e   :  { %7267 = vrot.lane.b32.xlu1 %v10366_v48, %s11081_s7 }
 0x670   :  { %7265 = vrot.lane.b32.xlu0 %v5737_v37, %s11081_s7 }
 0x672   :  { %v10373_v10 = vpop.f32.mrf.mxu1 }
 0x673   :  { %7271 = vrot.lane.b32.xlu1 %v10373_v10, %s11081_s7 }
 0x674   :  { %v5824_v1 = vpop.f32.mrf.mxu1 }
 0x675   :  { %7269 = vrot.lane.b32.xlu0 %v5824_v1, %s11081_s7  ;;  %v10380_v63 = vpop.f32.mrf.mxu0 }
 0x677   :  { %7307 = vrot.lane.b32.xlu1 %v10380_v63, %s11082_s23  ;;  %v5911_v52 = vpop.f32.mrf.mxu0 }
 0x679   :  { %7305 = vrot.lane.b32.xlu0 %v5911_v52, %s11082_s23 }
 0x67c   :  { %v10387_v39 = vpop.f32.mrf.mxu1 }
 0x67d   :  { %7311 = vrot.lane.b32.xlu1 %v10387_v39, %s11082_s23 }
 0x67e   :  { %v5998_v35 = vpop.f32.mrf.mxu1 }
 0x67f   :  { %7309 = vrot.lane.b32.xlu0 %v5998_v35, %s11082_s23  ;;  %v10394_v50 = vpop.f32.mrf.mxu0 }
 0x681   :  { %7315 = vrot.lane.b32.xlu1 %v10394_v50, %s11082_s23  ;;  %v6085_v57 = vpop.f32.mrf.mxu0 }
 0x683   :  { %7313 = vrot.lane.b32.xlu0 %v6085_v57, %s11082_s23 }
 0x688   :  { %v10401_v36 = vpop.f32.mrf.mxu1 }
 0x689   :  { %7319 = vrot.lane.b32.xlu1 %v10401_v36, %s11082_s23 }
 0x68a   :  { %v6172_v55 = vpop.f32.mrf.mxu1 }
 0x68b   :  { %7317 = vrot.lane.b32.xlu0 %v6172_v55, %s11082_s23  ;;  %v10408_v53 = vpop.f32.mrf.mxu0 }
 0x68d   :  { %7323 = vrot.lane.b32.xlu1 %v10408_v53, %s11082_s23  ;;  %v6259_v30 = vpop.f32.mrf.mxu0 }
 0x68f   :  { %7321 = vrot.lane.b32.xlu0 %v6259_v30, %s11082_s23 }
 0x697   :  { %v10415_v12 = vpop.f32.mrf.mxu1 }
 0x698   :  { %7327 = vrot.lane.b32.xlu1 %v10415_v12, %s11082_s23 }
 0x699   :  { %v6346_v41 = vpop.f32.mrf.mxu1 }
 0x69a   :  { %7325 = vrot.lane.b32.xlu0 %v6346_v41, %s11082_s23  ;;  %v10422_v7 = vpop.f32.mrf.mxu0 }
 0x69b   :  { %v13839_v11 = vpop.permute.xlu1 %7243 }
 0x69c   :  { %7331 = vrot.lane.b32.xlu1 %v10422_v7, %s11082_s23  ;;  %v6433_v46 = vpop.f32.mrf.mxu0 }
 0x69d   :  { %v7242_v51 = vpop.permute.xlu0 %7241 }
 0x69e   :  { %7329 = vrot.lane.b32.xlu0 %v6433_v46, %s11082_s23 }
 0x6ae   :  { %v13841_v9 = vpop.permute.xlu1 %7247 }
 0x6b0   :  { %v13843_v32 = vpop.permute.xlu0 %7245 }
 0x6b2   :  { %v10436_v56 = vpop.f32.mrf.mxu0  ;;  %v13845_v25 = vpop.permute.xlu1 %7251 }
 0x6b4   :  { %v6607_v23 = vpop.f32.mrf.mxu0 }
 0x6b5   :  { %v13847_v8 = vpop.permute.xlu0 %7249 }
 0x6b6   :  { %v13849_v24 = vpop.permute.xlu1 %7255 }
 0x6b9   :  { %v13852_v47 = vpop.permute.xlu0 %7253 }
 0x6c5   :  { %v10429_v0 = vpop.f32.mrf.mxu1 }
 0x6c6   :  { %7335 = vrot.lane.b32.xlu1 %v10429_v0, %s11082_s23 }
 0x6c7   :  { %v6520_v44 = vpop.f32.mrf.mxu1  ;;  %v13855_v54 = vpop.permute.xlu1 %7259 }
 0x6c8   :  { %7333 = vrot.lane.b32.xlu0 %v6520_v44, %s11082_s23  ;;  %v7417_v44 = vsel %vm723_vm1, %v13727_v34, %v7242_v51  ;;  %v7419_v51 = vsel %vm723_vm1, %v13741_v4, %v13843_v32  ;;  %v7421_v4 = vsel %vm723_vm1, %v13731_v3, %v13847_v8  ;;  %v7423_v3 = vsel %vm723_vm1, %v13749_v14, %v13852_v47 }
 0x6c9   :  { %v13857_v61 = vpop.permute.xlu0 %7257 }
 0x6ca   :  { %7371 = vrot.lane.b32.xlu1 %v10436_v56, %s11083_s0  ;;  %v7425_v14 = vsel %vm723_vm1, %v13735_v27, %v13857_v61 }
 0x6cc   :  { %7369 = vrot.lane.b32.xlu0 %v6607_v23, %s11083_s0 }
 0x6dc   :  { %v13860_v22 = vpop.permute.xlu1 %7263 }
 0x6de   :  { %v13863_v17 = vpop.permute.xlu0 %7261 }
 0x6df   :  { %v7427_v27 = vsel %vm723_vm1, %v13761_v28, %v13863_v17 }
 0x6e0   :  { %v13867_v15 = vpop.permute.xlu1 %7267 }
 0x6e2   :  { %v13870_v18 = vpop.permute.xlu0 %7265 }
 0x6e3   :  { %v7429_v28 = vsel %vm723_vm1, %v13743_v16, %v13870_v18 }
 0x6e5   :  { %v13874_v10 = vpop.permute.xlu1 %7271 }
 0x6e7   :  { %v13877_v63 = vpop.permute.xlu0 %7269 }
 0x6e8   :  { %v7431_v16 = vsel %vm723_vm1, %v13765_v45, %v13877_v63  ;;  %v13996_v45 = vld [vmem:[%s15350_s30] ss:$0 sm:$0xff] }
 0x6e9   :  { %v7308_v35 = vpop.permute.xlu1 %7307 }
 0x6eb   :  { %v7306_v57 = vpop.permute.xlu0 %7305 }
 0x6ef   :  { %v7312_v36 = vpop.permute.xlu1 %7311 }
 0x6f1   :  { %v7310_v55 = vpop.permute.xlu0 %7309 }
 0x6f3   :  { %v7316_v53 = vpop.permute.xlu1 %7315 }
 0x6f5   :  { %v7314_v30 = vpop.permute.xlu0 %7313 }
 0x6fb   :  { %v7320_v12 = vpop.permute.xlu1 %7319 }
 0x6fc   :  { %v10443_v31 = vpop.f32.mrf.mxu1 }
 0x6fd   :  { %7375 = vrot.lane.b32.xlu1 %v10443_v31, %s11083_s0  ;;  %v7318_v41 = vpop.permute.xlu0 %7317  ;;  %v7418_v31 = vsel %vm723_vm1, %v13725_v40, %v13839_v11  ;;  %v7420_v40 = vsel %vm723_vm1, %v13737_v13, %v13841_v9  ;;  %v7435_v11 = vsel %vm3672_vm2, %v7419_v51, %v7310_v55  ;;  %v7422_v13 = vsel %vm723_vm1, %v13729_v49, %v13845_v25 }
 0x6fe   :  { %v6694_v59 = vpop.f32.mrf.mxu1  ;;  %v7437_v9 = vsel %vm3672_vm2, %v7421_v4, %v7314_v30  ;;  %v7424_v49 = vsel %vm723_vm1, %v13745_v20, %v13849_v24  ;;  %v7439_v25 = vsel %vm3672_vm2, %v7423_v3, %v7318_v41  ;;  %v7426_v20 = vsel %vm723_vm1, %v13733_v21, %v13855_v54  ;;  %v15354_v4 = vld [vmem:[#allocation11_spill] sm:$0xff] }
 0x6ff   :  { %7373 = vrot.lane.b32.xlu0 %v6694_v59, %s11083_s0  ;;  %v7324_v7 = vpop.permute.xlu1 %7323  ;;  %v7433_v59 = vsel %vm3672_vm2, %v7417_v44, %v7306_v57  ;;  %v7440_v57 = vsel %vm3672_vm2, %v7424_v49, %v7320_v12  ;;  %v7428_v21 = vsel %vm723_vm1, %v13751_v60, %v13860_v22  ;;  %v7430_v60 = vsel %vm723_vm1, %v13739_v19, %v13867_v15 }
 0x700   :  { %v7442_v30 = vsel %vm3672_vm2, %v7426_v20, %v7324_v7  ;;  %v7432_v19 = vsel %vm723_vm1, %v13763_v43, %v13874_v10 }
 0x701   :  { %v10450_v38 = vpop.f32.mrf.mxu0  ;;  %v7322_v46 = vpop.permute.xlu0 %7321 }
 0x702   :  { %7379 = vrot.lane.b32.xlu1 %v10450_v38, %s11083_s0  ;;  %v7441_v24 = vsel %vm3672_vm2, %v7425_v14, %v7322_v46  ;;  %v15357_v14 = vld [vmem:[#allocation16_spill] sm:$0xff] }
 0x703   :  { %v6781_v62 = vpop.f32.mrf.mxu0 }
 0x704   :  { %7377 = vrot.lane.b32.xlu0 %v6781_v62, %s11083_s0  ;;  %v7434_v62 = vsel %vm3672_vm2, %v7418_v31, %v7308_v35 }
 0x705   :  { %v10457_v26 = vpop.f32.mrf.mxu1 }
 0x706   :  { %7383 = vrot.lane.b32.xlu1 %v10457_v26, %s11083_s0 }
 0x707   :  { %v6868_v29 = vpop.f32.mrf.mxu1 }
 0x708   :  { %7381 = vrot.lane.b32.xlu0 %v6868_v29, %s11083_s0 }
 0x709   :  { %v10464_v2 = vpop.f32.mrf.mxu0 }
 0x70a   :  { %7387 = vrot.lane.b32.xlu1 %v10464_v2, %s11083_s0  ;;  %v13883_v58 = vpop.permute.xlu1 %7327 }
 0x70b   :  { %v6955_v33 = vpop.f32.mrf.mxu0  ;;  %v7444_v7 = vsel %vm3672_vm2, %v7428_v21, %v13883_v58 }
 0x70c   :  { %7385 = vrot.lane.b32.xlu0 %v6955_v33, %s11083_s0  ;;  %v10471_v48 = vpop.f32.mrf.mxu1  ;;  %v7326_v42 = vpop.permute.xlu0 %7325  ;;  %v7436_v33 = vsel %vm3672_vm2, %v7420_v40, %v7312_v36 }
 0x70d   :  { %v7443_v54 = vsel %vm3672_vm2, %v7427_v27, %v7326_v42 }
 0x70e   :  { %7391 = vrot.lane.b32.xlu1 %v10471_v48, %s11083_s0  ;;  %v7042_v37 = vpop.f32.mrf.mxu1  ;;  %v13885_v6 = vpop.permute.xlu1 %7331 }
 0x70f   :  { %v7446_v58 = vsel %vm3672_vm2, %v7430_v60, %v13885_v6 }
 0x710   :  { %7389 = vrot.lane.b32.xlu0 %v7042_v37, %s11083_s0  ;;  %v10478_v1 = vpop.f32.mrf.mxu0  ;;  %v13887_v5 = vpop.permute.xlu0 %7329 }
 0x711   :  { %v7445_v22 = vsel %vm3672_vm2, %v7429_v28, %v13887_v5 }
 0x712   :  { %7395 = vrot.lane.b32.xlu1 %v10478_v1, %s11083_s0  ;;  %v7129_v52 = vpop.f32.mrf.mxu0 }
 0x714   :  { %7393 = vrot.lane.b32.xlu0 %v7129_v52, %s11083_s0  ;;  %v10485_v39 = vpop.f32.mrf.mxu1  ;;  %v7438_v52 = vsel %vm3672_vm2, %v7422_v13, %v7316_v53 }
 0x716   :  { %7399 = vrot.lane.b32.xlu1 %v10485_v39, %s11083_s0  ;;  %v7216_v50 = vpop.f32.mrf.mxu1 }
 0x718   :  { %7397 = vrot.lane.b32.xlu0 %v7216_v50, %s11083_s0 }
 0x738   :  { %v13889_v0 = vpop.permute.xlu1 %7335 }
 0x739   :  { %v7448_v5 = vsel %vm3672_vm2, %v7432_v19, %v13889_v0  ;;  %v15362_v19 = vld [vmem:[#allocation19_spill] sm:$0xff] }
 0x73a   :  { %v13891_v56 = vpop.permute.xlu0 %7333 }
 0x73b   :  { %v7447_v15 = vsel %vm3672_vm2, %v7431_v16, %v13891_v56  ;;  %v15351_v56 = vld [vmem:[#allocation10_spill] sm:$0xff] }
 0x73c   :  { %v7372_v23 = vpop.permute.xlu1 %7371 }
 0x73d   :  { %v7451_v29 = vsel %vm7449_vm3, %v7434_v62, %v7372_v23 }
 0x73e   :  { %v7370_v38 = vpop.permute.xlu0 %7369 }
 0x73f   :  { %v7450_v26 = vsel %vm7449_vm3, %v7433_v59, %v7370_v38 }
 0x740   :  { %10494 = vmatprep.mubr.msk.f32.mxu0 %vm97_vm0, %v7450_v26 }
 0x741   :  { %10495 = vmatmul.mubr.msk.f32.vlgmr.msra.gmra.mxu0 %vm97_vm0, %v7451_v29  ;;  %v15352_v29 = vld [vmem:[#allocation9_spill] sm:$0xff] }
 0x76f   :  { %v7376_v34 = vpop.permute.xlu1 %7375 }
 0x770   :  { %v7453_v37 = vsel %vm7449_vm3, %v7436_v33, %v7376_v34 }
 0x771   :  { %v7374_v2 = vpop.permute.xlu0 %7373 }
 0x772   :  { %v7452_v48 = vsel %vm7449_vm3, %v7435_v11, %v7374_v2 }
 0x773   :  { %10497 = vmatprep.mubr.msk.f32.mxu0 %vm97_vm0, %v7452_v48  ;;  %v15353_v48 = vld [vmem:[#allocation12_spill] sm:$0xff] }
 0x774   :  { %v7380_v1 = vpop.permute.xlu1 %7379  ;;  %10498 = vmatmul.mubr.msk.f32.gmra.mxu0 %vm97_vm0, %v7453_v37 }
 0x775   :  { %v7455_v35 = vsel %vm7449_vm3, %v7438_v52, %v7380_v1 }
 0x776   :  { %v7378_v32 = vpop.permute.xlu0 %7377 }
 0x777   :  { %v7454_v39 = vsel %vm7449_vm3, %v7437_v9, %v7378_v32 }
 0x778   :  { %v7384_v50 = vpop.permute.xlu1 %7383  ;;  %10500 = vmatprep.mubr.msk.f32.mxu0 %vm97_vm0, %v7454_v39 }
 0x779   :  { %10501 = vmatmul.mubr.msk.f32.gmra.mxu0 %vm97_vm0, %v7455_v35  ;;  %v7457_v55 = vsel %vm7449_vm3, %v7440_v57, %v7384_v50  ;;  %v15355_v35 = vld [vmem:[#allocation14_spill] sm:$0xff] }
 0x77a   :  { %v7382_v8 = vpop.permute.xlu0 %7381 }
 0x77b   :  { %v7456_v36 = vsel %vm7449_vm3, %v7439_v25, %v7382_v8  ;;  %v15356_v8 = vld [vmem:[#allocation13_spill] sm:$0xff] }
 0x77c   :  { %v7388_v53 = vpop.permute.xlu1 %7387  ;;  %10503 = vmatprep.mubr.msk.f32.mxu0 %vm97_vm0, %v7456_v36 }
 0x77d   :  { %10504 = vmatmul.mubr.msk.f32.gmra.mxu0 %vm97_vm0, %v7457_v55  ;;  %v7459_v41 = vsel %vm7449_vm3, %v7442_v30, %v7388_v53 }
 0x77e   :  { %v7386_v47 = vpop.permute.xlu0 %7385 }
 0x77f   :  { %v7458_v12 = vsel %vm7449_vm3, %v7441_v24, %v7386_v47 }
 0x780   :  { %v7392_v44 = vpop.permute.xlu1 %7391  ;;  %10506 = vmatprep.mubr.msk.f32.mxu0 %vm97_vm0, %v7458_v12  ;;  %v15358_v12 = vld [vmem:[#allocation15_spill] sm:$0xff] }
 0x781   :  { %10507 = vmatmul.mubr.msk.f32.gmra.mxu0 %vm97_vm0, %v7459_v41  ;;  %v7461_v23 = vsel %vm7449_vm3, %v7444_v7, %v7392_v44 }
 0x782   :  { %v7390_v61 = vpop.permute.xlu0 %7389 }
 0x783   :  { %v7460_v46 = vsel %vm7449_vm3, %v7443_v54, %v7390_v61  ;;  %v15359_v54 = vld [vmem:[#allocation18_spill] sm:$0xff] }
 0x784   :  { %v7396_v31 = vpop.permute.xlu1 %7395  ;;  %10509 = vmatprep.mubr.msk.f32.mxu0 %vm97_vm0, %v7460_v46 }
 0x785   :  { %10510 = vmatmul.mubr.msk.f32.gmra.mxu0 %vm97_vm0, %v7461_v23  ;;  %v7463_v59 = vsel %vm7449_vm3, %v7446_v58, %v7396_v31  ;;  %v15360_v31 = vld [vmem:[#allocation17_spill] sm:$0xff]  ;;  %v15361_v58 = vld [vmem:[#allocation20_spill] sm:$0xff] }
 0x786   :  { %v7394_v17 = vpop.permute.xlu0 %7393 }
 0x787   :  { %v7462_v42 = vsel %vm7449_vm3, %v7445_v22, %v7394_v17 }
 0x788   :  { %10512 = vmatprep.mubr.msk.f32.mxu0 %vm97_vm0, %v7462_v42  ;;  %v7400_v18 = vpop.permute.xlu1 %7399 }
 0x789   :  { %10513 = vmatmul.mubr.msk.f32.gmra.mxu0 %vm97_vm0, %v7463_v59  ;;  %v7465_v62 = vsel %vm7449_vm3, %v7448_v5, %v7400_v18 }
 0x78a   :  { %v7398_v6 = vpop.permute.xlu0 %7397 }
 0x78b   :  { %v7464_v38 = vsel %vm7449_vm3, %v7447_v15, %v7398_v6 }
 0x78c   :  { %10515 = vmatprep.mubr.msk.f32.mxu0 %vm97_vm0, %v7464_v38 }
 0x78d   :  { %10516 = vmatmul.mubr.msk.f32.gmra.mxu0 %vm97_vm0, %v7465_v62  ;;  %v15363_v62 = vld [vmem:[#allocation22_spill] sm:$0xff] }
 0x801   :  { %v10496_v43 = vpop.f32.mrf.mxu0 }
 0x802   :  { %v7597_v10 = vadd.f32 %v10496_v43, %v13996_v45 }
 0x803   :  { %v7591_v63 = vpop.f32.mrf.mxu0 }
 0x804   :  { %v14000_v26 = vadd.f32 %v7597_v10, %v15351_v56  ;;  %v7592_v0 = vadd.f32 %v13996_v45, %v7591_v63 }
 0x806   :  { %v14004_v34 = vadd.f32 %v7592_v0, %v15352_v29  ;;  %v7691_v51 = vsel %vm97_vm0, %v14000_v26, 0.0  ;;  %v15364_v0 = vld [vmem:[#allocation21_spill] sm:$0xff] }
 0x807   :  { %7692 = vadd.xlane.f32.xlu1 %v7691_v51 }
 0x808   :  { %v7688_v40 = vsel %vm97_vm0, %v14004_v34, 0.0 }
 0x809   :  { %7689 = vadd.xlane.f32.xlu0 %v7688_v40 }
 0x834   :  { %v10499_v11 = vpop.f32.mrf.mxu0 }
 0x835   :  { %v7607_v2 = vadd.f32 %v10499_v11, %v13996_v45 }
 0x836   :  { %v7601_v33 = vpop.f32.mrf.mxu0 }
 0x837   :  { %v14012_v37 = vadd.f32 %v7607_v2, %v15353_v48  ;;  %v7602_v1 = vadd.f32 %v13996_v45, %v7601_v33  ;;  %v15365_v2 = vld [vmem:[#allocation24_spill] sm:$0xff] }
 0x839   :  { %v14016_v13 = vadd.f32 %v7602_v1, %v15354_v4  ;;  %v10502_v9 = vpop.f32.mrf.mxu0  ;;  %v7697_v32 = vsel %vm97_vm0, %v14012_v37, 0.0  ;;  %v15366_v4 = vld [vmem:[#allocation23_spill] sm:$0xff] }
 0x83a   :  { %v7617_v52 = vadd.f32 %v10502_v9, %v13996_v45  ;;  %7698 = vadd.xlane.f32.xlu0 %v7697_v32 }
 0x83b   :  { %v7611_v39 = vpop.f32.mrf.mxu0  ;;  %v7694_v25 = vsel %vm97_vm0, %v14016_v13, 0.0 }
 0x83c   :  { %v14022_v50 = vadd.f32 %v7617_v52, %v15355_v35  ;;  %v7612_v3 = vadd.f32 %v13996_v45, %v7611_v39 }
 0x83d   :  { %v10505_v49 = vpop.f32.mrf.mxu0 }
 0x83e   :  { %v14028_v57 = vadd.f32 %v7612_v3, %v15356_v8  ;;  %v7627_v36 = vadd.f32 %v10505_v49, %v13996_v45  ;;  %7695 = vadd.xlane.f32.xlu0 %v7694_v25  ;;  %v7703_v55 = vsel %vm97_vm0, %v14022_v50, 0.0 }
 0x83f   :  { %7704 = vadd.xlane.f32.xlu1 %v7703_v55  ;;  %v7621_v53 = vpop.f32.mrf.mxu0 }
 0x840   :  { %v14034_v20 = vadd.f32 %v7627_v36, %v15357_v14  ;;  %v7622_v24 = vadd.f32 %v13996_v45, %v7621_v53  ;;  %v7700_v30 = vsel %vm97_vm0, %v14028_v57, 0.0  ;;  %v7941_v14 = vld [vmem:[%s14973_s10 + $0x8] sm:$0xff] }
 0x841   :  { %v10508_v47 = vpop.f32.mrf.mxu0 }
 0x842   :  { %v14040_v41 = vadd.f32 %v7622_v24, %v15358_v12  ;;  %v7637_v44 = vadd.f32 %v10508_v47, %v13996_v45  ;;  %7701 = vadd.xlane.f32.xlu0 %v7700_v30  ;;  %v7709_v27 = vsel %vm97_vm0, %v14034_v20, 0.0  ;;  %v7940_v24 = vld [vmem:[%s14973_s10] sm:$0xff] }
 0x843   :  { %7710 = vadd.xlane.f32.xlu1 %v7709_v27  ;;  %v7631_v21 = vpop.f32.mrf.mxu0 }
 0x844   :  { %v14046_v61 = vadd.f32 %v7637_v44, %v15359_v54  ;;  %v7632_v7 = vadd.f32 %v13996_v45, %v7631_v21  ;;  %v7706_v23 = vsel %vm97_vm0, %v14040_v41, 0.0 }
 0x845   :  { %v10511_v46 = vpop.f32.mrf.mxu0 }
 0x846   :  { %v14052_v28 = vadd.f32 %v7632_v7, %v15360_v31  ;;  %v7647_v60 = vadd.f32 %v10511_v46, %v13996_v45  ;;  %7707 = vadd.xlane.f32.xlu0 %v7706_v23  ;;  %v7715_v22 = vsel %vm97_vm0, %v14046_v61, 0.0 }
 0x847   :  { %7716 = vadd.xlane.f32.xlu1 %v7715_v22  ;;  %v7641_v17 = vpop.f32.mrf.mxu0 }
 0x848   :  { %v14058_v42 = vadd.f32 %v7647_v60, %v15361_v58  ;;  %v7642_v59 = vadd.f32 %v13996_v45, %v7641_v17  ;;  %v7712_v18 = vsel %vm97_vm0, %v14052_v28, 0.0 }
 0x849   :  { %v10514_v16 = vpop.f32.mrf.mxu0 }
 0x84a   :  { %v14064_v15 = vadd.f32 %v7642_v59, %v15362_v19  ;;  %v7657_v6 = vadd.f32 %v10514_v16, %v13996_v45  ;;  %7713 = vadd.xlane.f32.xlu0 %v7712_v18  ;;  %v7721_v5 = vsel %vm97_vm0, %v14058_v42, 0.0 }
 0x84b   :  { %7722 = vadd.xlane.f32.xlu1 %v7721_v5  ;;  %v7651_v38 = vpop.f32.mrf.mxu0 }
 0x84c   :  { %v14070_v43 = vadd.f32 %v7657_v6, %v15363_v62  ;;  %v7652_v10 = vadd.f32 %v13996_v45, %v7651_v38  ;;  %v7718_v56 = vsel %vm97_vm0, %v14064_v15, 0.0 }
 0x84d   :  { %v10517_v63 = vpop.f32.mrf.mxu0 }
 0x84e   :  { %v14076_v29 = vadd.f32 %v7652_v10, %v15364_v0  ;;  %v7667_v51 = vadd.f32 %v10517_v63, %v13996_v45  ;;  %7719 = vadd.xlane.f32.xlu0 %v7718_v56  ;;  %v7727_v40 = vsel %vm97_vm0, %v14070_v43, 0.0 }
 0x84f   :  { %7728 = vadd.xlane.f32.xlu1 %v7727_v40  ;;  %v7661_v11 = vpop.f32.mrf.mxu0 }
 0x850   :  { %v14082_v33 = vadd.f32 %v7667_v51, %v15365_v2  ;;  %v7662_v48 = vadd.f32 %v13996_v45, %v7661_v11  ;;  %v7724_v1 = vsel %vm97_vm0, %v14076_v29, 0.0 }
 0x852   :  { %v14088_v9 = vadd.f32 %v7662_v48, %v15366_v4  ;;  %7725 = vadd.xlane.f32.xlu0 %v7724_v1  ;;  %v7733_v32 = vsel %vm97_vm0, %v14082_v33, 0.0 }
 0x853   :  { %7734 = vadd.xlane.f32.xlu1 %v7733_v32 }
 0x854   :  { %v7730_v52 = vsel %vm97_vm0, %v14088_v9, 0.0 }
 0x856   :  { %7731 = vadd.xlane.f32.xlu0 %v7730_v52 }
 0x890   :  { %v7693_v39 = vpop.xlane.xlu1 %7692 }
 0x891   :  { %v7737_v35 = vmul.f32 0.03125, %v7693_v39 }
 0x892   :  { %v7690_v3 = vpop.xlane.xlu0 %7689 }
 0x893   :  { %v14095_v45 = vsub.f32 %v14000_v26, %v7737_v35  ;;  %v7736_v49 = vmul.f32 0.03125, %v7690_v3  ;;  %v7943_v26 = vld [vmem:[%s14973_s10 + $0x18] sm:$0xff] }
 0x894   :  { %10518 = vmatprep.subr.mxu1 %v7943_v26 }
 0x895   :  { %v14098_v25 = vsub.f32 %v14004_v34, %v7736_v49  ;;  %v7769_v8 = vmul.f32 %v14095_v45, %v14095_v45  ;;  %v7942_v34 = vld [vmem:[%s14973_s10 + $0x10] sm:$0xff]  ;;  %10519 = vmatpush3.msra.mxu1 %v7943_v26 }
 0x896   :  { %10520 = vmatprep.subr.mxu1 %v7942_v34 }
 0x897   :  { %v7787_v36 = vsel %vm97_vm0, %v7769_v8, 0.0  ;;  %v7768_v55 = vmul.f32 %v14098_v25, %v14098_v25  ;;  %10521 = vmatpush3.msra.mxu1 %v7942_v34 }
 0x898   :  { %7788 = vadd.xlane.f32.xlu1 %v7787_v36  ;;  %10522 = vmatprep.subr.mxu1 %v7941_v14 }
 0x899   :  { %v7784_v53 = vsel %vm97_vm0, %v7768_v55, 0.0  ;;  %10523 = vmatpush3.msra.mxu1 %v7941_v14 }
 0x89a   :  { %7785 = vadd.xlane.f32.xlu0 %v7784_v53  ;;  %10524 = vmatprep.subr.mxu1 %v7940_v24 }
 0x89b   :  { %10525 = vmatpush3.msra.mxu1 %v7940_v24 }
 0x8c3   :  { %v7699_v47 = vpop.xlane.xlu0 %7698 }
 0x8c4   :  { %v7739_v30 = vmul.f32 0.03125, %v7699_v47 }
 0x8c6   :  { %v14119_v12 = vsub.f32 %v14012_v37, %v7739_v30 }
 0x8c7   :  { %v7696_v44 = vpop.xlane.xlu0 %7695 }
 0x8c8   :  { %v7705_v27 = vpop.xlane.xlu1 %7704  ;;  %v7738_v21 = vmul.f32 0.03125, %v7696_v44  ;;  %v7771_v54 = vmul.f32 %v14119_v12, %v14119_v12 }
 0x8c9   :  { %v7741_v7 = vmul.f32 0.03125, %v7705_v27 }
 0x8ca   :  { %v14124_v46 = vsub.f32 %v14016_v13, %v7738_v21  ;;  %v7793_v23 = vsel %vm97_vm0, %v7771_v54, 0.0 }
 0x8cb   :  { %v14128_v31 = vsub.f32 %v14022_v50, %v7741_v7  ;;  %7794 = vadd.xlane.f32.xlu1 %v7793_v23  ;;  %v7702_v60 = vpop.xlane.xlu0 %7701 }
 0x8cc   :  { %v7711_v22 = vpop.xlane.xlu1 %7710  ;;  %v7740_v37 = vmul.f32 0.03125, %v7702_v60  ;;  %v7770_v17 = vmul.f32 %v14124_v46, %v14124_v46 }
 0x8cd   :  { %v7743_v58 = vmul.f32 0.03125, %v7711_v22  ;;  %v7773_v59 = vmul.f32 %v14128_v31, %v14128_v31 }
 0x8ce   :  { %v14135_v16 = vsub.f32 %v14028_v57, %v7740_v37  ;;  %v7790_v13 = vsel %vm97_vm0, %v7770_v17, 0.0 }
 0x8cf   :  { %v14139_v18 = vsub.f32 %v14034_v20, %v7743_v58  ;;  %v7799_v50 = vsel %vm97_vm0, %v7773_v59, 0.0  ;;  %7791 = vadd.xlane.f32.xlu0 %v7790_v13  ;;  %v7708_v19 = vpop.xlane.xlu0 %7707 }
 0x8d0   :  { %v7717_v6 = vpop.xlane.xlu1 %7716  ;;  %7800 = vadd.xlane.f32.xlu1 %v7799_v50  ;;  %v7742_v5 = vmul.f32 0.03125, %v7708_v19  ;;  %v7772_v38 = vmul.f32 %v14135_v16, %v14135_v16  ;;  %v14206_v19 = vld [vmem:[%s15367_s6] ss:$0 sm:$0xff] }
 0x8d1   :  { %v7745_v62 = vmul.f32 0.03125, %v7717_v6  ;;  %v7775_v57 = vmul.f32 %v14139_v18, %v14139_v18 }
 0x8d2   :  { %v14147_v10 = vsub.f32 %v14040_v41, %v7742_v5  ;;  %v7796_v20 = vsel %vm97_vm0, %v7772_v38, 0.0 }
 0x8d3   :  { %v14151_v63 = vsub.f32 %v14046_v61, %v7745_v62  ;;  %v7805_v56 = vsel %vm97_vm0, %v7775_v57, 0.0  ;;  %7797 = vadd.xlane.f32.xlu0 %v7796_v20  ;;  %v7714_v0 = vpop.xlane.xlu0 %7713  ;;  %v14213_v62 = vld [vmem:[%s14972_s9] ss:$0 sm:$0xff] }
 0x8d4   :  { %v7723_v51 = vpop.xlane.xlu1 %7722  ;;  %7806 = vadd.xlane.f32.xlu1 %v7805_v56  ;;  %v7744_v40 = vmul.f32 0.03125, %v7714_v0  ;;  %v7774_v11 = vmul.f32 %v14147_v10, %v14147_v10 }
 0x8d5   :  { %v7747_v2 = vmul.f32 0.03125, %v7723_v51  ;;  %v7777_v41 = vmul.f32 %v14151_v63, %v14151_v63 }
 0x8d6   :  { %v14159_v48 = vsub.f32 %v14052_v28, %v7744_v40  ;;  %v7802_v61 = vsel %vm97_vm0, %v7774_v11, 0.0 }
 0x8d7   :  { %v14163_v1 = vsub.f32 %v14058_v42, %v7747_v2  ;;  %v7811_v4 = vsel %vm97_vm0, %v7777_v41, 0.0  ;;  %7803 = vadd.xlane.f32.xlu0 %v7802_v61  ;;  %v7720_v32 = vpop.xlane.xlu0 %7719 }
 0x8d8   :  { %v7729_v52 = vpop.xlane.xlu1 %7728  ;;  %7812 = vadd.xlane.f32.xlu1 %v7811_v4  ;;  %v7746_v39 = vmul.f32 0.03125, %v7720_v32  ;;  %v7776_v35 = vmul.f32 %v14159_v48, %v14159_v48 }
 0x8d9   :  { %v7749_v3 = vmul.f32 0.03125, %v7729_v52  ;;  %v7779_v28 = vmul.f32 %v14163_v1, %v14163_v1 }
 0x8da   :  { %v14171_v49 = vsub.f32 %v14064_v15, %v7746_v39  ;;  %v7808_v42 = vsel %vm97_vm0, %v7776_v35, 0.0 }
 0x8db   :  { %v14175_v8 = vsub.f32 %v14070_v43, %v7749_v3  ;;  %v7817_v36 = vsel %vm97_vm0, %v7779_v28, 0.0  ;;  %7809 = vadd.xlane.f32.xlu0 %v7808_v42  ;;  %v7726_v55 = vpop.xlane.xlu0 %7725 }
 0x8dc   :  { %v7735_v53 = vpop.xlane.xlu1 %7734  ;;  %7818 = vadd.xlane.f32.xlu1 %v7817_v36  ;;  %v7748_v26 = vmul.f32 0.03125, %v7726_v55  ;;  %v7778_v34 = vmul.f32 %v14171_v49, %v14171_v49 }
 0x8dd   :  { %v7751_v14 = vmul.f32 0.03125, %v7735_v53  ;;  %v7781_v15 = vmul.f32 %v14175_v8, %v14175_v8 }
 0x8de   :  { %v14183_v24 = vsub.f32 %v14076_v29, %v7748_v26  ;;  %v7814_v43 = vsel %vm97_vm0, %v7778_v34, 0.0 }
 0x8df   :  { %v14187_v47 = vsub.f32 %v14082_v33, %v7751_v14  ;;  %v7823_v30 = vsel %vm97_vm0, %v7781_v15, 0.0  ;;  %7815 = vadd.xlane.f32.xlu0 %v7814_v43  ;;  %v7732_v44 = vpop.xlane.xlu0 %7731 }
 0x8e0   :  { %7824 = vadd.xlane.f32.xlu1 %v7823_v30  ;;  %v7750_v27 = vmul.f32 0.03125, %v7732_v44  ;;  %v7780_v21 = vmul.f32 %v14183_v24, %v14183_v24 }
 0x8e1   :  { %v7783_v54 = vmul.f32 %v14187_v47, %v14187_v47 }
 0x8e2   :  { %v14195_v29 = vsub.f32 %v14088_v9, %v7750_v27  ;;  %v7820_v7 = vsel %vm97_vm0, %v7780_v21, 0.0 }
 0x8e3   :  { %v7829_v33 = vsel %vm97_vm0, %v7783_v54, 0.0  ;;  %7821 = vadd.xlane.f32.xlu0 %v7820_v7 }
 0x8e4   :  { %7830 = vadd.xlane.f32.xlu1 %v7829_v33  ;;  %v7782_v23 = vmul.f32 %v14195_v29, %v14195_v29 }
 0x8e6   :  { %v7826_v60 = vsel %vm97_vm0, %v7782_v23, 0.0 }
 0x8e7   :  { %7827 = vadd.xlane.f32.xlu0 %v7826_v60 }
 0x921   :  { %v7789_v22 = vpop.xlane.xlu1 %7788 }
 0x922   :  { %v7833_v37 = vmul.f32 0.03125, %v7789_v22 }
 0x923   :  { %v7786_v17 = vpop.xlane.xlu0 %7785 }
 0x924   :  { %v7849_v58 = vadd.f32 1e-12, %v7833_v37  ;;  %v7832_v59 = vmul.f32 0.03125, %v7786_v17 }
 0x926   :  { %10924 = vrsqrt.f32 %v7849_v58  ;;  %v7848_v9 = vadd.f32 1e-12, %v7832_v59 }
 0x928   :  { %10926 = vrsqrt.f32 %v7848_v9 }
 0x933   :  { %v10925_v13 = vpop.eup %10924 }
 0x934   :  { %v7881_v50 = vmul.f32 %v10925_v13, %v14095_v45 }
 0x935   :  { %v10927_v6 = vpop.eup %10926 }
 0x936   :  { %v7880_v5 = vmul.f32 %v10927_v6, %v14098_v25  ;;  %v7903_v38 = vmul.f32 %v14206_v19, %v7881_v50 }
 0x938   :  { %v7902_v57 = vmul.f32 %v14206_v19, %v7880_v5  ;;  %v14220_v45 = vadd.f32 %v14213_v62, %v7903_v38 }
 0x93a   :  { %v14217_v20 = vadd.f32 %v14213_v62, %v7902_v57 }
 0x93c   :  { %10526 = vmatprep.mubr.msk.f32.mxu1 %vm97_vm0, %v14217_v20 }
 0x93d   :  { %10527 = vmatmul.mubr.msk.f32.vlgmr.msra.gmra.mxu1 %vm97_vm0, %v14220_v45 }
 0x954   :  { %v7795_v25 = vpop.xlane.xlu1 %7794 }
 0x955   :  { %v7835_v56 = vmul.f32 0.03125, %v7795_v25 }
 0x957   :  { %v7851_v0 = vadd.f32 1e-12, %v7835_v56 }
 0x958   :  { %v7792_v51 = vpop.xlane.xlu0 %7791 }
 0x959   :  { %10928 = vrsqrt.f32 %v7851_v0  ;;  %v7801_v40 = vpop.xlane.xlu1 %7800  ;;  %v7834_v11 = vmul.f32 0.03125, %v7792_v51 }
 0x95a   :  { %v7837_v2 = vmul.f32 0.03125, %v7801_v40 }
 0x95b   :  { %v7850_v41 = vadd.f32 1e-12, %v7834_v11 }
 0x95c   :  { %v7853_v61 = vadd.f32 1e-12, %v7837_v2  ;;  %v7798_v4 = vpop.xlane.xlu0 %7797 }
 0x95d   :  { %10930 = vrsqrt.f32 %v7850_v41  ;;  %v7807_v32 = vpop.xlane.xlu1 %7806  ;;  %v7836_v52 = vmul.f32 0.03125, %v7798_v4 }
 0x95e   :  { %10932 = vrsqrt.f32 %v7853_v61  ;;  %v7839_v39 = vmul.f32 0.03125, %v7807_v32 }
 0x95f   :  { %v7852_v35 = vadd.f32 1e-12, %v7836_v52 }
 0x960   :  { %v7855_v3 = vadd.f32 1e-12, %v7839_v39  ;;  %v7804_v28 = vpop.xlane.xlu0 %7803 }
 0x961   :  { %10934 = vrsqrt.f32 %v7852_v35  ;;  %v7813_v42 = vpop.xlane.xlu1 %7812  ;;  %v7838_v36 = vmul.f32 0.03125, %v7804_v28 }
 0x962   :  { %10936 = vrsqrt.f32 %v7855_v3  ;;  %v7841_v55 = vmul.f32 0.03125, %v7813_v42 }
 0x963   :  { %v7854_v53 = vadd.f32 1e-12, %v7838_v36 }
 0x964   :  { %v7857_v26 = vadd.f32 1e-12, %v7841_v55  ;;  %v7810_v34 = vpop.xlane.xlu0 %7809 }
 0x965   :  { %10938 = vrsqrt.f32 %v7854_v53  ;;  %v7819_v14 = vpop.xlane.xlu1 %7818  ;;  %v7840_v15 = vmul.f32 0.03125, %v7810_v34 }
 0x966   :  { %v10929_v43 = vpop.eup %10928  ;;  %10940 = vrsqrt.f32 %v7857_v26  ;;  %v7843_v30 = vmul.f32 0.03125, %v7819_v14 }
 0x967   :  { %v7856_v44 = vadd.f32 1e-12, %v7840_v15  ;;  %v7883_v54 = vmul.f32 %v10929_v43, %v14119_v12 }
 0x968   :  { %v7859_v27 = vadd.f32 1e-12, %v7843_v30  ;;  %v7816_v21 = vpop.xlane.xlu0 %7815 }
 0x969   :  { %10942 = vrsqrt.f32 %v7856_v44  ;;  %v7825_v7 = vpop.xlane.xlu1 %7824  ;;  %v7842_v33 = vmul.f32 0.03125, %v7816_v21  ;;  %v7905_v9 = vmul.f32 %v14206_v19, %v7883_v54 }
 0x96a   :  { %v10931_v23 = vpop.eup %10930  ;;  %10944 = vrsqrt.f32 %v7859_v27  ;;  %v7845_v60 = vmul.f32 0.03125, %v7825_v7 }
 0x96b   :  { %v10933_v22 = vpop.eup %10932  ;;  %v7858_v37 = vadd.f32 1e-12, %v7842_v33  ;;  %v7882_v17 = vmul.f32 %v10931_v23, %v14124_v46  ;;  %v14236_v40 = vadd.f32 %v14213_v62, %v7905_v9  ;;  %v8292_v9 = vld [vmem:[%s14975_s12 + $0x20] sm:$0xff] }
 0x96c   :  { %v7861_v58 = vadd.f32 1e-12, %v7845_v60  ;;  %v7822_v59 = vpop.xlane.xlu0 %7821  ;;  %v7885_v13 = vmul.f32 %v10933_v22, %v14128_v31 }
 0x96d   :  { %10946 = vrsqrt.f32 %v7858_v37  ;;  %v7831_v50 = vpop.xlane.xlu1 %7830  ;;  %v7844_v6 = vmul.f32 0.03125, %v7822_v59  ;;  %v7904_v12 = vmul.f32 %v14206_v19, %v7882_v17 }
 0x96e   :  { %v10935_v5 = vpop.eup %10934  ;;  %10948 = vrsqrt.f32 %v7861_v58  ;;  %v7847_v38 = vmul.f32 0.03125, %v7831_v50  ;;  %v7907_v31 = vmul.f32 %v14206_v19, %v7885_v13  ;;  %v8291_v13 = vld [vmem:[%s14975_s12 + $0x18] sm:$0xff]  ;;  %v8290_v50 = vld [vmem:[%s14975_s12 + $0x10] sm:$0xff] }
 0x96f   :  { %v10937_v57 = vpop.eup %10936  ;;  %v7860_v25 = vadd.f32 1e-12, %v7844_v6  ;;  %v14232_v56 = vadd.f32 %v14213_v62, %v7904_v12  ;;  %v7884_v46 = vmul.f32 %v10935_v5, %v14135_v16  ;;  %v8289_v6 = vld [vmem:[%s14975_s12 + $0x8] sm:$0xff]  ;;  %v8288_v12 = vld [vmem:[%s14975_s12] sm:$0xff] }
 0x970   :  { %v7863_v0 = vadd.f32 1e-12, %v7847_v38  ;;  %v7828_v51 = vpop.xlane.xlu0 %7827  ;;  %v7887_v11 = vmul.f32 %v10937_v57, %v14139_v18  ;;  %v14250_v18 = vadd.f32 %v14213_v62, %v7907_v31  ;;  %v14351_v5 = vld [vmem:[%s15184_s8] sm:$0xff] }
 0x971   :  { %10950 = vrsqrt.f32 %v7860_v25  ;;  %v7846_v2 = vmul.f32 0.03125, %v7828_v51  ;;  %10529 = vmatprep.mubr.msk.f32.mxu1 %vm97_vm0, %v14232_v56  ;;  %v7906_v41 = vmul.f32 %v14206_v19, %v7884_v46  ;;  %v8943_v38 = vsel %vm3672_vm2, %v14351_v5, 0.0  ;;  %v15368_v57 = vld [vmem:[#allocation60_spill] sm:$0xff] }
 0x972   :  { %v10939_v61 = vpop.eup %10938  ;;  %10952 = vrsqrt.f32 %v7863_v0  ;;  %10530 = vmatmul.mubr.msk.f32.gmra.mxu1 %vm97_vm0, %v14236_v40  ;;  %v7909_v39 = vmul.f32 %v14206_v19, %v7887_v11  ;;  %v14356_v25 = vsub.s32 1, %v15368_v57  ;;  %v8824_v46 = vsub.s32 5, %v15368_v57  ;;  %8944 = vadd.xlane.f32.xlu0 %v8943_v38 }
 0x973   :  { %v10941_v16 = vpop.eup %10940  ;;  %v7862_v4 = vadd.f32 1e-12, %v7846_v2  ;;  %v14246_v32 = vadd.f32 %v14213_v62, %v7906_v41  ;;  %v7886_v52 = vmul.f32 %v10939_v61, %v14147_v10  ;;  %v8791_v31 = vsub.s32 2, %v15368_v57  ;;  %v14368_v41 = vld [vmem:[%s14974_s11] ss:$0 sm:$0xff]  ;;  %s11087_s11 = smov [#allocation5]  }
 0x974   :  { %v7889_v35 = vmul.f32 %v10941_v16, %v14151_v63  ;;  %v14264_v55 = vadd.f32 %v14213_v62, %v7909_v39  ;;  %v8781_v0 = vrot.slane %v14351_v5, %v14356_v25  ;;  %v8825_v51 = vrot.slane %v14351_v5, %v8824_v46  ;;  %s9370_s9 = sshll.u32 %s11087_s11, 4  ;;  %s9371_s9 = int_to_ptr.vmem [resolvable:$true] %s9370_s9 }
 0x975   :  { %10954 = vrsqrt.f32 %v7862_v4  ;;  %10532 = vmatprep.mubr.msk.f32.mxu1 %vm97_vm0, %v14246_v32  ;;  %v7908_v3 = vmul.f32 %v14206_v19, %v7886_v52  ;;  %v8792_v11 = vrot.slane %v14351_v5, %v8791_v31  ;;  %v8835_v2 = vsub.s32 6, %v15368_v57  ;;  %p11036_p1 = scmp.lt.s32.totalorder %s9371_s9, %s9371_s9 }
 0x976   :  { %v10943_v28 = vpop.eup %10942  ;;  %10533 = vmatmul.mubr.msk.f32.gmra.mxu1 %vm97_vm0, %v14250_v18  ;;  %v7911_v63 = vmul.f32 %v14206_v19, %v7889_v35  ;;  %8783 = vbcast.lane.b32.xlu1 %v8781_v0, 256 }
 0x977   :  { %v10945_v42 = vpop.eup %10944  ;;  %v14260_v10 = vadd.f32 %v14213_v62, %v7908_v3  ;;  %v7888_v36 = vmul.f32 %v10943_v28, %v14159_v48  ;;  %v8836_v16 = vrot.slane %v14351_v5, %v8835_v2  ;;  %v15369_v3 = vld [vmem:[#allocation62_spill] sm:$0xff] }
 0x978   :  { %v7891_v53 = vmul.f32 %v10945_v42, %v14163_v1  ;;  %v14278_v43 = vadd.f32 %v14213_v62, %v7911_v63  ;;  %v14375_v28 = vrot.slane %v14351_v5, %v15369_v3 }
 0x979   :  { %10535 = vmatprep.mubr.msk.f32.mxu1 %vm97_vm0, %v14260_v10  ;;  %v7910_v26 = vmul.f32 %v14206_v19, %v7888_v36 }
 0x97a   :  { %v10947_v34 = vpop.eup %10946  ;;  %10536 = vmatmul.mubr.msk.f32.gmra.mxu1 %vm97_vm0, %v14264_v55  ;;  %v7913_v1 = vmul.f32 %v14206_v19, %v7891_v53  ;;  %8827 = vbcast.lane.b32.xlu1 %v8825_v51, 256 }
 0x97b   :  { %v10949_v14 = vpop.eup %10948  ;;  %v14274_v15 = vadd.f32 %v14213_v62, %v7910_v26  ;;  %v7890_v48 = vmul.f32 %v10947_v34, %v14171_v49 }
 0x97c   :  { %v7893_v30 = vmul.f32 %v10949_v14, %v14175_v8  ;;  %v14292_v7 = vadd.f32 %v14213_v62, %v7913_v1 }
 0x97d   :  { %10538 = vmatprep.mubr.msk.f32.mxu1 %vm97_vm0, %v14274_v15  ;;  %v7912_v44 = vmul.f32 %v14206_v19, %v7890_v48 }
 0x97e   :  { %v10951_v27 = vpop.eup %10950  ;;  %10539 = vmatmul.mubr.msk.f32.gmra.mxu1 %vm97_vm0, %v14278_v43  ;;  %v7915_v8 = vmul.f32 %v14206_v19, %v7893_v30  ;;  %8831 = vbcast.lane.b32.xlu1 %v8825_v51, 264 }
 0x97f   :  { %v10953_v21 = vpop.eup %10952  ;;  %v14288_v54 = vadd.f32 %v14213_v62, %v7912_v44  ;;  %v7892_v49 = vmul.f32 %v10951_v27, %v14183_v24 }
 0x980   :  { %v7895_v33 = vmul.f32 %v10953_v21, %v14187_v47  ;;  %v14306_v37 = vadd.f32 %v14213_v62, %v7915_v8 }
 0x981   :  { %10541 = vmatprep.mubr.msk.f32.mxu1 %vm97_vm0, %v14288_v54  ;;  %v7914_v23 = vmul.f32 %v14206_v19, %v7892_v49 }
 0x982   :  { %v10955_v60 = vpop.eup %10954  ;;  %10542 = vmatmul.mubr.msk.f32.gmra.mxu1 %vm97_vm0, %v14292_v7  ;;  %v7917_v17 = vmul.f32 %v14206_v19, %v7895_v33  ;;  %8794 = vbcast.lane.b32.xlu1 %v8792_v11, 256 }
 0x983   :  { %v14302_v22 = vadd.f32 %v14213_v62, %v7914_v23  ;;  %v7894_v24 = vmul.f32 %v10955_v60, %v14195_v29  ;;  %v8295_v29 = vld [vmem:[%s14975_s12 + $0x38] sm:$0xff] }
 0x984   :  { %v14318_v59 = vadd.f32 %v14213_v62, %v7917_v17  ;;  %10550 = vmatprep.subr.mxu0 %v8295_v29 }
 0x985   :  { %10544 = vmatprep.mubr.msk.f32.mxu1 %vm97_vm0, %v14302_v22  ;;  %v7916_v47 = vmul.f32 %v14206_v19, %v7894_v24  ;;  %10551 = vmatpush3.msra.mxu0 %v8295_v29  ;;  %v8294_v19 = vld [vmem:[%s14975_s12 + $0x30] sm:$0xff] }
 0x986   :  { %10545 = vmatmul.mubr.msk.f32.gmra.mxu1 %vm97_vm0, %v14306_v37  ;;  %10552 = vmatprep.subr.mxu0 %v8294_v19 }
 0x987   :  { %v14315_v58 = vadd.f32 %v14213_v62, %v7916_v47  ;;  %10553 = vmatpush3.msra.mxu0 %v8294_v19  ;;  %v8293_v62 = vld [vmem:[%s14975_s12 + $0x28] sm:$0xff]  ;;  %8838 = vbcast.lane.b32.xlu1 %v8836_v16, 256 }
 0x988   :  { %10554 = vmatprep.subr.mxu0 %v8293_v62  ;;  %8787 = vbcast.lane.b32.xlu0 %v8781_v0, 264 }
 0x989   :  { %10547 = vmatprep.mubr.msk.f32.mxu1 %vm97_vm0, %v14315_v58  ;;  %10555 = vmatpush3.msra.mxu0 %v8293_v62 }
 0x98a   :  { %10548 = vmatmul.mubr.msk.f32.gmra.mxu1 %vm97_vm0, %v14318_v59  ;;  %10556 = vmatprep.subr.mxu0 %v8292_v9 }
 0x98b   :  { %10557 = vmatpush3.msra.mxu0 %v8292_v9  ;;  %8772 = vbcast.lane.b32.xlu1 %v14375_v28, 256 }
 0x98c   :  { %10558 = vmatprep.subr.mxu0 %v8291_v13  ;;  %8798 = vbcast.lane.b32.xlu0 %v8792_v11, 264 }
 0x98d   :  { %10559 = vmatpush3.msra.mxu0 %v8291_v13 }
 0x98e   :  { %10560 = vmatprep.subr.mxu0 %v8290_v50 }
 0x98f   :  { %10561 = vmatpush3.msra.mxu0 %v8290_v50 }
 0x990   :  { %10562 = vmatprep.subr.mxu0 %v8289_v6  ;;  %8842 = vbcast.lane.b32.xlu0 %v8836_v16, 264 }
 0x991   :  { %10563 = vmatpush3.msra.mxu0 %v8289_v6 }
 0x992   :  { %10564 = vmatprep.subr.mxu0 %v8288_v12 }
 0x993   :  { %10565 = vmatpush3.msra.mxu0 %v8288_v12 }
 0x9fd   :  { %v10528_v61 = vpop.f32.mrf.mxu1 }
 0x9fe   :  { %v8071_v4 = vadd.f32 %v10528_v61, %v14368_v41 }
 0x9ff   :  { %v8065_v52 = vpop.f32.mrf.mxu1 }
 0xa00   :  { %v8161_v39 = vmul.f32 0.044715, %v8071_v4  ;;  %v8066_v35 = vadd.f32 %v14368_v41, %v8065_v52  ;;  %v8145_v8 = vmul.f32 0.5, %v8071_v4 }
 0xa02   :  { %v8177_v42 = vmul.f32 %v8161_v39, %v8071_v4  ;;  %v8160_v36 = vmul.f32 0.044715, %v8066_v35  ;;  %v8144_v21 = vmul.f32 0.5, %v8066_v35 }
 0xa04   :  { %v8193_v63 = vmul.f32 %v8177_v42, %v8071_v4  ;;  %v8176_v53 = vmul.f32 %v8160_v36, %v8066_v35 }
 0xa06   :  { %v8209_v26 = vadd.f32 %v8193_v63, %v8071_v4  ;;  %v8192_v34 = vmul.f32 %v8176_v53, %v8066_v35 }
 0xa08   :  { %v8225_v14 = vmul.f32 0.7978846, %v8209_v26  ;;  %v8208_v48 = vadd.f32 %v8192_v34, %v8066_v35 }
 0xa0a   :  { %10956 = vtanh.f32 %v8225_v14  ;;  %v8224_v1 = vmul.f32 0.7978846, %v8208_v48 }
 0xa0c   :  { %10958 = vtanh.f32 %v8224_v1 }
 0xa17   :  { %v10957_v30 = vpop.eup %10956 }
 0xa18   :  { %v8257_v27 = vadd.f32 1.0, %v10957_v30 }
 0xa19   :  { %v10959_v44 = vpop.eup %10958 }
 0xa1a   :  { %v8256_v49 = vadd.f32 1.0, %v10959_v44  ;;  %v8273_v23 = vmul.f32 %v8257_v27, %v8145_v8 }
 0xa1c   :  { %v8272_v33 = vmul.f32 %v8256_v49, %v8144_v21 }
 0xa1e   :  { %10566 = vmatprep.mubr.msk.f32.mxu0 %vm8303_vm4, %v8272_v33 }
 0xa1f   :  { %10567 = vmatmul.mubr.msk.f32.vlgmr.msra.gmra.mxu0 %vm8303_vm4, %v8273_v23 }
 0xa32   :  { %v10531_v60 = vpop.f32.mrf.mxu1 }
 0xa33   :  { %v14381_v24 = vadd.f32 %v10531_v60, %v14368_v41 }
 0xa34   :  { %v8075_v17 = vpop.f32.mrf.mxu1 }
 0xa35   :  { %v8163_v47 = vmul.f32 0.044715, %v14381_v24  ;;  %v14385_v29 = vadd.f32 %v14368_v41, %v8075_v17 }
 0xa36   :  { %v10534_v19 = vpop.f32.mrf.mxu1 }
 0xa37   :  { %v8179_v62 = vmul.f32 %v8163_v47, %v14381_v24  ;;  %v8162_v9 = vmul.f32 0.044715, %v14385_v29  ;;  %v14390_v13 = vadd.f32 %v10534_v19, %v14368_v41 }
 0xa38   :  { %v8085_v50 = vpop.f32.mrf.mxu1 }
 0xa39   :  { %v8195_v6 = vmul.f32 %v8179_v62, %v14381_v24  ;;  %v8178_v12 = vmul.f32 %v8162_v9, %v14385_v29  ;;  %v8165_v38 = vmul.f32 0.044715, %v14390_v13  ;;  %v14396_v46 = vadd.f32 %v14368_v41, %v8085_v50 }
 0xa3a   :  { %v10537_v0 = vpop.f32.mrf.mxu1 }
 0xa3b   :  { %v8211_v51 = vadd.f32 %v8195_v6, %v14381_v24  ;;  %v8194_v31 = vmul.f32 %v8178_v12, %v14385_v29  ;;  %v8181_v11 = vmul.f32 %v8165_v38, %v14390_v13  ;;  %v8164_v2 = vmul.f32 0.044715, %v14396_v46 }
 0xa3c   :  { %v14403_v61 = vadd.f32 %v10537_v0, %v14368_v41  ;;  %v8095_v16 = vpop.f32.mrf.mxu1 }
 0xa3d   :  { %v8210_v4 = vadd.f32 %v8194_v31, %v14385_v29  ;;  %v8197_v52 = vmul.f32 %v8181_v11, %v14390_v13  ;;  %v8180_v39 = vmul.f32 %v8164_v2, %v14396_v46  ;;  %v14409_v35 = vadd.f32 %v14368_v41, %v8095_v16 }
 0xa3e   :  { %v8167_v42 = vmul.f32 0.044715, %v14403_v61  ;;  %v10540_v36 = vpop.f32.mrf.mxu1  ;;  %v8227_v63 = vmul.f32 0.7978846, %v8211_v51 }
 0xa3f   :  { %v8213_v53 = vadd.f32 %v8197_v52, %v14390_v13  ;;  %v8196_v26 = vmul.f32 %v8180_v39, %v14396_v46  ;;  %v8166_v34 = vmul.f32 0.044715, %v14409_v35  ;;  %v14416_v14 = vadd.f32 %v10540_v36, %v14368_v41 }
 0xa40   :  { %v8183_v48 = vmul.f32 %v8167_v42, %v14403_v61  ;;  %v8105_v1 = vpop.f32.mrf.mxu1  ;;  %v8226_v30 = vmul.f32 0.7978846, %v8210_v4  ;;  %10960 = vtanh.f32 %v8227_v63 }
 0xa41   :  { %v8212_v44 = vadd.f32 %v8196_v26, %v14396_v46  ;;  %v8182_v27 = vmul.f32 %v8166_v34, %v14409_v35  ;;  %v8169_v21 = vmul.f32 0.044715, %v14416_v14  ;;  %v14423_v49 = vadd.f32 %v14368_v41, %v8105_v1 }
 0xa42   :  { %v8199_v8 = vmul.f32 %v8183_v48, %v14403_v61  ;;  %v10543_v33 = vpop.f32.mrf.mxu1  ;;  %10962 = vtanh.f32 %v8226_v30  ;;  %v8229_v23 = vmul.f32 0.7978846, %v8213_v53 }
 0xa43   :  { %v8198_v60 = vmul.f32 %v8182_v27, %v14409_v35  ;;  %v8185_v17 = vmul.f32 %v8169_v21, %v14416_v14  ;;  %v8168_v47 = vmul.f32 0.044715, %v14423_v49  ;;  %v14430_v19 = vadd.f32 %v10543_v33, %v14368_v41 }
 0xa44   :  { %v8215_v62 = vadd.f32 %v8199_v8, %v14403_v61  ;;  %v8115_v9 = vpop.f32.mrf.mxu1  ;;  %v8228_v50 = vmul.f32 0.7978846, %v8212_v44  ;;  %10964 = vtanh.f32 %v8229_v23 }
 0xa45   :  { %v8214_v6 = vadd.f32 %v8198_v60, %v14409_v35  ;;  %v8201_v12 = vmul.f32 %v8185_v17, %v14416_v14  ;;  %v8184_v38 = vmul.f32 %v8168_v47, %v14423_v49  ;;  %v8171_v0 = vmul.f32 0.044715, %v14430_v19 }
 0xa46   :  { %v14438_v51 = vadd.f32 %v14368_v41, %v8115_v9  ;;  %v10546_v31 = vpop.f32.mrf.mxu1  ;;  %10966 = vtanh.f32 %v8228_v50  ;;  %v8231_v11 = vmul.f32 0.7978846, %v8215_v62  ;;  %v8147_v60 = vmul.f32 0.5, %v14381_v24 }
 0xa47   :  { %v8217_v2 = vadd.f32 %v8201_v12, %v14416_v14  ;;  %v8200_v16 = vmul.f32 %v8184_v38, %v14423_v49  ;;  %v8187_v4 = vmul.f32 %v8171_v0, %v14430_v19  ;;  %v14444_v52 = vadd.f32 %v10546_v31, %v14368_v41 }
 0xa48   :  { %v8170_v39 = vmul.f32 0.044715, %v14438_v51  ;;  %v8125_v42 = vpop.f32.mrf.mxu1  ;;  %v8230_v36 = vmul.f32 0.7978846, %v8214_v6  ;;  %10968 = vtanh.f32 %v8231_v11 }
 0xa49   :  { %v8216_v63 = vadd.f32 %v8200_v16, %v14423_v49  ;;  %v8203_v53 = vmul.f32 %v8187_v4, %v14430_v19  ;;  %v8173_v26 = vmul.f32 0.044715, %v14444_v52  ;;  %v14451_v34 = vadd.f32 %v14368_v41, %v8125_v42 }
 0xa4a   :  { %v8186_v48 = vmul.f32 %v8170_v39, %v14438_v51  ;;  %v10549_v1 = vpop.f32.mrf.mxu1  ;;  %10970 = vtanh.f32 %v8230_v36  ;;  %v8233_v30 = vmul.f32 0.7978846, %v8217_v2  ;;  %v8146_v4 = vmul.f32 0.5, %v14385_v29 }
 0xa4b   :  { %v8219_v44 = vadd.f32 %v8203_v53, %v14430_v19  ;;  %v8189_v27 = vmul.f32 %v8173_v26, %v14444_v52  ;;  %v8172_v21 = vmul.f32 0.044715, %v14451_v34  ;;  %v14458_v8 = vadd.f32 %v10549_v1, %v14368_v41 }
 0xa4c   :  { %v8202_v33 = vmul.f32 %v8186_v48, %v14438_v51  ;;  %v8135_v23 = vpop.f32.mrf.mxu1  ;;  %v8232_v17 = vmul.f32 0.7978846, %v8216_v63  ;;  %10972 = vtanh.f32 %v8233_v30 }
 0xa4d   :  { %v10961_v47 = vpop.eup %10960  ;;  %v8205_v62 = vmul.f32 %v8189_v27, %v14444_v52  ;;  %v8188_v9 = vmul.f32 %v8172_v21, %v14451_v34  ;;  %v8175_v50 = vmul.f32 0.044715, %v14458_v8  ;;  %v14466_v6 = vadd.f32 %v14368_v41, %v8135_v23 }
 0xa4e   :  { %v8218_v12 = vadd.f32 %v8202_v33, %v14438_v51  ;;  %v8259_v38 = vadd.f32 1.0, %v10961_v47  ;;  %10974 = vtanh.f32 %v8232_v17  ;;  %v8235_v0 = vmul.f32 0.7978846, %v8219_v44 }
 0xa4f   :  { %v10963_v31 = vpop.eup %10962  ;;  %v8221_v24 = vadd.f32 %v8205_v62, %v14444_v52  ;;  %v8204_v11 = vmul.f32 %v8188_v9, %v14451_v34  ;;  %v8191_v2 = vmul.f32 %v8175_v50, %v14458_v8  ;;  %v8174_v16 = vmul.f32 0.044715, %v14466_v6 }
 0xa50   :  { %v8258_v39 = vadd.f32 1.0, %v10963_v31  ;;  %v8234_v42 = vmul.f32 0.7978846, %v8218_v12  ;;  %10976 = vtanh.f32 %v8235_v0  ;;  %v8275_v1 = vmul.f32 %v8259_v38, %v8147_v60 }
 0xa51   :  { %v10965_v41 = vpop.eup %10964  ;;  %v8220_v36 = vadd.f32 %v8204_v11, %v14451_v34  ;;  %v8207_v63 = vmul.f32 %v8191_v2, %v14458_v8  ;;  %v8190_v53 = vmul.f32 %v8174_v16, %v14466_v6  ;;  %v8237_v26 = vmul.f32 0.7978846, %v8221_v24 }
 0xa52   :  { %v8274_v48 = vmul.f32 %v8258_v39, %v8146_v4  ;;  %v8261_v30 = vadd.f32 1.0, %v10965_v41  ;;  %10978 = vtanh.f32 %v8234_v42  ;;  %v8148_v33 = vmul.f32 0.5, %v14396_v46 }
 0xa53   :  { %v10967_v44 = vpop.eup %10966  ;;  %v8223_v27 = vadd.f32 %v8207_v63, %v14458_v8  ;;  %v8206_v29 = vmul.f32 %v8190_v53, %v14466_v6  ;;  %v8236_v21 = vmul.f32 0.7978846, %v8220_v36  ;;  %10980 = vtanh.f32 %v8237_v26 }
 0xa54   :  { %10569 = vmatprep.mubr.msk.f32.mxu0 %vm8303_vm4, %v8274_v48  ;;  %v8260_v23 = vadd.f32 1.0, %v10967_v44  ;;  %v8149_v60 = vmul.f32 0.5, %v14390_v13  ;;  %v8150_v46 = vmul.f32 0.5, %v14409_v35  ;;  %v8151_v11 = vmul.f32 0.5, %v14403_v61 }
 0xa55   :  { %v10969_v17 = vpop.eup %10968  ;;  %v8222_v47 = vadd.f32 %v8206_v29, %v14466_v6  ;;  %10570 = vmatmul.mubr.msk.f32.gmra.mxu0 %vm8303_vm4, %v8275_v1  ;;  %10982 = vtanh.f32 %v8236_v21  ;;  %v8239_v62 = vmul.f32 0.7978846, %v8223_v27  ;;  %v8152_v39 = vmul.f32 0.5, %v14423_v49 }
 0xa56   :  { %v8276_v9 = vmul.f32 %v8260_v23, %v8148_v33  ;;  %v8277_v12 = vmul.f32 %v8261_v30, %v8149_v60  ;;  %v8263_v38 = vadd.f32 1.0, %v10969_v17  ;;  %v8153_v35 = vmul.f32 0.5, %v14416_v14 }
 0xa57   :  { %v10971_v50 = vpop.eup %10970  ;;  %v8238_v0 = vmul.f32 0.7978846, %v8222_v47  ;;  %10984 = vtanh.f32 %v8239_v62  ;;  %v8154_v48 = vmul.f32 0.5, %v14438_v51  ;;  %v8155_v49 = vmul.f32 0.5, %v14430_v19 }
 0xa58   :  { %10572 = vmatprep.mubr.msk.f32.mxu0 %vm8303_vm4, %v8276_v9  ;;  %v8262_v31 = vadd.f32 1.0, %v10971_v50  ;;  %v8279_v16 = vmul.f32 %v8263_v38, %v8151_v11  ;;  %v8156_v29 = vmul.f32 0.5, %v14451_v34  ;;  %v8157_v51 = vmul.f32 0.5, %v14444_v52  ;;  %v14509_v52 = vld [vmem:[%s14976_s13] ss:$0 sm:$0xff]  ;;  %s11031_s13 = scalar_lea.vmem %s9371_s9, 32 }
 0xa59   :  { %v10973_v24 = vpop.eup %10972  ;;  %10573 = vmatmul.mubr.msk.f32.gmra.mxu0 %vm8303_vm4, %v8277_v12  ;;  %10986 = vtanh.f32 %v8238_v0  ;;  %v8158_v19 = vmul.f32 0.5, %v14466_v6  ;;  %v8159_v9 = vmul.f32 0.5, %v14458_v8  ;;  %p11032_p0 = scmp.ne.s32.totalorder %s9371_s9, %s11031_s13  ;;  %p11037_p2 = scmp.lt.s32.totalorder %s11031_s13, %s11031_s13 }
 0xa5a   :  { %v8278_v13 = vmul.f32 %v8262_v31, %v8150_v46  ;;  %v8265_v4 = vadd.f32 1.0, %v10973_v24 }
 0xa5b   :  { %v10975_v2 = vpop.eup %10974  ;;  %p11038_p3 = por %p11037_p2, %p11036_p1 }
 0xa5c   :  { %10575 = vmatprep.mubr.msk.f32.mxu0 %vm8303_vm4, %v8278_v13  ;;  %v8264_v42 = vadd.f32 1.0, %v10975_v2  ;;  %v8281_v53 = vmul.f32 %v8265_v4, %v8153_v35 }
 0xa5d   :  { %v10977_v41 = vpop.eup %10976  ;;  %10576 = vmatmul.mubr.msk.f32.gmra.mxu0 %vm8303_vm4, %v8279_v16  ;;  %p11039_p4 = pnand %p11038_p3, %p11032_p0 }
 0xa5e   :  { %v8280_v36 = vmul.f32 %v8264_v42, %v8152_v39  ;;  %v8267_v26 = vadd.f32 1.0, %v10977_v41 }
 0xa5f   :  { %v10979_v63 = vpop.eup %10978 }
 0xa60   :  { %v10981_v61 = vpop.eup %10980  ;;  %10578 = vmatprep.mubr.msk.f32.mxu0 %vm8303_vm4, %v8280_v36  ;;  %v8266_v1 = vadd.f32 1.0, %v10979_v63  ;;  %v8283_v27 = vmul.f32 %v8267_v26, %v8155_v49 }
 0xa61   :  { %10579 = vmatmul.mubr.msk.f32.gmra.mxu0 %vm8303_vm4, %v8281_v53  ;;  %v8269_v21 = vadd.f32 1.0, %v10981_v61 }
 0xa62   :  { %v10983_v30 = vpop.eup %10982  ;;  %v8282_v44 = vmul.f32 %v8266_v1, %v8154_v48 }
 0xa63   :  { %v8268_v14 = vadd.f32 1.0, %v10983_v30  ;;  %v8285_v47 = vmul.f32 %v8269_v21, %v8157_v51 }
 0xa64   :  { %v10985_v33 = vpop.eup %10984  ;;  %10581 = vmatprep.mubr.msk.f32.mxu0 %vm8303_vm4, %v8282_v44 }
 0xa65   :  { %10582 = vmatmul.mubr.msk.f32.gmra.mxu0 %vm8303_vm4, %v8283_v27  ;;  %v8284_v23 = vmul.f32 %v8268_v14, %v8156_v29  ;;  %v8271_v62 = vadd.f32 1.0, %v10985_v33 }
 0xa66   :  { %v10987_v17 = vpop.eup %10986 }
 0xa67   :  { %10584 = vmatprep.mubr.msk.f32.mxu0 %vm8303_vm4, %v8284_v23  ;;  %v8270_v60 = vadd.f32 1.0, %v10987_v17  ;;  %v8287_v50 = vmul.f32 %v8271_v62, %v8159_v9 }
 0xa69   :  { %10585 = vmatmul.mubr.msk.f32.gmra.mxu0 %vm8303_vm4, %v8285_v47  ;;  %v8286_v34 = vmul.f32 %v8270_v60, %v8158_v19 }
 0xa6b   :  { %10587 = vmatprep.mubr.msk.f32.mxu0 %vm8303_vm4, %v8286_v34 }
 0xa6d   :  { %10588 = vmatmul.mubr.msk.f32.gmra.mxu0 %vm8303_vm4, %v8287_v50 }
 0xadf   :  { %v10568_v12 = vpop.f32.mrf.mxu0 }
 0xae0   :  { %v8424_v6 = vadd.f32 %v10568_v12, %v14509_v52 }
 0xae1   :  { %v8418_v38 = vpop.f32.mrf.mxu0 }
 0xae2   :  { %v14513_v0 = vadd.f32 %v8424_v6, %v14220_v45  ;;  %v8419_v46 = vadd.f32 %v14509_v52, %v8418_v38 }
 0xae4   :  { %v14517_v8 = vadd.f32 %v8419_v46, %v14217_v20  ;;  %v8518_v31 = vsel %vm97_vm0, %v14513_v0, 0.0 }
 0xae5   :  { %8519 = vadd.xlane.f32.xlu1 %v8518_v31 }
 0xae6   :  { %v8515_v24 = vsel %vm97_vm0, %v14517_v8, 0.0 }
 0xae7   :  { %8516 = vadd.xlane.f32.xlu0 %v8515_v24 }
 0xb15   :  { %v10571_v11 = vpop.f32.mrf.mxu0 }
 0xb16   :  { %v8434_v13 = vadd.f32 %v10571_v11, %v14509_v52 }
 0xb17   :  { %v8428_v2 = vpop.f32.mrf.mxu0 }
 0xb18   :  { %v14525_v45 = vadd.f32 %v8434_v13, %v14236_v40  ;;  %v8429_v16 = vadd.f32 %v14509_v52, %v8428_v2 }
 0xb19   :  { %v10574_v4 = vpop.f32.mrf.mxu0 }
 0xb1a   :  { %v14529_v20 = vadd.f32 %v8429_v16, %v14232_v56  ;;  %v8444_v39 = vadd.f32 %v10574_v4, %v14509_v52  ;;  %v8524_v42 = vsel %vm97_vm0, %v14525_v45, 0.0  ;;  %v14619_v4 = vpop.xlane.xlu0 %8944 }
 0xb1b   :  { %8525 = vadd.xlane.f32.xlu1 %v8524_v42  ;;  %v8438_v41 = vpop.f32.mrf.mxu0 }
 0xb1c   :  { %v14535_v35 = vadd.f32 %v8444_v39, %v14250_v18  ;;  %v8439_v36 = vadd.f32 %v14509_v52, %v8438_v41  ;;  %v8521_v40 = vsel %vm97_vm0, %v14529_v20, 0.0 }
 0xb1d   :  { %8522 = vadd.xlane.f32.xlu0 %v8521_v40  ;;  %v10577_v63 = vpop.f32.mrf.mxu0 }
 0xb1e   :  { %v14541_v56 = vadd.f32 %v8439_v36, %v14246_v32  ;;  %v8454_v53 = vadd.f32 %v10577_v63, %v14509_v52  ;;  %v8530_v26 = vsel %vm97_vm0, %v14535_v35, 0.0  ;;  %v14623_v42 = vpop.permute.xlu0 %8787 }
 0xb1f   :  { %8531 = vadd.xlane.f32.xlu1 %v8530_v26  ;;  %v8448_v61 = vpop.f32.mrf.mxu0 }
 0xb20   :  { %v14547_v18 = vadd.f32 %v8454_v53, %v14264_v55  ;;  %v8449_v48 = vadd.f32 %v14509_v52, %v8448_v61  ;;  %v8527_v1 = vsel %vm97_vm0, %v14541_v56, 0.0 }
 0xb21   :  { %8528 = vadd.xlane.f32.xlu0 %v8527_v1  ;;  %v10580_v49 = vpop.f32.mrf.mxu0 }
 0xb22   :  { %v14553_v32 = vadd.f32 %v8449_v48, %v14260_v10  ;;  %v8464_v30 = vadd.f32 %v10580_v49, %v14509_v52  ;;  %v8536_v44 = vsel %vm97_vm0, %v14547_v18, 0.0  ;;  %v14627_v36 = vpop.permute.xlu0 %8798 }
 0xb23   :  { %8537 = vadd.xlane.f32.xlu1 %v8536_v44  ;;  %v8458_v27 = vpop.f32.mrf.mxu0 }
 0xb24   :  { %v14559_v55 = vadd.f32 %v8464_v30, %v14278_v43  ;;  %v8459_v29 = vadd.f32 %v14509_v52, %v8458_v27  ;;  %v8533_v14 = vsel %vm97_vm0, %v14553_v32, 0.0 }
 0xb25   :  { %8534 = vadd.xlane.f32.xlu0 %v8533_v14  ;;  %v10583_v21 = vpop.f32.mrf.mxu0 }
 0xb26   :  { %v14565_v10 = vadd.f32 %v8459_v29, %v14274_v15  ;;  %v8474_v33 = vadd.f32 %v10583_v21, %v14509_v52  ;;  %v8542_v23 = vsel %vm97_vm0, %v14559_v55, 0.0  ;;  %v14631_v63 = vpop.permute.xlu0 %8842 }
 0xb27   :  { %8543 = vadd.xlane.f32.xlu1 %v8542_v23  ;;  %v8468_v51 = vpop.f32.mrf.mxu0 }
 0xb28   :  { %v14571_v43 = vadd.f32 %v8474_v33, %v14292_v7  ;;  %v8469_v17 = vadd.f32 %v14509_v52, %v8468_v51  ;;  %v8539_v47 = vsel %vm97_vm0, %v14565_v10, 0.0 }
 0xb29   :  { %8540 = vadd.xlane.f32.xlu0 %v8539_v47  ;;  %v10586_v19 = vpop.f32.mrf.mxu0 }
 0xb2a   :  { %v14577_v15 = vadd.f32 %v8469_v17, %v14288_v54  ;;  %v8484_v60 = vadd.f32 %v10586_v19, %v14509_v52  ;;  %v8548_v62 = vsel %vm97_vm0, %v14571_v43, 0.0 }
 0xb2b   :  { %8549 = vadd.xlane.f32.xlu1 %v8548_v62  ;;  %v8478_v34 = vpop.f32.mrf.mxu0 }
 0xb2c   :  { %v14583_v7 = vadd.f32 %v8484_v60, %v14306_v37  ;;  %v8479_v9 = vadd.f32 %v14509_v52, %v8478_v34  ;;  %v8545_v50 = vsel %vm97_vm0, %v14577_v15, 0.0 }
 0xb2d   :  { %8546 = vadd.xlane.f32.xlu0 %v8545_v50  ;;  %v10589_v12 = vpop.f32.mrf.mxu0 }
 0xb2e   :  { %v14589_v54 = vadd.f32 %v8479_v9, %v14302_v22  ;;  %v8494_v6 = vadd.f32 %v10589_v12, %v14509_v52  ;;  %v8554_v38 = vsel %vm97_vm0, %v14583_v7, 0.0 }
 0xb2f   :  { %8555 = vadd.xlane.f32.xlu1 %v8554_v38  ;;  %v8488_v46 = vpop.f32.mrf.mxu0 }
 0xb30   :  { %v14595_v37 = vadd.f32 %v8494_v6, %v14318_v59  ;;  %v8489_v31 = vadd.f32 %v14509_v52, %v8488_v46  ;;  %v8551_v24 = vsel %vm97_vm0, %v14589_v54, 0.0  ;;  %v8802_v59 = vsub.s32 3, %v15368_v57  ;;  %v14613_v52 = vpop.permute.xlu1 %8783 }
 0xb31   :  { %8552 = vadd.xlane.f32.xlu0 %v8551_v24 }
 0xb32   :  { %v14601_v11 = vadd.f32 %v8489_v31, %v14315_v58  ;;  %v8560_v22 = vsel %vm97_vm0, %v14595_v37, 0.0  ;;  %v14609_v2 = vrot.slane %v14351_v5, %v8802_v59 }
 0xb33   :  { %8561 = vadd.xlane.f32.xlu1 %v8560_v22 }
 0xb34   :  { %v8557_v13 = vsel %vm97_vm0, %v14601_v11, 0.0  ;;  %v14615_v58 = vpop.permute.xlu1 %8827 }
 0xb35   :  { %8558 = vadd.xlane.f32.xlu0 %v8557_v13 }
 0xb38   :  { %v14617_v16 = vpop.permute.xlu1 %8831 }
 0xb3c   :  { %v14621_v39 = vpop.permute.xlu1 %8794 }
 0xb40   :  { %v14625_v41 = vpop.permute.xlu1 %8838 }
 0xb44   :  { %8805 = vbcast.lane.b32.xlu1 %v14609_v2, 256  ;;  %v14629_v40 = vpop.permute.xlu1 %8772 }
 0xb4b   :  { %8776 = vbcast.lane.b32.xlu0 %v14375_v28, 264 }
 0xb6e   :  { %v8520_v28 = vpop.xlane.xlu1 %8519 }
 0xb6f   :  { %v8564_v53 = vmul.f32 0.03125, %v8520_v28 }
 0xb70   :  { %v8517_v26 = vpop.xlane.xlu0 %8516 }
 0xb71   :  { %v14634_v61 = vsub.f32 %v14513_v0, %v8564_v53  ;;  %v8563_v48 = vmul.f32 0.03125, %v8517_v26 }
 0xb73   :  { %v14637_v1 = vsub.f32 %v14517_v8, %v8563_v48  ;;  %v8596_v49 = vmul.f32 %v14634_v61, %v14634_v61 }
 0xb75   :  { %v8614_v30 = vsel %vm97_vm0, %v8596_v49, 0.0  ;;  %v8595_v44 = vmul.f32 %v14637_v1, %v14637_v1 }
 0xb76   :  { %8615 = vadd.xlane.f32.xlu1 %v8614_v30 }
 0xb77   :  { %v8611_v27 = vsel %vm97_vm0, %v8595_v44, 0.0 }
 0xb78   :  { %8612 = vadd.xlane.f32.xlu0 %v8611_v27 }
 0xba4   :  { %v8526_v29 = vpop.xlane.xlu1 %8525 }
 0xba5   :  { %v8566_v14 = vmul.f32 0.03125, %v8526_v29 }
 0xba6   :  { %v8523_v0 = vpop.xlane.xlu0 %8522 }
 0xba7   :  { %v14646_v21 = vsub.f32 %v14525_v45, %v8566_v14  ;;  %v8565_v8 = vmul.f32 0.03125, %v8523_v0 }
 0xba8   :  { %v8532_v33 = vpop.xlane.xlu1 %8531 }
 0xba9   :  { %v14649_v23 = vsub.f32 %v14529_v20, %v8565_v8  ;;  %v8568_v51 = vmul.f32 0.03125, %v8532_v33  ;;  %v8598_v17 = vmul.f32 %v14646_v21, %v14646_v21 }
 0xbaa   :  { %v8529_v47 = vpop.xlane.xlu0 %8528 }
 0xbab   :  { %v14654_v19 = vsub.f32 %v14535_v35, %v8568_v51  ;;  %v8567_v60 = vmul.f32 0.03125, %v8529_v47  ;;  %v8620_v62 = vsel %vm97_vm0, %v8598_v17, 0.0  ;;  %v8597_v45 = vmul.f32 %v14649_v23, %v14649_v23 }
 0xbac   :  { %v8538_v34 = vpop.xlane.xlu1 %8537  ;;  %8621 = vadd.xlane.f32.xlu1 %v8620_v62 }
 0xbad   :  { %v14660_v9 = vsub.f32 %v14541_v56, %v8567_v60  ;;  %v8570_v20 = vmul.f32 0.03125, %v8538_v34  ;;  %v8617_v50 = vsel %vm97_vm0, %v8597_v45, 0.0  ;;  %v8600_v12 = vmul.f32 %v14654_v19, %v14654_v19 }
 0xbae   :  { %8618 = vadd.xlane.f32.xlu0 %v8617_v50  ;;  %v8535_v35 = vpop.xlane.xlu0 %8534 }
 0xbaf   :  { %v14666_v6 = vsub.f32 %v14547_v18, %v8570_v20  ;;  %v8569_v38 = vmul.f32 0.03125, %v8535_v35  ;;  %v8626_v46 = vsel %vm97_vm0, %v8600_v12, 0.0  ;;  %v8599_v31 = vmul.f32 %v14660_v9, %v14660_v9 }
 0xbb0   :  { %v8544_v24 = vpop.xlane.xlu1 %8543  ;;  %8627 = vadd.xlane.f32.xlu1 %v8626_v46 }
 0xbb1   :  { %v14672_v56 = vsub.f32 %v14553_v32, %v8569_v38  ;;  %v8572_v22 = vmul.f32 0.03125, %v8544_v24  ;;  %v8623_v13 = vsel %vm97_vm0, %v8599_v31, 0.0  ;;  %v8602_v59 = vmul.f32 %v14666_v6, %v14666_v6 }
 0xbb2   :  { %8624 = vadd.xlane.f32.xlu0 %v8623_v13  ;;  %v8541_v18 = vpop.xlane.xlu0 %8540 }
 0xbb3   :  { %v14678_v28 = vsub.f32 %v14559_v55, %v8572_v22  ;;  %v8571_v53 = vmul.f32 0.03125, %v8541_v18  ;;  %v8632_v26 = vsel %vm97_vm0, %v8602_v59, 0.0  ;;  %v8601_v48 = vmul.f32 %v14672_v56, %v14672_v56 }
 0xbb4   :  { %v8550_v49 = vpop.xlane.xlu1 %8549  ;;  %8633 = vadd.xlane.f32.xlu1 %v8632_v26  ;;  %v8846_v26 = vsub.s32 7, %v15368_v57 }
 0xbb5   :  { %v14684_v32 = vsub.f32 %v14565_v10, %v8571_v53  ;;  %v8574_v30 = vmul.f32 0.03125, %v8550_v49  ;;  %v8629_v44 = vsel %vm97_vm0, %v8601_v48, 0.0  ;;  %v8604_v27 = vmul.f32 %v14678_v28, %v14678_v28 }
 0xbb6   :  { %8630 = vadd.xlane.f32.xlu0 %v8629_v44  ;;  %v8547_v55 = vpop.xlane.xlu0 %8546  ;;  %v8813_v53 = vsub.s32 4, %v15368_v57  ;;  %v8847_v48 = vrot.slane %v14351_v5, %v8846_v26  ;;  %v11084_v49 = vmov 0  }
 0xbb7   :  { %v14690_v29 = vsub.f32 %v14571_v43, %v8574_v30  ;;  %v8573_v14 = vmul.f32 0.03125, %v8547_v55  ;;  %v8638_v0 = vsel %vm97_vm0, %v8604_v27, 0.0  ;;  %v8603_v8 = vmul.f32 %v14684_v32, %v14684_v32  ;;  %10634 = vset.pattern.permute.xlu0 %v11084_v49  ;;  %10635 = vset.pattern.permute.xlu1 %v11084_v49 }
 0xbb8   :  { %v8556_v33 = vpop.xlane.xlu1 %8555  ;;  %8639 = vadd.xlane.f32.xlu1 %v8638_v0 }
 0xbb9   :  { %v14696_v10 = vsub.f32 %v14577_v15, %v8573_v14  ;;  %v8576_v51 = vmul.f32 0.03125, %v8556_v33  ;;  %v8635_v17 = vsel %vm97_vm0, %v8603_v8, 0.0  ;;  %v8606_v47 = vmul.f32 %v14690_v29, %v14690_v29 }
 0xbba   :  { %8636 = vadd.xlane.f32.xlu0 %v8635_v17  ;;  %v8553_v43 = vpop.xlane.xlu0 %8552 }
 0xbbb   :  { %v14702_v60 = vsub.f32 %v14583_v7, %v8576_v51  ;;  %v8575_v62 = vmul.f32 0.03125, %v8553_v43  ;;  %v8644_v45 = vsel %vm97_vm0, %v8606_v47, 0.0  ;;  %v8605_v34 = vmul.f32 %v14696_v10, %v14696_v10  ;;  %v14741_v47 = vld [vmem:[%s14977_s14] ss:$0 sm:$0xff] }
 0xbbc   :  { %8645 = vadd.xlane.f32.xlu1 %v8644_v45  ;;  %v8562_v15 = vpop.xlane.xlu1 %8561  ;;  %v14748_v45 = vld [vmem:[%s14978_s15] ss:$0 sm:$0xff] }
 0xbbd   :  { %v14708_v20 = vsub.f32 %v14589_v54, %v8575_v62  ;;  %v8578_v50 = vmul.f32 0.03125, %v8562_v15  ;;  %v8641_v12 = vsel %vm97_vm0, %v8605_v34, 0.0  ;;  %v8608_v35 = vmul.f32 %v14702_v60, %v14702_v60 }
 0xbbe   :  { %8642 = vadd.xlane.f32.xlu0 %v8641_v12  ;;  %v8559_v7 = vpop.xlane.xlu0 %8558 }
 0xbbf   :  { %v14714_v38 = vsub.f32 %v14595_v37, %v8578_v50  ;;  %v8577_v46 = vmul.f32 0.03125, %v8559_v7  ;;  %v8650_v31 = vsel %vm97_vm0, %v8608_v35, 0.0  ;;  %v8607_v24 = vmul.f32 %v14708_v20, %v14708_v20 }
 0xbc0   :  { %8651 = vadd.xlane.f32.xlu1 %v8650_v31  ;;  %v14734_v44 = vpop.permute.xlu1 %8805 }
 0xbc1   :  { %v14720_v54 = vsub.f32 %v14601_v11, %v8577_v46  ;;  %v8647_v22 = vsel %vm97_vm0, %v8607_v24, 0.0  ;;  %v8610_v13 = vmul.f32 %v14714_v38, %v14714_v38  ;;  %v8814_v11 = vrot.slane %v14351_v5, %v8813_v53 }
 0xbc2   :  { %8648 = vadd.xlane.f32.xlu0 %v8647_v22  ;;  %v8777_v30 = vpop.permute.xlu0 %8776 }
 0xbc3   :  { %v8656_v59 = vsel %vm97_vm0, %v8610_v13, 0.0  ;;  %v8609_v37 = vmul.f32 %v14720_v54, %v14720_v54 }
 0xbc4   :  { %8657 = vadd.xlane.f32.xlu1 %v8656_v59 }
 0xbc5   :  { %v8653_v18 = vsel %vm97_vm0, %v8609_v37, 0.0 }
 0xbc6   :  { %8654 = vadd.xlane.f32.xlu0 %v8653_v18 }
 0xbd5   :  { %8816 = vbcast.lane.b32.xlu1 %v8814_v11, 256 }
 0xbd9   :  { %8849 = vbcast.lane.b32.xlu1 %v8847_v48, 256 }
 0xbdc   :  { %8809 = vbcast.lane.b32.xlu0 %v14609_v2, 264 }
 0xbe0   :  { %8820 = vbcast.lane.b32.xlu0 %v8814_v11, 264 }
 0xbe4   :  { %8853 = vbcast.lane.b32.xlu0 %v8847_v48, 264 }
 0xbff   :  { %v8616_v55 = vpop.xlane.xlu1 %8615 }
 0xc00   :  { %v8660_v0 = vmul.f32 0.03125, %v8616_v55 }
 0xc01   :  { %v8613_v27 = vpop.xlane.xlu0 %8612 }
 0xc02   :  { %v8659_v14 = vmul.f32 0.03125, %v8613_v27  ;;  %v8676_v33 = vadd.f32 1e-12, %v8660_v0 }
 0xc04   :  { %v8675_v8 = vadd.f32 1e-12, %v8659_v14 }
 0xc06   :  { %10988 = vrsqrt.f32 %v8675_v8 }
 0xc07   :  { %10990 = vrsqrt.f32 %v8676_v33 }
 0xc13   :  { %v10989_v5 = vpop.eup %10988 }
 0xc14   :  { %v10991_v51 = vpop.eup %10990  ;;  %v8707_v2 = vmul.f32 %v10989_v5, %v14637_v1 }
 0xc15   :  { %v8708_v17 = vmul.f32 %v10991_v51, %v14634_v61 }
 0xc16   :  { %v8729_v43 = vmul.f32 %v14741_v47, %v8707_v2  ;;  %v8946_v2 = vmax.f32 %v14619_v4, 1e-09 }
 0xc17   :  { %v8730_v62 = vmul.f32 %v14741_v47, %v8708_v17 }
 0xc18   :  { %v8751_v34 = vadd.f32 %v14748_v45, %v8729_v43 }
 0xc19   :  { %v8752_v1 = vadd.f32 %v14748_v45, %v8730_v62 }
 0xc1a   :  { %v8855_v61 = vmul.f32 %v14629_v40, %v8751_v34 }
 0xc1b   :  { %v8856_v35 = vmul.f32 %v8777_v30, %v8752_v1 }
 0xc1c   :  { %v8871_v13 = vsel %vm97_vm0, %v8855_v61, 0.0 }
 0xc1d   :  { %v8872_v53 = vsel %vm97_vm0, %v8856_v35, 0.0 }
 0xc1e   :  { %v8873_v26 = vadd.f32 %v8872_v53, %v8871_v13 }
 0xc20   :  { %v8874_v14 = vrot.slane %v8873_v26, 4 }
 0xc22   :  { %v8875_v43 = vadd.f32 %v8874_v14, %v8873_v26 }
 0xc35   :  { %v8622_v15 = vpop.xlane.xlu1 %8621 }
 0xc36   :  { %v8662_v50 = vmul.f32 0.03125, %v8622_v15 }
 0xc37   :  { %v8619_v12 = vpop.xlane.xlu0 %8618 }
 0xc38   :  { %v8678_v7 = vadd.f32 1e-12, %v8662_v50  ;;  %v8661_v46 = vmul.f32 0.03125, %v8619_v12 }
 0xc39   :  { %v8628_v31 = vpop.xlane.xlu1 %8627 }
 0xc3a   :  { %10992 = vrsqrt.f32 %v8678_v7  ;;  %v8677_v24 = vadd.f32 1e-12, %v8661_v46  ;;  %v8664_v22 = vmul.f32 0.03125, %v8628_v31  ;;  %v8876_v46 = vrot.slane %v8875_v43, 2 }
 0xc3b   :  { %v8625_v59 = vpop.xlane.xlu0 %8624 }
 0xc3c   :  { %10994 = vrsqrt.f32 %v8677_v24  ;;  %v8680_v37 = vadd.f32 1e-12, %v8664_v22  ;;  %v8663_v18 = vmul.f32 0.03125, %v8625_v59 }
 0xc3d   :  { %v8634_v11 = vpop.xlane.xlu1 %8633 }
 0xc3e   :  { %10996 = vrsqrt.f32 %v8680_v37  ;;  %v8679_v40 = vadd.f32 1e-12, %v8663_v18  ;;  %v8666_v48 = vmul.f32 0.03125, %v8634_v11 }
 0xc3f   :  { %v8631_v49 = vpop.xlane.xlu0 %8630 }
 0xc40   :  { %10998 = vrsqrt.f32 %v8679_v40  ;;  %v8682_v30 = vadd.f32 1e-12, %v8666_v48  ;;  %v8665_v27 = vmul.f32 0.03125, %v8631_v49  ;;  %v8877_v48 = vadd.f32 %v8876_v46, %v8875_v43 }
 0xc41   :  { %v8640_v55 = vpop.xlane.xlu1 %8639 }
 0xc42   :  { %11000 = vrsqrt.f32 %v8682_v30  ;;  %v8681_v0 = vadd.f32 1e-12, %v8665_v27  ;;  %v8668_v8 = vmul.f32 0.03125, %v8640_v55 }
 0xc43   :  { %v8637_v33 = vpop.xlane.xlu0 %8636 }
 0xc44   :  { %11002 = vrsqrt.f32 %v8681_v0  ;;  %v8684_v5 = vadd.f32 1e-12, %v8668_v8  ;;  %v8667_v51 = vmul.f32 0.03125, %v8637_v33 }
 0xc45   :  { %v8646_v17 = vpop.xlane.xlu1 %8645 }
 0xc46   :  { %11004 = vrsqrt.f32 %v8684_v5  ;;  %v8683_v62 = vadd.f32 1e-12, %v8667_v51  ;;  %v8670_v34 = vmul.f32 0.03125, %v8646_v17 }
 0xc47   :  { %v10993_v1 = vpop.eup %10992  ;;  %v8643_v15 = vpop.xlane.xlu0 %8642 }
 0xc48   :  { %v8710_v61 = vmul.f32 %v10993_v1, %v14646_v21  ;;  %11006 = vrsqrt.f32 %v8683_v62  ;;  %v8686_v50 = vadd.f32 1e-12, %v8670_v34  ;;  %v8669_v12 = vmul.f32 0.03125, %v8643_v15 }
 0xc49   :  { %v10995_v35 = vpop.eup %10994  ;;  %11008 = vrcp.f32 %v8946_v2  ;;  %v8652_v7 = vpop.xlane.xlu1 %8651 }
 0xc4a   :  { %v8732_v31 = vmul.f32 %v14741_v47, %v8710_v61  ;;  %v8709_v4 = vmul.f32 %v10995_v35, %v14649_v23  ;;  %11010 = vrsqrt.f32 %v8686_v50  ;;  %v8685_v24 = vadd.f32 1e-12, %v8669_v12 }
 0xc4b   :  { %v10997_v22 = vpop.eup %10996  ;;  %v8672_v13 = vmul.f32 0.03125, %v8652_v7  ;;  %v8649_v59 = vpop.xlane.xlu0 %8648 }
 0xc4c   :  { %v8754_v37 = vadd.f32 %v14748_v45, %v8732_v31  ;;  %v8731_v21 = vmul.f32 %v14741_v47, %v8709_v4  ;;  %v8712_v18 = vmul.f32 %v10997_v22, %v14654_v19  ;;  %11012 = vrsqrt.f32 %v8685_v24 }
 0xc4d   :  { %v10999_v53 = vpop.eup %10998  ;;  %v8688_v11 = vadd.f32 1e-12, %v8672_v13  ;;  %v8671_v26 = vmul.f32 0.03125, %v8649_v59  ;;  %v8658_v40 = vpop.xlane.xlu1 %8657 }
 0xc4e   :  { %v8753_v49 = vadd.f32 %v14748_v45, %v8731_v21  ;;  %v8734_v23 = vmul.f32 %v14741_v47, %v8712_v18  ;;  %v8711_v30 = vmul.f32 %v10999_v53, %v14660_v9  ;;  %v8858_v55 = vmul.f32 %v14623_v42, %v8754_v37 }
 0xc4f   :  { %v11001_v27 = vpop.eup %11000  ;;  %11014 = vrsqrt.f32 %v8688_v11  ;;  %v8687_v14 = vadd.f32 1e-12, %v8671_v26  ;;  %v8674_v0 = vmul.f32 0.03125, %v8658_v40  ;;  %v8655_v8 = vpop.xlane.xlu0 %8654  ;;  %v8878_v9 = vrot.slane %v8877_v48, 1 }
 0xc50   :  { %v8857_v19 = vmul.f32 %v14613_v52, %v8753_v49  ;;  %v8756_v33 = vadd.f32 %v14748_v45, %v8734_v23  ;;  %v8733_v5 = vmul.f32 %v14741_v47, %v8711_v30  ;;  %v8673_v51 = vmul.f32 0.03125, %v8655_v8 }
 0xc51   :  { %v11003_v2 = vpop.eup %11002  ;;  %11016 = vrsqrt.f32 %v8687_v14  ;;  %v8690_v17 = vadd.f32 1e-12, %v8674_v0  ;;  %v8714_v43 = vmul.f32 %v11001_v27, %v14666_v6  ;;  %v8881_v12 = vsel %vm97_vm0, %v8858_v55, 0.0  ;;  %v8817_v8 = vpop.permute.xlu1 %8816 }
 0xc52   :  { %v8860_v62 = vmul.f32 %v14627_v36, %v8756_v33  ;;  %v8755_v42 = vadd.f32 %v14748_v45, %v8733_v5  ;;  %v8689_v34 = vadd.f32 1e-12, %v8673_v51  ;;  %v8713_v1 = vmul.f32 %v11003_v2, %v14672_v56 }
 0xc53   :  { %v11005_v15 = vpop.eup %11004  ;;  %11018 = vrsqrt.f32 %v8690_v17  ;;  %v8736_v52 = vmul.f32 %v14741_v47, %v8714_v43  ;;  %v8810_v61 = vpop.permute.xlu0 %8809  ;;  %v8880_v50 = vsel %vm97_vm0, %v8857_v19, 0.0 }
 0xc54   :  { %v8859_v35 = vmul.f32 %v14621_v39, %v8755_v42  ;;  %11020 = vrsqrt.f32 %v8689_v34  ;;  %v8735_v6 = vmul.f32 %v14741_v47, %v8713_v1  ;;  %v8716_v36 = vmul.f32 %v11005_v15, %v14678_v28 }
 0xc55   :  { %v11007_v7 = vpop.eup %11006  ;;  %v8758_v46 = vadd.f32 %v14748_v45, %v8736_v52  ;;  %v8882_v56 = vadd.f32 %v8881_v12, %v8880_v50  ;;  %v8890_v31 = vsel %vm97_vm0, %v8860_v62, 0.0  ;;  %v8879_v28 = vadd.f32 %v8878_v9, %v8877_v48 }
 0xc56   :  { %v14781_v4 = vpop.eup %11008  ;;  %v8757_v24 = vadd.f32 %v14748_v45, %v8735_v6  ;;  %v8738_v22 = vmul.f32 %v14741_v47, %v8716_v36  ;;  %v8715_v13 = vmul.f32 %v11007_v7, %v14684_v32  ;;  %v8889_v39 = vsel %vm97_vm0, %v8859_v35, 0.0 }
 0xc57   :  { %v11011_v59 = vpop.eup %11010  ;;  %v8862_v37 = vmul.f32 %v8810_v61, %v8758_v46  ;;  %v8821_v21 = vpop.permute.xlu0 %8820  ;;  %v8883_v18 = vrot.slane %v8882_v56, 4  ;;  %v8891_v53 = vadd.f32 %v8890_v31, %v8889_v39  ;;  %v8949_v55 = vrot.slane %v14781_v4, 1 }
 0xc58   :  { %v8718_v11 = vmul.f32 %v11011_v59, %v14690_v29  ;;  %v8861_v26 = vmul.f32 %v14734_v44, %v8757_v24  ;;  %v8760_v40 = vadd.f32 %v14748_v45, %v8738_v22  ;;  %v8737_v49 = vmul.f32 %v14741_v47, %v8715_v13 }
 0xc59   :  { %v11013_v23 = vpop.eup %11012  ;;  %v8899_v30 = vsel %vm97_vm0, %v8862_v37, 0.0  ;;  %v8884_v32 = vadd.f32 %v8883_v18, %v8882_v56  ;;  %v8892_v27 = vrot.slane %v8891_v53, 4  ;;  %v8950_v17 = vrot.slane %v14781_v4, 2 }
 0xc5a   :  { %v8740_v14 = vmul.f32 %v14741_v47, %v8718_v11  ;;  %v8717_v48 = vmul.f32 %v11013_v23, %v14696_v10  ;;  %v8898_v0 = vsel %vm97_vm0, %v8861_v26, 0.0  ;;  %v8864_v29 = vmul.f32 %v8821_v21, %v8760_v40 }
 0xc5b   :  { %v8900_v44 = vadd.f32 %v8899_v30, %v8898_v0  ;;  %v8759_v19 = vadd.f32 %v14748_v45, %v8737_v49  ;;  %v8885_v33 = vrot.slane %v8884_v32, 2  ;;  %v8893_v5 = vadd.f32 %v8892_v27, %v8891_v53  ;;  %v8854_v40 = vpop.permute.xlu0 %8853 }
 0xc5c   :  { %v11015_v51 = vpop.eup %11014  ;;  %v8739_v2 = vmul.f32 %v14741_v47, %v8717_v48  ;;  %v8951_v43 = vrot.slane %v14781_v4, 3  ;;  %v14801_v9 = vmul.f32 %v14781_v4, %v8879_v28  ;;  %v8762_v15 = vadd.f32 %v14748_v45, %v8740_v14  ;;  %v14827_v14 = vld [vmem:[%s14979_s16] ss:$0 sm:$0xff] }
 0xc5d   :  { %v8720_v10 = vmul.f32 %v11015_v51, %v14702_v60  ;;  %v8901_v62 = vrot.slane %v8900_v44, 4  ;;  %v8863_v42 = vmul.f32 %v8817_v8, %v8759_v19  ;;  %v8886_v34 = vadd.f32 %v8885_v33, %v8884_v32 }
 0xc5e   :  { %v11017_v1 = vpop.eup %11016  ;;  %v8761_v52 = vadd.f32 %v14748_v45, %v8739_v2  ;;  %v8908_v61 = vsel %vm97_vm0, %v8864_v29, 0.0  ;;  %v8894_v50 = vrot.slane %v8893_v5, 2  ;;  %v8866_v18 = vmul.f32 %v14617_v16, %v8762_v15  ;;  %v8850_v16 = vpop.permute.xlu1 %8849 }
 0xc5f   :  { %v8742_v12 = vmul.f32 %v14741_v47, %v8720_v10  ;;  %v8719_v35 = vmul.f32 %v11017_v1, %v14708_v20  ;;  %v8902_v6 = vadd.f32 %v8901_v62, %v8900_v44  ;;  %v8907_v36 = vsel %vm97_vm0, %v8863_v42, 0.0 }
 0xc60   :  { %v11019_v7 = vpop.eup %11018  ;;  %v8865_v60 = vmul.f32 %v14615_v58, %v8761_v52  ;;  %v8909_v46 = vadd.f32 %v8908_v61, %v8907_v36  ;;  %v8887_v56 = vrot.slane %v8886_v34, 1  ;;  %v8895_v31 = vadd.f32 %v8894_v50, %v8893_v5 }
 0xc61   :  { %v11021_v24 = vpop.eup %11020  ;;  %v8764_v22 = vadd.f32 %v14748_v45, %v8742_v12  ;;  %v8741_v13 = vmul.f32 %v14741_v47, %v8719_v35  ;;  %v8903_v39 = vrot.slane %v8902_v6, 2  ;;  %v8722_v59 = vmul.f32 %v11019_v7, %v14714_v38 }
 0xc62   :  { %v8910_v37 = vrot.slane %v8909_v46, 4  ;;  %v8721_v20 = vmul.f32 %v11021_v24, %v14720_v54  ;;  %v8888_v21 = vadd.f32 %v8887_v56, %v8886_v34  ;;  %v8896_v28 = vrot.slane %v8895_v31, 1 }
 0xc63   :  { %v8763_v58 = vadd.f32 %v14748_v45, %v8741_v13  ;;  %v8904_v53 = vadd.f32 %v8903_v39, %v8902_v6  ;;  %v8744_v11 = vmul.f32 %v14741_v47, %v8722_v59  ;;  %v8868_v38 = vmul.f32 %v14631_v63, %v8764_v22 }
 0xc64   :  { %v8911_v26 = vadd.f32 %v8910_v37, %v8909_v46  ;;  %v8743_v49 = vmul.f32 %v14741_v47, %v8721_v20  ;;  %v8897_v23 = vadd.f32 %v8896_v28, %v8895_v31  ;;  %v14819_v30 = vmul.f32 %v8949_v55, %v8888_v21 }
 0xc65   :  { %v8867_v54 = vmul.f32 %v14625_v41, %v8763_v58  ;;  %v8905_v32 = vrot.slane %v8904_v53, 1  ;;  %v8766_v27 = vadd.f32 %v14748_v45, %v8744_v11  ;;  %v8916_v63 = vsel %vm97_vm0, %v8865_v60, 0.0 }
 0xc66   :  { %v8765_v48 = vadd.f32 %v14748_v45, %v8743_v49  ;;  %v14830_v0 = vmul.f32 %v8950_v17, %v8897_v23  ;;  %v8980_v47 = vmul.f32 %v14827_v14, %v14819_v30  ;;  %v8912_v41 = vrot.slane %v8911_v26, 2 }
 0xc67   :  { %v8906_v55 = vadd.f32 %v8905_v32, %v8904_v53  ;;  %v8870_v29 = vmul.f32 %v8854_v40, %v8766_v27  ;;  %v8917_v8 = vsel %vm97_vm0, %v8866_v18, 0.0  ;;  %v8925_v5 = vsel %vm97_vm0, %v8867_v54, 0.0 }
 0xc68   :  { %v8869_v44 = vmul.f32 %v8850_v16, %v8765_v48  ;;  %v8981_v19 = vmul.f32 %v14827_v14, %v14830_v0  ;;  %v8995_v33 = vrot.slane %v8980_v47, 7  ;;  %v8979_v51 = vmul.f32 %v14827_v14, %v14801_v9 }
 0xc69   :  { %v14839_v45 = vmul.f32 %v8951_v43, %v8906_v55  ;;  %v8918_v2 = vadd.f32 %v8917_v8, %v8916_v63  ;;  %v8935_v17 = vsel %vm97_vm0, %v8870_v29, 0.0  ;;  %v8926_v42 = vsel %vm97_vm0, %v8868_v38, 0.0 }
 0xc6a   :  { %v8934_v10 = vsel %vm97_vm0, %v8869_v44, 0.0  ;;  %v8998_v62 = vrot.slane %v8981_v19, 6  ;;  %v8927_v52 = vadd.f32 %v8926_v42, %v8925_v5  ;;  %v8913_v43 = vadd.f32 %v8912_v41, %v8911_v26 }
 0xc6b   :  { %v8936_v34 = vadd.f32 %v8935_v17, %v8934_v10  ;;  %v8982_v1 = vmul.f32 %v14827_v14, %v14839_v45  ;;  %v8919_v15 = vrot.slane %v8918_v2, 4  ;;  %v8997_v61 = vsel %vm8996_vm5, %v8995_v33, %v8979_v51  ;;  %v9651_v33 = vld [vmem:[#allocation2] ss:$0 sm:$0xff] }
 0xc6c   :  { %v8928_v6 = vrot.slane %v8927_v52, 4  ;;  %v9000_v36 = vsel %vm8999_vm6, %v8998_v62, %v8997_v61  ;;  %v8914_v31 = vrot.slane %v8913_v43, 1  ;;  %v8953_v53 = vrot.slane %v14781_v4, 5 }
 0xc6d   :  { %v8937_v50 = vrot.slane %v8936_v34, 4  ;;  %v9001_v12 = vrot.slane %v8982_v1, 5  ;;  %v8920_v35 = vadd.f32 %v8919_v15, %v8918_v2  ;;  %v8952_v11 = vrot.slane %v14781_v4, 4 }
 0xc6e   :  { %v8929_v56 = vadd.f32 %v8928_v6, %v8927_v52  ;;  %v8915_v21 = vadd.f32 %v8914_v31, %v8913_v43  ;;  %v8954_v26 = vrot.slane %v14781_v4, 6  ;;  %v8955_v23 = vrot.slane %v14781_v4, 7 }
 0xc6f   :  { %v8938_v7 = vadd.f32 %v8937_v50, %v8936_v34  ;;  %v9003_v60 = vsel %vm9002_vm7, %v9001_v12, %v9000_v36  ;;  %v8921_v46 = vrot.slane %v8920_v35, 2  ;;  %v15370_v5 = vlaneseq }
 0xc70   :  { %v9013_v24 = vsel %vm9012_vm8, %v9003_v60, 0.0  ;;  %v8930_v39 = vrot.slane %v8929_v56, 2  ;;  %v14858_v54 = vmul.f32 %v8952_v11, %v8915_v21 }
 0xc71   :  { %v8939_v22 = vrot.slane %v8938_v7, 2  ;;  %9014 = vadd.xlane.f32.xlu1 %v9013_v24  ;;  %v8922_v13 = vadd.f32 %v8921_v46, %v8920_v35  ;;  %v9034_v51 = vand.u32 127, %v15370_v5 }
 0xc72   :  { %v8931_v20 = vadd.f32 %v8930_v39, %v8929_v56  ;;  %v8983_v4 = vmul.f32 %v14827_v14, %v14858_v54  ;;  %v11085_v39 = vmov 0.0  }
 0xc73   :  { %v8940_v59 = vadd.f32 %v8939_v22, %v8938_v7  ;;  %v8923_v37 = vrot.slane %v8922_v13, 1  ;;  %v14878_v17 = vsub.s32 %v9034_v51, %v15368_v57  ;;  %10590 = vmatprep.subr.mxu1 %v11085_v39  ;;  %10598 = vmatprep.mubr.msk.f32.mxu1 %vm11086_vm10, %v11085_v39 }
 0xc74   :  { %v8932_v58 = vrot.slane %v8931_v20, 1 }
 0xc75   :  { %v8941_v28 = vrot.slane %v8940_v59, 1  ;;  %v8924_v18 = vadd.f32 %v8923_v37, %v8922_v13  ;;  %v9181_v13 = vld [vmem:[%s14981_s18 + $0x18] sm:$0xff] }
 0xc76   :  { %v8933_v49 = vadd.f32 %v8932_v58, %v8931_v20  ;;  %10591 = vmatpush3.msra.mxu1 %v9181_v13  ;;  %v9180_v58 = vld [vmem:[%s14981_s18 + $0x10] sm:$0xff] }
 0xc77   :  { %v8942_v40 = vadd.f32 %v8941_v28, %v8940_v59  ;;  %v14856_v38 = vmul.f32 %v8953_v53, %v8924_v18  ;;  %10592 = vmatprep.subr.mxu1 %v11085_v39  ;;  %v9179_v53 = vld [vmem:[%s14981_s18 + $0x8] sm:$0xff] }
 0xc78   :  { %v14860_v32 = vmul.f32 %v8954_v26, %v8933_v49  ;;  %10593 = vmatpush3.msra.mxu1 %v9180_v58 }
 0xc79   :  { %v14862_v27 = vmul.f32 %v8955_v23, %v8942_v40  ;;  %v8984_v16 = vmul.f32 %v14827_v14, %v14856_v38  ;;  %10594 = vmatprep.subr.mxu1 %v11085_v39 }
 0xc7a   :  { %v8985_v48 = vmul.f32 %v14827_v14, %v14860_v32  ;;  %10595 = vmatpush3.msra.mxu1 %v9179_v53 }
 0xc7b   :  { %v8986_v47 = vmul.f32 %v14827_v14, %v14862_v27  ;;  %v9004_v63 = vrot.slane %v8984_v16, 7  ;;  %10596 = vmatprep.subr.mxu1 %v11085_v39 }
 0xc7c   :  { %v9006_v55 = vrot.slane %v8985_v48, 6 }
 0xc7d   :  { %v9008_v41 = vrot.slane %v8986_v47, 5  ;;  %v9005_v29 = vsel %vm8996_vm5, %v9004_v63, %v8983_v4 }
 0xc7e   :  { %v9007_v8 = vsel %vm8999_vm6, %v9006_v55, %v9005_v29 }
 0xc7f   :  { %v9009_v44 = vsel %vm9002_vm7, %v9008_v41, %v9007_v8 }
 0xc80   :  { %v9016_v19 = vsel %vm9012_vm8, %v9009_v44, 0.0 }
 0xc81   :  { %9017 = vadd.xlane.f32.xlu0 %v9016_v19 }
 0xc97   :  { %9026 = vperm.xlu0 %10634, %v9651_v33  }
 0xcfa   :  { %v9015_v14 = vpop.xlane.xlu1 %9014 }
 0xd0a   :  { %v9018_v2 = vpop.xlane.xlu0 %9017 }
 0xd12   :  { %v9027_v10 = vpop.permute.xlu0 %9026 }
 0xd13   :  { %v9029_v62 = vadd.f32 %v9027_v10, %v9015_v14  ;;  %v9030_v42 = vadd.f32 %v9027_v10, %v9018_v2 }
 0xd15   :  { %v9038_v34 = vrot.slane %v9029_v62, %v14878_v17  ;;  %v9042_v1 = vrot.slane %v9030_v42, %v14878_v17 }
 0xd17   :  { %v9043_v15 = vsel %vm8996_vm5, %v9042_v1, %v9038_v34 }
 0xd18   :  { %v9046_v52 = vsel %vm9045_vm9, %v9043_v15, -inf }
 0xd19   :  { %9047 = vmax.xlane.f32.xlu1 %v9046_v52 }
 0xda2   :  { %v9048_v43 = vpop.xlane.xlu1 %9047 }
 0xda3   :  { %v9053_v61 = vrot.slane %v9048_v43, %v15369_v3  ;;  %v9057_v57 = vrot.slane %v9048_v43, %v14356_v25 }
 0xda5   :  { %v9060_v50 = vsub.f32 %v9029_v62, %v9053_v61  ;;  %v9061_v12 = vsub.f32 %v9030_v42, %v9057_v57 }
 0xda7   :  { %v9062_v35 = vmul.f32 1.442695, %v9060_v50  ;;  %v9064_v6 = vmul.f32 1.442695, %v9061_v12 }
 0xda9   :  { %11022 = vpow2.f32 %v9062_v35 }
 0xdaa   :  { %11024 = vpow2.f32 %v9064_v6 }
 0xdb6   :  { %v11023_v36 = vpop.eup %11022 }
 0xdb7   :  { %9069 = vperm.xlu1 %10635, %v11023_v36   ;;  %v11025_v7 = vpop.eup %11024 }
 0xdbb   :  { %9072 = vperm.xlu1 %10635, %v11025_v7  }
 0xe32   :  { %v9070_v60 = vpop.permute.xlu1 %9069 }
 0xe33   :  { %v9077_v56 = vrot.slane %v9070_v60, %v14878_v17  ;;  %v9269_v60 = vld [vmem:[%s14983_s20 + $0x18] sm:$0xff] }
 0xe36   :  { %v9073_v46 = vpop.permute.xlu1 %9072 }
 0xe37   :  { %v9081_v31 = vrot.slane %v9073_v46, %v14878_v17  ;;  %v9268_v46 = vld [vmem:[%s14983_s20 + $0x10] sm:$0xff] }
 0xe39   :  { %v9082_v24 = vsel %vm8996_vm5, %v9081_v31, %v9077_v56  ;;  %v9267_v56 = vld [vmem:[%s14983_s20 + $0x8] sm:$0xff]  ;;  %v9266_v31 = vld [vmem:[%s14983_s20] sm:$0xff] }
 0xe3a   :  { %v9084_v22 = vsel %vm9045_vm9, %v9082_v24, 0.0  ;;  %v9652_v24 = vld [vmem:[%s14982_s19] ss:$0 sm:$0xff] }
 0xe3b   :  { %9085 = vadd.xlane.f32.xlu1 %v9084_v22 }
 0xec4   :  { %v9086_v59 = vpop.xlane.xlu1 %9085 }
 0xec5   :  { %11026 = vrcp.f32 %v9086_v59 }
 0xed2   :  { %v11027_v37 = vpop.eup %11026 }
 0xed3   :  { %v9096_v20 = vrot.slane %v11027_v37, %v14356_v25  ;;  %v9092_v28 = vrot.slane %v11027_v37, %v15369_v3  ;;  %v9178_v25 = vld [vmem:[%s14981_s18] sm:$0xff] }
 0xed4   :  { %10597 = vmatpush3.msra.mxu1 %v9178_v25 }
 0xed5   :  { %v9100_v21 = vmul.f32 %v11025_v7, %v9096_v20  ;;  %v9099_v18 = vmul.f32 %v11023_v36, %v9092_v28  ;;  %10601 = vmatprep.subr.mxu1 %v11085_v39 }
 0xed7   :  { %9107 = vperm.xlu0 %10634, %v9100_v21  }
 0xedb   :  { %9104 = vperm.xlu0 %10634, %v9099_v18  }
 0xf52   :  { %v9108_v3 = vpop.permute.xlu0 %9107 }
 0xf53   :  { %v9123_v11 = vrot.slane %v9108_v3, 1  ;;  %v9124_v26 = vrot.slane %v9108_v3, 2  ;;  %v9125_v40 = vrot.slane %v9108_v3, 3  ;;  %v9138_v48 = vmul.f32 %v9108_v3, %v14858_v54 }
 0xf54   :  { %v9116_v41 = vrot.slane %v9108_v3, %v14878_v17 }
 0xf55   :  { %v9139_v49 = vmul.f32 %v9123_v11, %v14856_v38  ;;  %v9140_v23 = vmul.f32 %v9124_v26, %v14860_v32  ;;  %v9141_v16 = vmul.f32 %v9125_v40, %v14862_v27 }
 0xf56   :  { %v9105_v47 = vpop.permute.xlu0 %9104 }
 0xf57   :  { %v9156_v63 = vrot.slane %v9139_v49, 7  ;;  %v9158_v4 = vrot.slane %v9140_v23, 6  ;;  %v9112_v55 = vrot.slane %v9105_v47, %v14878_v17  ;;  %v9120_v29 = vrot.slane %v9105_v47, 1 }
 0xf58   :  { %v9121_v8 = vrot.slane %v9105_v47, 2  ;;  %v9122_v44 = vrot.slane %v9105_v47, 3  ;;  %v9160_v33 = vrot.slane %v9141_v16, 5  ;;  %v9134_v17 = vmul.f32 %v9105_v47, %v14801_v9 }
 0xf59   :  { %v9157_v19 = vsel %vm8996_vm5, %v9156_v63, %v9138_v48  ;;  %v9117_v38 = vsel %vm8996_vm5, %v9116_v41, %v9112_v55  ;;  %v9135_v27 = vmul.f32 %v9120_v29, %v14819_v30 }
 0xf5a   :  { %v9159_v32 = vsel %vm8999_vm6, %v9158_v4, %v9157_v19  ;;  %v9136_v54 = vmul.f32 %v9121_v8, %v14830_v0  ;;  %v9137_v5 = vmul.f32 %v9122_v44, %v14839_v45  ;;  %9119 = vst.msk [vmem:[#allocation5] sm:$0x3] %vm9045_vm9, %v9117_v38 }
 0xf5b   :  { %v9161_v51 = vsel %vm9002_vm7, %v9160_v33, %v9159_v32  ;;  %v9150_v14 = vrot.slane %v9135_v27, 7 }
 0xf5c   :  { %v9171_v2 = vsel %vm9012_vm8, %v9161_v51, 0.0  ;;  %v9152_v10 = vrot.slane %v9136_v54, 6  ;;  %v9154_v34 = vrot.slane %v9137_v5, 5 }
 0xf5d   :  { %v9172_v62 = vrot.slane %v9171_v2, 4  ;;  %v9151_v42 = vsel %vm8996_vm5, %v9150_v14, %v9134_v17 }
 0xf5e   :  { %v9153_v30 = vsel %vm8999_vm6, %v9152_v10, %v9151_v42 }
 0xf5f   :  { %v9173_v1 = vadd.f32 %v9172_v62, %v9171_v2  ;;  %v9155_v0 = vsel %vm9002_vm7, %v9154_v34, %v9153_v30 }
 0xf60   :  { %v9164_v45 = vsel %vm9012_vm8, %v9155_v0, 0.0 }
 0xf61   :  { %v9174_v15 = vrot.slane %v9173_v1, 2  ;;  %v9165_v52 = vrot.slane %v9164_v45, 4 }
 0xf63   :  { %v9175_v43 = vadd.f32 %v9174_v15, %v9173_v1  ;;  %v9166_v61 = vadd.f32 %v9165_v52, %v9164_v45 }
 0xf65   :  { %v9176_v57 = vrot.slane %v9175_v43, 1  ;;  %v9167_v50 = vrot.slane %v9166_v61, 2 }
 0xf67   :  { %v9168_v9 = vadd.f32 %v9167_v50, %v9166_v61  ;;  %v9177_v12 = vadd.f32 %v9176_v57, %v9175_v43 }
 0xf69   :  { %v9169_v35 = vrot.slane %v9168_v9, 1  ;;  %v9191_v36 = vrot.slane %v9177_v12, 7 }
 0xf6b   :  { %v9170_v6 = vadd.f32 %v9169_v35, %v9168_v9 }
 0xf6d   :  { %v9192_v7 = vsel %vm8996_vm5, %v9191_v36, %v9170_v6 }
 0xf6e   :  { %10599 = vmatmul.mubr.msk.f32.vlgmr.msra.gmra.mxu1 %vm97_vm0, %v9192_v7 }
 0xf6f   :  { %10609 = vmatprep.mubr.msk.f32.mxu1 %vm11086_vm10, %v11085_v39  ;;  %10602 = vmatpush3.msra.mxu1 %v9269_v60 }
 0xf70   :  { %10603 = vmatprep.subr.mxu1 %v11085_v39 }
 0xf71   :  { %10604 = vmatpush3.msra.mxu1 %v9268_v46 }
 0xf72   :  { %10605 = vmatprep.subr.mxu1 %v11085_v39 }
 0xf73   :  { %10606 = vmatpush3.msra.mxu1 %v9267_v56 }
 0xf74   :  { %10607 = vmatprep.subr.mxu1 %v11085_v39 }
 0xf75   :  { %10608 = vmatpush3.msra.mxu1 %v9266_v31 }
0x102e   :  { %v9261_v22 = vpop.f32.mrf.mxu1 }
0x102f   :  { %v9262_v13 = vadd.f32 %v9652_v24, %v9261_v22 }
0x1030   :  { %v10600_v59 = vpop.f32.mrf.mxu1 }
0x1031   :  { %11028 = vtanh.f32 %v9262_v13 }
0x103e   :  { %v11029_v37 = vpop.eup %11028 }
0x103f   :  { %10610 = vmatmul.mubr.msk.f32.vlgmr.msra.gmra.mxu1 %vm97_vm0, %v11029_v37 }
0x1040   :  { %11042 = shalt.err (!%p11039_p4)
}
0x1041   :  { %9373 = dma.vmem_to_hbm [thread:$0]  %s9371_s9, 32, %s14987_s24, [#allocation6]   ;;  %v9654_v39 = vld [vmem:[%s14984_s21] ss:$0 sm:$0xff]  ;;  %vm9350_vm11 = vcmask 17408  }
0x1042   :  { %s11088_s17 = smov [#allocation3]  }
0x1043   :  { %s9358_s14 = sshll.u32 %s11088_s17, 4  ;;  %s9359_s14 = int_to_ptr.vmem [resolvable:$true] %s9358_s14 }
0x1044   :  { %s11051_s15 = scalar_lea.vmem %s9359_s14, 32  ;;  %p11056_p6 = scmp.lt.s32.totalorder %s9359_s14, %s9359_s14 }
0x1045   :  { %p11052_p5 = scmp.ne.s32.totalorder %s9359_s14, %s11051_s15  ;;  %p11057_p7 = scmp.lt.s32.totalorder %s11051_s15, %s11051_s15 }
0x1047   :  { %p11058_p8 = por %p11057_p7, %p11056_p6 }
0x1049   :  { %p11059_p9 = pnand %p11058_p8, %p11052_p5 }
0x10ff   :  { %v9346_v20 = vpop.f32.mrf.mxu1 }
0x1100   :  { %v9347_v21 = vadd.f32 %v9654_v39, %v9346_v20 }
0x1101   :  { %v10611_v28 = vpop.f32.mrf.mxu1 }
0x1102   :  { %9351 = vst.msk [vmem:[#allocation3] sm:$0x3] %vm9350_vm11, %v9347_v21 }
0x1103   :  { %11062 = shalt.err (!%p11059_p9)
}
0x1104   :  { %9361 = dma.vmem_to_hbm [thread:$0]  %s9359_s14, 32, %s14985_s22, [#allocation4]  }
0x1105   :  { %11071 = dma.done.wait [#allocation4], 32  }
0x1106   :  { %11072 = vsyncadd [#allocation4], 4294967264 }
0x1107   :  { %11073 = dma.done.wait [#allocation6], 32  }
0x1108   :  { %11074 = vsyncadd [#allocation6], 4294967264 }
0x1109   :  { %9382 = vsyncpa [#allocation4], 1 }
0x110a   :  { %9383 = vsyncpa [#allocation6], 1 }

</bundles_post_ra>
